<compile_context>
chip_gen: v5e
topology: v5e:2x2
jax: 0.10.0
libtpu: 0.0.40
codegen_flags: <defaults>
</compile_context>

<pallas_src>
import functools

import jax
import jax.numpy as jnp
from jax.experimental import pallas as pl
from jax.experimental.pallas import tpu as pltpu


def _round_up(x, m):
    return ((x + m - 1) // m) * m


def _vmem_limit_bytes():
    """Per-generation VMEM budget: 3/4 of physical (48 MiB on v7x, 96 MiB on v5e/v6e)."""
    cap = 64 * 1024 * 1024
    try:
        cap = int(getattr(pltpu.get_tpu_info(), "vmem_capacity_bytes", cap))
    except Exception:
        pass
    return min(cap * 3 // 4, 100 * 1024 * 1024)


def _full_spec(shape):
    """Whole-array VMEM-resident BlockSpec (block index constant across the grid)."""
    zeros = (0,) * len(shape)
    return pl.BlockSpec(shape, lambda b, t, _z=zeros: _z)


# ----------------------------- Pallas kernels ------------------------------


def lstm_kernel(x_ref, w0ih_ref, w0hh_ref, wih_ref, whh_ref, bias_ref, out_ref,
                h_scr, c_scr, xp_scr, *, num_layers, b_block, t_chunk):
    """One (batch_block, time_chunk) grid step of a multi-layer LSTM.

    x_ref:    (t_chunk*b_block, E)   bf16  chunk rows ordered (t major, batch minor)
    w0ih_ref: (E, 4Hp)               bf16  layer-0 input weights, gate order (i, f, o, g)
    w0hh_ref: (Hp, 4Hp)              bf16  layer-0 recurrent weights
    wih_ref:  (L-1, Hp, 4Hp)         bf16  layer l>=1 input weights
    whh_ref:  (L-1, Hp, 4Hp)         bf16  layer l>=1 recurrent weights
    bias_ref: (L, 4Hp)               f32   pre-summed bih+bhh per layer
    out_ref:  (t_chunk*b_block, Hp)  bf16  top-layer hidden state per step
    h_scr, c_scr: (L, b_block, Hp)   f32   persistent recurrent state across time chunks
    xp_scr:   (t_chunk*b_block, 4Hp) f32   per-chunk hoisted layer-0 input projection
    """
    Hp = w0hh_ref.shape[0]
    G = 4 * Hp

    # Reset the resident recurrent state at the start of each batch block's time stream.
    @pl.when(pl.program_id(1) == 0)
    def _():
        h_scr[...] = jnp.zeros_like(h_scr)
        c_scr[...] = jnp.zeros_like(c_scr)

    # Hoisted layer-0 input projection for this chunk: one MXU matmul, off the serial
    # critical path.  Layer-0 bias (pre-summed bih+bhh) is folded in here.
    xp_scr[...] = (
        jnp.dot(x_ref[...], w0ih_ref[...], preferred_element_type=jnp.float32)
        + bias_ref[0:1, :]
    )

    # Loop-invariant bias broadcasts hoisted out of the recurrence (JAX does not CSE
    # broadcast_in_dim inside loops).
    b_rest = [jnp.broadcast_to(bias_ref[l:l + 1, :], (b_block, G))
              for l in range(1, num_layers)]

    hs = [h_scr[l] for l in range(num_layers)]
    cs = [c_scr[l] for l in range(num_layers)]

    def gate_math(gates, c_prev):
        # gate order (i, f, o | g): one contiguous 3*Hp sigmoid + one Hp tanh (EUP),
        # all slices lane-aligned (Hp is a multiple of 128).
        sig = jax.nn.sigmoid(gates[:, :3 * Hp])
        g_g = jnp.tanh(gates[:, 3 * Hp:])
        i_g = sig[:, 0 * Hp:1 * Hp]
        f_g = sig[:, 1 * Hp:2 * Hp]
        o_g = sig[:, 2 * Hp:3 * Hp]
        c_new = f_g * c_prev + i_g * g_g
        h_new = o_g * jnp.tanh(c_new)
        return h_new, c_new

    # Fully-unrolled static time loop over the chunk (LLO scheduler visibility; live
    # state is just 2*L tiles of (b_block, Hp) f32).
    for t in range(t_chunk):
        row = t * b_block
        # layer 0: only the recurrent dot remains on the serial critical path.
        gates0 = xp_scr[pl.ds(row, b_block), :] + jnp.dot(
            hs[0].astype(jnp.bfloat16), w0hh_ref[...],
            preferred_element_type=jnp.float32)
        hs[0], cs[0] = gate_math(gates0, cs[0])
        inp = hs[0]
        for l in range(1, num_layers):
            # two accumulated MXU dots (no per-step lane concat).
            gates_l = (
                jnp.dot(inp.astype(jnp.bfloat16), wih_ref[l - 1],
                        preferred_element_type=jnp.float32)
                + jnp.dot(hs[l].astype(jnp.bfloat16), whh_ref[l - 1],
                          preferred_element_type=jnp.float32)
                + b_rest[l - 1])
            hs[l], cs[l] = gate_math(gates_l, cs[l])
            inp = hs[l]
        out_ref[pl.ds(row, b_block), :] = inp.astype(out_ref.dtype)

    # Persist recurrent state for the next time chunk of this batch block.
    for l in range(num_layers):
        h_scr[l] = hs[l]
        c_scr[l] = cs[l]


def linear_kernel(x_ref, w_ref, b_ref, o_ref):
    """o = x @ w + b on one (TN, TV) tile; bf16 operands, f32 accumulate, lane-dense out."""
    o_ref[...] = (
        jnp.dot(x_ref[...], w_ref[...], preferred_element_type=jnp.float32)
        + b_ref[...]
    )


# ----------------------------- wrappers -------------------------------------


def run_lstm(x4d, w0_ih, w0_hh, w_ih_rest, w_hh_rest, bias, *, n_t, n_b, b_block,
             t_chunk, hidden_p, num_layers):
    E = x4d.shape[-1]
    CB = t_chunk * b_block
    kern = functools.partial(lstm_kernel, num_layers=num_layers,
                             b_block=b_block, t_chunk=t_chunk)
    return pl.pallas_call(
        kern,
        out_shape=jax.ShapeDtypeStruct((n_t, n_b, CB, hidden_p), jnp.bfloat16),
        grid=(n_b, n_t),                       # batch blocks outer (parallel), time inner
        in_specs=[
            pl.BlockSpec((None, None, CB, E), lambda b, t: (t, b, 0, 0)),
            _full_spec(w0_ih.shape),
            _full_spec(w0_hh.shape),
            _full_spec(w_ih_rest.shape),
            _full_spec(w_hh_rest.shape),
            _full_spec(bias.shape),
        ],
        out_specs=pl.BlockSpec((None, None, CB, hidden_p), lambda b, t: (t, b, 0, 0)),
        scratch_shapes=[
            pltpu.VMEM((num_layers, b_block, hidden_p), jnp.float32),   # h state
            pltpu.VMEM((num_layers, b_block, hidden_p), jnp.float32),   # c state
            pltpu.VMEM((CB, 4 * hidden_p), jnp.float32),                # layer-0 x proj
        ],
        compiler_params=pltpu.CompilerParams(
            dimension_semantics=("parallel", "arbitrary"),
            vmem_limit_bytes=_vmem_limit_bytes()),
    )(x4d, w0_ih, w0_hh, w_ih_rest, w_hh_rest, bias)


def run_linear(x_bf16, w_t_bf16, b_f32):
    """Tiled (N, Hp) @ (Hp, V) + b.  V (vocab) grid axis is OUTERMOST so the big weight
    matrix streams from HBM exactly once; the small activation tile is revisited."""
    N, Hc = x_bf16.shape
    V = w_t_bf16.shape[1]

    if V >= 1024:
        TV = next((c for c in (2048, 1024, 512) if V % c == 0), 1024)
    else:
        TV = _round_up(V, 128)
    V_pad = _round_up(V, TV)
    if N >= 512:
        TN = next((c for c in (512, 256, 128) if N % c == 0), 512)
    else:
        TN = _round_up(N, 16)
    N_pad = _round_up(N, TN)

    x_p = x_bf16 if N_pad == N else jnp.zeros((N_pad, Hc), jnp.bfloat16).at[:N].set(x_bf16)
    w_p = (w_t_bf16 if V_pad == V
           else jnp.zeros((Hc, V_pad), jnp.bfloat16).at[:, :V].set(w_t_bf16))
    b_p = (b_f32.reshape(1, V) if V_pad == V
           else jnp.zeros((1, V_pad), jnp.float32).at[0, :V].set(b_f32))

    grid = (V_pad // TV, N_pad // TN)          # V outer, N inner
    out = pl.pallas_call(
        linear_kernel,
        out_shape=jax.ShapeDtypeStruct((N_pad, V_pad), jnp.float32),
        grid=grid,
        in_specs=[
            pl.BlockSpec((TN, Hc), lambda j, i: (i, 0)),
            pl.BlockSpec((Hc, TV), lambda j, i: (0, j)),
            pl.BlockSpec((1, TV), lambda j, i: (0, j)),
        ],
        out_specs=pl.BlockSpec((TN, TV), lambda j, i: (i, j)),
        compiler_params=pltpu.CompilerParams(
            dimension_semantics=("parallel", "parallel"),
            vmem_limit_bytes=_vmem_limit_bytes()),
    )(x_p, w_p, b_p)
    if N_pad == N and V_pad == V:
        return out
    return out[:N, :V]


def decoder_forward(params, img_features, captions, lengths):
    """Mirrors Decoder.forward.  `lengths` is a Python list (host data, as in PyTorch)."""
    B, T = captions.shape
    E = params["emb"].shape[1]
    Hp = params["hidden_p"]
    L = params["num_layers"]
    T_CHUNK = 8
    S = T + 1
    S_pad = _round_up(S, T_CHUNK)
    n_t = S_pad // T_CHUNK

    # Batch padding / blocking: 16 rows (bf16 sublane pair) for unmasked per-step stores;
    # >= 2 batch blocks when possible so the "parallel" axis feeds v7x's two TensorCores.
    B_pad = _round_up(B, 16)
    if B_pad <= 16:
        B_block = B_pad
    elif B_pad <= 256:
        B_pad = _round_up(B_pad, 32)
        B_block = B_pad // 2
    else:
        B_pad = _round_up(B_pad, 128)
        B_block = 128
    n_b = B_pad // B_block
    CB = T_CHUNK * B_block

    # Embedding lookup (gather) kept as XLA glue.
    # TODO(synk): fuse this gather + the packed-row gather into the Pallas kernels via
    # PrefetchScalarGridSpec row-gather if they ever become hot.
    embeddings = jnp.take(params["emb"], captions, axis=0)                  # (B, T, E)

    # [image-feature step] ++ caption embeddings, time-major, bf16 for the MXU.
    seq = jnp.concatenate([img_features[:, None, :], embeddings], axis=1)   # (B, S, E)
    seq = jnp.transpose(seq, (1, 0, 2)).astype(jnp.bfloat16)                # (S, B, E)
    x = jnp.zeros((S_pad, B_pad, E), jnp.bfloat16).at[:S, :B, :].set(seq)
    # Pre-chunk into (n_t, n_b, T_CHUNK*B_block, E): the kernel sees 2-D slabs (rows
    # ordered t-major, batch-minor), no in-kernel reshape needed.
    x4d = (x.reshape(n_t, T_CHUNK, n_b, B_block, E)
             .transpose(0, 2, 1, 3, 4)
             .reshape(n_t, n_b, CB, E))

    out4d = run_lstm(x4d, params["w0_ih"], params["w0_hh"], params["w_ih_rest"],
                     params["w_hh_rest"], params["bias"],
                     n_t=n_t, n_b=n_b, b_block=B_block, t_chunk=T_CHUNK,
                     hidden_p=Hp, num_layers=L)              # (n_t, n_b, CB, Hp) bf16

    # pack_padded_sequence(enforce_sorted=False) data ordering (host-side index math):
    # sort batch by descending length, then emit time-major valid positions.  Indices are
    # computed directly in the chunked layout (no un-permute copy of the LSTM output).
    order = sorted(range(B), key=lambda i: -lengths[i])
    c_idx, g_idx, r_idx = [], [], []
    for t in range(max(lengths)):
        for j in order:
            if lengths[j] > t:
                st = t + 1                       # step 0 of the sequence is the image
                c_idx.append(st // T_CHUNK)
                g_idx.append(j // B_block)
                r_idx.append((st % T_CHUNK) * B_block + (j % B_block))
    packed_h = out4d[jnp.asarray(c_idx, jnp.int32),
                     jnp.asarray(g_idx, jnp.int32),
                     jnp.asarray(r_idx, jnp.int32)]          # (N, Hp) bf16

    return run_linear(packed_h, params["w_lin_t"], params["b_lin"])         # (N, V) f32


# ----------------------------- parameter init --------------------------------


def _reorder_gates_rows(w, H):
    # PyTorch gate order along dim 0 is (i, f, g, o); the kernel wants (i, f, o, g) so the
    # three sigmoid gates form one contiguous slab.
    return jnp.concatenate([w[0:H], w[H:2 * H], w[3 * H:4 * H], w[2 * H:3 * H]], axis=0)


def _pad_gate_cols(w_t, H, Hp):
    # (in_dim, 4H) gate-major columns (i,f,o,g) -> (in_dim, 4Hp); zero the padded slots.
    if H == Hp:
        return w_t
    parts = []
    for g in range(4):
        parts.append(w_t[:, g * H:(g + 1) * H])
        parts.append(jnp.zeros((w_t.shape[0], Hp - H), w_t.dtype))
    return jnp.concatenate(parts, axis=1)


def _pad_rows(w, H, Hp):
    if H == Hp:
        return w
    return jnp.concatenate([w, jnp.zeros((Hp - H, w.shape[1]), w.dtype)], axis=0)


def init_params(key, vocab_len, embed_size, hidden_size, layers, pad_idx):
    H, E, V, L = hidden_size, embed_size, vocab_len, layers
    # Lane-dense hidden: pad to a multiple of 128.  With zero weights/bias in the padded
    # slots the padded hidden/cell units provably stay exactly 0, so dynamics are unchanged.
    Hp = _round_up(H, 128)
    ks = jax.random.split(key, 4)
    bound = 1.0 / float(H) ** 0.5

    def u(k, shape):
        return jax.random.uniform(k, shape, jnp.float32, -bound, bound)

    emb = 0.1 * jax.random.normal(ks[0], (V, E), jnp.float32)
    emb = emb.at[pad_idx].set(0.0)                                   # padding_idx row = 0

    lkeys = jax.random.split(ks[1], 4 * L)
    w0_ih = w0_hh = None
    wih_list, whh_list, b_list = [], [], []
    for l in range(L):
        in_dim = E if l == 0 else H
        wih = u(lkeys[4 * l + 0], (4 * H, in_dim))   # PyTorch layout (4H, in), (i,f,g,o)
        whh = u(lkeys[4 * l + 1], (4 * H, H))
        bih = u(lkeys[4 * l + 2], (4 * H,))
        bhh = u(lkeys[4 * l + 3], (4 * H,))
        wih_t = _pad_gate_cols(_reorder_gates_rows(wih, H).T, H, Hp)          # (in, 4Hp)
        whh_t = _pad_rows(_pad_gate_cols(_reorder_gates_rows(whh, H).T, H, Hp), H, Hp)
        b_ro = _reorder_gates_rows(bih + bhh, H).reshape(1, 4 * H)
        b_list.append(_pad_gate_cols(b_ro, H, Hp)[0])                 # pre-summed bias
        if l == 0:
            w0_ih = wih_t.astype(jnp.bfloat16)                        # (E, 4Hp)
            w0_hh = whh_t.astype(jnp.bfloat16)                        # (Hp, 4Hp)
        else:
            wih_list.append(_pad_rows(wih_t, H, Hp))                  # (Hp, 4Hp)
            whh_list.append(whh_t)                                    # (Hp, 4Hp)
    if L > 1:
        w_ih_rest = jnp.stack(wih_list, axis=0).astype(jnp.bfloat16)  # (L-1, Hp, 4Hp)
        w_hh_rest = jnp.stack(whh_list, axis=0).astype(jnp.bfloat16)
    else:
        w_ih_rest = jnp.zeros((1, Hp, 4 * Hp), jnp.bfloat16)          # unused dummy
        w_hh_rest = jnp.zeros((1, Hp, 4 * Hp), jnp.bfloat16)
    bias = jnp.stack(b_list, axis=0)                                  # (L, 4Hp) f32

    w_lin = u(ks[2], (V, H))
    b_lin = u(ks[3], (V,))
    w_lin_t = _pad_rows(w_lin.T, H, Hp).astype(jnp.bfloat16)          # (Hp, V)

    return dict(emb=emb, w0_ih=w0_ih, w0_hh=w0_hh, w_ih_rest=w_ih_rest,
                w_hh_rest=w_hh_rest, bias=bias, w_lin_t=w_lin_t, b_lin=b_lin,
                hidden=H, hidden_p=Hp, num_layers=L)


# ----------------------------- main -------------------------------------------


if __name__ == "__main__":
    B, T = 2, 8
    embed_size = 32
    hidden_size = 32
    layers = 2
    vocab_len = 40
    pad_idx = 0

    key = jax.random.PRNGKey(0)
    k_par, k_img, k_cap = jax.random.split(key, 3)

    params = init_params(k_par, vocab_len, embed_size, hidden_size, layers, pad_idx)

    img_features = jax.random.normal(k_img, (B, embed_size), jnp.float32)
    lengths = [8, 5]
    captions = jax.random.randint(k_cap, (B, T), 1, vocab_len, jnp.int32)
    # zero out padded caption positions with <pad>
    mask = jnp.arange(T)[None, :] < jnp.asarray(lengths)[:, None]
    captions = jnp.where(mask, captions, pad_idx)

    out = decoder_forward(params, img_features, captions, lengths)
    out = jax.block_until_ready(out)

    assert out.shape == (sum(lengths), vocab_len), out.shape
    assert bool(jnp.all(jnp.isfinite(out)))
    print("KERNEL_OK")
</pallas_src>

<mosaic_0001>
module attributes {stable_mosaic.version = 11 : i64} {
  func.func @lstm_kernel(%arg0: i32, %arg1: i32, %arg2: memref<1x1x128x32xbf16, #tpu.memory_space<vmem>>, %arg3: memref<32x512xbf16, #tpu.memory_space<vmem>>, %arg4: memref<128x512xbf16, #tpu.memory_space<vmem>>, %arg5: memref<1x128x512xbf16, #tpu.memory_space<vmem>>, %arg6: memref<1x128x512xbf16, #tpu.memory_space<vmem>>, %arg7: memref<2x512xf32, #tpu.memory_space<vmem>>, %arg8: memref<1x1x128x128xbf16, #tpu.memory_space<vmem>>, %arg9: memref<2x16x128xf32, #tpu.memory_space<vmem>>, %arg10: memref<2x16x128xf32, #tpu.memory_space<vmem>>, %arg11: memref<128x512xf32, #tpu.memory_space<vmem>>) attributes {dimension_semantics = [#tpu.dimension_semantics<parallel>, #tpu.dimension_semantics<arbitrary>], iteration_bounds = array<i64: 1, 2>, scalar_prefetch = 0 : i64, scratch_operands = 3 : i64, tpu.core_type = #tpu.core_type<tc>, window_params = [{transform_indices = @transform_0, window_bounds = array<i64: 1, 1, 128, 32>}, {pipeline_mode = #tpu.pipeline_mode<synchronous>, transform_indices = @transform_1, window_bounds = array<i64: 32, 512>}, {pipeline_mode = #tpu.pipeline_mode<synchronous>, transform_indices = @transform_2, window_bounds = array<i64: 128, 512>}, {pipeline_mode = #tpu.pipeline_mode<synchronous>, transform_indices = @transform_3, window_bounds = array<i64: 1, 128, 512>}, {pipeline_mode = #tpu.pipeline_mode<synchronous>, transform_indices = @transform_4, window_bounds = array<i64: 1, 128, 512>}, {pipeline_mode = #tpu.pipeline_mode<synchronous>, transform_indices = @transform_5, window_bounds = array<i64: 2, 512>}, {transform_indices = @transform_6, window_bounds = array<i64: 1, 1, 128, 128>}]} {
    %c0_i32 = arith.constant 0 : i32
    %0 = arith.cmpi eq, %arg1, %c0_i32 : i32
    %1 = arith.extui %0 : i1 to i32
    %c0_i32_0 = arith.constant 0 : i32
    %2 = arith.cmpi ne, %1, %c0_i32_0 : i32
    scf.if %2 {
      %cst_180 = arith.constant 0.000000e+00 : f32
      %442 = vector.broadcast %cst_180 : f32 to vector<2x16x128xf32>
      %c0_181 = arith.constant 0 : index
      %c0_182 = arith.constant 0 : index
      %c0_183 = arith.constant 0 : index
      %443 = vector.load %arg9[%c0_181, %c0_182, %c0_183] : memref<2x16x128xf32, #tpu.memory_space<vmem>>, vector<2x16x128xf32>
      tpu.vector_store %arg9[%c0_181, %c0_182, %c0_183], %442 {strides = array<i32>} : memref<2x16x128xf32, #tpu.memory_space<vmem>>, vector<2x16x128xf32>,
      %cst_184 = arith.constant 0.000000e+00 : f32
      %444 = vector.broadcast %cst_184 : f32 to vector<2x16x128xf32>
      %c0_185 = arith.constant 0 : index
      %c0_186 = arith.constant 0 : index
      %c0_187 = arith.constant 0 : index
      %445 = vector.load %arg10[%c0_185, %c0_186, %c0_187] : memref<2x16x128xf32, #tpu.memory_space<vmem>>, vector<2x16x128xf32>
      tpu.vector_store %arg10[%c0_185, %c0_186, %c0_187], %444 {strides = array<i32>} : memref<2x16x128xf32, #tpu.memory_space<vmem>>, vector<2x16x128xf32>,
    } else {
    }
    %c0 = arith.constant 0 : index
    %c0_1 = arith.constant 0 : index
    %c0_2 = arith.constant 0 : index
    %c0_3 = arith.constant 0 : index
    %3 = vector.load %arg2[%c0, %c0_1, %c0_2, %c0_3] : memref<1x1x128x32xbf16, #tpu.memory_space<vmem>>, vector<1x1x128x32xbf16>
    %4 = vector.shape_cast %3 : vector<1x1x128x32xbf16> to vector<128x32xbf16>
    %c0_4 = arith.constant 0 : index
    %c0_5 = arith.constant 0 : index
    %5 = vector.load %arg3[%c0_4, %c0_5] : memref<32x512xbf16, #tpu.memory_space<vmem>>, vector<32x512xbf16>
    %cst = arith.constant dense<0.000000e+00> : vector<128x512xf32>
    %6 = tpu.matmul %4, %5, %cst {dimension_numbers = #tpu.dot_dimension_numbers<[1], [0], [0], [1], [0, 0, 1, 1], [], []>} : vector<128x32xbf16>, vector<32x512xbf16>, vector<128x512xf32> -> vector<128x512xf32>
    %c0_6 = arith.constant 0 : index
    %c0_7 = arith.constant 0 : index
    %7 = vector.load %arg7[%c0_6, %c0_7] : memref<2x512xf32, #tpu.memory_space<vmem>>, vector<1x512xf32>
    %8 = vector.broadcast %7 : vector<1x512xf32> to vector<128x512xf32>
    %9 = arith.addf %6, %8 : vector<128x512xf32>
    %c0_8 = arith.constant 0 : index
    %c0_9 = arith.constant 0 : index
    %10 = vector.load %arg11[%c0_8, %c0_9] : memref<128x512xf32, #tpu.memory_space<vmem>>, vector<128x512xf32>
    tpu.vector_store %arg11[%c0_8, %c0_9], %9 {strides = array<i32>} : memref<128x512xf32, #tpu.memory_space<vmem>>, vector<128x512xf32>,
    %c1 = arith.constant 1 : index
    %c0_10 = arith.constant 0 : index
    %11 = vector.load %arg7[%c1, %c0_10] : memref<2x512xf32, #tpu.memory_space<vmem>>, vector<1x512xf32>
    %12 = vector.shape_cast %11 : vector<1x512xf32> to vector<1x512xf32>
    %13 = vector.broadcast %12 : vector<1x512xf32> to vector<16x512xf32>
    %c0_11 = arith.constant 0 : index
    %c0_12 = arith.constant 0 : index
    %c0_13 = arith.constant 0 : index
    %14 = vector.load %arg9[%c0_11, %c0_12, %c0_13] : memref<2x16x128xf32, #tpu.memory_space<vmem>>, vector<1x16x128xf32>
    %15 = vector.shape_cast %14 : vector<1x16x128xf32> to vector<16x128xf32>
    %c1_14 = arith.constant 1 : index
    %c0_15 = arith.constant 0 : index
    %c0_16 = arith.constant 0 : index
    %16 = vector.load %arg9[%c1_14, %c0_15, %c0_16] : memref<2x16x128xf32, #tpu.memory_space<vmem>>, vector<1x16x128xf32>
    %17 = vector.shape_cast %16 : vector<1x16x128xf32> to vector<16x128xf32>
    %c0_17 = arith.constant 0 : index
    %c0_18 = arith.constant 0 : index
    %c0_19 = arith.constant 0 : index
    %18 = vector.load %arg10[%c0_17, %c0_18, %c0_19] : memref<2x16x128xf32, #tpu.memory_space<vmem>>, vector<1x16x128xf32>
    %19 = vector.shape_cast %18 : vector<1x16x128xf32> to vector<16x128xf32>
    %c1_20 = arith.constant 1 : index
    %c0_21 = arith.constant 0 : index
    %c0_22 = arith.constant 0 : index
    %20 = vector.load %arg10[%c1_20, %c0_21, %c0_22] : memref<2x16x128xf32, #tpu.memory_space<vmem>>, vector<1x16x128xf32>
    %21 = vector.shape_cast %20 : vector<1x16x128xf32> to vector<16x128xf32>
    %c0_23 = arith.constant 0 : index
    %c0_24 = arith.constant 0 : index
    %22 = vector.load %arg11[%c0_23, %c0_24] : memref<128x512xf32, #tpu.memory_space<vmem>>, vector<16x512xf32>
    %23 = arith.truncf %15 : vector<16x128xf32> to vector<16x128xbf16>
    %c0_25 = arith.constant 0 : index
    %c0_26 = arith.constant 0 : index
    %24 = vector.load %arg4[%c0_25, %c0_26] : memref<128x512xbf16, #tpu.memory_space<vmem>>, vector<128x512xbf16>
    %cst_27 = arith.constant dense<0.000000e+00> : vector<16x512xf32>
    %25 = tpu.matmul %23, %24, %cst_27 {dimension_numbers = #tpu.dot_dimension_numbers<[1], [0], [0], [1], [0, 0, 1, 1], [], []>} : vector<16x128xbf16>, vector<128x512xbf16>, vector<16x512xf32> -> vector<16x512xf32>
    %26 = arith.addf %22, %25 : vector<16x512xf32>
    %27 = vector.extract_strided_slice %26 {offsets = [0, 0], sizes = [16, 384], strides = [1, 1]} : vector<16x512xf32> to vector<16x384xf32>
    %28 = arith.negf %27 : vector<16x384xf32>
    %29 = math.exp %28 : vector<16x384xf32>
    %cst_28 = arith.constant 1.000000e+00 : f32
    %30 = vector.broadcast %cst_28 : f32 to vector<16x384xf32>
    %31 = arith.addf %30, %29 : vector<16x384xf32>
    %32 = arith.divf %30, %31 : vector<16x384xf32>
    %33 = vector.extract_strided_slice %26 {offsets = [0, 384], sizes = [16, 128], strides = [1, 1]} : vector<16x512xf32> to vector<16x128xf32>
    %34 = math.tanh %33 : vector<16x128xf32>
    %35 = vector.extract_strided_slice %32 {offsets = [0, 0], sizes = [16, 128], strides = [1, 1]} : vector<16x384xf32> to vector<16x128xf32>
    %36 = vector.extract_strided_slice %32 {offsets = [0, 128], sizes = [16, 128], strides = [1, 1]} : vector<16x384xf32> to vector<16x128xf32>
    %37 = vector.extract_strided_slice %32 {offsets = [0, 256], sizes = [16, 128], strides = [1, 1]} : vector<16x384xf32> to vector<16x128xf32>
    %38 = arith.mulf %36, %19 : vector<16x128xf32>
    %39 = arith.mulf %35, %34 : vector<16x128xf32>
    %40 = arith.addf %38, %39 : vector<16x128xf32>
    %41 = math.tanh %40 : vector<16x128xf32>
    %42 = arith.mulf %37, %41 : vector<16x128xf32>
    %43 = arith.truncf %42 : vector<16x128xf32> to vector<16x128xbf16>
    %c0_29 = arith.constant 0 : index
    %c0_30 = arith.constant 0 : index
    %c0_31 = arith.constant 0 : index
    %44 = vector.load %arg5[%c0_29, %c0_30, %c0_31] : memref<1x128x512xbf16, #tpu.memory_space<vmem>>, vector<1x128x512xbf16>
    %45 = vector.shape_cast %44 : vector<1x128x512xbf16> to vector<128x512xbf16>
    %cst_32 = arith.constant dense<0.000000e+00> : vector<16x512xf32>
    %46 = tpu.matmul %43, %45, %cst_32 {dimension_numbers = #tpu.dot_dimension_numbers<[1], [0], [0], [1], [0, 0, 1, 1], [], []>} : vector<16x128xbf16>, vector<128x512xbf16>, vector<16x512xf32> -> vector<16x512xf32>
    %47 = arith.truncf %17 : vector<16x128xf32> to vector<16x128xbf16>
    %c0_33 = arith.constant 0 : index
    %c0_34 = arith.constant 0 : index
    %c0_35 = arith.constant 0 : index
    %48 = vector.load %arg6[%c0_33, %c0_34, %c0_35] : memref<1x128x512xbf16, #tpu.memory_space<vmem>>, vector<1x128x512xbf16>
    %49 = vector.shape_cast %48 : vector<1x128x512xbf16> to vector<128x512xbf16>
    %cst_36 = arith.constant dense<0.000000e+00> : vector<16x512xf32>
    %50 = tpu.matmul %47, %49, %cst_36 {dimension_numbers = #tpu.dot_dimension_numbers<[1], [0], [0], [1], [0, 0, 1, 1], [], []>} : vector<16x128xbf16>, vector<128x512xbf16>, vector<16x512xf32> -> vector<16x512xf32>
    %51 = arith.addf %46, %50 : vector<16x512xf32>
    %52 = arith.addf %51, %13 : vector<16x512xf32>
    %53 = vector.extract_strided_slice %52 {offsets = [0, 0], sizes = [16, 384], strides = [1, 1]} : vector<16x512xf32> to vector<16x384xf32>
    %54 = arith.negf %53 : vector<16x384xf32>
    %55 = math.exp %54 : vector<16x384xf32>
    %cst_37 = arith.constant 1.000000e+00 : f32
    %56 = vector.broadcast %cst_37 : f32 to vector<16x384xf32>
    %57 = arith.addf %56, %55 : vector<16x384xf32>
    %58 = arith.divf %56, %57 : vector<16x384xf32>
    %59 = vector.extract_strided_slice %52 {offsets = [0, 384], sizes = [16, 128], strides = [1, 1]} : vector<16x512xf32> to vector<16x128xf32>
    %60 = math.tanh %59 : vector<16x128xf32>
    %61 = vector.extract_strided_slice %58 {offsets = [0, 0], sizes = [16, 128], strides = [1, 1]} : vector<16x384xf32> to vector<16x128xf32>
    %62 = vector.extract_strided_slice %58 {offsets = [0, 128], sizes = [16, 128], strides = [1, 1]} : vector<16x384xf32> to vector<16x128xf32>
    %63 = vector.extract_strided_slice %58 {offsets = [0, 256], sizes = [16, 128], strides = [1, 1]} : vector<16x384xf32> to vector<16x128xf32>
    %64 = arith.mulf %62, %21 : vector<16x128xf32>
    %65 = arith.mulf %61, %60 : vector<16x128xf32>
    %66 = arith.addf %64, %65 : vector<16x128xf32>
    %67 = math.tanh %66 : vector<16x128xf32>
    %68 = arith.mulf %63, %67 : vector<16x128xf32>
    %69 = arith.truncf %68 : vector<16x128xf32> to vector<16x128xbf16>
    %c0_38 = arith.constant 0 : index
    %c0_39 = arith.constant 0 : index
    %c0_40 = arith.constant 0 : index
    %c0_41 = arith.constant 0 : index
    %70 = vector.load %arg8[%c0_38, %c0_39, %c0_40, %c0_41] : memref<1x1x128x128xbf16, #tpu.memory_space<vmem>>, vector<1x1x16x128xbf16>
    %71 = vector.shape_cast %70 : vector<1x1x16x128xbf16> to vector<16x128xbf16>
    %72 = vector.shape_cast %69 : vector<16x128xbf16> to vector<1x1x16x128xbf16>
    tpu.vector_store %arg8[%c0_38, %c0_39, %c0_40, %c0_41], %72 {strides = array<i32>} : memref<1x1x128x128xbf16, #tpu.memory_space<vmem>>, vector<1x1x16x128xbf16>,
    %c16 = arith.constant 16 : index
    %c0_42 = arith.constant 0 : index
    %73 = vector.load %arg11[%c16, %c0_42] : memref<128x512xf32, #tpu.memory_space<vmem>>, vector<16x512xf32>
    %74 = arith.truncf %42 : vector<16x128xf32> to vector<16x128xbf16>
    %c0_43 = arith.constant 0 : index
    %c0_44 = arith.constant 0 : index
    %75 = vector.load %arg4[%c0_43, %c0_44] : memref<128x512xbf16, #tpu.memory_space<vmem>>, vector<128x512xbf16>
    %cst_45 = arith.constant dense<0.000000e+00> : vector<16x512xf32>
    %76 = tpu.matmul %74, %75, %cst_45 {dimension_numbers = #tpu.dot_dimension_numbers<[1], [0], [0], [1], [0, 0, 1, 1], [], []>} : vector<16x128xbf16>, vector<128x512xbf16>, vector<16x512xf32> -> vector<16x512xf32>
    %77 = arith.addf %73, %76 : vector<16x512xf32>
    %78 = vector.extract_strided_slice %77 {offsets = [0, 0], sizes = [16, 384], strides = [1, 1]} : vector<16x512xf32> to vector<16x384xf32>
    %79 = arith.negf %78 : vector<16x384xf32>
    %80 = math.exp %79 : vector<16x384xf32>
    %cst_46 = arith.constant 1.000000e+00 : f32
    %81 = vector.broadcast %cst_46 : f32 to vector<16x384xf32>
    %82 = arith.addf %81, %80 : vector<16x384xf32>
    %83 = arith.divf %81, %82 : vector<16x384xf32>
    %84 = vector.extract_strided_slice %77 {offsets = [0, 384], sizes = [16, 128], strides = [1, 1]} : vector<16x512xf32> to vector<16x128xf32>
    %85 = math.tanh %84 : vector<16x128xf32>
    %86 = vector.extract_strided_slice %83 {offsets = [0, 0], sizes = [16, 128], strides = [1, 1]} : vector<16x384xf32> to vector<16x128xf32>
    %87 = vector.extract_strided_slice %83 {offsets = [0, 128], sizes = [16, 128], strides = [1, 1]} : vector<16x384xf32> to vector<16x128xf32>
    %88 = vector.extract_strided_slice %83 {offsets = [0, 256], sizes = [16, 128], strides = [1, 1]} : vector<16x384xf32> to vector<16x128xf32>
    %89 = arith.mulf %87, %40 : vector<16x128xf32>
    %90 = arith.mulf %86, %85 : vector<16x128xf32>
    %91 = arith.addf %89, %90 : vector<16x128xf32>
    %92 = math.tanh %91 : vector<16x128xf32>
    %93 = arith.mulf %88, %92 : vector<16x128xf32>
    %94 = arith.truncf %93 : vector<16x128xf32> to vector<16x128xbf16>
    %c0_47 = arith.constant 0 : index
    %c0_48 = arith.constant 0 : index
    %c0_49 = arith.constant 0 : index
    %95 = vector.load %arg5[%c0_47, %c0_48, %c0_49] : memref<1x128x512xbf16, #tpu.memory_space<vmem>>, vector<1x128x512xbf16>
    %96 = vector.shape_cast %95 : vector<1x128x512xbf16> to vector<128x512xbf16>
    %cst_50 = arith.constant dense<0.000000e+00> : vector<16x512xf32>
    %97 = tpu.matmul %94, %96, %cst_50 {dimension_numbers = #tpu.dot_dimension_numbers<[1], [0], [0], [1], [0, 0, 1, 1], [], []>} : vector<16x128xbf16>, vector<128x512xbf16>, vector<16x512xf32> -> vector<16x512xf32>
    %98 = arith.truncf %68 : vector<16x128xf32> to vector<16x128xbf16>
    %c0_51 = arith.constant 0 : index
    %c0_52 = arith.constant 0 : index
    %c0_53 = arith.constant 0 : index
    %99 = vector.load %arg6[%c0_51, %c0_52, %c0_53] : memref<1x128x512xbf16, #tpu.memory_space<vmem>>, vector<1x128x512xbf16>
    %100 = vector.shape_cast %99 : vector<1x128x512xbf16> to vector<128x512xbf16>
    %cst_54 = arith.constant dense<0.000000e+00> : vector<16x512xf32>
    %101 = tpu.matmul %98, %100, %cst_54 {dimension_numbers = #tpu.dot_dimension_numbers<[1], [0], [0], [1], [0, 0, 1, 1], [], []>} : vector<16x128xbf16>, vector<128x512xbf16>, vector<16x512xf32> -> vector<16x512xf32>
    %102 = arith.addf %97, %101 : vector<16x512xf32>
    %103 = arith.addf %102, %13 : vector<16x512xf32>
    %104 = vector.extract_strided_slice %103 {offsets = [0, 0], sizes = [16, 384], strides = [1, 1]} : vector<16x512xf32> to vector<16x384xf32>
    %105 = arith.negf %104 : vector<16x384xf32>
    %106 = math.exp %105 : vector<16x384xf32>
    %cst_55 = arith.constant 1.000000e+00 : f32
    %107 = vector.broadcast %cst_55 : f32 to vector<16x384xf32>
    %108 = arith.addf %107, %106 : vector<16x384xf32>
    %109 = arith.divf %107, %108 : vector<16x384xf32>
    %110 = vector.extract_strided_slice %103 {offsets = [0, 384], sizes = [16, 128], strides = [1, 1]} : vector<16x512xf32> to vector<16x128xf32>
    %111 = math.tanh %110 : vector<16x128xf32>
    %112 = vector.extract_strided_slice %109 {offsets = [0, 0], sizes = [16, 128], strides = [1, 1]} : vector<16x384xf32> to vector<16x128xf32>
    %113 = vector.extract_strided_slice %109 {offsets = [0, 128], sizes = [16, 128], strides = [1, 1]} : vector<16x384xf32> to vector<16x128xf32>
    %114 = vector.extract_strided_slice %109 {offsets = [0, 256], sizes = [16, 128], strides = [1, 1]} : vector<16x384xf32> to vector<16x128xf32>
    %115 = arith.mulf %113, %66 : vector<16x128xf32>
    %116 = arith.mulf %112, %111 : vector<16x128xf32>
    %117 = arith.addf %115, %116 : vector<16x128xf32>
    %118 = math.tanh %117 : vector<16x128xf32>
    %119 = arith.mulf %114, %118 : vector<16x128xf32>
    %120 = arith.truncf %119 : vector<16x128xf32> to vector<16x128xbf16>
    %c0_56 = arith.constant 0 : index
    %c0_57 = arith.constant 0 : index
    %c16_58 = arith.constant 16 : index
    %c0_59 = arith.constant 0 : index
    %121 = vector.load %arg8[%c0_56, %c0_57, %c16_58, %c0_59] : memref<1x1x128x128xbf16, #tpu.memory_space<vmem>>, vector<1x1x16x128xbf16>
    %122 = vector.shape_cast %121 : vector<1x1x16x128xbf16> to vector<16x128xbf16>
    %123 = vector.shape_cast %120 : vector<16x128xbf16> to vector<1x1x16x128xbf16>
    tpu.vector_store %arg8[%c0_56, %c0_57, %c16_58, %c0_59], %123 {strides = array<i32>} : memref<1x1x128x128xbf16, #tpu.memory_space<vmem>>, vector<1x1x16x128xbf16>,
    %c32 = arith.constant 32 : index
    %c0_60 = arith.constant 0 : index
    %124 = vector.load %arg11[%c32, %c0_60] : memref<128x512xf32, #tpu.memory_space<vmem>>, vector<16x512xf32>
    %125 = arith.truncf %93 : vector<16x128xf32> to vector<16x128xbf16>
    %c0_61 = arith.constant 0 : index
    %c0_62 = arith.constant 0 : index
    %126 = vector.load %arg4[%c0_61, %c0_62] : memref<128x512xbf16, #tpu.memory_space<vmem>>, vector<128x512xbf16>
    %cst_63 = arith.constant dense<0.000000e+00> : vector<16x512xf32>
    %127 = tpu.matmul %125, %126, %cst_63 {dimension_numbers = #tpu.dot_dimension_numbers<[1], [0], [0], [1], [0, 0, 1, 1], [], []>} : vector<16x128xbf16>, vector<128x512xbf16>, vector<16x512xf32> -> vector<16x512xf32>
    %128 = arith.addf %124, %127 : vector<16x512xf32>
    %129 = vector.extract_strided_slice %128 {offsets = [0, 0], sizes = [16, 384], strides = [1, 1]} : vector<16x512xf32> to vector<16x384xf32>
    %130 = arith.negf %129 : vector<16x384xf32>
    %131 = math.exp %130 : vector<16x384xf32>
    %cst_64 = arith.constant 1.000000e+00 : f32
    %132 = vector.broadcast %cst_64 : f32 to vector<16x384xf32>
    %133 = arith.addf %132, %131 : vector<16x384xf32>
    %134 = arith.divf %132, %133 : vector<16x384xf32>
    %135 = vector.extract_strided_slice %128 {offsets = [0, 384], sizes = [16, 128], strides = [1, 1]} : vector<16x512xf32> to vector<16x128xf32>
    %136 = math.tanh %135 : vector<16x128xf32>
    %137 = vector.extract_strided_slice %134 {offsets = [0, 0], sizes = [16, 128], strides = [1, 1]} : vector<16x384xf32> to vector<16x128xf32>
    %138 = vector.extract_strided_slice %134 {offsets = [0, 128], sizes = [16, 128], strides = [1, 1]} : vector<16x384xf32> to vector<16x128xf32>
    %139 = vector.extract_strided_slice %134 {offsets = [0, 256], sizes = [16, 128], strides = [1, 1]} : vector<16x384xf32> to vector<16x128xf32>
    %140 = arith.mulf %138, %91 : vector<16x128xf32>
    %141 = arith.mulf %137, %136 : vector<16x128xf32>
    %142 = arith.addf %140, %141 : vector<16x128xf32>
    %143 = math.tanh %142 : vector<16x128xf32>
    %144 = arith.mulf %139, %143 : vector<16x128xf32>
    %145 = arith.truncf %144 : vector<16x128xf32> to vector<16x128xbf16>
    %c0_65 = arith.constant 0 : index
    %c0_66 = arith.constant 0 : index
    %c0_67 = arith.constant 0 : index
    %146 = vector.load %arg5[%c0_65, %c0_66, %c0_67] : memref<1x128x512xbf16, #tpu.memory_space<vmem>>, vector<1x128x512xbf16>
    %147 = vector.shape_cast %146 : vector<1x128x512xbf16> to vector<128x512xbf16>
    %cst_68 = arith.constant dense<0.000000e+00> : vector<16x512xf32>
    %148 = tpu.matmul %145, %147, %cst_68 {dimension_numbers = #tpu.dot_dimension_numbers<[1], [0], [0], [1], [0, 0, 1, 1], [], []>} : vector<16x128xbf16>, vector<128x512xbf16>, vector<16x512xf32> -> vector<16x512xf32>
    %149 = arith.truncf %119 : vector<16x128xf32> to vector<16x128xbf16>
    %c0_69 = arith.constant 0 : index
    %c0_70 = arith.constant 0 : index
    %c0_71 = arith.constant 0 : index
    %150 = vector.load %arg6[%c0_69, %c0_70, %c0_71] : memref<1x128x512xbf16, #tpu.memory_space<vmem>>, vector<1x128x512xbf16>
    %151 = vector.shape_cast %150 : vector<1x128x512xbf16> to vector<128x512xbf16>
    %cst_72 = arith.constant dense<0.000000e+00> : vector<16x512xf32>
    %152 = tpu.matmul %149, %151, %cst_72 {dimension_numbers = #tpu.dot_dimension_numbers<[1], [0], [0], [1], [0, 0, 1, 1], [], []>} : vector<16x128xbf16>, vector<128x512xbf16>, vector<16x512xf32> -> vector<16x512xf32>
    %153 = arith.addf %148, %152 : vector<16x512xf32>
    %154 = arith.addf %153, %13 : vector<16x512xf32>
    %155 = vector.extract_strided_slice %154 {offsets = [0, 0], sizes = [16, 384], strides = [1, 1]} : vector<16x512xf32> to vector<16x384xf32>
    %156 = arith.negf %155 : vector<16x384xf32>
    %157 = math.exp %156 : vector<16x384xf32>
    %cst_73 = arith.constant 1.000000e+00 : f32
    %158 = vector.broadcast %cst_73 : f32 to vector<16x384xf32>
    %159 = arith.addf %158, %157 : vector<16x384xf32>
    %160 = arith.divf %158, %159 : vector<16x384xf32>
    %161 = vector.extract_strided_slice %154 {offsets = [0, 384], sizes = [16, 128], strides = [1, 1]} : vector<16x512xf32> to vector<16x128xf32>
    %162 = math.tanh %161 : vector<16x128xf32>
    %163 = vector.extract_strided_slice %160 {offsets = [0, 0], sizes = [16, 128], strides = [1, 1]} : vector<16x384xf32> to vector<16x128xf32>
    %164 = vector.extract_strided_slice %160 {offsets = [0, 128], sizes = [16, 128], strides = [1, 1]} : vector<16x384xf32> to vector<16x128xf32>
    %165 = vector.extract_strided_slice %160 {offsets = [0, 256], sizes = [16, 128], strides = [1, 1]} : vector<16x384xf32> to vector<16x128xf32>
    %166 = arith.mulf %164, %117 : vector<16x128xf32>
    %167 = arith.mulf %163, %162 : vector<16x128xf32>
    %168 = arith.addf %166, %167 : vector<16x128xf32>
    %169 = math.tanh %168 : vector<16x128xf32>
    %170 = arith.mulf %165, %169 : vector<16x128xf32>
    %171 = arith.truncf %170 : vector<16x128xf32> to vector<16x128xbf16>
    %c0_74 = arith.constant 0 : index
    %c0_75 = arith.constant 0 : index
    %c32_76 = arith.constant 32 : index
    %c0_77 = arith.constant 0 : index
    %172 = vector.load %arg8[%c0_74, %c0_75, %c32_76, %c0_77] : memref<1x1x128x128xbf16, #tpu.memory_space<vmem>>, vector<1x1x16x128xbf16>
    %173 = vector.shape_cast %172 : vector<1x1x16x128xbf16> to vector<16x128xbf16>
    %174 = vector.shape_cast %171 : vector<16x128xbf16> to vector<1x1x16x128xbf16>
    tpu.vector_store %arg8[%c0_74, %c0_75, %c32_76, %c0_77], %174 {strides = array<i32>} : memref<1x1x128x128xbf16, #tpu.memory_space<vmem>>, vector<1x1x16x128xbf16>,
    %c48 = arith.constant 48 : index
    %c0_78 = arith.constant 0 : index
    %175 = vector.load %arg11[%c48, %c0_78] : memref<128x512xf32, #tpu.memory_space<vmem>>, vector<16x512xf32>
    %176 = arith.truncf %144 : vector<16x128xf32> to vector<16x128xbf16>
    %c0_79 = arith.constant 0 : index
    %c0_80 = arith.constant 0 : index
    %177 = vector.load %arg4[%c0_79, %c0_80] : memref<128x512xbf16, #tpu.memory_space<vmem>>, vector<128x512xbf16>
    %cst_81 = arith.constant dense<0.000000e+00> : vector<16x512xf32>
    %178 = tpu.matmul %176, %177, %cst_81 {dimension_numbers = #tpu.dot_dimension_numbers<[1], [0], [0], [1], [0, 0, 1, 1], [], []>} : vector<16x128xbf16>, vector<128x512xbf16>, vector<16x512xf32> -> vector<16x512xf32>
    %179 = arith.addf %175, %178 : vector<16x512xf32>
    %180 = vector.extract_strided_slice %179 {offsets = [0, 0], sizes = [16, 384], strides = [1, 1]} : vector<16x512xf32> to vector<16x384xf32>
    %181 = arith.negf %180 : vector<16x384xf32>
    %182 = math.exp %181 : vector<16x384xf32>
    %cst_82 = arith.constant 1.000000e+00 : f32
    %183 = vector.broadcast %cst_82 : f32 to vector<16x384xf32>
    %184 = arith.addf %183, %182 : vector<16x384xf32>
    %185 = arith.divf %183, %184 : vector<16x384xf32>
    %186 = vector.extract_strided_slice %179 {offsets = [0, 384], sizes = [16, 128], strides = [1, 1]} : vector<16x512xf32> to vector<16x128xf32>
    %187 = math.tanh %186 : vector<16x128xf32>
    %188 = vector.extract_strided_slice %185 {offsets = [0, 0], sizes = [16, 128], strides = [1, 1]} : vector<16x384xf32> to vector<16x128xf32>
    %189 = vector.extract_strided_slice %185 {offsets = [0, 128], sizes = [16, 128], strides = [1, 1]} : vector<16x384xf32> to vector<16x128xf32>
    %190 = vector.extract_strided_slice %185 {offsets = [0, 256], sizes = [16, 128], strides = [1, 1]} : vector<16x384xf32> to vector<16x128xf32>
    %191 = arith.mulf %189, %142 : vector<16x128xf32>
    %192 = arith.mulf %188, %187 : vector<16x128xf32>
    %193 = arith.addf %191, %192 : vector<16x128xf32>
    %194 = math.tanh %193 : vector<16x128xf32>
    %195 = arith.mulf %190, %194 : vector<16x128xf32>
    %196 = arith.truncf %195 : vector<16x128xf32> to vector<16x128xbf16>
    %c0_83 = arith.constant 0 : index
    %c0_84 = arith.constant 0 : index
    %c0_85 = arith.constant 0 : index
    %197 = vector.load %arg5[%c0_83, %c0_84, %c0_85] : memref<1x128x512xbf16, #tpu.memory_space<vmem>>, vector<1x128x512xbf16>
    %198 = vector.shape_cast %197 : vector<1x128x512xbf16> to vector<128x512xbf16>
    %cst_86 = arith.constant dense<0.000000e+00> : vector<16x512xf32>
    %199 = tpu.matmul %196, %198, %cst_86 {dimension_numbers = #tpu.dot_dimension_numbers<[1], [0], [0], [1], [0, 0, 1, 1], [], []>} : vector<16x128xbf16>, vector<128x512xbf16>, vector<16x512xf32> -> vector<16x512xf32>
    %200 = arith.truncf %170 : vector<16x128xf32> to vector<16x128xbf16>
    %c0_87 = arith.constant 0 : index
    %c0_88 = arith.constant 0 : index
    %c0_89 = arith.constant 0 : index
    %201 = vector.load %arg6[%c0_87, %c0_88, %c0_89] : memref<1x128x512xbf16, #tpu.memory_space<vmem>>, vector<1x128x512xbf16>
    %202 = vector.shape_cast %201 : vector<1x128x512xbf16> to vector<128x512xbf16>
    %cst_90 = arith.constant dense<0.000000e+00> : vector<16x512xf32>
    %203 = tpu.matmul %200, %202, %cst_90 {dimension_numbers = #tpu.dot_dimension_numbers<[1], [0], [0], [1], [0, 0, 1, 1], [], []>} : vector<16x128xbf16>, vector<128x512xbf16>, vector<16x512xf32> -> vector<16x512xf32>
    %204 = arith.addf %199, %203 : vector<16x512xf32>
    %205 = arith.addf %204, %13 : vector<16x512xf32>
    %206 = vector.extract_strided_slice %205 {offsets = [0, 0], sizes = [16, 384], strides = [1, 1]} : vector<16x512xf32> to vector<16x384xf32>
    %207 = arith.negf %206 : vector<16x384xf32>
    %208 = math.exp %207 : vector<16x384xf32>
    %cst_91 = arith.constant 1.000000e+00 : f32
    %209 = vector.broadcast %cst_91 : f32 to vector<16x384xf32>
    %210 = arith.addf %209, %208 : vector<16x384xf32>
    %211 = arith.divf %209, %210 : vector<16x384xf32>
    %212 = vector.extract_strided_slice %205 {offsets = [0, 384], sizes = [16, 128], strides = [1, 1]} : vector<16x512xf32> to vector<16x128xf32>
    %213 = math.tanh %212 : vector<16x128xf32>
    %214 = vector.extract_strided_slice %211 {offsets = [0, 0], sizes = [16, 128], strides = [1, 1]} : vector<16x384xf32> to vector<16x128xf32>
    %215 = vector.extract_strided_slice %211 {offsets = [0, 128], sizes = [16, 128], strides = [1, 1]} : vector<16x384xf32> to vector<16x128xf32>
    %216 = vector.extract_strided_slice %211 {offsets = [0, 256], sizes = [16, 128], strides = [1, 1]} : vector<16x384xf32> to vector<16x128xf32>
    %217 = arith.mulf %215, %168 : vector<16x128xf32>
    %218 = arith.mulf %214, %213 : vector<16x128xf32>
    %219 = arith.addf %217, %218 : vector<16x128xf32>
    %220 = math.tanh %219 : vector<16x128xf32>
    %221 = arith.mulf %216, %220 : vector<16x128xf32>
    %222 = arith.truncf %221 : vector<16x128xf32> to vector<16x128xbf16>
    %c0_92 = arith.constant 0 : index
    %c0_93 = arith.constant 0 : index
    %c48_94 = arith.constant 48 : index
    %c0_95 = arith.constant 0 : index
    %223 = vector.load %arg8[%c0_92, %c0_93, %c48_94, %c0_95] : memref<1x1x128x128xbf16, #tpu.memory_space<vmem>>, vector<1x1x16x128xbf16>
    %224 = vector.shape_cast %223 : vector<1x1x16x128xbf16> to vector<16x128xbf16>
    %225 = vector.shape_cast %222 : vector<16x128xbf16> to vector<1x1x16x128xbf16>
    tpu.vector_store %arg8[%c0_92, %c0_93, %c48_94, %c0_95], %225 {strides = array<i32>} : memref<1x1x128x128xbf16, #tpu.memory_space<vmem>>, vector<1x1x16x128xbf16>,
    %c64 = arith.constant 64 : index
    %c0_96 = arith.constant 0 : index
    %226 = vector.load %arg11[%c64, %c0_96] : memref<128x512xf32, #tpu.memory_space<vmem>>, vector<16x512xf32>
    %227 = arith.truncf %195 : vector<16x128xf32> to vector<16x128xbf16>
    %c0_97 = arith.constant 0 : index
    %c0_98 = arith.constant 0 : index
    %228 = vector.load %arg4[%c0_97, %c0_98] : memref<128x512xbf16, #tpu.memory_space<vmem>>, vector<128x512xbf16>
    %cst_99 = arith.constant dense<0.000000e+00> : vector<16x512xf32>
    %229 = tpu.matmul %227, %228, %cst_99 {dimension_numbers = #tpu.dot_dimension_numbers<[1], [0], [0], [1], [0, 0, 1, 1], [], []>} : vector<16x128xbf16>, vector<128x512xbf16>, vector<16x512xf32> -> vector<16x512xf32>
    %230 = arith.addf %226, %229 : vector<16x512xf32>
    %231 = vector.extract_strided_slice %230 {offsets = [0, 0], sizes = [16, 384], strides = [1, 1]} : vector<16x512xf32> to vector<16x384xf32>
    %232 = arith.negf %231 : vector<16x384xf32>
    %233 = math.exp %232 : vector<16x384xf32>
    %cst_100 = arith.constant 1.000000e+00 : f32
    %234 = vector.broadcast %cst_100 : f32 to vector<16x384xf32>
    %235 = arith.addf %234, %233 : vector<16x384xf32>
    %236 = arith.divf %234, %235 : vector<16x384xf32>
    %237 = vector.extract_strided_slice %230 {offsets = [0, 384], sizes = [16, 128], strides = [1, 1]} : vector<16x512xf32> to vector<16x128xf32>
    %238 = math.tanh %237 : vector<16x128xf32>
    %239 = vector.extract_strided_slice %236 {offsets = [0, 0], sizes = [16, 128], strides = [1, 1]} : vector<16x384xf32> to vector<16x128xf32>
    %240 = vector.extract_strided_slice %236 {offsets = [0, 128], sizes = [16, 128], strides = [1, 1]} : vector<16x384xf32> to vector<16x128xf32>
    %241 = vector.extract_strided_slice %236 {offsets = [0, 256], sizes = [16, 128], strides = [1, 1]} : vector<16x384xf32> to vector<16x128xf32>
    %242 = arith.mulf %240, %193 : vector<16x128xf32>
    %243 = arith.mulf %239, %238 : vector<16x128xf32>
    %244 = arith.addf %242, %243 : vector<16x128xf32>
    %245 = math.tanh %244 : vector<16x128xf32>
    %246 = arith.mulf %241, %245 : vector<16x128xf32>
    %247 = arith.truncf %246 : vector<16x128xf32> to vector<16x128xbf16>
    %c0_101 = arith.constant 0 : index
    %c0_102 = arith.constant 0 : index
    %c0_103 = arith.constant 0 : index
    %248 = vector.load %arg5[%c0_101, %c0_102, %c0_103] : memref<1x128x512xbf16, #tpu.memory_space<vmem>>, vector<1x128x512xbf16>
    %249 = vector.shape_cast %248 : vector<1x128x512xbf16> to vector<128x512xbf16>
    %cst_104 = arith.constant dense<0.000000e+00> : vector<16x512xf32>
    %250 = tpu.matmul %247, %249, %cst_104 {dimension_numbers = #tpu.dot_dimension_numbers<[1], [0], [0], [1], [0, 0, 1, 1], [], []>} : vector<16x128xbf16>, vector<128x512xbf16>, vector<16x512xf32> -> vector<16x512xf32>
    %251 = arith.truncf %221 : vector<16x128xf32> to vector<16x128xbf16>
    %c0_105 = arith.constant 0 : index
    %c0_106 = arith.constant 0 : index
    %c0_107 = arith.constant 0 : index
    %252 = vector.load %arg6[%c0_105, %c0_106, %c0_107] : memref<1x128x512xbf16, #tpu.memory_space<vmem>>, vector<1x128x512xbf16>
    %253 = vector.shape_cast %252 : vector<1x128x512xbf16> to vector<128x512xbf16>
    %cst_108 = arith.constant dense<0.000000e+00> : vector<16x512xf32>
    %254 = tpu.matmul %251, %253, %cst_108 {dimension_numbers = #tpu.dot_dimension_numbers<[1], [0], [0], [1], [0, 0, 1, 1], [], []>} : vector<16x128xbf16>, vector<128x512xbf16>, vector<16x512xf32> -> vector<16x512xf32>
    %255 = arith.addf %250, %254 : vector<16x512xf32>
    %256 = arith.addf %255, %13 : vector<16x512xf32>
    %257 = vector.extract_strided_slice %256 {offsets = [0, 0], sizes = [16, 384], strides = [1, 1]} : vector<16x512xf32> to vector<16x384xf32>
    %258 = arith.negf %257 : vector<16x384xf32>
    %259 = math.exp %258 : vector<16x384xf32>
    %cst_109 = arith.constant 1.000000e+00 : f32
    %260 = vector.broadcast %cst_109 : f32 to vector<16x384xf32>
    %261 = arith.addf %260, %259 : vector<16x384xf32>
    %262 = arith.divf %260, %261 : vector<16x384xf32>
    %263 = vector.extract_strided_slice %256 {offsets = [0, 384], sizes = [16, 128], strides = [1, 1]} : vector<16x512xf32> to vector<16x128xf32>
    %264 = math.tanh %263 : vector<16x128xf32>
    %265 = vector.extract_strided_slice %262 {offsets = [0, 0], sizes = [16, 128], strides = [1, 1]} : vector<16x384xf32> to vector<16x128xf32>
    %266 = vector.extract_strided_slice %262 {offsets = [0, 128], sizes = [16, 128], strides = [1, 1]} : vector<16x384xf32> to vector<16x128xf32>
    %267 = vector.extract_strided_slice %262 {offsets = [0, 256], sizes = [16, 128], strides = [1, 1]} : vector<16x384xf32> to vector<16x128xf32>
    %268 = arith.mulf %266, %219 : vector<16x128xf32>
    %269 = arith.mulf %265, %264 : vector<16x128xf32>
    %270 = arith.addf %268, %269 : vector<16x128xf32>
    %271 = math.tanh %270 : vector<16x128xf32>
    %272 = arith.mulf %267, %271 : vector<16x128xf32>
    %273 = arith.truncf %272 : vector<16x128xf32> to vector<16x128xbf16>
    %c0_110 = arith.constant 0 : index
    %c0_111 = arith.constant 0 : index
    %c64_112 = arith.constant 64 : index
    %c0_113 = arith.constant 0 : index
    %274 = vector.load %arg8[%c0_110, %c0_111, %c64_112, %c0_113] : memref<1x1x128x128xbf16, #tpu.memory_space<vmem>>, vector<1x1x16x128xbf16>
    %275 = vector.shape_cast %274 : vector<1x1x16x128xbf16> to vector<16x128xbf16>
    %276 = vector.shape_cast %273 : vector<16x128xbf16> to vector<1x1x16x128xbf16>
    tpu.vector_store %arg8[%c0_110, %c0_111, %c64_112, %c0_113], %276 {strides = array<i32>} : memref<1x1x128x128xbf16, #tpu.memory_space<vmem>>, vector<1x1x16x128xbf16>,
    %c80 = arith.constant 80 : index
    %c0_114 = arith.constant 0 : index
    %277 = vector.load %arg11[%c80, %c0_114] : memref<128x512xf32, #tpu.memory_space<vmem>>, vector<16x512xf32>
    %278 = arith.truncf %246 : vector<16x128xf32> to vector<16x128xbf16>
    %c0_115 = arith.constant 0 : index
    %c0_116 = arith.constant 0 : index
    %279 = vector.load %arg4[%c0_115, %c0_116] : memref<128x512xbf16, #tpu.memory_space<vmem>>, vector<128x512xbf16>
    %cst_117 = arith.constant dense<0.000000e+00> : vector<16x512xf32>
    %280 = tpu.matmul %278, %279, %cst_117 {dimension_numbers = #tpu.dot_dimension_numbers<[1], [0], [0], [1], [0, 0, 1, 1], [], []>} : vector<16x128xbf16>, vector<128x512xbf16>, vector<16x512xf32> -> vector<16x512xf32>
    %281 = arith.addf %277, %280 : vector<16x512xf32>
    %282 = vector.extract_strided_slice %281 {offsets = [0, 0], sizes = [16, 384], strides = [1, 1]} : vector<16x512xf32> to vector<16x384xf32>
    %283 = arith.negf %282 : vector<16x384xf32>
    %284 = math.exp %283 : vector<16x384xf32>
    %cst_118 = arith.constant 1.000000e+00 : f32
    %285 = vector.broadcast %cst_118 : f32 to vector<16x384xf32>
    %286 = arith.addf %285, %284 : vector<16x384xf32>
    %287 = arith.divf %285, %286 : vector<16x384xf32>
    %288 = vector.extract_strided_slice %281 {offsets = [0, 384], sizes = [16, 128], strides = [1, 1]} : vector<16x512xf32> to vector<16x128xf32>
    %289 = math.tanh %288 : vector<16x128xf32>
    %290 = vector.extract_strided_slice %287 {offsets = [0, 0], sizes = [16, 128], strides = [1, 1]} : vector<16x384xf32> to vector<16x128xf32>
    %291 = vector.extract_strided_slice %287 {offsets = [0, 128], sizes = [16, 128], strides = [1, 1]} : vector<16x384xf32> to vector<16x128xf32>
    %292 = vector.extract_strided_slice %287 {offsets = [0, 256], sizes = [16, 128], strides = [1, 1]} : vector<16x384xf32> to vector<16x128xf32>
    %293 = arith.mulf %291, %244 : vector<16x128xf32>
    %294 = arith.mulf %290, %289 : vector<16x128xf32>
    %295 = arith.addf %293, %294 : vector<16x128xf32>
    %296 = math.tanh %295 : vector<16x128xf32>
    %297 = arith.mulf %292, %296 : vector<16x128xf32>
    %298 = arith.truncf %297 : vector<16x128xf32> to vector<16x128xbf16>
    %c0_119 = arith.constant 0 : index
    %c0_120 = arith.constant 0 : index
    %c0_121 = arith.constant 0 : index
    %299 = vector.load %arg5[%c0_119, %c0_120, %c0_121] : memref<1x128x512xbf16, #tpu.memory_space<vmem>>, vector<1x128x512xbf16>
    %300 = vector.shape_cast %299 : vector<1x128x512xbf16> to vector<128x512xbf16>
    %cst_122 = arith.constant dense<0.000000e+00> : vector<16x512xf32>
    %301 = tpu.matmul %298, %300, %cst_122 {dimension_numbers = #tpu.dot_dimension_numbers<[1], [0], [0], [1], [0, 0, 1, 1], [], []>} : vector<16x128xbf16>, vector<128x512xbf16>, vector<16x512xf32> -> vector<16x512xf32>
    %302 = arith.truncf %272 : vector<16x128xf32> to vector<16x128xbf16>
    %c0_123 = arith.constant 0 : index
    %c0_124 = arith.constant 0 : index
    %c0_125 = arith.constant 0 : index
    %303 = vector.load %arg6[%c0_123, %c0_124, %c0_125] : memref<1x128x512xbf16, #tpu.memory_space<vmem>>, vector<1x128x512xbf16>
    %304 = vector.shape_cast %303 : vector<1x128x512xbf16> to vector<128x512xbf16>
    %cst_126 = arith.constant dense<0.000000e+00> : vector<16x512xf32>
    %305 = tpu.matmul %302, %304, %cst_126 {dimension_numbers = #tpu.dot_dimension_numbers<[1], [0], [0], [1], [0, 0, 1, 1], [], []>} : vector<16x128xbf16>, vector<128x512xbf16>, vector<16x512xf32> -> vector<16x512xf32>
    %306 = arith.addf %301, %305 : vector<16x512xf32>
    %307 = arith.addf %306, %13 : vector<16x512xf32>
    %308 = vector.extract_strided_slice %307 {offsets = [0, 0], sizes = [16, 384], strides = [1, 1]} : vector<16x512xf32> to vector<16x384xf32>
    %309 = arith.negf %308 : vector<16x384xf32>
    %310 = math.exp %309 : vector<16x384xf32>
    %cst_127 = arith.constant 1.000000e+00 : f32
    %311 = vector.broadcast %cst_127 : f32 to vector<16x384xf32>
    %312 = arith.addf %311, %310 : vector<16x384xf32>
    %313 = arith.divf %311, %312 : vector<16x384xf32>
    %314 = vector.extract_strided_slice %307 {offsets = [0, 384], sizes = [16, 128], strides = [1, 1]} : vector<16x512xf32> to vector<16x128xf32>
    %315 = math.tanh %314 : vector<16x128xf32>
    %316 = vector.extract_strided_slice %313 {offsets = [0, 0], sizes = [16, 128], strides = [1, 1]} : vector<16x384xf32> to vector<16x128xf32>
    %317 = vector.extract_strided_slice %313 {offsets = [0, 128], sizes = [16, 128], strides = [1, 1]} : vector<16x384xf32> to vector<16x128xf32>
    %318 = vector.extract_strided_slice %313 {offsets = [0, 256], sizes = [16, 128], strides = [1, 1]} : vector<16x384xf32> to vector<16x128xf32>
    %319 = arith.mulf %317, %270 : vector<16x128xf32>
    %320 = arith.mulf %316, %315 : vector<16x128xf32>
    %321 = arith.addf %319, %320 : vector<16x128xf32>
    %322 = math.tanh %321 : vector<16x128xf32>
    %323 = arith.mulf %318, %322 : vector<16x128xf32>
    %324 = arith.truncf %323 : vector<16x128xf32> to vector<16x128xbf16>
    %c0_128 = arith.constant 0 : index
    %c0_129 = arith.constant 0 : index
    %c80_130 = arith.constant 80 : index
    %c0_131 = arith.constant 0 : index
    %325 = vector.load %arg8[%c0_128, %c0_129, %c80_130, %c0_131] : memref<1x1x128x128xbf16, #tpu.memory_space<vmem>>, vector<1x1x16x128xbf16>
    %326 = vector.shape_cast %325 : vector<1x1x16x128xbf16> to vector<16x128xbf16>
    %327 = vector.shape_cast %324 : vector<16x128xbf16> to vector<1x1x16x128xbf16>
    tpu.vector_store %arg8[%c0_128, %c0_129, %c80_130, %c0_131], %327 {strides = array<i32>} : memref<1x1x128x128xbf16, #tpu.memory_space<vmem>>, vector<1x1x16x128xbf16>,
    %c96 = arith.constant 96 : index
    %c0_132 = arith.constant 0 : index
    %328 = vector.load %arg11[%c96, %c0_132] : memref<128x512xf32, #tpu.memory_space<vmem>>, vector<16x512xf32>
    %329 = arith.truncf %297 : vector<16x128xf32> to vector<16x128xbf16>
    %c0_133 = arith.constant 0 : index
    %c0_134 = arith.constant 0 : index
    %330 = vector.load %arg4[%c0_133, %c0_134] : memref<128x512xbf16, #tpu.memory_space<vmem>>, vector<128x512xbf16>
    %cst_135 = arith.constant dense<0.000000e+00> : vector<16x512xf32>
    %331 = tpu.matmul %329, %330, %cst_135 {dimension_numbers = #tpu.dot_dimension_numbers<[1], [0], [0], [1], [0, 0, 1, 1], [], []>} : vector<16x128xbf16>, vector<128x512xbf16>, vector<16x512xf32> -> vector<16x512xf32>
    %332 = arith.addf %328, %331 : vector<16x512xf32>
    %333 = vector.extract_strided_slice %332 {offsets = [0, 0], sizes = [16, 384], strides = [1, 1]} : vector<16x512xf32> to vector<16x384xf32>
    %334 = arith.negf %333 : vector<16x384xf32>
    %335 = math.exp %334 : vector<16x384xf32>
    %cst_136 = arith.constant 1.000000e+00 : f32
    %336 = vector.broadcast %cst_136 : f32 to vector<16x384xf32>
    %337 = arith.addf %336, %335 : vector<16x384xf32>
    %338 = arith.divf %336, %337 : vector<16x384xf32>
    %339 = vector.extract_strided_slice %332 {offsets = [0, 384], sizes = [16, 128], strides = [1, 1]} : vector<16x512xf32> to vector<16x128xf32>
    %340 = math.tanh %339 : vector<16x128xf32>
    %341 = vector.extract_strided_slice %338 {offsets = [0, 0], sizes = [16, 128], strides = [1, 1]} : vector<16x384xf32> to vector<16x128xf32>
    %342 = vector.extract_strided_slice %338 {offsets = [0, 128], sizes = [16, 128], strides = [1, 1]} : vector<16x384xf32> to vector<16x128xf32>
    %343 = vector.extract_strided_slice %338 {offsets = [0, 256], sizes = [16, 128], strides = [1, 1]} : vector<16x384xf32> to vector<16x128xf32>
    %344 = arith.mulf %342, %295 : vector<16x128xf32>
    %345 = arith.mulf %341, %340 : vector<16x128xf32>
    %346 = arith.addf %344, %345 : vector<16x128xf32>
    %347 = math.tanh %346 : vector<16x128xf32>
    %348 = arith.mulf %343, %347 : vector<16x128xf32>
    %349 = arith.truncf %348 : vector<16x128xf32> to vector<16x128xbf16>
    %c0_137 = arith.constant 0 : index
    %c0_138 = arith.constant 0 : index
    %c0_139 = arith.constant 0 : index
    %350 = vector.load %arg5[%c0_137, %c0_138, %c0_139] : memref<1x128x512xbf16, #tpu.memory_space<vmem>>, vector<1x128x512xbf16>
    %351 = vector.shape_cast %350 : vector<1x128x512xbf16> to vector<128x512xbf16>
    %cst_140 = arith.constant dense<0.000000e+00> : vector<16x512xf32>
    %352 = tpu.matmul %349, %351, %cst_140 {dimension_numbers = #tpu.dot_dimension_numbers<[1], [0], [0], [1], [0, 0, 1, 1], [], []>} : vector<16x128xbf16>, vector<128x512xbf16>, vector<16x512xf32> -> vector<16x512xf32>
    %353 = arith.truncf %323 : vector<16x128xf32> to vector<16x128xbf16>
    %c0_141 = arith.constant 0 : index
    %c0_142 = arith.constant 0 : index
    %c0_143 = arith.constant 0 : index
    %354 = vector.load %arg6[%c0_141, %c0_142, %c0_143] : memref<1x128x512xbf16, #tpu.memory_space<vmem>>, vector<1x128x512xbf16>
    %355 = vector.shape_cast %354 : vector<1x128x512xbf16> to vector<128x512xbf16>
    %cst_144 = arith.constant dense<0.000000e+00> : vector<16x512xf32>
    %356 = tpu.matmul %353, %355, %cst_144 {dimension_numbers = #tpu.dot_dimension_numbers<[1], [0], [0], [1], [0, 0, 1, 1], [], []>} : vector<16x128xbf16>, vector<128x512xbf16>, vector<16x512xf32> -> vector<16x512xf32>
    %357 = arith.addf %352, %356 : vector<16x512xf32>
    %358 = arith.addf %357, %13 : vector<16x512xf32>
    %359 = vector.extract_strided_slice %358 {offsets = [0, 0], sizes = [16, 384], strides = [1, 1]} : vector<16x512xf32> to vector<16x384xf32>
    %360 = arith.negf %359 : vector<16x384xf32>
    %361 = math.exp %360 : vector<16x384xf32>
    %cst_145 = arith.constant 1.000000e+00 : f32
    %362 = vector.broadcast %cst_145 : f32 to vector<16x384xf32>
    %363 = arith.addf %362, %361 : vector<16x384xf32>
    %364 = arith.divf %362, %363 : vector<16x384xf32>
    %365 = vector.extract_strided_slice %358 {offsets = [0, 384], sizes = [16, 128], strides = [1, 1]} : vector<16x512xf32> to vector<16x128xf32>
    %366 = math.tanh %365 : vector<16x128xf32>
    %367 = vector.extract_strided_slice %364 {offsets = [0, 0], sizes = [16, 128], strides = [1, 1]} : vector<16x384xf32> to vector<16x128xf32>
    %368 = vector.extract_strided_slice %364 {offsets = [0, 128], sizes = [16, 128], strides = [1, 1]} : vector<16x384xf32> to vector<16x128xf32>
    %369 = vector.extract_strided_slice %364 {offsets = [0, 256], sizes = [16, 128], strides = [1, 1]} : vector<16x384xf32> to vector<16x128xf32>
    %370 = arith.mulf %368, %321 : vector<16x128xf32>
    %371 = arith.mulf %367, %366 : vector<16x128xf32>
    %372 = arith.addf %370, %371 : vector<16x128xf32>
    %373 = math.tanh %372 : vector<16x128xf32>
    %374 = arith.mulf %369, %373 : vector<16x128xf32>
    %375 = arith.truncf %374 : vector<16x128xf32> to vector<16x128xbf16>
    %c0_146 = arith.constant 0 : index
    %c0_147 = arith.constant 0 : index
    %c96_148 = arith.constant 96 : index
    %c0_149 = arith.constant 0 : index
    %376 = vector.load %arg8[%c0_146, %c0_147, %c96_148, %c0_149] : memref<1x1x128x128xbf16, #tpu.memory_space<vmem>>, vector<1x1x16x128xbf16>
    %377 = vector.shape_cast %376 : vector<1x1x16x128xbf16> to vector<16x128xbf16>
    %378 = vector.shape_cast %375 : vector<16x128xbf16> to vector<1x1x16x128xbf16>
    tpu.vector_store %arg8[%c0_146, %c0_147, %c96_148, %c0_149], %378 {strides = array<i32>} : memref<1x1x128x128xbf16, #tpu.memory_space<vmem>>, vector<1x1x16x128xbf16>,
    %c112 = arith.constant 112 : index
    %c0_150 = arith.constant 0 : index
    %379 = vector.load %arg11[%c112, %c0_150] : memref<128x512xf32, #tpu.memory_space<vmem>>, vector<16x512xf32>
    %380 = arith.truncf %348 : vector<16x128xf32> to vector<16x128xbf16>
    %c0_151 = arith.constant 0 : index
    %c0_152 = arith.constant 0 : index
    %381 = vector.load %arg4[%c0_151, %c0_152] : memref<128x512xbf16, #tpu.memory_space<vmem>>, vector<128x512xbf16>
    %cst_153 = arith.constant dense<0.000000e+00> : vector<16x512xf32>
    %382 = tpu.matmul %380, %381, %cst_153 {dimension_numbers = #tpu.dot_dimension_numbers<[1], [0], [0], [1], [0, 0, 1, 1], [], []>} : vector<16x128xbf16>, vector<128x512xbf16>, vector<16x512xf32> -> vector<16x512xf32>
    %383 = arith.addf %379, %382 : vector<16x512xf32>
    %384 = vector.extract_strided_slice %383 {offsets = [0, 0], sizes = [16, 384], strides = [1, 1]} : vector<16x512xf32> to vector<16x384xf32>
    %385 = arith.negf %384 : vector<16x384xf32>
    %386 = math.exp %385 : vector<16x384xf32>
    %cst_154 = arith.constant 1.000000e+00 : f32
    %387 = vector.broadcast %cst_154 : f32 to vector<16x384xf32>
    %388 = arith.addf %387, %386 : vector<16x384xf32>
    %389 = arith.divf %387, %388 : vector<16x384xf32>
    %390 = vector.extract_strided_slice %383 {offsets = [0, 384], sizes = [16, 128], strides = [1, 1]} : vector<16x512xf32> to vector<16x128xf32>
    %391 = math.tanh %390 : vector<16x128xf32>
    %392 = vector.extract_strided_slice %389 {offsets = [0, 0], sizes = [16, 128], strides = [1, 1]} : vector<16x384xf32> to vector<16x128xf32>
    %393 = vector.extract_strided_slice %389 {offsets = [0, 128], sizes = [16, 128], strides = [1, 1]} : vector<16x384xf32> to vector<16x128xf32>
    %394 = vector.extract_strided_slice %389 {offsets = [0, 256], sizes = [16, 128], strides = [1, 1]} : vector<16x384xf32> to vector<16x128xf32>
    %395 = arith.mulf %393, %346 : vector<16x128xf32>
    %396 = arith.mulf %392, %391 : vector<16x128xf32>
    %397 = arith.addf %395, %396 : vector<16x128xf32>
    %398 = math.tanh %397 : vector<16x128xf32>
    %399 = arith.mulf %394, %398 : vector<16x128xf32>
    %400 = arith.truncf %399 : vector<16x128xf32> to vector<16x128xbf16>
    %c0_155 = arith.constant 0 : index
    %c0_156 = arith.constant 0 : index
    %c0_157 = arith.constant 0 : index
    %401 = vector.load %arg5[%c0_155, %c0_156, %c0_157] : memref<1x128x512xbf16, #tpu.memory_space<vmem>>, vector<1x128x512xbf16>
    %402 = vector.shape_cast %401 : vector<1x128x512xbf16> to vector<128x512xbf16>
    %cst_158 = arith.constant dense<0.000000e+00> : vector<16x512xf32>
    %403 = tpu.matmul %400, %402, %cst_158 {dimension_numbers = #tpu.dot_dimension_numbers<[1], [0], [0], [1], [0, 0, 1, 1], [], []>} : vector<16x128xbf16>, vector<128x512xbf16>, vector<16x512xf32> -> vector<16x512xf32>
    %404 = arith.truncf %374 : vector<16x128xf32> to vector<16x128xbf16>
    %c0_159 = arith.constant 0 : index
    %c0_160 = arith.constant 0 : index
    %c0_161 = arith.constant 0 : index
    %405 = vector.load %arg6[%c0_159, %c0_160, %c0_161] : memref<1x128x512xbf16, #tpu.memory_space<vmem>>, vector<1x128x512xbf16>
    %406 = vector.shape_cast %405 : vector<1x128x512xbf16> to vector<128x512xbf16>
    %cst_162 = arith.constant dense<0.000000e+00> : vector<16x512xf32>
    %407 = tpu.matmul %404, %406, %cst_162 {dimension_numbers = #tpu.dot_dimension_numbers<[1], [0], [0], [1], [0, 0, 1, 1], [], []>} : vector<16x128xbf16>, vector<128x512xbf16>, vector<16x512xf32> -> vector<16x512xf32>
    %408 = arith.addf %403, %407 : vector<16x512xf32>
    %409 = arith.addf %408, %13 : vector<16x512xf32>
    %410 = vector.extract_strided_slice %409 {offsets = [0, 0], sizes = [16, 384], strides = [1, 1]} : vector<16x512xf32> to vector<16x384xf32>
    %411 = arith.negf %410 : vector<16x384xf32>
    %412 = math.exp %411 : vector<16x384xf32>
    %cst_163 = arith.constant 1.000000e+00 : f32
    %413 = vector.broadcast %cst_163 : f32 to vector<16x384xf32>
    %414 = arith.addf %413, %412 : vector<16x384xf32>
    %415 = arith.divf %413, %414 : vector<16x384xf32>
    %416 = vector.extract_strided_slice %409 {offsets = [0, 384], sizes = [16, 128], strides = [1, 1]} : vector<16x512xf32> to vector<16x128xf32>
    %417 = math.tanh %416 : vector<16x128xf32>
    %418 = vector.extract_strided_slice %415 {offsets = [0, 0], sizes = [16, 128], strides = [1, 1]} : vector<16x384xf32> to vector<16x128xf32>
    %419 = vector.extract_strided_slice %415 {offsets = [0, 128], sizes = [16, 128], strides = [1, 1]} : vector<16x384xf32> to vector<16x128xf32>
    %420 = vector.extract_strided_slice %415 {offsets = [0, 256], sizes = [16, 128], strides = [1, 1]} : vector<16x384xf32> to vector<16x128xf32>
    %421 = arith.mulf %419, %372 : vector<16x128xf32>
    %422 = arith.mulf %418, %417 : vector<16x128xf32>
    %423 = arith.addf %421, %422 : vector<16x128xf32>
    %424 = math.tanh %423 : vector<16x128xf32>
    %425 = arith.mulf %420, %424 : vector<16x128xf32>
    %426 = arith.truncf %425 : vector<16x128xf32> to vector<16x128xbf16>
    %c0_164 = arith.constant 0 : index
    %c0_165 = arith.constant 0 : index
    %c112_166 = arith.constant 112 : index
    %c0_167 = arith.constant 0 : index
    %427 = vector.load %arg8[%c0_164, %c0_165, %c112_166, %c0_167] : memref<1x1x128x128xbf16, #tpu.memory_space<vmem>>, vector<1x1x16x128xbf16>
    %428 = vector.shape_cast %427 : vector<1x1x16x128xbf16> to vector<16x128xbf16>
    %429 = vector.shape_cast %426 : vector<16x128xbf16> to vector<1x1x16x128xbf16>
    tpu.vector_store %arg8[%c0_164, %c0_165, %c112_166, %c0_167], %429 {strides = array<i32>} : memref<1x1x128x128xbf16, #tpu.memory_space<vmem>>, vector<1x1x16x128xbf16>,
    %c0_168 = arith.constant 0 : index
    %c0_169 = arith.constant 0 : index
    %c0_170 = arith.constant 0 : index
    %430 = vector.load %arg9[%c0_168, %c0_169, %c0_170] : memref<2x16x128xf32, #tpu.memory_space<vmem>>, vector<1x16x128xf32>
    %431 = vector.shape_cast %430 : vector<1x16x128xf32> to vector<16x128xf32>
    %432 = vector.shape_cast %399 : vector<16x128xf32> to vector<1x16x128xf32>
    tpu.vector_store %arg9[%c0_168, %c0_169, %c0_170], %432 {strides = array<i32>} : memref<2x16x128xf32, #tpu.memory_space<vmem>>, vector<1x16x128xf32>,
    %c0_171 = arith.constant 0 : index
    %c0_172 = arith.constant 0 : index
    %c0_173 = arith.constant 0 : index
    %433 = vector.load %arg10[%c0_171, %c0_172, %c0_173] : memref<2x16x128xf32, #tpu.memory_space<vmem>>, vector<1x16x128xf32>
    %434 = vector.shape_cast %433 : vector<1x16x128xf32> to vector<16x128xf32>
    %435 = vector.shape_cast %397 : vector<16x128xf32> to vector<1x16x128xf32>
    tpu.vector_store %arg10[%c0_171, %c0_172, %c0_173], %435 {strides = array<i32>} : memref<2x16x128xf32, #tpu.memory_space<vmem>>, vector<1x16x128xf32>,
    %c1_174 = arith.constant 1 : index
    %c0_175 = arith.constant 0 : index
    %c0_176 = arith.constant 0 : index
    %436 = vector.load %arg9[%c1_174, %c0_175, %c0_176] : memref<2x16x128xf32, #tpu.memory_space<vmem>>, vector<1x16x128xf32>
    %437 = vector.shape_cast %436 : vector<1x16x128xf32> to vector<16x128xf32>
    %438 = vector.shape_cast %425 : vector<16x128xf32> to vector<1x16x128xf32>
    tpu.vector_store %arg9[%c1_174, %c0_175, %c0_176], %438 {strides = array<i32>} : memref<2x16x128xf32, #tpu.memory_space<vmem>>, vector<1x16x128xf32>,
    %c1_177 = arith.constant 1 : index
    %c0_178 = arith.constant 0 : index
    %c0_179 = arith.constant 0 : index
    %439 = vector.load %arg10[%c1_177, %c0_178, %c0_179] : memref<2x16x128xf32, #tpu.memory_space<vmem>>, vector<1x16x128xf32>
    %440 = vector.shape_cast %439 : vector<1x16x128xf32> to vector<16x128xf32>
    %441 = vector.shape_cast %423 : vector<16x128xf32> to vector<1x16x128xf32>
    tpu.vector_store %arg10[%c1_177, %c0_178, %c0_179], %441 {strides = array<i32>} : memref<2x16x128xf32, #tpu.memory_space<vmem>>, vector<1x16x128xf32>,
    return
  }
  func.func @transform_0(%arg0: i32, %arg1: i32) -> (i32, i32, i32, i32) {
    %c0_i32 = arith.constant 0 : i32
    %c0_i32_0 = arith.constant 0 : i32
    %c0_i32_1 = arith.constant 0 : i32
    return %arg1, %arg0, %c0_i32, %c0_i32_0 : i32, i32, i32, i32
  }
  func.func @transform_1(%arg0: i32, %arg1: i32) -> (i32, i32) {
    %c0_i32 = arith.constant 0 : i32
    %c0_i32_0 = arith.constant 0 : i32
    %c0_i32_1 = arith.constant 0 : i32
    return %c0_i32, %c0_i32_0 : i32, i32
  }
  func.func @transform_2(%arg0: i32, %arg1: i32) -> (i32, i32) {
    %c0_i32 = arith.constant 0 : i32
    %c0_i32_0 = arith.constant 0 : i32
    %c0_i32_1 = arith.constant 0 : i32
    return %c0_i32, %c0_i32_0 : i32, i32
  }
  func.func @transform_3(%arg0: i32, %arg1: i32) -> (i32, i32, i32) {
    %c0_i32 = arith.constant 0 : i32
    %c0_i32_0 = arith.constant 0 : i32
    %c0_i32_1 = arith.constant 0 : i32
    %c0_i32_2 = arith.constant 0 : i32
    return %c0_i32, %c0_i32_0, %c0_i32_1 : i32, i32, i32
  }
  func.func @transform_4(%arg0: i32, %arg1: i32) -> (i32, i32, i32) {
    %c0_i32 = arith.constant 0 : i32
    %c0_i32_0 = arith.constant 0 : i32
    %c0_i32_1 = arith.constant 0 : i32
    %c0_i32_2 = arith.constant 0 : i32
    return %c0_i32, %c0_i32_0, %c0_i32_1 : i32, i32, i32
  }
  func.func @transform_5(%arg0: i32, %arg1: i32) -> (i32, i32) {
    %c0_i32 = arith.constant 0 : i32
    %c0_i32_0 = arith.constant 0 : i32
    %c0_i32_1 = arith.constant 0 : i32
    return %c0_i32, %c0_i32_0 : i32, i32
  }
  func.func @transform_6(%arg0: i32, %arg1: i32) -> (i32, i32, i32, i32) {
    %c0_i32 = arith.constant 0 : i32
    %c0_i32_0 = arith.constant 0 : i32
    %c0_i32_1 = arith.constant 0 : i32
    return %arg1, %arg0, %c0_i32, %c0_i32_0 : i32, i32, i32, i32
  }
}

</mosaic_0001>

<bundles_post_ra>
// kernel: tpu_custom_call.1
= control target key start
LH: loop header
LB: loop body
LE: loop exit
PB: predicated region body
PF: predicated region fallthrough
CT: control target
= control target key end

     0   :  { %s17778_s0 = inlined_call_operand.vmem [shape: bf16[2,1,128,32], index: 0, kind: input, shape index: {}]   ;;  %s17779_s1 = inlined_call_operand.vmem [shape: bf16[32,512], index: 1, kind: input, shape index: {}]   ;;  %s17780_s2 = inlined_call_operand.hbm [shape: bf16[128,512], index: 2, kind: input, shape index: {}]   ;;  %s17781_s3 = inlined_call_operand.hbm [shape: bf16[1,128,512], index: 3, kind: input, shape index: {}]   ;;  %s17782_s4 = inlined_call_operand.hbm [shape: bf16[1,128,512], index: 4, kind: input, shape index: {}]   ;;  %s17783_s5 = inlined_call_operand.vmem [shape: f32[2,512], index: 5, kind: input, shape index: {}]   ;;  %s17784_s6 = inlined_call_operand.hbm [shape: bf16[2,1,128,128], index: 6, kind: output, shape index: {}]  }
   0x1   :  { %17788 = sst [smem:[#allocation59_spill]] %s17781_s3 }
   0x2   :  { %11 = vsyncpa [#allocation6], 0 }
   0x3   :  { %12 = vsyncpa [#allocation9], 0 }
   0x4   :  { %13 = vsyncpa [#allocation7], 0 }
   0x5   :  { %15 = vsyncpa [#allocation7 + $0x1], 0  ;;  %s14086_s21 = smov 0   ;;  %s14088_s22 = smov 0  }
   0x6   :  { %s14090_s23 = smov 0   ;;  %s14092_s24 = smov 0  }
   0x7   :  { %s14094_s25 = smov 0   ;;  %s14096_s26 = smov 0  }
   0x8 LB: > { %17789 = sst [smem:[#allocation15_spill]] %s14037_s25  ;;  %s9144_s27 = sadd.s32 4294967295, %s14041_s26   ;;  %s14041_s26 = sphi %s14096_s26, %s21_s26   ;;  %s14037_s25 = sphi %s14094_s25, %s18166_s25   ;;  %s14033_s24 = sphi %s14092_s24, %s18165_s24   ;;  %s14029_s23 = sphi %s14090_s23, %s18169_s23   ;;  %s14025_s22 = sphi %s14088_s22, %s18168_s22   ;;  %s14021_s21 = sphi %s14086_s21, %s18167_s21  }
   0x9   : > { %s9145_s28 = sadd.s32 4294967294, %s14041_s26   ;;  %s30_s29 = sadd.s32 1, %s14037_s25 }
   0xa   : > { %s175_s30 = sadd.s32 1, %s14029_s23  ;;  %p31_p0 = scmp.ge.s32.totalorder %s30_s29, 2 }
   0xb   : > { %p185_p1 = scmp.ne.s32.totalorder %s14029_s23, %s14025_s22  ;;  %p186_p2 = scmp.eq.s32.totalorder %s9144_s27, 1 }
   0xc   : > { %p191_p3 = scmp.ne.s32.totalorder %s14025_s22, %s14021_s21  ;;  %s18171_s29 = smov (%p31_p0, %s30_s29), 0 }
   0xd   : > { %17790 = sst [smem:[#allocation16_spill]] %s18171_s29  ;;  %p14126_p4 = por %p186_p2, %p185_p1 }
   0xe   : > { %p192_p5 = scmp.eq.s32.totalorder %s9145_s28, 1  ;;  %s170_s8 = ssub.s32 %s14037_s25, %s18171_s29 }
   0xf   : > { %p9146_p6 = scmp.ge.s32.totalorder %s14041_s26, 1  ;;  %p173_p7 = scmp.eq.s32.totalorder %s170_s8, 0 }
  0x10   : > { %p14133_p8 = por %p192_p5, %p191_p3  ;;  %p199_p9 = scmp.lt.s32.totalorder %s14041_s26, 3 }
  0x11   : > { %s14139_s10 = scalar_select %p173_p7, %s14029_s23, %s175_s30  }
  0x12   : > { %p14141_p10 = pnand %p9146_p6, %p199_p9  ;;  %p14145_p11 = scmp.eq.s32.totalorder %s9144_s27, 0 }
  0x13   : > { %s17795_s3 = sld [smem:[#allocation59_spill]]  ;;  %s14043_s17 = smov [#allocation8]  }
  0x14   : > { %p13276_p12 = pneg %p14141_p10  ;;  %s229_s18 = sshll.u32 %s14043_s17, 4  ;;  %s230_s18 = int_to_ptr.vmem [resolvable:$true] %s229_s18 }
  0x15   : > { %s14044_s19 = smov 256   ;;  %s14045_s20 = smov 16  }
  0x16   : > { %p14156_p13 = pnand %p14145_p11, %p13276_p12  ;;  %s213_s30 = sshll.u32 %s17780_s2, 4  ;;  %s214_s30 = int_to_ptr.hbm [resolvable:$true] %s213_s30 }
  0x17   : > { %s14046_s8 = smov [#allocation5]   ;;  %s241_s29 = sshll.u32 %s17782_s4, 4  ;;  %s242_s29 = int_to_ptr.hbm [resolvable:$true] %s241_s29 }
  0x18   : > { %s215_s13 = sshll.u32 %s14046_s8, 4  ;;  %s14047_s17 = smov [#allocation10]   ;;  %s216_s13 = int_to_ptr.vmem [resolvable:$true] %s215_s13 }
  0x19   : > { %s227_s15 = sshll.u32 %s17795_s3, 4  ;;  %s243_s25 = sshll.u32 %s14047_s17, 4  ;;  %s228_s15 = int_to_ptr.hbm [resolvable:$true] %s227_s15  ;;  %s244_s25 = int_to_ptr.vmem [resolvable:$true] %s243_s25 }
  0x1a   : > { %13282 = dma.hbm_to_vmem [thread:$0]  (!%p14156_p13), %s228_s15, 4096, %s230_s18, [#allocation9], %s14044_s19, %s14044_s19, %s14045_s20  }
  0x1b   : > { %13279 = dma.hbm_to_vmem [thread:$0]  (!%p14156_p13), %s214_s30, 4096, %s216_s13, [#allocation6], %s14044_s19, %s14044_s19, %s14045_s20  }
  0x1c   : > { %13285 = dma.hbm_to_vmem [thread:$0]  (!%p14156_p13), %s242_s29, 4096, %s244_s25, [#allocation9], %s14044_s19, %s14044_s19, %s14045_s20  }
  0x1d   : > { %274 = sbr.rel (%p14141_p10) target bundleno = 2117 (0x845), region = 44 }
  0x22   : > { %14008 = dma.done.wait (%p14145_p11), [#allocation6], 4096  }
  0x23   : > { %14010 = vsyncadd (%p14145_p11), [#allocation6], 4294963200 }
  0x24   : > { %14012 = dma.done.wait (%p14145_p11), [#allocation9], 8192  }
  0x25   : > { %14014 = vsyncadd (%p14145_p11), [#allocation9], 4294959104  ;;  %s316_s3 = sand.u32 1, %s14025_s22   ;;  %p319_p0 = scmp.lt.s32.totalorder %s14033_s24, 1 }
  0x26   : > { %s9155_s25 = sshll.u32 %s316_s3, 6  ;;  %p9158_p1 = scmp.ne.s32.totalorder %s14033_s24, 0 }
  0x27   : > { %s320_s29 = scalar_select %p319_p0, %s14033_s24, 1 }
  0x28   : > { %s14192_s19 = scalar_lea.vmem [#allocation11], %s9155_s25  ;;  %332 = sbr.rel (%p9158_p1) target bundleno = 54 (0x36), region = 60 }
  0x29   : > { %s12429_s11 = sshll.u32 %s320_s29, 6 }
  0x2a   : > { %s14190_s18 = scalar_lea.vmem %s17778_s0, %s12429_s11 }
  0x2d   : > { %v14048_v0 = vmov 0.0  }
  0x2e   : > { %333 = vst [vmem:[#allocation2 + $0x10] sm:$0xff] %v14048_v0 }
  0x2f   : > { %334 = vst [vmem:[#allocation2] sm:$0xff] %v14048_v0 }
  0x30   : > { %335 = vst [vmem:[#allocation2 + $0x18] sm:$0xff] %v14048_v0 }
  0x31   : > { %336 = vst [vmem:[#allocation2 + $0x8] sm:$0xff] %v14048_v0 }
  0x32   : > { %337 = vst [vmem:[#allocation3] sm:$0xff] %v14048_v0 }
  0x33   : > { %338 = vst [vmem:[#allocation3 + $0x18] sm:$0xff] %v14048_v0 }
  0x34   : > { %339 = vst [vmem:[#allocation3 + $0x8] sm:$0xff] %v14048_v0 }
  0x35   : > { %340 = vst [vmem:[#allocation3 + $0x10] sm:$0xff] %v14048_v0 }
  0x36 PF: > { %v9209_v1 = vld [vmem:[%s17779_s1 + $0x20] sm:$0xf]  ;;  %v12444_v2 = vld [vmem:[%s17779_s1 + $0x2c] sm:$0xf0]  ;;  %v12442_v3 = vld [vmem:[%s17779_s1 + $0x24] sm:$0xf] }
  0x37   : > { %v9210_v4 = vor.u32 %v12444_v2, %v9209_v1  ;;  %v9211_v5 = vld [vmem:[%s17779_s1 + $0x30] sm:$0xf0]  ;;  %v9217_v6 = vld [vmem:[%s17779_s1 + $0x28] sm:$0xf]  ;;  %v12445_v7 = vld [vmem:[%s17779_s1 + $0x34] sm:$0xf0] }
  0x38   : > { %v9214_v8 = vor.u32 %v12442_v3, %v9211_v5  ;;  %v9218_v9 = vor.u32 %v12445_v7, %v9217_v6  ;;  %v12443_v10 = vld [vmem:[%s17779_s1 + $0x2c] sm:$0xf]  ;;  %v9219_v11 = vld [vmem:[%s17779_s1 + $0x38] sm:$0xf0]  ;;  %v9193_v12 = vld [vmem:[%s17779_s1] sm:$0xf] }
  0x39   : > { %486 = vmatpush.bf16.msra.mxu0 %v9210_v4  ;;  %v9222_v13 = vor.u32 %v12443_v10, %v9219_v11  ;;  %v12440_v14 = vld [vmem:[%s17779_s1 + $0xc] sm:$0xf0]  ;;  %v12438_v15 = vld [vmem:[%s17779_s1 + $0x4] sm:$0xf]  ;;  %v9195_v16 = vld [vmem:[%s17779_s1 + $0x10] sm:$0xf0] }
  0x3a   : > { %535 = vmatpush.bf16.msra.mxu1 %v9214_v8  ;;  %584 = vmatpush.bf16.msra.mxu2 %v9218_v9  ;;  %v9194_v17 = vor.u32 %v12440_v14, %v9193_v12  ;;  %v9198_v18 = vor.u32 %v12438_v15, %v9195_v16  ;;  %v9201_v19 = vld [vmem:[%s17779_s1 + $0x8] sm:$0xf]  ;;  %v12441_v20 = vld [vmem:[%s17779_s1 + $0x14] sm:$0xf0]  ;;  %v12439_v21 = vld [vmem:[%s17779_s1 + $0xc] sm:$0xf] }
  0x3b   : > { %633 = vmatpush.bf16.msra.mxu3 %v9222_v13  ;;  %v9202_v22 = vor.u32 %v12441_v20, %v9201_v19  ;;  %v9203_v23 = vld [vmem:[%s17779_s1 + $0x18] sm:$0xf0]  ;;  %v12430_v24 = vld [vmem:[%s14190_s18] sm:$0xff]  ;;  %vm455_vm0 = vcmask 261120   ;;  %v12476_v27 = vld [vmem:[#allocation5 + $0xec] sm:$0xf0] }
  0x3c   : > { %v9370_v25 = vld [vmem:[#allocation5 + $0xe0] sm:$0xf]  ;;  %v9206_v26 = vor.u32 %v12439_v21, %v9203_v23  ;;  %v12474_v28 = vld [vmem:[#allocation5 + $0xe4] sm:$0xf]  ;;  %v9372_v29 = vld [vmem:[#allocation5 + $0xf0] sm:$0xf0] }
  0x3d   : > { %487 = vmatpush.bf16.msra.mxu0 %v9194_v17  ;;  %v9371_v30 = vor.u32 %v12476_v27, %v9370_v25  ;;  %v9375_v31 = vor.u32 %v12474_v28, %v9372_v29  ;;  %v9378_v32 = vld [vmem:[#allocation5 + $0xe8] sm:$0xf]  ;;  %v12477_v33 = vld [vmem:[#allocation5 + $0xf4] sm:$0xf0]  ;;  %v12475_v34 = vld [vmem:[#allocation5 + $0xec] sm:$0xf] }
  0x3e   : > { %536 = vmatpush.bf16.msra.mxu1 %v9198_v18  ;;  %585 = vmatpush.bf16.msra.mxu2 %v9202_v22  ;;  %v9379_v35 = vor.u32 %v12477_v33, %v9378_v32  ;;  %v9380_v36 = vld [vmem:[#allocation5 + $0xf8] sm:$0xf0]  ;;  %v9354_v37 = vld [vmem:[#allocation5 + $0xc0] sm:$0xf]  ;;  %v12472_v39 = vld [vmem:[#allocation5 + $0xcc] sm:$0xf0] }
  0x3f   : > { %634 = vmatpush.bf16.msra.mxu3 %v9206_v26  ;;  %v9383_v38 = vor.u32 %v12475_v34, %v9380_v36  ;;  %v12470_v40 = vld [vmem:[#allocation5 + $0xc4] sm:$0xf]  ;;  %v9356_v41 = vld [vmem:[#allocation5 + $0xd0] sm:$0xf0]  ;;  %v9355_v42 = vor.u32 %v12472_v39, %v9354_v37  ;;  %v9362_v44 = vld [vmem:[#allocation5 + $0xc8] sm:$0xf] }
  0x40   : > { %9223 = vmatmul.msk.bf16.vlgmr.msra.gmra.mxu0 %vm455_vm0, %v12430_v24  ;;  %v9359_v43 = vor.u32 %v12470_v40, %v9356_v41  ;;  %v12473_v45 = vld [vmem:[#allocation5 + $0xd4] sm:$0xf0]  ;;  %v12471_v46 = vld [vmem:[#allocation5 + $0xcc] sm:$0xf]  ;;  %v9364_v47 = vld [vmem:[#allocation5 + $0xd8] sm:$0xf0] }
  0x41   : > { %962 = vmatpush.bf16.msrb.mxu0 %v9371_v30  ;;  %9231 = vmatmul.msk.bf16.vlgmr.msra.gmra.mxu1 %vm455_vm0, %v12430_v24  ;;  %v9363_v48 = vor.u32 %v12473_v45, %v9362_v44  ;;  %v9338_v49 = vld [vmem:[#allocation5 + $0xa0] sm:$0xf]  ;;  %v12468_v50 = vld [vmem:[#allocation5 + $0xac] sm:$0xf0]  ;;  %v12466_v51 = vld [vmem:[#allocation5 + $0xa4] sm:$0xf]  ;;  %v9367_v52 = vor.u32 %v12471_v46, %v9364_v47 }
  0x42   : > { %976 = vmatpush.bf16.msrb.mxu1 %v9375_v31  ;;  %9239 = vmatmul.msk.bf16.vlgmr.msra.gmra.mxu2 %vm455_vm0, %v12430_v24  ;;  %v9339_v53 = vor.u32 %v12468_v50, %v9338_v49  ;;  %v9340_v54 = vld [vmem:[#allocation5 + $0xb0] sm:$0xf0]  ;;  %v9346_v55 = vld [vmem:[#allocation5 + $0xa8] sm:$0xf]  ;;  %v12469_v56 = vld [vmem:[#allocation5 + $0xb4] sm:$0xf0] }
  0x43   : > { %9247 = vmatmul.msk.bf16.vlgmr.msra.gmra.mxu3 %vm455_vm0, %v12430_v24  ;;  %990 = vmatpush.bf16.msrb.mxu2 %v9379_v35  ;;  %v9343_v57 = vor.u32 %v12466_v51, %v9340_v54  ;;  %v12467_v58 = vld [vmem:[#allocation5 + $0xac] sm:$0xf]  ;;  %v9348_v59 = vld [vmem:[#allocation5 + $0xb8] sm:$0xf0]  ;;  %v9347_v60 = vor.u32 %v12469_v56, %v9346_v55  ;;  %v9322_v63 = vld [vmem:[#allocation5 + $0x80] sm:$0xf] }
  0x44   : > { %1004 = vmatpush.bf16.msrb.mxu3 %v9383_v38  ;;  %v9351_v61 = vor.u32 %v12467_v58, %v9348_v59  ;;  %v12431_v62 = vld [vmem:[%s14190_s18 + $0x8] sm:$0xff]  ;;  %v12464_v0 = vld [vmem:[#allocation5 + $0x8c] sm:$0xf0]  ;;  %v12462_v1 = vld [vmem:[#allocation5 + $0x84] sm:$0xf]  ;;  %s13214_s14 = sshll.u32 %s14033_s24, 6 }
  0x45   : > { %963 = vmatpush.bf16.msrb.mxu0 %v9355_v42  ;;  %v9323_v2 = vor.u32 %v12464_v0, %v9322_v63  ;;  %v9324_v3 = vld [vmem:[#allocation5 + $0x90] sm:$0xf0]  ;;  %v9330_v4 = vld [vmem:[#allocation5 + $0x88] sm:$0xf]  ;;  %v12465_v5 = vld [vmem:[#allocation5 + $0x94] sm:$0xf0]  ;;  %s9027_s29 = scalar_lea.hbm %s17784_s6, %s13214_s14 }
  0x46   : > { %977 = vmatpush.bf16.msrb.mxu1 %v9359_v43  ;;  %v9327_v6 = vor.u32 %v12462_v1, %v9324_v3  ;;  %v9331_v7 = vor.u32 %v12465_v5, %v9330_v4  ;;  %v12463_v8 = vld [vmem:[#allocation5 + $0x8c] sm:$0xf]  ;;  %v9332_v9 = vld [vmem:[#allocation5 + $0x98] sm:$0xf0]  ;;  %v12432_v11 = vld [vmem:[%s14190_s18 + $0x10] sm:$0xff]  ;;  %s9028_s24 = sshll.u32 %s14192_s19, 4  ;;  %s9029_s24 = int_to_ptr.vmem [resolvable:$true] %s9028_s24 }
  0x47   : > { %991 = vmatpush.bf16.msrb.mxu2 %v9363_v48  ;;  %v9335_v10 = vor.u32 %v12463_v8, %v9332_v9  ;;  %v9306_v12 = vld [vmem:[#allocation5 + $0x60] sm:$0xf]  ;;  %v12460_v13 = vld [vmem:[#allocation5 + $0x6c] sm:$0xf0]  ;;  %v12458_v14 = vld [vmem:[#allocation5 + $0x64] sm:$0xf] }
  0x48   : > { %1005 = vmatpush.bf16.msrb.mxu3 %v9367_v52  ;;  %v9307_v15 = vor.u32 %v12460_v13, %v9306_v12  ;;  %v9308_v16 = vld [vmem:[#allocation5 + $0x70] sm:$0xf0]  ;;  %v9314_v17 = vld [vmem:[#allocation5 + $0x68] sm:$0xf]  ;;  %v12461_v18 = vld [vmem:[#allocation5 + $0x74] sm:$0xf0] }
  0x49   : > { %964 = vmatpush.bf16.msrb.mxu0 %v9339_v53  ;;  %v9311_v19 = vor.u32 %v12458_v14, %v9308_v16  ;;  %v9315_v20 = vor.u32 %v12461_v18, %v9314_v17  ;;  %v12459_v21 = vld [vmem:[#allocation5 + $0x6c] sm:$0xf]  ;;  %v9316_v22 = vld [vmem:[#allocation5 + $0x78] sm:$0xf0]  ;;  %v9290_v25 = vld [vmem:[#allocation5 + $0x40] sm:$0xf] }
  0x4a   : > { %978 = vmatpush.bf16.msrb.mxu1 %v9343_v57  ;;  %v9319_v23 = vor.u32 %v12459_v21, %v9316_v22  ;;  %v12433_v24 = vld [vmem:[%s14190_s18 + $0x18] sm:$0xff]  ;;  %v12456_v26 = vld [vmem:[#allocation5 + $0x4c] sm:$0xf0]  ;;  %v12454_v27 = vld [vmem:[#allocation5 + $0x44] sm:$0xf]  ;;  %s9030_s11 = sshll.u32 %s9027_s29, 4  ;;  %s9031_s11 = int_to_ptr.hbm [resolvable:$true] %s9030_s11 }
  0x4b   : > { %992 = vmatpush.bf16.msrb.mxu2 %v9347_v60  ;;  %v9291_v28 = vor.u32 %v12456_v26, %v9290_v25  ;;  %v9292_v29 = vld [vmem:[#allocation5 + $0x50] sm:$0xf0]  ;;  %v9298_v30 = vld [vmem:[#allocation5 + $0x48] sm:$0xf]  ;;  %v12457_v31 = vld [vmem:[#allocation5 + $0x54] sm:$0xf0] }
  0x4c   : > { %1006 = vmatpush.bf16.msrb.mxu3 %v9351_v61  ;;  %v9295_v32 = vor.u32 %v12454_v27, %v9292_v29  ;;  %v9299_v33 = vor.u32 %v12457_v31, %v9298_v30  ;;  %v12455_v34 = vld [vmem:[#allocation5 + $0x4c] sm:$0xf]  ;;  %v9300_v35 = vld [vmem:[#allocation5 + $0x58] sm:$0xf0]  ;;  %v12434_v37 = vld [vmem:[%s14190_s18 + $0x20] sm:$0xff]  ;;  %s9014_s15 = scalar_lea.sflag [#allocation7], %s316_s3 }
  0x4d   : > { %965 = vmatpush.bf16.msrb.mxu0 %v9323_v2  ;;  %v9303_v36 = vor.u32 %v12455_v34, %v9300_v35  ;;  %v9274_v38 = vld [vmem:[#allocation5 + $0x20] sm:$0xf]  ;;  %v12452_v39 = vld [vmem:[#allocation5 + $0x2c] sm:$0xf0]  ;;  %v12450_v40 = vld [vmem:[#allocation5 + $0x24] sm:$0xf] }
  0x4e   : > { %979 = vmatpush.bf16.msrb.mxu1 %v9327_v6  ;;  %v9275_v41 = vor.u32 %v12452_v39, %v9274_v38  ;;  %v9276_v42 = vld [vmem:[#allocation5 + $0x30] sm:$0xf0]  ;;  %v9282_v43 = vld [vmem:[#allocation5 + $0x28] sm:$0xf]  ;;  %v12453_v44 = vld [vmem:[#allocation5 + $0x34] sm:$0xf0] }
  0x4f   : > { %993 = vmatpush.bf16.msrb.mxu2 %v9331_v7  ;;  %v9279_v45 = vor.u32 %v12450_v40, %v9276_v42  ;;  %v9283_v46 = vor.u32 %v12453_v44, %v9282_v43  ;;  %v12451_v47 = vld [vmem:[#allocation5 + $0x2c] sm:$0xf]  ;;  %v9284_v48 = vld [vmem:[#allocation5 + $0x38] sm:$0xf0]  ;;  %v9258_v51 = vld [vmem:[#allocation5] sm:$0xf] }
  0x50   : > { %9224 = vmatmul.msk.bf16.gmra.mxu0 %vm455_vm0, %v12431_v62  ;;  %1007 = vmatpush.bf16.msrb.mxu3 %v9335_v10  ;;  %v9287_v49 = vor.u32 %v12451_v47, %v9284_v48  ;;  %v12435_v50 = vld [vmem:[%s14190_s18 + $0x28] sm:$0xff]  ;;  %v12448_v52 = vld [vmem:[#allocation5 + $0xc] sm:$0xf0]  ;;  %v12446_v53 = vld [vmem:[#allocation5 + $0x4] sm:$0xf]  ;;  %s13969_s16 = sshra.s32 %s9031_s11, 4  ;;  %s13970_s16 = int_to_ptr.hbm [resolvable:$true] %s13969_s16 }
  0x51   : > { %9232 = vmatmul.msk.bf16.gmra.mxu1 %vm455_vm0, %v12431_v62  ;;  %966 = vmatpush.bf16.msrb.mxu0 %v9307_v15  ;;  %v9259_v54 = vor.u32 %v12448_v52, %v9258_v51  ;;  %v9260_v55 = vld [vmem:[#allocation5 + $0x10] sm:$0xf0]  ;;  %v9266_v56 = vld [vmem:[#allocation5 + $0x8] sm:$0xf]  ;;  %v12449_v57 = vld [vmem:[#allocation5 + $0x14] sm:$0xf0]  ;;  %p13976_p6 = scmp.lt.s32.totalorder %s13970_s16, %s17784_s6 }
  0x52   : > { %9240 = vmatmul.msk.bf16.gmra.mxu2 %vm455_vm0, %v12431_v62  ;;  %980 = vmatpush.bf16.msrb.mxu1 %v9311_v19  ;;  %v9263_v58 = vor.u32 %v12446_v53, %v9260_v55  ;;  %v9267_v59 = vor.u32 %v12449_v57, %v9266_v56  ;;  %v12436_v60 = vld [vmem:[%s14190_s18 + $0x30] sm:$0xff]  ;;  %v12447_v61 = vld [vmem:[#allocation5 + $0xc] sm:$0xf]  ;;  %v12437_v0 = vld [vmem:[%s14190_s18 + $0x38] sm:$0xff]  ;;  %s13971_s12 = scalar_lea.hbm %s13970_s16, 64  ;;  %s13975_s28 = scalar_lea.hbm %s17784_s6, 128 }
  0x53   : > { %9248 = vmatmul.msk.bf16.gmra.mxu3 %vm455_vm0, %v12431_v62  ;;  %994 = vmatpush.bf16.msrb.mxu2 %v9315_v20  ;;  %v9268_v62 = vld [vmem:[#allocation5 + $0x18] sm:$0xf0]  ;;  %v751_v1 = vld [vmem:[#allocation2 + $0x10] sm:$0xff]  ;;  %v752_v2 = vld [vmem:[#allocation2] sm:$0xff]  ;;  %p13972_p2 = scmp.ne.s32.totalorder %s13970_s16, %s13971_s12  ;;  %p13977_p7 = scmp.lt.s32.totalorder %s13975_s28, %s13971_s12 }
  0x54   : > { %1008 = vmatpush.bf16.msrb.mxu3 %v9319_v23  ;;  %v9271_v63 = vor.u32 %v12447_v61, %v9268_v62  ;;  %v769_v3 = vpack.c.bf16 %v752_v2, %v751_v1  ;;  %v9504_v42 = vld [vmem:[#allocation10 + $0xe0] sm:$0xf]  ;;  %v12540_v43 = vld [vmem:[#allocation10 + $0xec] sm:$0xf0]  ;;  %v12538_v44 = vld [vmem:[#allocation10 + $0xe4] sm:$0xf] }
  0x55   : > { %967 = vmatpush.bf16.msrb.mxu0 %v9291_v28  ;;  %v9512_v47 = vld [vmem:[#allocation10 + $0xe8] sm:$0xf]  ;;  %v12541_v48 = vld [vmem:[#allocation10 + $0xf4] sm:$0xf0]  ;;  %v12539_v51 = vld [vmem:[#allocation10 + $0xec] sm:$0xf]  ;;  %p13973_p3 = pnand %p13972_p2, %p14126_p4  ;;  %p13978_p9 = por %p13977_p7, %p13976_p6 }
  0x56   : > { %981 = vmatpush.bf16.msrb.mxu1 %v9295_v32  ;;  %v9514_v52 = vld [vmem:[#allocation10 + $0xf8] sm:$0xf0]  ;;  %v9488_v57 = vld [vmem:[#allocation10 + $0xc0] sm:$0xf]  ;;  %v9490_v62 = vld [vmem:[#allocation10 + $0xd0] sm:$0xf0] }
  0x57   : > { %995 = vmatpush.bf16.msrb.mxu2 %v9299_v33  ;;  %v9517_v53 = vor.u32 %v12539_v51, %v9514_v52  ;;  %v12533_v51 = vld [vmem:[#allocation10 + $0xb4] sm:$0xf0]  ;;  %v12531_v52 = vld [vmem:[#allocation10 + $0xac] sm:$0xf]  ;;  %p13974_p5 = pneg %p13973_p3 }
  0x58   : > { %1009 = vmatpush.bf16.msrb.mxu3 %v9303_v36 }
  0x59   : > { %968 = vmatpush.bf16.msrb.mxu0 %v9275_v41  ;;  %p13979_p10 = pnand %p13978_p9, %p13974_p5 }
  0x5a   : > { %982 = vmatpush.bf16.msrb.mxu1 %v9279_v45  ;;  %v9505_v45 = vor.u32 %v12540_v43, %v9504_v42  ;;  %v9498_v42 = vld [vmem:[#allocation10 + $0xd8] sm:$0xf0]  ;;  %v9472_v43 = vld [vmem:[#allocation10 + $0xa0] sm:$0xf] }
  0x5b   : > { %996 = vmatpush.bf16.msrb.mxu2 %v9283_v46  ;;  %v9506_v46 = vld [vmem:[#allocation10 + $0xf0] sm:$0xf0] }
  0x5c   : > { %1010 = vmatpush.bf16.msrb.mxu3 %v9287_v49  ;;  %v9509_v49 = vor.u32 %v12538_v44, %v9506_v46  ;;  %v12530_v46 = vld [vmem:[#allocation10 + $0xa4] sm:$0xf] }
  0x5d   : > { %969 = vmatpush.bf16.msrb.mxu0 %v9259_v54 }
  0x5e   : > { %983 = vmatpush.bf16.msrb.mxu1 %v9263_v58  ;;  %v12536_v58 = vld [vmem:[#allocation10 + $0xcc] sm:$0xf0] }
  0x5f   : > { %997 = vmatpush.bf16.msrb.mxu2 %v9267_v59  ;;  %v12534_v59 = vld [vmem:[#allocation10 + $0xc4] sm:$0xf]  ;;  %v9489_v61 = vor.u32 %v12536_v58, %v9488_v57  ;;  %v9482_v57 = vld [vmem:[#allocation10 + $0xb8] sm:$0xf0] }
  0x60   : > { %9225 = vmatmul.msk.bf16.gmra.mxu0 %vm455_vm0, %v12432_v11  ;;  %1011 = vmatpush.bf16.msrb.mxu3 %v9271_v63  ;;  %v9496_v63 = vld [vmem:[#allocation10 + $0xc8] sm:$0xf]  ;;  %v9493_v1 = vor.u32 %v12534_v59, %v9490_v62  ;;  %v9485_v58 = vor.u32 %v12531_v52, %v9482_v57  ;;  %v12524_v52 = vld [vmem:[#allocation10 + $0x6c] sm:$0xf0] }
  0x61   : > { %9233 = vmatmul.msk.bf16.gmra.mxu1 %vm455_vm0, %v12432_v11  ;;  %1378 = vmatpush.bf16.msra.mxu0 %v9505_v45  ;;  %v12532_v45 = vld [vmem:[#allocation10 + $0xac] sm:$0xf0] }
  0x62   : > { %9241 = vmatmul.msk.bf16.gmra.mxu2 %vm455_vm0, %v12432_v11  ;;  %1392 = vmatpush.bf16.msra.mxu1 %v9509_v49 }
  0x63   : > { %9249 = vmatmul.msk.bf16.gmra.mxu3 %vm455_vm0, %v12432_v11 }
  0x64   : > { %1420 = vmatpush.bf16.msra.mxu3 %v9517_v53 }
  0x65   : > { %1379 = vmatpush.bf16.msra.mxu0 %v9489_v61 }
  0x66   : > { %1393 = vmatpush.bf16.msra.mxu1 %v9493_v1  ;;  %v12526_v1 = vld [vmem:[#allocation10 + $0x84] sm:$0xf] }
  0x70   : > { %9226 = vmatmul.msk.bf16.gmra.mxu0 %vm455_vm0, %v12433_v24 }
  0x71   : > { %9234 = vmatmul.msk.bf16.gmra.mxu1 %vm455_vm0, %v12433_v24 }
  0x72   : > { %9242 = vmatmul.msk.bf16.gmra.mxu2 %vm455_vm0, %v12433_v24 }
  0x73   : > { %9250 = vmatmul.msk.bf16.gmra.mxu3 %vm455_vm0, %v12433_v24 }
  0x80   : > { %9227 = vmatmul.msk.bf16.gmra.mxu0 %vm455_vm0, %v12434_v37 }
  0x81   : > { %9235 = vmatmul.msk.bf16.gmra.mxu1 %vm455_vm0, %v12434_v37 }
  0x82   : > { %9243 = vmatmul.msk.bf16.gmra.mxu2 %vm455_vm0, %v12434_v37 }
  0x83   : > { %9251 = vmatmul.msk.bf16.gmra.mxu3 %vm455_vm0, %v12434_v37 }
  0x90   : > { %9228 = vmatmul.msk.bf16.gmra.mxu0 %vm455_vm0, %v12435_v50 }
  0x91   : > { %9236 = vmatmul.msk.bf16.gmra.mxu1 %vm455_vm0, %v12435_v50 }
  0x92   : > { %9244 = vmatmul.msk.bf16.gmra.mxu2 %vm455_vm0, %v12435_v50 }
  0x93   : > { %9252 = vmatmul.msk.bf16.gmra.mxu3 %vm455_vm0, %v12435_v50  ;;  %v9513_v50 = vor.u32 %v12541_v48, %v9512_v47  ;;  %v9474_v47 = vld [vmem:[#allocation10 + $0xb0] sm:$0xf0]  ;;  %v9473_v48 = vor.u32 %v12532_v45, %v9472_v43  ;;  %v9464_v43 = vld [vmem:[#allocation10 + $0x88] sm:$0xf] }
  0x94   : > { %v9477_v49 = vor.u32 %v12530_v46, %v9474_v47  ;;  %v12527_v47 = vld [vmem:[#allocation10 + $0x8c] sm:$0xf] }
  0x95   : > { %1406 = vmatpush.bf16.msra.mxu2 %v9513_v50  ;;  %v9480_v50 = vld [vmem:[#allocation10 + $0xa8] sm:$0xf]  ;;  %1380 = vmatpush.bf16.msra.mxu0 %v9473_v48  ;;  %v9466_v48 = vld [vmem:[#allocation10 + $0x98] sm:$0xf0] }
  0x96   : > { %v9481_v53 = vor.u32 %v12533_v51, %v9480_v50  ;;  %1394 = vmatpush.bf16.msra.mxu1 %v9477_v49  ;;  %v9440_v50 = vld [vmem:[#allocation10 + $0x60] sm:$0xf]  ;;  %v9469_v51 = vor.u32 %v12527_v47, %v9466_v48  ;;  %v12522_v49 = vld [vmem:[#allocation10 + $0x64] sm:$0xf] }
  0x97   : > { %v9441_v57 = vor.u32 %v12524_v52, %v9440_v50  ;;  %v9426_v50 = vld [vmem:[#allocation10 + $0x50] sm:$0xf0] }
  0xa0   : > { %9229 = vmatmul.msk.bf16.gmra.mxu0 %vm455_vm0, %v12436_v60 }
  0xa1   : > { %9237 = vmatmul.msk.bf16.gmra.mxu1 %vm455_vm0, %v12436_v60 }
  0xa2   : > { %9245 = vmatmul.msk.bf16.gmra.mxu2 %vm455_vm0, %v12436_v60 }
  0xa3   : > { %9253 = vmatmul.msk.bf16.gmra.mxu3 %vm455_vm0, %v12436_v60 }
  0xb0   : > { %9230 = vmatmul.msk.bf16.gmra.mxu0 %vm455_vm0, %v12437_v0 }
  0xb1   : > { %9238 = vmatmul.msk.bf16.gmra.mxu1 %vm455_vm0, %v12437_v0 }
  0xb2   : > { %9246 = vmatmul.msk.bf16.gmra.mxu2 %vm455_vm0, %v12437_v0 }
  0xb3   : > { %9254 = vmatmul.msk.bf16.gmra.mxu3 %vm455_vm0, %v12437_v0  ;;  %v12537_v0 = vld [vmem:[#allocation10 + $0xd4] sm:$0xf0] }
  0xb4   : > { %v9497_v2 = vor.u32 %v12537_v0, %v9496_v63  ;;  %v9456_v63 = vld [vmem:[#allocation10 + $0x80] sm:$0xf]  ;;  %v12528_v0 = vld [vmem:[#allocation10 + $0x8c] sm:$0xf0] }
  0xb6   : > { %1407 = vmatpush.bf16.msra.mxu2 %v9497_v2 }
  0xba   : > { %1408 = vmatpush.bf16.msra.mxu2 %v9481_v53  ;;  %v9442_v53 = vld [vmem:[#allocation10 + $0x70] sm:$0xf0] }
  0xbd   : > { %v14283_v4 = vpop.f32.mrf.mxu0 }
  0xbe   : > { %v14285_v5 = vpop.f32.mrf.mxu1 }
  0xc0   : > { %970 = vmatmul.bf16.vlgmr.msrb.gmra.mxu0 %v769_v3 }
  0xc1   : > { %984 = vmatmul.bf16.vlgmr.msrb.gmra.mxu1 %v769_v3 }
  0xc2   : > { %998 = vmatmul.bf16.vlgmr.msrb.gmra.mxu2 %v769_v3 }
  0xc3   : > { %1012 = vmatmul.bf16.vlgmr.msrb.gmra.mxu3 %v769_v3  ;;  %v12535_v3 = vld [vmem:[#allocation10 + $0xcc] sm:$0xf] }
  0xc4   : > { %v9501_v44 = vor.u32 %v12535_v3, %v9498_v42  ;;  %v9457_v3 = vor.u32 %v12528_v0, %v9456_v63  ;;  %v9458_v42 = vld [vmem:[#allocation10 + $0x90] sm:$0xf0]  ;;  %v12523_v63 = vld [vmem:[#allocation10 + $0x6c] sm:$0xf] }
  0xc5   : > { %v14287_v6 = vpop.f32.mrf.mxu2  ;;  %v14291_v8 = vpop.f32.mrf.mxu0  ;;  %v9461_v45 = vor.u32 %v12526_v1, %v9458_v42 }
  0xc6   : > { %v14289_v7 = vpop.f32.mrf.mxu3  ;;  %v14293_v9 = vpop.f32.mrf.mxu1  ;;  %1421 = vmatpush.bf16.msra.mxu3 %v9501_v44  ;;  %v12529_v44 = vld [vmem:[#allocation10 + $0x94] sm:$0xf0]  ;;  %1381 = vmatpush.bf16.msra.mxu0 %v9457_v3 }
  0xc7   : > { %v9465_v46 = vor.u32 %v12529_v44, %v9464_v43  ;;  %1395 = vmatpush.bf16.msra.mxu1 %v9461_v45  ;;  %v9424_v44 = vld [vmem:[#allocation10 + $0x40] sm:$0xf]  ;;  %v12520_v45 = vld [vmem:[#allocation10 + $0x4c] sm:$0xf0] }
  0xc8   : > { %v9425_v48 = vor.u32 %v12520_v45, %v9424_v44 }
  0xc9   : > { %1409 = vmatpush.bf16.msra.mxu2 %v9465_v46  ;;  %v12518_v46 = vld [vmem:[#allocation10 + $0x44] sm:$0xf] }
  0xca   : > { %1422 = vmatpush.bf16.msra.mxu3 %v9485_v58  ;;  %v12525_v58 = vld [vmem:[#allocation10 + $0x74] sm:$0xf0]  ;;  %1382 = vmatpush.bf16.msra.mxu0 %v9441_v57 }
  0xcd   : > { %v14295_v10 = vpop.f32.mrf.mxu2  ;;  %v14299_v12 = vpop.f32.mrf.mxu0 }
  0xce   : > { %v14297_v11 = vpop.f32.mrf.mxu3  ;;  %v14301_v13 = vpop.f32.mrf.mxu1  ;;  %1423 = vmatpush.bf16.msra.mxu3 %v9469_v51  ;;  %v12521_v51 = vld [vmem:[#allocation10 + $0x54] sm:$0xf0]  ;;  %1383 = vmatpush.bf16.msra.mxu0 %v9425_v48 }
  0xd5   : > { %v14303_v14 = vpop.f32.mrf.mxu2  ;;  %v14307_v16 = vpop.f32.mrf.mxu0 }
  0xd6   : > { %v14305_v15 = vpop.f32.mrf.mxu3  ;;  %v14309_v17 = vpop.f32.mrf.mxu1 }
  0xdd   : > { %v14311_v18 = vpop.f32.mrf.mxu2  ;;  %v14315_v20 = vpop.f32.mrf.mxu0 }
  0xde   : > { %v14313_v19 = vpop.f32.mrf.mxu3  ;;  %v14317_v21 = vpop.f32.mrf.mxu1 }
  0xe5   : > { %v14319_v22 = vpop.f32.mrf.mxu2  ;;  %v14323_v24 = vpop.f32.mrf.mxu0 }
  0xe6   : > { %v14321_v23 = vpop.f32.mrf.mxu3  ;;  %v14325_v25 = vpop.f32.mrf.mxu1 }
  0xed   : > { %v14327_v26 = vpop.f32.mrf.mxu2  ;;  %v14331_v28 = vpop.f32.mrf.mxu0 }
  0xee   : > { %v14329_v27 = vpop.f32.mrf.mxu3  ;;  %17798 = vst [vmem:[#allocation18_spill] sm:$0xff] %v14331_v28  ;;  %v14333_v29 = vpop.f32.mrf.mxu1  ;;  %v9966_v28 = vld [vmem:[#allocation8 + $0x70] sm:$0xf0] }
  0xef   : > { %17797 = vst [vmem:[#allocation17_spill] sm:$0xff] %v14329_v27  ;;  %v9972_v27 = vld [vmem:[#allocation8 + $0x68] sm:$0xf] }
  0xf0   : > { %17799 = vst [vmem:[#allocation19_spill] sm:$0xff] %v14333_v29  ;;  %v12579_v29 = vld [vmem:[#allocation8 + $0x2c] sm:$0xf] }
  0xf5   : > { %v14335_v30 = vpop.f32.mrf.mxu2  ;;  %v14339_v32 = vpop.f32.mrf.mxu0 }
  0xf6   : > { %17800 = vst [vmem:[#allocation20_spill] sm:$0xff] %v14335_v30  ;;  %v14337_v31 = vpop.f32.mrf.mxu3  ;;  %v14341_v33 = vpop.f32.mrf.mxu1 }
  0xf7   : > { %17801 = vst [vmem:[#allocation21_spill] sm:$0xff] %v14337_v31 }
  0xf8   : > { %17802 = vst [vmem:[#allocation22_spill] sm:$0xff] %v14339_v32 }
  0xf9   : > { %17803 = vst [vmem:[#allocation23_spill] sm:$0xff] %v14341_v33 }
  0xfd   : > { %v14343_v34 = vpop.f32.mrf.mxu2  ;;  %v14347_v36 = vpop.f32.mrf.mxu0 }
  0xfe   : > { %17804 = vst [vmem:[#allocation24_spill] sm:$0xff] %v14343_v34  ;;  %v14345_v35 = vpop.f32.mrf.mxu3  ;;  %v14349_v37 = vpop.f32.mrf.mxu1 }
  0xff   : > { %17805 = vst [vmem:[#allocation25_spill] sm:$0xff] %v14345_v35 }
 0x100   : > { %17806 = vst [vmem:[#allocation26_spill] sm:$0xff] %v14347_v36 }
 0x101   : > { %17807 = vst [vmem:[#allocation27_spill] sm:$0xff] %v14349_v37 }
 0x105   : > { %v14351_v38 = vpop.f32.mrf.mxu2  ;;  %v14355_v40 = vpop.f32.mrf.mxu0 }
 0x106   : > { %17808 = vst [vmem:[#allocation28_spill] sm:$0xff] %v14351_v38  ;;  %v14353_v39 = vpop.f32.mrf.mxu3  ;;  %v14357_v41 = vpop.f32.mrf.mxu1  ;;  %v12567_v38 = vld [vmem:[#allocation5 + $0xcc] sm:$0xf] }
 0x107   : > { %17809 = vst [vmem:[#allocation29_spill] sm:$0xff] %v14353_v39  ;;  %v12569_v39 = vld [vmem:[#allocation5 + $0xd4] sm:$0xf0] }
 0x108   : > { %17810 = vst [vmem:[#allocation30_spill] sm:$0xff] %v14355_v40 }
 0x109   : > { %17811 = vst [vmem:[#allocation31_spill] sm:$0xff] %v14357_v41  ;;  %v9750_v41 = vld [vmem:[#allocation5 + $0xc0] sm:$0xf] }
 0x10d   : > { %v14359_v54 = vpop.f32.mrf.mxu2  ;;  %v14363_v56 = vpop.f32.mrf.mxu0 }
 0x10e   : > { %17812 = vst [vmem:[#allocation32_spill] sm:$0xff] %v14359_v54  ;;  %v14361_v55 = vpop.f32.mrf.mxu3  ;;  %v14365_v60 = vpop.f32.mrf.mxu1 }
 0x10f   : > { %17813 = vst [vmem:[#allocation33_spill] sm:$0xff] %v14361_v55 }
 0x110   : > { %17814 = vst [vmem:[#allocation34_spill] sm:$0xff] %v14363_v56 }
 0x111   : > { %17815 = vst [vmem:[#allocation35_spill] sm:$0xff] %v14365_v60 }
 0x115   : > { %v14367_v59 = vpop.f32.mrf.mxu2  ;;  %v14371_v61 = vpop.f32.mrf.mxu0 }
 0x116   : > { %17816 = vst [vmem:[#allocation36_spill] sm:$0xff] %v14367_v59  ;;  %v14369_v62 = vpop.f32.mrf.mxu3  ;;  %v14373_v2 = vpop.f32.mrf.mxu1 }
 0x117   : > { %17817 = vst [vmem:[#allocation37_spill] sm:$0xff] %v14369_v62  ;;  %v9450_v62 = vld [vmem:[#allocation10 + $0x78] sm:$0xf0] }
 0x118   : > { %17818 = vst [vmem:[#allocation38_spill] sm:$0xff] %v14371_v61  ;;  %v9445_v61 = vor.u32 %v12522_v49, %v9442_v53  ;;  %v9453_v1 = vor.u32 %v12523_v63, %v9450_v62  ;;  %v9429_v62 = vor.u32 %v12518_v46, %v9426_v50  ;;  %v12519_v49 = vld [vmem:[#allocation10 + $0x4c] sm:$0xf]  ;;  %v9434_v53 = vld [vmem:[#allocation10 + $0x58] sm:$0xf0] }
 0x119   : > { %17819 = vst [vmem:[#allocation39_spill] sm:$0xff] %v14373_v2  ;;  %v9448_v2 = vld [vmem:[#allocation10 + $0x68] sm:$0xf]  ;;  %v9437_v57 = vor.u32 %v12519_v49, %v9434_v53  ;;  %v12514_v63 = vld [vmem:[#allocation10 + $0x24] sm:$0xf] }
 0x11a   : > { %v9449_v0 = vor.u32 %v12525_v58, %v9448_v2  ;;  %1396 = vmatpush.bf16.msra.mxu1 %v9445_v61  ;;  %1424 = vmatpush.bf16.msra.mxu3 %v9453_v1  ;;  %v9432_v2 = vld [vmem:[#allocation10 + $0x48] sm:$0xf]  ;;  %v9408_v61 = vld [vmem:[#allocation10 + $0x20] sm:$0xf]  ;;  %v12516_v58 = vld [vmem:[#allocation10 + $0x2c] sm:$0xf0] }
 0x11b   : > { %v9433_v52 = vor.u32 %v12521_v51, %v9432_v2  ;;  %v12517_v1 = vld [vmem:[#allocation10 + $0x34] sm:$0xf0]  ;;  %v12510_v49 = vld [vmem:[#allocation10 + $0x4] sm:$0xf]  ;;  %v9400_v53 = vld [vmem:[#allocation10 + $0x8] sm:$0xf] }
 0x11c   : > { %1410 = vmatpush.bf16.msra.mxu2 %v9449_v0  ;;  %v9409_v0 = vor.u32 %v12516_v58, %v9408_v61 }
 0x11d   : > { %v14375_v42 = vpop.f32.mrf.mxu2  ;;  %v14379_v3 = vpop.f32.mrf.mxu0 }
 0x11e   : > { %17820 = vst [vmem:[#allocation40_spill] sm:$0xff] %v14375_v42  ;;  %v14377_v43 = vpop.f32.mrf.mxu3  ;;  %v14381_v47 = vpop.f32.mrf.mxu1  ;;  %1397 = vmatpush.bf16.msra.mxu1 %v9429_v62  ;;  %1425 = vmatpush.bf16.msra.mxu3 %v9437_v57  ;;  %v9418_v42 = vld [vmem:[#allocation10 + $0x38] sm:$0xf0]  ;;  %v9392_v62 = vld [vmem:[#allocation10] sm:$0xf] }
 0x11f   : > { %17821 = vst [vmem:[#allocation41_spill] sm:$0xff] %v14377_v43  ;;  %v12515_v43 = vld [vmem:[#allocation10 + $0x2c] sm:$0xf]  ;;  %1384 = vmatpush.bf16.msra.mxu0 %v9409_v0  ;;  %v12513_v57 = vld [vmem:[#allocation10 + $0x14] sm:$0xf0] }
 0x120   : > { %17822 = vst [vmem:[#allocation42_spill] sm:$0xff] %v14379_v3  ;;  %1411 = vmatpush.bf16.msra.mxu2 %v9433_v52  ;;  %v9410_v3 = vld [vmem:[#allocation10 + $0x30] sm:$0xf0]  ;;  %v9421_v50 = vor.u32 %v12515_v43, %v9418_v42  ;;  %v12512_v52 = vld [vmem:[#allocation10 + $0xc] sm:$0xf0]  ;;  %v9401_v58 = vor.u32 %v12513_v57, %v9400_v53 }
 0x121   : > { %17823 = vst [vmem:[#allocation43_spill] sm:$0xff] %v14381_v47  ;;  %v9416_v47 = vld [vmem:[#allocation10 + $0x28] sm:$0xf]  ;;  %v9413_v44 = vor.u32 %v12514_v63, %v9410_v3  ;;  %v9393_v3 = vor.u32 %v12512_v52, %v9392_v62  ;;  %v12511_v63 = vld [vmem:[#allocation10 + $0xc] sm:$0xf] }
 0x122   : > { %v9417_v45 = vor.u32 %v12517_v1, %v9416_v47  ;;  %1426 = vmatpush.bf16.msra.mxu3 %v9421_v50  ;;  %v9394_v47 = vld [vmem:[#allocation10 + $0x10] sm:$0xf0]  ;;  %v9402_v42 = vld [vmem:[#allocation10 + $0x18] sm:$0xf0]  ;;  %v9632_v43 = vld [vmem:[#allocation8 + $0xe0] sm:$0xf] }
 0x123   : > { %1398 = vmatpush.bf16.msra.mxu1 %v9413_v44  ;;  %v9397_v61 = vor.u32 %v12510_v49, %v9394_v47  ;;  %1385 = vmatpush.bf16.msra.mxu0 %v9393_v3  ;;  %v9405_v0 = vor.u32 %v12511_v63, %v9402_v42  ;;  %v12508_v1 = vld [vmem:[#allocation8 + $0xec] sm:$0xf0]  ;;  %v12506_v44 = vld [vmem:[#allocation8 + $0xe4] sm:$0xf]  ;;  %v12507_v62 = vld [vmem:[#allocation8 + $0xec] sm:$0xf] }
 0x124   : > { %1412 = vmatpush.bf16.msra.mxu2 %v9417_v45  ;;  %v9634_v45 = vld [vmem:[#allocation8 + $0xf0] sm:$0xf0]  ;;  %v9633_v50 = vor.u32 %v12508_v1, %v9632_v43  ;;  %v9642_v47 = vld [vmem:[#allocation8 + $0xf8] sm:$0xf0]  ;;  %v12502_v42 = vld [vmem:[#allocation8 + $0xc4] sm:$0xf] }
 0x125   : > { %v14383_v46 = vpop.f32.mrf.mxu2  ;;  %v14387_v2 = vpop.f32.mrf.mxu0  ;;  %v9645_v3 = vor.u32 %v12507_v62, %v9642_v47  ;;  %v9618_v1 = vld [vmem:[#allocation8 + $0xd0] sm:$0xf0]  ;;  %v9600_v47 = vld [vmem:[#allocation8 + $0xa0] sm:$0xf] }
 0x126   : > { %17824 = vst [vmem:[#allocation44_spill] sm:$0xff] %v14383_v46  ;;  %v14385_v48 = vpop.f32.mrf.mxu3  ;;  %v14389_v51 = vpop.f32.mrf.mxu1  ;;  %1427 = vmatpush.bf16.msra.mxu3 %v9405_v0  ;;  %v12505_v0 = vld [vmem:[#allocation8 + $0xd4] sm:$0xf0] }
 0x127   : > { %17825 = vst [vmem:[#allocation45_spill] sm:$0xff] %v14385_v48  ;;  %1399 = vmatpush.bf16.msra.mxu1 %v9397_v61  ;;  %v12509_v48 = vld [vmem:[#allocation8 + $0xf4] sm:$0xf0]  ;;  %1594 = vmatpush.bf16.msrb.mxu0 %v9633_v50  ;;  %v9616_v61 = vld [vmem:[#allocation8 + $0xc0] sm:$0xf] }
 0x128   : > { %17826 = vst [vmem:[#allocation46_spill] sm:$0xff] %v14387_v2  ;;  %1413 = vmatpush.bf16.msra.mxu2 %v9401_v58  ;;  %v9640_v2 = vld [vmem:[#allocation8 + $0xe8] sm:$0xf]  ;;  %v12504_v58 = vld [vmem:[#allocation8 + $0xcc] sm:$0xf0] }
 0x129   : > { %17827 = vst [vmem:[#allocation47_spill] sm:$0xff] %v14389_v51  ;;  %v9637_v51 = vor.u32 %v12506_v44, %v9634_v45  ;;  %v9641_v49 = vor.u32 %v12509_v48, %v9640_v2  ;;  %v9617_v43 = vor.u32 %v12504_v58, %v9616_v61  ;;  %v9624_v44 = vld [vmem:[#allocation8 + $0xc8] sm:$0xf]  ;;  %v9621_v48 = vor.u32 %v12502_v42, %v9618_v1  ;;  %v12503_v45 = vld [vmem:[#allocation8 + $0xcc] sm:$0xf] }
 0x12a   : > { %1636 = vmatpush.bf16.msrb.mxu3 %v9645_v3  ;;  %v9625_v2 = vor.u32 %v12505_v0, %v9624_v44  ;;  %v12500_v3 = vld [vmem:[#allocation8 + $0xac] sm:$0xf0]  ;;  %v12498_v61 = vld [vmem:[#allocation8 + $0xa4] sm:$0xf]  ;;  %v9602_v1 = vld [vmem:[#allocation8 + $0xb0] sm:$0xf0] }
 0x12b   : > { %1608 = vmatpush.bf16.msrb.mxu1 %v9637_v51  ;;  %v14402_v51 = vld [vmem:[%s17783_s5] ss:$2 sm:$0xf]  ;;  %1595 = vmatpush.bf16.msrb.mxu0 %v9617_v43  ;;  %v9601_v42 = vor.u32 %v12500_v3, %v9600_v47  ;;  %v9608_v44 = vld [vmem:[#allocation8 + $0xa8] sm:$0xf] }
 0x12c   : > { %1622 = vmatpush.bf16.msrb.mxu2 %v9641_v49  ;;  %v12501_v0 = vld [vmem:[#allocation8 + $0xb4] sm:$0xf0]  ;;  %v12499_v43 = vld [vmem:[#allocation8 + $0xac] sm:$0xf]  ;;  %v12496_v47 = vld [vmem:[#allocation8 + $0x8c] sm:$0xf0] }
 0x12d   : > { %v14391_v52 = vpop.f32.mrf.mxu2  ;;  %v14395_v57 = vpop.f32.mrf.mxu0  ;;  %v12494_v3 = vld [vmem:[#allocation8 + $0x84] sm:$0xf] }
 0x12e   : > { %17828 = vst [vmem:[#allocation48_spill] sm:$0xff] %v14391_v52  ;;  %v14393_v53 = vpop.f32.mrf.mxu3  ;;  %v14397_v63 = vpop.f32.mrf.mxu1  ;;  %v9594_v52 = vld [vmem:[#allocation8 + $0x98] sm:$0xf0] }
 0x12f   : > { %17829 = vst [vmem:[#allocation49_spill] sm:$0xff] %v14393_v53  ;;  %v9626_v53 = vld [vmem:[#allocation8 + $0xd8] sm:$0xf0]  ;;  %1609 = vmatpush.bf16.msrb.mxu1 %v9621_v48  ;;  %v14416_v48 = vperm.slane %v14402_v51, 1  ;;  %1596 = vmatpush.bf16.msrb.mxu0 %v9601_v42  ;;  %v14425_v42 = vperm.slane %v14402_v51, 2 }
 0x130   : > { %17830 = vst [vmem:[#allocation50_spill] sm:$0xff] %v14395_v57  ;;  %v9629_v62 = vor.u32 %v12503_v45, %v9626_v53  ;;  %1623 = vmatpush.bf16.msrb.mxu2 %v9625_v2  ;;  %v9605_v57 = vor.u32 %v12498_v61, %v9602_v1  ;;  %v9610_v53 = vld [vmem:[#allocation8 + $0xb8] sm:$0xf0]  ;;  %v14413_v45 = vperm.slane %v14402_v51, 0  ;;  %v9592_v61 = vld [vmem:[#allocation8 + $0x88] sm:$0xf] }
 0x131   : > { %17831 = vst [vmem:[#allocation51_spill] sm:$0xff] %v14397_v63  ;;  %v9613_v2 = vor.u32 %v12499_v43, %v9610_v53  ;;  %v12497_v1 = vld [vmem:[#allocation8 + $0x94] sm:$0xf0]  ;;  %v12492_v53 = vld [vmem:[#allocation8 + $0x6c] sm:$0xf0] }
 0x132   : > { %1637 = vmatpush.bf16.msrb.mxu3 %v9629_v62  ;;  %v9584_v62 = vld [vmem:[#allocation8 + $0x80] sm:$0xf]  ;;  %v490_v46 = vadd.f32 %v14283_v4, %v14413_v45  ;;  %v12490_v4 = vld [vmem:[#allocation8 + $0x64] sm:$0xf] }
 0x133   : > { %1610 = vmatpush.bf16.msrb.mxu1 %v9605_v57 }
 0x135   : > { %v14404_v50 = vpop.f32.mrf.mxu2  ;;  %v14406_v49 = vpop.f32.mrf.mxu0 }
 0x136   : > { %17832 = vst [vmem:[#allocation52_spill] sm:$0xff] %v14404_v50  ;;  %v14408_v58 = vpop.f32.mrf.mxu1  ;;  %v14410_v63 = vpop.f32.mrf.mxu3  ;;  %v9609_v50 = vor.u32 %v12501_v0, %v9608_v44  ;;  %1638 = vmatpush.bf16.msrb.mxu3 %v9613_v2  ;;  %v9593_v0 = vor.u32 %v12497_v1, %v9592_v61  ;;  %v9576_v61 = vld [vmem:[#allocation8 + $0x68] sm:$0xf]  ;;  %v12491_v1 = vld [vmem:[#allocation8 + $0x6c] sm:$0xf] }
 0x137   : > { %17833 = vst [vmem:[#allocation53_spill] sm:$0xff] %v14406_v49  ;;  %v9586_v49 = vld [vmem:[#allocation8 + $0x90] sm:$0xf0] }
 0x138   : > { %17834 = vst [vmem:[#allocation54_spill] sm:$0xff] %v14408_v58  ;;  %1624 = vmatpush.bf16.msrb.mxu2 %v9609_v50  ;;  %v9585_v58 = vor.u32 %v12496_v47, %v9584_v62  ;;  %v9589_v44 = vor.u32 %v12494_v3, %v9586_v49  ;;  %v539_v50 = vadd.f32 %v14285_v5, %v14416_v48  ;;  %v9568_v49 = vld [vmem:[#allocation8 + $0x60] sm:$0xf]  ;;  %v9570_v3 = vld [vmem:[#allocation8 + $0x70] sm:$0xf0] }
 0x139   : > { %17835 = vst [vmem:[#allocation55_spill] sm:$0xff] %v14410_v63  ;;  %v12495_v63 = vld [vmem:[#allocation8 + $0x8c] sm:$0xf]  ;;  %v9569_v47 = vor.u32 %v12492_v53, %v9568_v49  ;;  %v9578_v5 = vld [vmem:[#allocation8 + $0x78] sm:$0xf0] }
 0x13a   : > { %1597 = vmatpush.bf16.msrb.mxu0 %v9585_v58  ;;  %v9597_v57 = vor.u32 %v12495_v63, %v9594_v52  ;;  %1611 = vmatpush.bf16.msrb.mxu1 %v9589_v44  ;;  %v9573_v52 = vor.u32 %v12490_v4, %v9570_v3  ;;  %v12493_v63 = vld [vmem:[#allocation8 + $0x74] sm:$0xf0]  ;;  %v9581_v56 = vor.u32 %v12491_v1, %v9578_v5  ;;  %v12486_v53 = vld [vmem:[#allocation8 + $0x44] sm:$0xf]  ;;  %v9560_v3 = vld [vmem:[#allocation8 + $0x48] sm:$0xf] }
 0x13b   : > { %v9577_v60 = vor.u32 %v12493_v63, %v9576_v61  ;;  %v12489_v61 = vld [vmem:[#allocation8 + $0x54] sm:$0xf0] }
 0x13c   : > { %1625 = vmatpush.bf16.msrb.mxu2 %v9593_v0  ;;  %1639 = vmatpush.bf16.msrb.mxu3 %v9597_v57  ;;  %v9552_v57 = vld [vmem:[#allocation8 + $0x40] sm:$0xf] }
 0x13d   : > { %v14420_v59 = vpop.f32.mrf.mxu2  ;;  %v971_v43 = vpop.f32.mrf.mxu0 }
 0x13e   : > { %17836 = vst [vmem:[#allocation56_spill] sm:$0xff] %v14420_v59  ;;  %v1018_v2 = vadd.f32 %v971_v43, %v490_v46  ;;  %v985_v62 = vpop.f32.mrf.mxu1  ;;  %1598 = vmatpush.bf16.msrb.mxu0 %v9569_v47  ;;  %v14427_v44 = vpop.f32.mrf.mxu3  ;;  %1612 = vmatpush.bf16.msrb.mxu1 %v9573_v52  ;;  %v754_v46 = vld [vmem:[#allocation2 + $0x18] sm:$0xff]  ;;  %v755_v43 = vld [vmem:[#allocation2 + $0x8] sm:$0xff]  ;;  %v492_v52 = vadd.f32 %v14291_v8, %v14413_v45 }
 0x13f   : > { %v1019_v58 = vadd.f32 %v985_v62, %v539_v50  ;;  %17837 = vst [vmem:[#allocation57_spill] sm:$0xff] %v14427_v44  ;;  %v1185_v49 = vpack.c.bf16 %v755_v43, %v754_v46  ;;  %v12488_v50 = vld [vmem:[#allocation8 + $0x4c] sm:$0xf0]  ;;  %v9554_v62 = vld [vmem:[#allocation8 + $0x50] sm:$0xf0] }
 0x140   : > { %v9384_v59 = vmul.f32 -1.442695, %v1018_v2  ;;  %1626 = vmatpush.bf16.msrb.mxu2 %v9577_v60  ;;  %1640 = vmatpush.bf16.msrb.mxu3 %v9581_v56  ;;  %v588_v2 = vadd.f32 %v14287_v6, %v14425_v42  ;;  %v9553_v47 = vor.u32 %v12488_v50, %v9552_v57  ;;  %v9557_v4 = vor.u32 %v12486_v53, %v9554_v62  ;;  %v9562_v60 = vld [vmem:[#allocation8 + $0x58] sm:$0xf0]  ;;  %v12484_v46 = vld [vmem:[#allocation8 + $0x2c] sm:$0xf0] }
 0x141   : > { %v9385_v0 = vmul.f32 -1.442695, %v1019_v58  ;;  %v12487_v58 = vld [vmem:[#allocation8 + $0x4c] sm:$0xf]  ;;  %1386 = vmatmul.bf16.vlgmr.msra.gmra.mxu0 %v1185_v49  ;;  %1400 = vmatmul.bf16.vlgmr.msra.gmra.mxu1 %v1185_v49  ;;  %v9561_v56 = vor.u32 %v12489_v61, %v9560_v3  ;;  %v12482_v43 = vld [vmem:[#allocation8 + $0x24] sm:$0xf] }
 0x142   : > { %13353 = vpow2.f32 %v9384_v59  ;;  %v541_v59 = vadd.f32 %v14293_v9, %v14416_v48  ;;  %1599 = vmatpush.bf16.msrb.mxu0 %v9553_v47  ;;  %1613 = vmatpush.bf16.msrb.mxu1 %v9557_v4  ;;  %v9565_v6 = vor.u32 %v12487_v58, %v9562_v60  ;;  %v9538_v53 = vld [vmem:[#allocation8 + $0x30] sm:$0xf0]  ;;  %v9544_v62 = vld [vmem:[#allocation8 + $0x28] sm:$0xf]  ;;  %v12485_v44 = vld [vmem:[#allocation8 + $0x34] sm:$0xf0] }
 0x143   : > { %13355 = vpow2.f32 %v9385_v0  ;;  %v9536_v0 = vld [vmem:[#allocation8 + $0x20] sm:$0xf]  ;;  %1428 = vmatmul.bf16.vlgmr.msra.gmra.mxu3 %v1185_v49  ;;  %v9541_v9 = vor.u32 %v12482_v43, %v9538_v53  ;;  %1414 = vmatmul.bf16.vlgmr.msra.gmra.mxu2 %v1185_v49  ;;  %v14436_v4 = vperm.slane %v14402_v51, 3  ;;  %v12478_v43 = vld [vmem:[#allocation8 + $0x4] sm:$0xf] }
 0x144   : > { %1627 = vmatpush.bf16.msrb.mxu2 %v9561_v56  ;;  %v9537_v8 = vor.u32 %v12484_v46, %v9536_v0  ;;  %1641 = vmatpush.bf16.msrb.mxu3 %v9565_v6  ;;  %v9520_v49 = vld [vmem:[#allocation8] sm:$0xf]  ;;  %v12480_v6 = vld [vmem:[#allocation8 + $0xc] sm:$0xf0]  ;;  %v12481_v53 = vld [vmem:[#allocation8 + $0x14] sm:$0xf0] }
 0x145   : > { %v999_v63 = vpop.f32.mrf.mxu2  ;;  %v973_v5 = vpop.f32.mrf.mxu0  ;;  %v637_v0 = vadd.f32 %v14289_v7, %v14436_v4  ;;  %v12572_v7 = vld [vmem:[#allocation5 + $0xec] sm:$0xf0] }
 0x146   : > { %v1020_v1 = vadd.f32 %v999_v63, %v588_v2  ;;  %v1022_v57 = vadd.f32 %v973_v5, %v492_v52  ;;  %v987_v50 = vpop.f32.mrf.mxu1  ;;  %v9545_v2 = vor.u32 %v12485_v44, %v9544_v62  ;;  %v12483_v63 = vld [vmem:[#allocation8 + $0x2c] sm:$0xf]  ;;  %v9546_v52 = vld [vmem:[#allocation8 + $0x38] sm:$0xf0]  ;;  %1600 = vmatpush.bf16.msrb.mxu0 %v9537_v8  ;;  %1614 = vmatpush.bf16.msrb.mxu1 %v9541_v9  ;;  %v1013_v51 = vpop.f32.mrf.mxu3  ;;  %v9766_v9 = vld [vmem:[#allocation5 + $0xe0] sm:$0xf] }
 0x147   : > { %v1023_v61 = vadd.f32 %v987_v50, %v541_v59  ;;  %v590_v44 = vadd.f32 %v14295_v10, %v14425_v42  ;;  %v9528_v50 = vld [vmem:[#allocation8 + $0x8] sm:$0xf]  ;;  %v12479_v62 = vld [vmem:[#allocation8 + $0xc] sm:$0xf]  ;;  %v1021_v10 = vadd.f32 %v1013_v51, %v637_v0  ;;  %v9767_v54 = vor.u32 %v12572_v7, %v9766_v9 }
 0x148   : > { %v9386_v3 = vmul.f32 -1.442695, %v1020_v1  ;;  %v13354_v47 = vpop.eup %13353  ;;  %v9387_v58 = vmul.f32 -1.442695, %v1022_v57  ;;  %v9549_v1 = vor.u32 %v12483_v63, %v9546_v52  ;;  %1628 = vmatpush.bf16.msrb.mxu2 %v9545_v2  ;;  %v9522_v57 = vld [vmem:[#allocation8 + $0x10] sm:$0xf0] }
 0x149   : > { %v13356_v60 = vpop.eup %13355  ;;  %v14438_v56 = vadd.f32 1.0, %v13354_v47  ;;  %v9388_v5 = vmul.f32 -1.442695, %v1023_v61  ;;  %v9530_v61 = vld [vmem:[#allocation8 + $0x18] sm:$0xf0]  ;;  %v9525_v47 = vor.u32 %v12478_v43, %v9522_v57 }
 0x14a   : > { %13357 = vpow2.f32 %v9386_v3  ;;  %v14440_v59 = vadd.f32 1.0, %v13356_v60  ;;  %1642 = vmatpush.bf16.msrb.mxu3 %v9549_v1  ;;  %v9521_v3 = vor.u32 %v12480_v6, %v9520_v49  ;;  %v9533_v52 = vor.u32 %v12479_v62, %v9530_v61  ;;  %v12570_v60 = vld [vmem:[#allocation5 + $0xe4] sm:$0xf] }
 0x14b   : > { %13359 = vpow2.f32 %v9387_v58  ;;  %v9529_v58 = vor.u32 %v12481_v53, %v9528_v50  ;;  %1615 = vmatpush.bf16.msrb.mxu1 %v9525_v47  ;;  %v1061_v43 = vand.u32 2147483648, %v14438_v56  ;;  %v639_v62 = vadd.f32 %v14297_v11, %v14436_v4 }
 0x14c   : > { %13361 = vrcp.f32 %v14438_v56  ;;  %1601 = vmatpush.bf16.msrb.mxu0 %v9521_v3  ;;  %v1074_v53 = vand.u32 2147483647, %v14440_v59  ;;  %vm1070_vm1 = vweird.f32 %v14440_v59  ;;  %vm1055_vm2 = vweird.f32 %v14438_v56 }
 0x14d   : > { %13363 = vrcp.f32 %v14440_v59  ;;  %v1001_v46 = vpop.f32.mrf.mxu2  ;;  %1629 = vmatpush.bf16.msrb.mxu2 %v9529_v58  ;;  %v1062_v11 = vor.u32 1.1754944e-38, %v1061_v43  ;;  %v9776_v43 = vld [vmem:[#allocation5 + $0xf8] sm:$0xf0] }
 0x14e   : > { %13365 = vpow2.f32 %v9388_v5  ;;  %v1024_v8 = vadd.f32 %v1001_v46, %v590_v44  ;;  %v9768_v5 = vld [vmem:[#allocation5 + $0xf0] sm:$0xf0]  ;;  %v1059_v46 = vand.u32 2147483647, %v14438_v56  ;;  %1643 = vmatpush.bf16.msrb.mxu3 %v9533_v52  ;;  %vm14471_vm6 = vcmp.eq.f32.partialorder %v1074_v53, 8.507059e+37 }
 0x14f   : > { %v9771_v49 = vor.u32 %v12570_v60, %v9768_v5 }
 0x150   : > { %v13358_v2 = vpop.eup %13357  ;;  %v9389_v63 = vmul.f32 -1.442695, %v1024_v8  ;;  %1988 = vmatpush.bf16.msra.mxu0 %v9767_v54  ;;  %v1076_v8 = vand.u32 2147483648, %v14440_v59  ;;  %vm14466_vm3 = vcmp.eq.f32.partialorder %v1059_v46, 8.507059e+37  ;;  %v9752_v54 = vld [vmem:[#allocation5 + $0xd0] sm:$0xf0] }
 0x151   : > { %v13360_v1 = vpop.eup %13359  ;;  %v14448_v55 = vadd.f32 1.0, %v13358_v2  ;;  %2002 = vmatpush.bf16.msra.mxu1 %v9771_v49  ;;  %v1015_v2 = vpop.f32.mrf.mxu3 }
 0x152   : > { %v13362_v44 = vpop.eup %13361  ;;  %v14451_v51 = vadd.f32 1.0, %v13360_v1  ;;  %13367 = vpow2.f32 %v9389_v63  ;;  %v12573_v63 = vld [vmem:[#allocation5 + $0xf4] sm:$0xf0]  ;;  %v1077_v7 = vor.u32 1.1754944e-38, %v1076_v8  ;;  %v1025_v49 = vadd.f32 %v1015_v2, %v639_v62 }
 0x153   : > { %v13364_v6 = vpop.eup %13363  ;;  %v1051_v0 = vmul.f32 %v13362_v44, %v14438_v56  ;;  %13369 = vrcp.f32 %v14448_v55  ;;  %vm1056_vm4 = vweird.f32 %v13362_v44  ;;  %v756_v56 = vld [vmem:[#allocation3] sm:$0xff] }
 0x154   : > { %v13366_v57 = vpop.eup %13365  ;;  %v1066_v50 = vmul.f32 %v13364_v6, %v14440_v59  ;;  %13371 = vtanh.f32 %v1021_v10  ;;  %v9774_v10 = vld [vmem:[#allocation5 + $0xe8] sm:$0xf]  ;;  %vm1071_vm5 = vweird.f32 %v13364_v6  ;;  %vm1057_vm7 = vmor %vm1055_vm2, %vm1056_vm4  ;;  %v1104_v53 = vand.u32 2147483647, %v14451_v51 }
 0x155   : > { %v1052_v3 = vsub.f32 1.0, %v1051_v0  ;;  %13373 = vrcp.f32 %v14451_v51  ;;  %v14462_v61 = vadd.f32 1.0, %v13366_v57  ;;  %v9775_v0 = vor.u32 %v12573_v63, %v9774_v10  ;;  %vm14490_vm8 = vmor %vm1070_vm1, %vm1071_vm5  ;;  %v12566_v63 = vld [vmem:[#allocation5 + $0xc4] sm:$0xf] }
 0x156   : > { %v1067_v9 = vsub.f32 1.0, %v1066_v50  ;;  %v1106_v10 = vand.u32 2147483648, %v14451_v51  ;;  %vm14513_vm9 = vcmp.eq.f32.partialorder %v1104_v53, 8.507059e+37  ;;  %v9734_v53 = vld [vmem:[#allocation5 + $0xa0] sm:$0xf]  ;;  %v9755_v35 = vor.u32 %v12566_v63, %v9752_v54 }
 0x157   : > { %v1053_v47 = vmul.f32 %v13362_v44, %v1052_v3  ;;  %13375 = vrcp.f32 %v14462_v61  ;;  %v1121_v8 = vand.u32 2147483648, %v14462_v61  ;;  %2016 = vmatpush.bf16.msra.mxu2 %v9775_v0  ;;  %vm1115_vm12 = vweird.f32 %v14462_v61  ;;  %v9744_v63 = vld [vmem:[#allocation5 + $0xb8] sm:$0xf0] }
 0x158   : > { %v13368_v58 = vpop.eup %13367  ;;  %v1068_v52 = vmul.f32 %v13364_v6, %v1067_v9  ;;  %vm1100_vm13 = vweird.f32 %v14451_v51  ;;  %2003 = vmatpush.bf16.msra.mxu1 %v9755_v35  ;;  %v12561_v35 = vld [vmem:[#allocation5 + $0x94] sm:$0xf0]  ;;  %vm1085_vm2 = vweird.f32 %v14448_v55 }
 0x159   : > { %v14475_v1 = vpop.eup %13369  ;;  %v1054_v5 = vadd.f32 %v13362_v44, %v1053_v47  ;;  %v14477_v46 = vadd.f32 1.0, %v13368_v58  ;;  %v1122_v60 = vor.u32 1.1754944e-38, %v1121_v8  ;;  %v12562_v8 = vld [vmem:[#allocation5 + $0xa4] sm:$0xf] }
 0x15a   : > { %v13372_v57 = vpop.eup %13371  ;;  %v1069_v50 = vadd.f32 %v13364_v6, %v1068_v52  ;;  %v14496_v9 = vmul.f32 %v14475_v1, %v14448_v55  ;;  %v12571_v52 = vld [vmem:[#allocation5 + $0xec] sm:$0xf]  ;;  %vm1086_vm1 = vweird.f32 %v14475_v1 }
 0x15b   : > { %v14485_v3 = vpop.eup %13373  ;;  %v1058_v2 = vsel %vm1057_vm7, %v13362_v44, %v1054_v5  ;;  %13377 = vrcp.f32 %v14477_v46  ;;  %v12568_v44 = vld [vmem:[#allocation5 + $0xcc] sm:$0xf0]  ;;  %vm1130_vm5 = vweird.f32 %v14477_v46 }
 0x15c   : > { %v1063_v59 = vsel %vm14466_vm3, %v1062_v11, %v1058_v2  ;;  %v1073_v47 = vsel %vm14490_vm8, %v13364_v6, %v1069_v50  ;;  %v1096_v58 = vmul.f32 %v14485_v3, %v14451_v51  ;;  %13379 = vtanh.f32 %v1025_v49  ;;  %v9758_v11 = vld [vmem:[#allocation5 + $0xc8] sm:$0xf]  ;;  %v12558_v51 = vld [vmem:[#allocation5 + $0x84] sm:$0xf]  ;;  %vm14561_vm3 = vmor %vm1085_vm2, %vm1086_vm1 }
 0x15d   : > { %v14507_v5 = vpop.eup %13375  ;;  %v1078_v0 = vsel %vm14471_vm6, %v1077_v7, %v1073_v47  ;;  %v1144_v40 = vmul.f32 %v13372_v57, %v1063_v59  ;;  %v1082_v37 = vsub.f32 1.0, %v14496_v9  ;;  %v1107_v7 = vor.u32 1.1754944e-38, %v1106_v10  ;;  %v9760_v47 = vld [vmem:[#allocation5 + $0xd8] sm:$0xf0]  ;;  %v12564_v9 = vld [vmem:[#allocation5 + $0xac] sm:$0xf0] }
 0x15e   : > { %v1142_v2 = vmul.f32 %v1078_v0, %v756_v56  ;;  %v1097_v62 = vsub.f32 1.0, %v1096_v58  ;;  %v1111_v6 = vmul.f32 %v14507_v5, %v14462_v61  ;;  %v1119_v49 = vand.u32 2147483647, %v14462_v61  ;;  %v9736_v10 = vld [vmem:[#allocation5 + $0xb0] sm:$0xf0] }
 0x15f   : > { %vm1101_vm10 = vweird.f32 %v14485_v3  ;;  %v9779_v0 = vor.u32 %v12571_v52, %v9776_v43  ;;  %v9751_v36 = vor.u32 %v12568_v44, %v9750_v41  ;;  %v9759_v34 = vor.u32 %v12569_v39, %v9758_v11  ;;  %v757_v43 = vld [vmem:[#allocation3 + $0x18] sm:$0xff]  ;;  %v9718_v52 = vld [vmem:[#allocation5 + $0x80] sm:$0xf]  ;;  %v12560_v44 = vld [vmem:[#allocation5 + $0x8c] sm:$0xf0] }
 0x160   : > { %v14519_v57 = vadd.f32 %v1144_v40, %v1142_v2  ;;  %v1112_v59 = vsub.f32 1.0, %v1111_v6  ;;  %v1098_v56 = vmul.f32 %v14485_v3, %v1097_v62  ;;  %vm1116_vm11 = vweird.f32 %v14507_v5  ;;  %v9742_v2 = vld [vmem:[#allocation5 + $0xa8] sm:$0xf]  ;;  %v12565_v62 = vld [vmem:[#allocation5 + $0xb4] sm:$0xf0]  ;;  %vm14534_vm14 = vmor %vm1100_vm13, %vm1101_vm10 }
 0x161   : > { %v14523_v58 = vpop.eup %13377  ;;  %v12563_v6 = vld [vmem:[#allocation5 + $0xac] sm:$0xf]  ;;  %2030 = vmatpush.bf16.msra.mxu3 %v9779_v0  ;;  %1989 = vmatpush.bf16.msra.mxu0 %v9751_v36  ;;  %v9763_v39 = vor.u32 %v12567_v38, %v9760_v47  ;;  %v9739_v31 = vor.u32 %v12562_v8, %v9736_v10  ;;  %v9720_v0 = vld [vmem:[#allocation5 + $0x90] sm:$0xf0]  ;;  %v1083_v36 = vmul.f32 %v14475_v1, %v1082_v37  ;;  %vm1117_vm15 = vmor %vm1115_vm12, %vm1116_vm11  ;;  %vm1120_vm0 = vcmp.eq.f32.partialorder %v1119_v49, 8.507059e+37 }
 0x162   : > { %v1113_v33 = vmul.f32 %v14507_v5, %v1112_v59  ;;  %v1126_v40 = vmul.f32 %v14523_v58, %v14477_v46  ;;  %v13380_v32 = vpop.eup %13379  ;;  %v1099_v41 = vadd.f32 %v14485_v3, %v1098_v56  ;;  %2017 = vmatpush.bf16.msra.mxu2 %v9759_v34  ;;  %v9735_v56 = vor.u32 %v12564_v9, %v9734_v53  ;;  %v9728_v49 = vld [vmem:[#allocation5 + $0x98] sm:$0xf0]  ;;  %v12555_v11 = vld [vmem:[#allocation5 + $0x6c] sm:$0xf] }
 0x163   : > { %v9743_v47 = vor.u32 %v12565_v62, %v9742_v2  ;;  %v9747_v9 = vor.u32 %v12563_v6, %v9744_v63  ;;  %v9719_v37 = vor.u32 %v12560_v44, %v9718_v52  ;;  %v1134_v61 = vand.u32 2147483647, %v14477_v46  ;;  %2004 = vmatpush.bf16.msra.mxu1 %v9739_v31  ;;  %v12556_v62 = vld [vmem:[#allocation5 + $0x6c] sm:$0xf0]  ;;  %v12554_v6 = vld [vmem:[#allocation5 + $0x64] sm:$0xf] }
 0x164   : > { %v1127_v54 = vsub.f32 1.0, %v1126_v40  ;;  %v1114_v59 = vadd.f32 %v14507_v5, %v1113_v33  ;;  %v1103_v38 = vsel %vm14534_vm14, %v14485_v3, %v1099_v41  ;;  %v9726_v33 = vld [vmem:[#allocation5 + $0x88] sm:$0xf]  ;;  %v12559_v3 = vld [vmem:[#allocation5 + $0x8c] sm:$0xf]  ;;  %v9723_v50 = vor.u32 %v12558_v51, %v9720_v0 }
 0x165   : > { %v1108_v34 = vsel %vm14513_vm9, %v1107_v7, %v1103_v38  ;;  %2031 = vmatpush.bf16.msra.mxu3 %v9763_v39  ;;  %1990 = vmatpush.bf16.msra.mxu0 %v9735_v56  ;;  %v9727_v7 = vor.u32 %v12561_v35, %v9726_v33  ;;  %v9704_v41 = vld [vmem:[#allocation5 + $0x70] sm:$0xf0]  ;;  %v9710_v63 = vld [vmem:[#allocation5 + $0x68] sm:$0xf]  ;;  %13381 = vtanh.f32 %v14519_v57  ;;  %v1136_v39 = vand.u32 2147483648, %v14477_v46 }
 0x166   : > { %v1118_v53 = vsel %vm1117_vm15, %v14507_v5, %v1114_v59  ;;  %v1128_v8 = vmul.f32 %v14523_v58, %v1127_v54  ;;  %v1145_v40 = vmul.f32 %v13380_v32, %v1108_v34  ;;  %2018 = vmatpush.bf16.msra.mxu2 %v9743_v47  ;;  %v9702_v5 = vld [vmem:[#allocation5 + $0x60] sm:$0xf]  ;;  %v1084_v32 = vadd.f32 %v14475_v1, %v1083_v36  ;;  %v9712_v59 = vld [vmem:[#allocation5 + $0x78] sm:$0xf0]  ;;  %v12552_v36 = vld [vmem:[#allocation5 + $0x4c] sm:$0xf0] }
 0x167   : > { %v1123_v10 = vsel %vm1120_vm0, %v1122_v60, %v1118_v53  ;;  %v12557_v60 = vld [vmem:[#allocation5 + $0x74] sm:$0xf0]  ;;  %vm1131_vm4 = vweird.f32 %v14523_v58  ;;  %v9731_v44 = vor.u32 %v12559_v3, %v9728_v49  ;;  %v9703_v54 = vor.u32 %v12556_v62, %v9702_v5  ;;  %2005 = vmatpush.bf16.msra.mxu1 %v9723_v50  ;;  %v9686_v0 = vld [vmem:[#allocation5 + $0x40] sm:$0xf]  ;;  %v12550_v38 = vld [vmem:[#allocation5 + $0x44] sm:$0xf] }
 0x168   : > { %v1143_v2 = vmul.f32 %v1123_v10, %v757_v43  ;;  %v1129_v43 = vadd.f32 %v14523_v58, %v1128_v8  ;;  %v9707_v56 = vor.u32 %v12554_v6, %v9704_v41  ;;  %v9711_v51 = vor.u32 %v12557_v60, %v9710_v63  ;;  %v9688_v47 = vld [vmem:[#allocation5 + $0x50] sm:$0xf0]  ;;  %v9694_v33 = vld [vmem:[#allocation5 + $0x48] sm:$0xf]  ;;  %v12553_v35 = vld [vmem:[#allocation5 + $0x54] sm:$0xf0] }
 0x169   : > { %2032 = vmatpush.bf16.msra.mxu3 %v9747_v9  ;;  %1991 = vmatpush.bf16.msra.mxu0 %v9719_v37  ;;  %v1088_v34 = vsel %vm14561_vm3, %v14475_v1, %v1084_v32  ;;  %vm14574_vm6 = vmor %vm1130_vm5, %vm1131_vm4  ;;  %v9715_v46 = vor.u32 %v12555_v11, %v9712_v59  ;;  %v9687_v37 = vor.u32 %v12552_v36, %v9686_v0  ;;  %v17852_v10 = vand.u32 2147483648, %v14448_v55  ;;  %v12551_v50 = vld [vmem:[#allocation5 + $0x4c] sm:$0xf]  ;;  %v9670_v6 = vld [vmem:[#allocation5 + $0x20] sm:$0xf] }
 0x16a   : > { %v14557_v52 = vadd.f32 %v1145_v40, %v1143_v2  ;;  %2019 = vmatpush.bf16.msra.mxu2 %v9727_v7  ;;  %v1133_v9 = vsel %vm14574_vm6, %v14523_v58, %v1129_v43  ;;  %v1137_v3 = vor.u32 1.1754944e-38, %v1136_v39  ;;  %v9691_v1 = vor.u32 %v12550_v38, %v9688_v47  ;;  %v9696_v7 = vld [vmem:[#allocation5 + $0x58] sm:$0xf0]  ;;  %v12548_v41 = vld [vmem:[#allocation5 + $0x2c] sm:$0xf0] }
 0x16b   : > { %v13382_v8 = vpop.eup %13381  ;;  %v1092_v40 = vor.u32 1.1754944e-38, %v17852_v10  ;;  %2006 = vmatpush.bf16.msra.mxu1 %v9707_v56  ;;  %v9695_v49 = vor.u32 %v12553_v35, %v9694_v33  ;;  %v17853_v2 = vand.u32 2147483647, %v14448_v55  ;;  %vm1135_vm8 = vcmp.eq.f32.partialorder %v1134_v61, 8.507059e+37  ;;  %v12546_v63 = vld [vmem:[#allocation5 + $0x24] sm:$0xf] }
 0x16c   : > { %13383 = vtanh.f32 %v14557_v52  ;;  %v1138_v62 = vsel %vm1135_vm8, %v1137_v3, %v1133_v9  ;;  %v9672_v39 = vld [vmem:[#allocation5 + $0x30] sm:$0xf0]  ;;  %v9678_v31 = vld [vmem:[#allocation5 + $0x28] sm:$0xf]  ;;  %v12549_v43 = vld [vmem:[#allocation5 + $0x34] sm:$0xf0]  ;;  %v9671_v61 = vor.u32 %v12548_v41, %v9670_v6 }
 0x16d   : > { %2033 = vmatpush.bf16.msra.mxu3 %v9731_v44  ;;  %1992 = vmatpush.bf16.msra.mxu0 %v9703_v54  ;;  %vm1090_vm7 = vcmp.eq.f32.partialorder %v17853_v2, 8.507059e+37  ;;  %v9699_v44 = vor.u32 %v12551_v50, %v9696_v7  ;;  %v12547_v54 = vld [vmem:[#allocation5 + $0x2c] sm:$0xf]  ;;  %v9680_v11 = vld [vmem:[#allocation5 + $0x38] sm:$0xf0]  ;;  %v9675_v59 = vor.u32 %v12546_v63, %v9672_v39  ;;  %v9679_v56 = vor.u32 %v12549_v43, %v9678_v31 }
 0x16e   : > { %2020 = vmatpush.bf16.msra.mxu2 %v9711_v51  ;;  %v1093_v5 = vsel %vm1090_vm7, %v1092_v40, %v1088_v34  ;;  %v9654_v51 = vld [vmem:[#allocation5] sm:$0xf]  ;;  %v12544_v0 = vld [vmem:[#allocation5 + $0xc] sm:$0xf0]  ;;  %v12542_v36 = vld [vmem:[#allocation5 + $0x4] sm:$0xf]  ;;  %v9683_v35 = vor.u32 %v12547_v54, %v9680_v11 }
 0x16f   : > { %v1150_v60 = vmul.f32 %v13382_v8, %v1093_v5  ;;  %2007 = vmatpush.bf16.msra.mxu1 %v9691_v1  ;;  %v9656_v38 = vld [vmem:[#allocation5 + $0x10] sm:$0xf0]  ;;  %v9662_v47 = vld [vmem:[#allocation5 + $0x8] sm:$0xf]  ;;  %v12545_v33 = vld [vmem:[#allocation5 + $0x14] sm:$0xf0]  ;;  %v9655_v34 = vor.u32 %v12544_v0, %v9654_v51 }
 0x170   : > { %v9659_v53 = vor.u32 %v12542_v36, %v9656_v38  ;;  %v9663_v9 = vor.u32 %v12545_v33, %v9662_v47  ;;  %v9900_v10 = vld [vmem:[#allocation10 + $0xe0] sm:$0xf]  ;;  %v12636_v40 = vld [vmem:[#allocation10 + $0xec] sm:$0xf0]  ;;  %v12634_v3 = vld [vmem:[#allocation10 + $0xe4] sm:$0xf] }
 0x171   : > { %2034 = vmatpush.bf16.msra.mxu3 %v9715_v46  ;;  %1993 = vmatpush.bf16.msra.mxu0 %v9687_v37  ;;  %v12543_v46 = vld [vmem:[#allocation5 + $0xc] sm:$0xf]  ;;  %v9664_v37 = vld [vmem:[#allocation5 + $0x18] sm:$0xf0]  ;;  %v9901_v1 = vor.u32 %v12636_v40, %v9900_v10  ;;  %v9908_v2 = vld [vmem:[#allocation10 + $0xe8] sm:$0xf] }
 0x172   : > { %v13384_v58 = vpop.eup %13383  ;;  %2021 = vmatpush.bf16.msra.mxu2 %v9695_v49  ;;  %v9667_v8 = vor.u32 %v12543_v46, %v9664_v37  ;;  %v9902_v49 = vld [vmem:[#allocation10 + $0xf0] sm:$0xf0]  ;;  %v12637_v7 = vld [vmem:[#allocation10 + $0xf4] sm:$0xf0]  ;;  %v9910_v5 = vld [vmem:[#allocation10 + $0xf8] sm:$0xf0] }
 0x173   : > { %v1151_v32 = vmul.f32 %v13384_v58, %v1138_v62  ;;  %2008 = vmatpush.bf16.msra.mxu1 %v9675_v59  ;;  %v9905_v50 = vor.u32 %v12634_v3, %v9902_v49  ;;  %v12635_v58 = vld [vmem:[#allocation10 + $0xec] sm:$0xf]  ;;  %v9909_v62 = vor.u32 %v12637_v7, %v9908_v2  ;;  %v9884_v41 = vld [vmem:[#allocation10 + $0xc0] sm:$0xf]  ;;  %v12632_v63 = vld [vmem:[#allocation10 + $0xcc] sm:$0xf0] }
 0x174   : > { %v9913_v6 = vor.u32 %v12635_v58, %v9910_v5  ;;  %v9886_v39 = vld [vmem:[#allocation10 + $0xd0] sm:$0xf0]  ;;  %v9892_v31 = vld [vmem:[#allocation10 + $0xc8] sm:$0xf]  ;;  %v12633_v43 = vld [vmem:[#allocation10 + $0xd4] sm:$0xf0] }
 0x175   : > { %v1152_v55 = vpack.c.bf16 %v1151_v32, %v1150_v60  ;;  %2035 = vmatpush.bf16.msra.mxu3 %v9699_v44  ;;  %1994 = vmatpush.bf16.msra.mxu0 %v9671_v61  ;;  %v12630_v60 = vld [vmem:[#allocation10 + $0xc4] sm:$0xf]  ;;  %v9885_v32 = vor.u32 %v12632_v63, %v9884_v41  ;;  %v9893_v44 = vor.u32 %v12633_v43, %v9892_v31  ;;  %v12631_v61 = vld [vmem:[#allocation10 + $0xcc] sm:$0xf]  ;;  %v9894_v54 = vld [vmem:[#allocation10 + $0xd8] sm:$0xf0] }
 0x176   : > { %2022 = vmatpush.bf16.msra.mxu2 %v9679_v56  ;;  %v9897_v11 = vor.u32 %v12631_v61, %v9894_v54  ;;  %v9868_v51 = vld [vmem:[#allocation10 + $0xa0] sm:$0xf]  ;;  %v12628_v0 = vld [vmem:[#allocation10 + $0xac] sm:$0xf0]  ;;  %v12626_v36 = vld [vmem:[#allocation10 + $0xa4] sm:$0xf] }
 0x177   : > { %1602 = vmatmul.bf16.vlgmr.msrb.gmra.mxu0 %v1152_v55  ;;  %1616 = vmatmul.bf16.vlgmr.msrb.gmra.mxu1 %v1152_v55  ;;  %v9869_v38 = vor.u32 %v12628_v0, %v9868_v51  ;;  %v9870_v47 = vld [vmem:[#allocation10 + $0xb0] sm:$0xf0]  ;;  %v9876_v33 = vld [vmem:[#allocation10 + $0xa8] sm:$0xf]  ;;  %v9878_v46 = vld [vmem:[#allocation10 + $0xb8] sm:$0xf0] }
 0x178   : > { %1630 = vmatmul.bf16.vlgmr.msrb.gmra.mxu2 %v1152_v55  ;;  %1644 = vmatmul.bf16.vlgmr.msrb.gmra.mxu3 %v1152_v55  ;;  %v9852_v10 = vld [vmem:[#allocation10 + $0x80] sm:$0xf]  ;;  %v12624_v40 = vld [vmem:[#allocation10 + $0x8c] sm:$0xf0]  ;;  %v12622_v3 = vld [vmem:[#allocation10 + $0x84] sm:$0xf] }
 0x179   : > { %2036 = vmatpush.bf16.msra.mxu3 %v9683_v35  ;;  %1995 = vmatpush.bf16.msra.mxu0 %v9655_v34  ;;  %v12629_v35 = vld [vmem:[#allocation10 + $0xb4] sm:$0xf0]  ;;  %v9873_v34 = vor.u32 %v12626_v36, %v9870_v47  ;;  %v9854_v49 = vld [vmem:[#allocation10 + $0x90] sm:$0xf0]  ;;  %v9860_v2 = vld [vmem:[#allocation10 + $0x88] sm:$0xf] }
 0x17a   : > { %2009 = vmatpush.bf16.msra.mxu1 %v9659_v53  ;;  %2023 = vmatpush.bf16.msra.mxu2 %v9663_v9  ;;  %v9877_v53 = vor.u32 %v12629_v35, %v9876_v33  ;;  %v12627_v9 = vld [vmem:[#allocation10 + $0xac] sm:$0xf]  ;;  %v9857_v5 = vor.u32 %v12622_v3, %v9854_v49  ;;  %v9862_v41 = vld [vmem:[#allocation10 + $0x98] sm:$0xf0]  ;;  %v12620_v51 = vld [vmem:[#allocation10 + $0x6c] sm:$0xf0] }
 0x17b   : > { %v9881_v37 = vor.u32 %v12627_v9, %v9878_v46  ;;  %v12618_v0 = vld [vmem:[#allocation10 + $0x64] sm:$0xf]  ;;  %v9844_v47 = vld [vmem:[#allocation10 + $0x68] sm:$0xf]  ;;  %v12621_v33 = vld [vmem:[#allocation10 + $0x74] sm:$0xf0] }
 0x17c   : > { %v9845_v9 = vor.u32 %v12621_v33, %v9844_v47  ;;  %v12619_v46 = vld [vmem:[#allocation10 + $0x6c] sm:$0xf]  ;;  %v9820_v3 = vld [vmem:[#allocation10 + $0x40] sm:$0xf]  ;;  %v12614_v49 = vld [vmem:[#allocation10 + $0x44] sm:$0xf] }
 0x17d   : > { %2037 = vmatpush.bf16.msra.mxu3 %v9667_v8  ;;  %2409 = vmatpush.bf16.msrb.mxu0 %v9901_v1  ;;  %v9853_v1 = vor.u32 %v12624_v40, %v9852_v10 }
 0x17e   : > { %2423 = vmatpush.bf16.msrb.mxu1 %v9905_v50  ;;  %2437 = vmatpush.bf16.msrb.mxu2 %v9909_v62  ;;  %v12625_v50 = vld [vmem:[#allocation10 + $0x94] sm:$0xf0] }
 0x17f   : > { %v9861_v62 = vor.u32 %v12625_v50, %v9860_v2 }
 0x181   : > { %2451 = vmatpush.bf16.msrb.mxu3 %v9913_v6  ;;  %2410 = vmatpush.bf16.msrb.mxu0 %v9885_v32  ;;  %v12623_v6 = vld [vmem:[#allocation10 + $0x8c] sm:$0xf] }
 0x182   : > { %2438 = vmatpush.bf16.msrb.mxu2 %v9893_v44  ;;  %v9865_v63 = vor.u32 %v12623_v6, %v9862_v41  ;;  %v9828_v6 = vld [vmem:[#allocation10 + $0x48] sm:$0xf]  ;;  %v12617_v41 = vld [vmem:[#allocation10 + $0x54] sm:$0xf0] }
 0x185   : > { %2452 = vmatpush.bf16.msrb.mxu3 %v9897_v11  ;;  %2411 = vmatpush.bf16.msrb.mxu0 %v9869_v38  ;;  %v9836_v11 = vld [vmem:[#allocation10 + $0x60] sm:$0xf]  ;;  %v9838_v38 = vld [vmem:[#allocation10 + $0x70] sm:$0xf0] }
 0x186   : > { %2439 = vmatpush.bf16.msrb.mxu2 %v9877_v53  ;;  %v9837_v36 = vor.u32 %v12620_v51, %v9836_v11  ;;  %v9841_v53 = vor.u32 %v12618_v0, %v9838_v38  ;;  %v9830_v11 = vld [vmem:[#allocation10 + $0x58] sm:$0xf0] }
 0x187   : > { %1996 = vmatmul.bf16.vlgmr.msra.gmra.mxu0 %v1152_v55  ;;  %2010 = vmatmul.bf16.vlgmr.msra.gmra.mxu1 %v1152_v55 }
 0x188   : > { %2024 = vmatmul.bf16.vlgmr.msra.gmra.mxu2 %v1152_v55  ;;  %2038 = vmatmul.bf16.vlgmr.msra.gmra.mxu3 %v1152_v55  ;;  %v9889_v55 = vor.u32 %v12630_v60, %v9886_v39  ;;  %v14588_v60 = vld [vmem:[%s17783_s5 + $0x1] ss:$2 sm:$0xf] }
 0x189   : > { %2453 = vmatpush.bf16.msrb.mxu3 %v9881_v37  ;;  %2412 = vmatpush.bf16.msrb.mxu0 %v9853_v1  ;;  %v14595_v31 = vperm.slane %v14588_v60, 0  ;;  %v14598_v43 = vperm.slane %v14588_v60, 1  ;;  %v9846_v37 = vld [vmem:[#allocation10 + $0x78] sm:$0xf0]  ;;  %v12616_v1 = vld [vmem:[#allocation10 + $0x4c] sm:$0xf0] }
 0x18a   : > { %2424 = vmatpush.bf16.msrb.mxu1 %v9889_v55  ;;  %2440 = vmatpush.bf16.msrb.mxu2 %v9861_v62  ;;  %v9849_v10 = vor.u32 %v12619_v46, %v9846_v37  ;;  %v9822_v62 = vld [vmem:[#allocation10 + $0x50] sm:$0xf0] }
 0x18d   : > { %2454 = vmatpush.bf16.msrb.mxu3 %v9865_v63  ;;  %2413 = vmatpush.bf16.msrb.mxu0 %v9837_v36  ;;  %v9829_v36 = vor.u32 %v12617_v41, %v9828_v6  ;;  %v9788_v41 = vld [vmem:[#allocation10] sm:$0xf] }
 0x18e   : > { %2425 = vmatpush.bf16.msrb.mxu1 %v9873_v34  ;;  %2441 = vmatpush.bf16.msrb.mxu2 %v9845_v9  ;;  %v9804_v9 = vld [vmem:[#allocation10 + $0x20] sm:$0xf] }
 0x191   : > { %2455 = vmatpush.bf16.msrb.mxu3 %v9849_v10 }
 0x192   : > { %2426 = vmatpush.bf16.msrb.mxu1 %v9857_v5  ;;  %v9821_v5 = vor.u32 %v12616_v1, %v9820_v3  ;;  %2442 = vmatpush.bf16.msrb.mxu2 %v9829_v36  ;;  %v9806_v3 = vld [vmem:[#allocation10 + $0x30] sm:$0xf0]  ;;  %v9812_v1 = vld [vmem:[#allocation10 + $0x28] sm:$0xf] }
 0x194   : > { %2414 = vmatpush.bf16.msrb.mxu0 %v9821_v5  ;;  %v12611_v5 = vld [vmem:[#allocation10 + $0x2c] sm:$0xf] }
 0x196   : > { %2427 = vmatpush.bf16.msrb.mxu1 %v9841_v53 }
 0x1be   : > { %v1387_v59 = vpop.f32.mrf.mxu0  ;;  %v1401_v56 = vpop.f32.mrf.mxu1 }
 0x1c6   : > { %v1415_v8 = vpop.f32.mrf.mxu2  ;;  %v1389_v7 = vpop.f32.mrf.mxu0 }
 0x1c7   : > { %v1403_v58 = vpop.f32.mrf.mxu1  ;;  %v14590_v32 = vpop.f32.mrf.mxu3 }
 0x1ce   : > { %v14592_v39 = vpop.f32.mrf.mxu2 }
 0x1cf   : > { %v14605_v2 = vpop.f32.mrf.mxu3 }
 0x1f4   : > { %v1603_v55 = vpop.f32.mrf.mxu0  ;;  %v1617_v44 = vpop.f32.mrf.mxu1 }
 0x1f5   : > { %v1604_v61 = vadd.f32 %v1603_v55, %v1387_v59  ;;  %v1618_v54 = vadd.f32 %v1617_v44, %v1401_v56  ;;  %v14603_v56 = vperm.slane %v14588_v60, 2 }
 0x1f7   : > { %v1650_v35 = vadd.f32 %v1604_v61, %v14595_v31  ;;  %v1651_v34 = vadd.f32 %v1618_v54, %v14598_v43  ;;  %v9825_v61 = vor.u32 %v12614_v49, %v9822_v62  ;;  %v12615_v54 = vld [vmem:[#allocation10 + $0x4c] sm:$0xf]  ;;  %v12613_v49 = vld [vmem:[#allocation10 + $0x34] sm:$0xf0]  ;;  %v9814_v62 = vld [vmem:[#allocation10 + $0x38] sm:$0xf0] }
 0x1f8   : > { %v9833_v38 = vor.u32 %v12615_v54, %v9830_v11  ;;  %v9813_v54 = vor.u32 %v12613_v49, %v9812_v1  ;;  %v497_v1 = vadd.f32 %v14307_v16, %v14413_v45 }
 0x1f9   : > { %v9646_v40 = vmul.f32 -1.442695, %v1650_v35  ;;  %v9647_v59 = vmul.f32 -1.442695, %v1651_v34  ;;  %2428 = vmatpush.bf16.msrb.mxu1 %v9825_v61 }
 0x1fa   : > { %2456 = vmatpush.bf16.msrb.mxu3 %v9833_v38  ;;  %2443 = vmatpush.bf16.msrb.mxu2 %v9813_v54 }
 0x1fb   : > { %13385 = vpow2.f32 %v9646_v40  ;;  %v1631_v50 = vpop.f32.mrf.mxu2 }
 0x1fc   : > { %13387 = vpow2.f32 %v9647_v59  ;;  %v1632_v63 = vadd.f32 %v1631_v50, %v1415_v8  ;;  %v1605_v55 = vpop.f32.mrf.mxu0  ;;  %v1619_v44 = vpop.f32.mrf.mxu1  ;;  %v12610_v59 = vld [vmem:[#allocation10 + $0x24] sm:$0xf] }
 0x1fd   : > { %v1606_v51 = vadd.f32 %v1605_v55, %v1389_v7  ;;  %v1620_v0 = vadd.f32 %v1619_v44, %v1403_v58  ;;  %v12612_v58 = vld [vmem:[#allocation10 + $0x2c] sm:$0xf0]  ;;  %v1645_v50 = vpop.f32.mrf.mxu3  ;;  %v9809_v61 = vor.u32 %v12610_v59, %v9806_v3  ;;  %v14646_v3 = vadd.f32 %v14305_v15, %v14436_v4 }
 0x1fe   : > { %v1652_v47 = vadd.f32 %v1632_v63, %v14603_v56  ;;  %v9805_v40 = vor.u32 %v12612_v58, %v9804_v9  ;;  %v12608_v63 = vld [vmem:[#allocation10 + $0xc] sm:$0xf0]  ;;  %v1646_v9 = vadd.f32 %v1645_v50, %v14590_v32  ;;  %v593_v32 = vadd.f32 %v14303_v14, %v14425_v42 }
 0x1ff   : > { %v1654_v33 = vadd.f32 %v1606_v51, %v14595_v31  ;;  %v1655_v35 = vadd.f32 %v1620_v0, %v14598_v43  ;;  %v495_v51 = vadd.f32 %v14299_v12, %v14413_v45  ;;  %v9817_v0 = vor.u32 %v12611_v5, %v9814_v62  ;;  %2429 = vmatpush.bf16.msrb.mxu1 %v9809_v61 }
 0x200   : > { %v9648_v8 = vmul.f32 -1.442695, %v1652_v47  ;;  %2415 = vmatpush.bf16.msrb.mxu0 %v9805_v40  ;;  %v14652_v50 = vadd.f32 %v14309_v17, %v14416_v48  ;;  %v14664_v17 = vadd.f32 %v14311_v18, %v14425_v42 }
 0x201   : > { %v13386_v34 = vpop.eup %13385  ;;  %v9649_v53 = vmul.f32 -1.442695, %v1654_v33  ;;  %v9650_v7 = vmul.f32 -1.442695, %v1655_v35  ;;  %v9789_v33 = vor.u32 %v12608_v63, %v9788_v41  ;;  %2457 = vmatpush.bf16.msrb.mxu3 %v9817_v0 }
 0x202   : > { %v13388_v46 = vpop.eup %13387  ;;  %v14610_v37 = vadd.f32 1.0, %v13386_v34  ;;  %13389 = vpow2.f32 %v9648_v8 }
 0x203   : > { %v14612_v10 = vadd.f32 1.0, %v13388_v46  ;;  %13391 = vpow2.f32 %v9649_v53  ;;  %v1633_v6 = vpop.f32.mrf.mxu2  ;;  %v14626_v53 = vperm.slane %v14588_v60, 3  ;;  %v544_v60 = vadd.f32 %v14301_v13, %v14416_v48 }
 0x204   : > { %13393 = vrcp.f32 %v14610_v37  ;;  %v1997_v44 = vpop.f32.mrf.mxu0  ;;  %v1634_v47 = vadd.f32 %v1633_v6, %v14592_v39  ;;  %2416 = vmatpush.bf16.msrb.mxu0 %v9789_v33  ;;  %v2011_v40 = vpop.f32.mrf.mxu1  ;;  %v1691_v14 = vand.u32 2147483647, %v14610_v37  ;;  %v1693_v16 = vand.u32 2147483648, %v14610_v37 }
 0x205   : > { %13395 = vrcp.f32 %v14612_v10  ;;  %v2044_v8 = vadd.f32 %v1997_v44, %v495_v51  ;;  %v1647_v49 = vpop.f32.mrf.mxu3  ;;  %v1653_v13 = vadd.f32 %v1646_v9, %v14626_v53  ;;  %v2045_v62 = vadd.f32 %v2011_v40, %v544_v60 }
 0x206   : > { %13397 = vpow2.f32 %v9650_v7  ;;  %v1656_v58 = vadd.f32 %v1634_v47, %v14603_v56  ;;  %v1708_v63 = vand.u32 2147483648, %v14612_v10  ;;  %v14668_v44 = vadd.f32 %v14313_v19, %v14436_v4 }
 0x207   : > { %v9780_v59 = vmul.f32 -1.442695, %v2044_v8  ;;  %v1706_v61 = vand.u32 2147483647, %v14612_v10  ;;  %vm1687_vm9 = vweird.f32 %v14610_v37  ;;  %vm1702_vm10 = vweird.f32 %v14612_v10 }
 0x208   : > { %v13390_v55 = vpop.eup %13389  ;;  %v9651_v41 = vmul.f32 -1.442695, %v1656_v58  ;;  %v1709_v47 = vor.u32 1.1754944e-38, %v1708_v63  ;;  %vm14681_vm11 = vcmp.eq.f32.partialorder %v1691_v14, 8.507059e+37  ;;  %v1694_v8 = vor.u32 1.1754944e-38, %v1693_v16 }
 0x209   : > { %v13392_v11 = vpop.eup %13391  ;;  %v14636_v7 = vadd.f32 1.0, %v13390_v55  ;;  %v1648_v55 = vadd.f32 %v1647_v49, %v14605_v2  ;;  %v9781_v2 = vmul.f32 -1.442695, %v2045_v62  ;;  %vm14692_vm14 = vcmp.eq.f32.partialorder %v1706_v61, 8.507059e+37  ;;  %v12606_v58 = vld [vmem:[#allocation10 + $0x4] sm:$0xf] }
 0x20a   : > { %v14618_v36 = vpop.eup %13393  ;;  %v14620_v38 = vadd.f32 1.0, %v13392_v11 }
 0x20b   : > { %v14623_v35 = vpop.eup %13395  ;;  %v1683_v12 = vmul.f32 %v14618_v36, %v14610_v37  ;;  %v2025_v0 = vpop.f32.mrf.mxu2  ;;  %vm1688_vm13 = vweird.f32 %v14618_v36  ;;  %v17878_v30 = vand.u32 2147483647, %v14636_v7 }
 0x20c   : > { %v13398_v34 = vpop.eup %13397  ;;  %13399 = vrcp.f32 %v14620_v38  ;;  %v1698_v46 = vmul.f32 %v14623_v35, %v14612_v10  ;;  %vm1703_vm12 = vweird.f32 %v14623_v35  ;;  %v1999_v60 = vpop.f32.mrf.mxu0  ;;  %v1738_v14 = vand.u32 2147483648, %v14620_v38  ;;  %vm14711_vm0 = vmor %vm1687_vm9, %vm1688_vm13 }
 0x20d   : > { %v14632_v39 = vadd.f32 1.0, %v13398_v34  ;;  %v1684_v5 = vsub.f32 1.0, %v1683_v12  ;;  %v1657_v12 = vadd.f32 %v1648_v55, %v14626_v53  ;;  %vm1732_vm15 = vweird.f32 %v14620_v38  ;;  %vm14722_vm2 = vmor %vm1702_vm10, %vm1703_vm12 }
 0x20e   : > { %v1699_v6 = vsub.f32 1.0, %v1698_v46  ;;  %v2048_v61 = vadd.f32 %v1999_v60, %v497_v1  ;;  %v1739_v60 = vor.u32 1.1754944e-38, %v1738_v14  ;;  %v2013_v46 = vpop.f32.mrf.mxu1  ;;  %v759_v14 = vld [vmem:[#allocation3 + $0x8] sm:$0xff] }
 0x20f   : > { %13401 = vrcp.f32 %v14632_v39  ;;  %v1685_v51 = vmul.f32 %v14618_v36, %v1684_v5  ;;  %v1753_v5 = vand.u32 2147483648, %v14632_v39  ;;  %vm1747_vm1 = vweird.f32 %v14632_v39 }
 0x210   : > { %13403 = vrcp.f32 %v14636_v7  ;;  %v1700_v18 = vmul.f32 %v14623_v35, %v1699_v6 }
 0x211   : > { %13405 = vpow2.f32 %v9780_v59  ;;  %v1686_v49 = vadd.f32 %v14618_v36, %v1685_v51  ;;  %v9790_v51 = vld [vmem:[#allocation10 + $0x10] sm:$0xf0] }
 0x212   : > { %v14657_v15 = vpop.eup %13399  ;;  %13407 = vtanh.f32 %v1653_v13  ;;  %v1736_v13 = vand.u32 2147483647, %v14620_v38  ;;  %v1701_v62 = vadd.f32 %v14623_v35, %v1700_v18  ;;  %v2046_v18 = vadd.f32 %v2025_v0, %v593_v32 }
 0x213   : > { %v1728_v54 = vmul.f32 %v14657_v15, %v14620_v38  ;;  %13409 = vpow2.f32 %v9651_v41  ;;  %v1690_v37 = vsel %vm14711_vm0, %v14618_v36, %v1686_v49  ;;  %vm1733_vm4 = vweird.f32 %v14657_v15 }
 0x214   : > { %13411 = vpow2.f32 %v9781_v2  ;;  %v1751_v2 = vand.u32 2147483647, %v14632_v39  ;;  %v1705_v32 = vsel %vm14722_vm2, %v14623_v35, %v1701_v62  ;;  %vm14735_vm3 = vcmp.eq.f32.partialorder %v1736_v13, 8.507059e+37  ;;  %vm14756_vm6 = vmor %vm1732_vm15, %vm1733_vm4 }
 0x215   : > { %v14673_v11 = vpop.eup %13401  ;;  %v1729_v34 = vsub.f32 1.0, %v1728_v54  ;;  %v1695_v35 = vsel %vm14681_vm11, %v1694_v8, %v1690_v37  ;;  %v9782_v62 = vmul.f32 -1.442695, %v2046_v18  ;;  %v9793_v1 = vor.u32 %v12606_v58, %v9790_v51  ;;  %v12609_v37 = vld [vmem:[#allocation10 + $0x14] sm:$0xf0] }
 0x216   : > { %v1743_v19 = vmul.f32 %v14673_v11, %v14632_v39  ;;  %v14686_v9 = vpop.eup %13403  ;;  %vm1748_vm5 = vweird.f32 %v14673_v11  ;;  %vm14761_vm7 = vcmp.eq.f32.partialorder %v1751_v2, 8.507059e+37  ;;  %vm1717_vm2 = vweird.f32 %v14636_v7 }
 0x217   : > { %v13406_v59 = vpop.eup %13405  ;;  %v1713_v16 = vmul.f32 %v14686_v9, %v14636_v7  ;;  %v1730_v55 = vmul.f32 %v14657_v15, %v1729_v34  ;;  %v9783_v34 = vmul.f32 -1.442695, %v2048_v61  ;;  %v1710_v61 = vsel %vm14692_vm14, %v1709_v47, %v1705_v32  ;;  %2430 = vmatpush.bf16.msrb.mxu1 %v9793_v1  ;;  %vm14780_vm8 = vmor %vm1747_vm1, %vm1748_vm5  ;;  %v760_v1 = vld [vmem:[#allocation3 + $0x10] sm:$0xff] }
 0x218   : > { %v1744_v6 = vsub.f32 1.0, %v1743_v19  ;;  %v14701_v41 = vadd.f32 1.0, %v13406_v59  ;;  %v13408_v63 = vpop.eup %13407  ;;  %v14729_v19 = vor.u32 1.1754944e-38, %v1753_v5  ;;  %v2039_v59 = vpop.f32.mrf.mxu3  ;;  %v1774_v58 = vmul.f32 %v1710_v61, %v759_v14  ;;  %v12602_v61 = vld [vmem:[#allocation8 + $0xe4] sm:$0xf] }
 0x219   : > { %v13410_v54 = vpop.eup %13409  ;;  %v1714_v49 = vsub.f32 1.0, %v1713_v16  ;;  %v2047_v16 = vadd.f32 %v2039_v59, %v14646_v3  ;;  %v1776_v2 = vmul.f32 %v13408_v63, %v1695_v35  ;;  %v9798_v63 = vld [vmem:[#allocation10 + $0x18] sm:$0xf0]  ;;  %vm1718_vm1 = vweird.f32 %v14686_v9 }
 0x21a   : > { %13413 = vrcp.f32 %v14701_v41  ;;  %v1745_v0 = vmul.f32 %v14673_v11, %v1744_v6  ;;  %v13412_v36 = vpop.eup %13411  ;;  %v14739_v5 = vadd.f32 1.0, %v13410_v54  ;;  %v2027_v6 = vpop.f32.mrf.mxu2  ;;  %v2049_v54 = vadd.f32 %v2013_v46, %v14652_v50  ;;  %v9796_v46 = vld [vmem:[#allocation10 + $0x8] sm:$0xf] }
 0x21b   : > { %13415 = vtanh.f32 %v1657_v12  ;;  %v1731_v12 = vadd.f32 %v14657_v15, %v1730_v55  ;;  %v14745_v13 = vadd.f32 1.0, %v13412_v36  ;;  %v2050_v47 = vadd.f32 %v2027_v6, %v14664_v17 }
 0x21c   : > { %13417 = vpow2.f32 %v9783_v34  ;;  %v1746_v8 = vadd.f32 %v14673_v11, %v1745_v0  ;;  %v9784_v18 = vmul.f32 -1.442695, %v2049_v54  ;;  %v12607_v34 = vld [vmem:[#allocation10 + $0xc] sm:$0xf]  ;;  %v14774_v32 = vmul.f32 %v14686_v9, %v1714_v49 }
 0x21d   : > { %13419 = vrcp.f32 %v14745_v13  ;;  %v1735_v50 = vsel %vm14756_vm6, %v14657_v15, %v1731_v12  ;;  %v2085_v0 = vand.u32 2147483647, %v14701_v41  ;;  %v2087_v49 = vand.u32 2147483648, %v14701_v41 }
 0x21e   : > { %13421 = vrcp.f32 %v14739_v5  ;;  %v1740_v51 = vsel %vm14735_vm3, %v1739_v60, %v1735_v50  ;;  %v1750_v36 = vsel %vm14780_vm8, %v14673_v11, %v1746_v8  ;;  %v9785_v35 = vmul.f32 -1.442695, %v2050_v47  ;;  %v12604_v11 = vld [vmem:[#allocation8 + $0xec] sm:$0xf0]  ;;  %v12605_v47 = vld [vmem:[#allocation8 + $0xf4] sm:$0xf0] }
 0x21f   : > { %13423 = vpow2.f32 %v9782_v62  ;;  %v10028_v62 = vld [vmem:[#allocation8 + $0xe0] sm:$0xf]  ;;  %v14797_v14 = vadd.f32 %v1776_v2, %v1774_v58  ;;  %vm2081_vm10 = vweird.f32 %v14701_v41  ;;  %v9797_v10 = vor.u32 %v12609_v37, %v9796_v46  ;;  %v10038_v37 = vld [vmem:[#allocation8 + $0xf8] sm:$0xf0]  ;;  %v10020_v2 = vld [vmem:[#allocation8 + $0xc8] sm:$0xf] }
 0x220   : > { %v14751_v55 = vpop.eup %13413  ;;  %13425 = vtanh.f32 %v2047_v16  ;;  %v9801_v60 = vor.u32 %v12607_v34, %v9798_v63  ;;  %v10030_v16 = vld [vmem:[#allocation8 + $0xf0] sm:$0xf0]  ;;  %v1755_v33 = vsel %vm14761_vm7, %v14729_v19, %v1750_v36  ;;  %vm14817_vm12 = vcmp.eq.f32.partialorder %v2085_v0, 8.507059e+37  ;;  %v10012_v63 = vld [vmem:[#allocation8 + $0xc0] sm:$0xf] }
 0x221   : > { %v13416_v3 = vpop.eup %13415  ;;  %v2077_v38 = vmul.f32 %v14751_v55, %v14701_v41  ;;  %13427 = vpow2.f32 %v9784_v18  ;;  %vm2082_vm9 = vweird.f32 %v14751_v55  ;;  %v2088_v40 = vor.u32 1.1754944e-38, %v2087_v49  ;;  %2444 = vmatpush.bf16.msrb.mxu2 %v9797_v10  ;;  %v12603_v18 = vld [vmem:[#allocation8 + $0xec] sm:$0xf] }
 0x222   : > { %v13418_v59 = vpop.eup %13417  ;;  %v1777_v58 = vmul.f32 %v13416_v3, %v1740_v51  ;;  %vm14813_vm11 = vmor %vm2081_vm10, %vm2082_vm9  ;;  %2458 = vmatpush.bf16.msrb.mxu3 %v9801_v60  ;;  %v10029_v15 = vor.u32 %v12604_v11, %v10028_v62  ;;  %v1775_v51 = vmul.f32 %v1755_v33, %v760_v1  ;;  %v2102_v36 = vand.u32 2147483648, %v14745_v13  ;;  %v10014_v1 = vld [vmem:[#allocation8 + $0xd0] sm:$0xf0] }
 0x223   : > { %v2078_v17 = vsub.f32 1.0, %v2077_v38  ;;  %v14793_v12 = vadd.f32 1.0, %v13418_v59  ;;  %v14795_v6 = vpop.eup %13419  ;;  %v10036_v38 = vld [vmem:[#allocation8 + $0xe8] sm:$0xf]  ;;  %v12600_v59 = vld [vmem:[#allocation8 + $0xcc] sm:$0xf0]  ;;  %v10041_v11 = vor.u32 %v12603_v18, %v10038_v37  ;;  %vm2096_vm14 = vweird.f32 %v14745_v13 }
 0x224   : > { %v14800_v54 = vpop.eup %13421  ;;  %v2092_v8 = vmul.f32 %v14795_v6, %v14745_v13  ;;  %vm2097_vm13 = vweird.f32 %v14795_v6  ;;  %2625 = vmatpush.bf16.msra.mxu0 %v10029_v15  ;;  %v10037_v62 = vor.u32 %v12605_v47, %v10036_v38  ;;  %v2103_v47 = vor.u32 1.1754944e-38, %v2102_v36  ;;  %v12601_v37 = vld [vmem:[#allocation8 + $0xd4] sm:$0xf0]  ;;  %v12599_v15 = vld [vmem:[#allocation8 + $0xcc] sm:$0xf] }
 0x225   : > { %v2079_v39 = vmul.f32 %v14751_v55, %v2078_v17  ;;  %13429 = vrcp.f32 %v14793_v12  ;;  %v13424_v46 = vpop.eup %13423  ;;  %v10033_v17 = vor.u32 %v12602_v61, %v10030_v16  ;;  %v10013_v61 = vor.u32 %v12600_v59, %v10012_v63  ;;  %v12598_v16 = vld [vmem:[#allocation8 + $0xc4] sm:$0xf]  ;;  %vm14843_vm15 = vmor %vm2096_vm14, %vm2097_vm13  ;;  %v9996_v36 = vld [vmem:[#allocation8 + $0xa0] sm:$0xf] }
 0x226   : > { %13431 = vpow2.f32 %v9785_v35  ;;  %v13426_v34 = vpop.eup %13425  ;;  %v2093_v3 = vsub.f32 1.0, %v2092_v8  ;;  %v1768_v8 = vand.u32 2147483648, %v14739_v5  ;;  %v14847_v18 = vadd.f32 1.0, %v13424_v46  ;;  %2653 = vmatpush.bf16.msra.mxu2 %v10037_v62  ;;  %2667 = vmatpush.bf16.msra.mxu3 %v10041_v11  ;;  %v12594_v62 = vld [vmem:[#allocation8 + $0xa4] sm:$0xf]  ;;  %vm14951_vm13 = vmor %vm1717_vm2, %vm1718_vm1 }
 0x227   : > { %v2080_v50 = vadd.f32 %v14751_v55, %v2079_v39  ;;  %v13428_v0 = vpop.eup %13427  ;;  %v2100_v39 = vand.u32 2147483647, %v14745_v13  ;;  %2639 = vmatpush.bf16.msra.mxu1 %v10033_v17  ;;  %v10022_v17 = vld [vmem:[#allocation8 + $0xd8] sm:$0xf0]  ;;  %vm1762_vm3 = vweird.f32 %v14739_v5  ;;  %vm2126_vm4 = vweird.f32 %v14793_v12 }
 0x228   : > { %v2094_v35 = vmul.f32 %v14795_v6, %v2093_v3  ;;  %v14830_v60 = vadd.f32 1.0, %v13428_v0  ;;  %2626 = vmatpush.bf16.msra.mxu0 %v10013_v61  ;;  %v10021_v61 = vor.u32 %v12601_v37, %v10020_v2  ;;  %v10025_v38 = vor.u32 %v12599_v15, %v10022_v17  ;;  %v12592_v2 = vld [vmem:[#allocation8 + $0x8c] sm:$0xf0] }
 0x229   : > { %v2084_v41 = vsel %vm14813_vm11, %v14751_v55, %v2080_v50  ;;  %v1758_v55 = vmul.f32 %v14800_v54, %v14739_v5  ;;  %vm2101_vm0 = vcmp.eq.f32.partialorder %v2100_v39, 8.507059e+37  ;;  %v2041_v39 = vpop.f32.mrf.mxu3  ;;  %vm14892_vm5 = vcmp.eq.f32.partialorder %v17878_v30, 8.507059e+37 }
 0x22a   : > { %v2089_v49 = vsel %vm14817_vm12, %v2088_v40, %v2084_v41  ;;  %v2095_v50 = vadd.f32 %v14795_v6, %v2094_v35  ;;  %13433 = vrcp.f32 %v14830_v60  ;;  %v1766_v40 = vand.u32 2147483647, %v14739_v5  ;;  %2654 = vmatpush.bf16.msra.mxu2 %v10021_v61  ;;  %2668 = vmatpush.bf16.msra.mxu3 %v10025_v38  ;;  %v12586_v38 = vld [vmem:[#allocation8 + $0x64] sm:$0xf] }
 0x22b   : > { %v2170_v10 = vmul.f32 %v13426_v34, %v2089_v49  ;;  %v14834_v33 = vpop.eup %13429  ;;  %v14851_v34 = vadd.f32 %v1777_v58, %v1775_v51  ;;  %v10017_v41 = vor.u32 %v12598_v16, %v10014_v1  ;;  %v1759_v63 = vsub.f32 1.0, %v1758_v55  ;;  %v12596_v49 = vld [vmem:[#allocation8 + $0xac] sm:$0xf0]  ;;  %v9998_v55 = vld [vmem:[#allocation8 + $0xb0] sm:$0xf0] }
 0x22c   : > { %v13432_v19 = vpop.eup %13431  ;;  %v2122_v13 = vmul.f32 %v14834_v33, %v14793_v12  ;;  %v2099_v3 = vsel %vm14843_vm15, %v14795_v6, %v2095_v50  ;;  %v17877_v35 = vand.u32 2147483648, %v14636_v7  ;;  %13435 = vtanh.f32 %v14797_v14  ;;  %v10004_v16 = vld [vmem:[#allocation8 + $0xa8] sm:$0xf]  ;;  %v12597_v1 = vld [vmem:[#allocation8 + $0xb4] sm:$0xf0] }
 0x22d   : > { %17876 = vst [vmem:[#allocation58_spill] sm:$0xff] %v14851_v34  ;;  %v2104_v46 = vsel %vm2101_vm0, %v2103_v47, %v2099_v3  ;;  %v14856_v0 = vadd.f32 1.0, %v13432_v19  ;;  %v14863_v51 = vor.u32 1.1754944e-38, %v1768_v8  ;;  %2640 = vmatpush.bf16.msra.mxu1 %v10017_v41  ;;  %13437 = vrcp.f32 %v14847_v18  ;;  %v12595_v50 = vld [vmem:[#allocation8 + $0xac] sm:$0xf] }
 0x22e   : > { %v2123_v59 = vsub.f32 1.0, %v2122_v13  ;;  %v14860_v58 = vor.u32 1.1754944e-38, %v17877_v35  ;;  %v2168_v6 = vmul.f32 %v2104_v46, %v14519_v57  ;;  %v14873_v8 = vadd.f32 %v14686_v9, %v14774_v32  ;;  %v10006_v47 = vld [vmem:[#allocation8 + $0xb8] sm:$0xf0]  ;;  %v14879_v13 = vld [vmem:[#allocation8 + $0x80] sm:$0xf] }
 0x22f   : > { %13439 = vtanh.f32 %v14851_v34  ;;  %v1760_v37 = vmul.f32 %v14800_v54, %v1759_v63  ;;  %v2051_v32 = vadd.f32 %v2041_v39, %v14668_v44  ;;  %v12590_v41 = vld [vmem:[#allocation8 + $0x84] sm:$0xf]  ;;  %v14887_v46 = vld [vmem:[#allocation8 + $0x88] sm:$0xf]  ;;  %v9997_v15 = vor.u32 %v12596_v49, %v9996_v36  ;;  %v12591_v35 = vld [vmem:[#allocation8 + $0x8c] sm:$0xf] }
 0x230   : > { %v2124_v11 = vmul.f32 %v14834_v33, %v2123_v59  ;;  %v14869_v19 = vpop.eup %13433  ;;  %v14877_v57 = vadd.f32 %v2170_v10, %v2168_v6  ;;  %13441 = vrcp.f32 %v14856_v0  ;;  %v9982_v10 = vld [vmem:[#allocation8 + $0x90] sm:$0xf0]  ;;  %v10001_v17 = vor.u32 %v12594_v62, %v9998_v55  ;;  %v12593_v59 = vld [vmem:[#allocation8 + $0x94] sm:$0xf0]  ;;  %v9990_v6 = vld [vmem:[#allocation8 + $0x98] sm:$0xf0] }
 0x231   : > { %v2137_v3 = vmul.f32 %v14869_v19, %v14830_v60  ;;  %v10005_v63 = vor.u32 %v12597_v1, %v10004_v16  ;;  %vm14896_vm6 = vcmp.eq.f32.partialorder %v1766_v40, 8.507059e+37  ;;  %vm2127_vm7 = vweird.f32 %v14834_v33  ;;  %v14902_v49 = vld [vmem:[#allocation8 + $0x60] sm:$0xf]  ;;  %v14904_v62 = vld [vmem:[#allocation8 + $0x6c] sm:$0xf0]  ;;  %2627 = vmatpush.bf16.msra.mxu0 %v9997_v15 }
 0x232   : > { %v2125_v61 = vadd.f32 %v14834_v33, %v2124_v11  ;;  %v10009_v36 = vor.u32 %v12595_v50, %v10006_v47  ;;  %v14906_v55 = vpop.eup %13435  ;;  %v2130_v30 = vand.u32 2147483647, %v14793_v12  ;;  %v2132_v16 = vand.u32 2147483648, %v14793_v12  ;;  %2641 = vmatpush.bf16.msra.mxu1 %v10001_v17  ;;  %vm14923_vm10 = vmor %vm2126_vm4, %vm2127_vm7 }
 0x233   : > { %v2138_v39 = vsub.f32 1.0, %v2137_v3  ;;  %v9981_v40 = vor.u32 %v12592_v2, %v14879_v13  ;;  %v9985_v1 = vor.u32 %v12590_v41, %v9982_v10  ;;  %v14911_v11 = vpop.eup %13437  ;;  %vm2142_vm8 = vweird.f32 %v14869_v19  ;;  %2655 = vmatpush.bf16.msra.mxu2 %v10005_v63  ;;  %v12589_v10 = vld [vmem:[#allocation8 + $0x74] sm:$0xf0]  ;;  %v9974_v63 = vld [vmem:[#allocation8 + $0x78] sm:$0xf0] }
 0x234   : > { %v2147_v47 = vand.u32 2147483648, %v14830_v60  ;;  %v9989_v3 = vor.u32 %v12593_v59, %v14887_v46  ;;  %v1761_v15 = vadd.f32 %v14800_v54, %v1760_v37  ;;  %vm1763_vm9 = vweird.f32 %v14800_v54  ;;  %2669 = vmatpush.bf16.msra.mxu3 %v10009_v36  ;;  %v12587_v46 = vld [vmem:[#allocation8 + $0x6c] sm:$0xf]  ;;  %v9948_v59 = vld [vmem:[#allocation8 + $0x40] sm:$0xf] }
 0x235   : > { %v2139_v50 = vmul.f32 %v14869_v19, %v2138_v39  ;;  %v13440_v34 = vpop.eup %13439  ;;  %v2145_v2 = vand.u32 2147483647, %v14830_v60  ;;  %v9993_v41 = vor.u32 %v12591_v35, %v9990_v6  ;;  %vm2141_vm11 = vweird.f32 %v14830_v60  ;;  %v12584_v39 = vld [vmem:[#allocation8 + $0x4c] sm:$0xf0]  ;;  %2628 = vmatpush.bf16.msra.mxu0 %v9981_v40  ;;  %v12582_v6 = vld [vmem:[#allocation8 + $0x44] sm:$0xf]  ;;  %vm14962_vm15 = vmor %vm1762_vm3, %vm1763_vm9 }
 0x236   : > { %v14928_v17 = vpop.eup %13441  ;;  %v2129_v37 = vsel %vm14923_vm10, %v14834_v33, %v2125_v61  ;;  %13443 = vtanh.f32 %v2051_v32  ;;  %v14937_v36 = vmul.f32 %v14911_v11, %v14847_v18  ;;  %vm14941_vm12 = vmor %vm2141_vm11, %vm2142_vm8  ;;  %v2133_v60 = vor.u32 1.1754944e-38, %v2132_v16  ;;  %2642 = vmatpush.bf16.msra.mxu1 %v9985_v1  ;;  %v9950_v61 = vld [vmem:[#allocation8 + $0x50] sm:$0xf0]  ;;  %v9940_v35 = vld [vmem:[#allocation8 + $0x28] sm:$0xf] }
 0x237   : > { %v2140_v12 = vadd.f32 %v14869_v19, %v2139_v50  ;;  %v9965_v33 = vor.u32 %v14904_v62, %v14902_v49  ;;  %v9969_v32 = vor.u32 %v12586_v38, %v9966_v28  ;;  %v2148_v13 = vor.u32 1.1754944e-38, %v2147_v47  ;;  %2656 = vmatpush.bf16.msra.mxu2 %v9989_v3  ;;  %v12583_v38 = vld [vmem:[#allocation8 + $0x4c] sm:$0xf]  ;;  %v9958_v47 = vld [vmem:[#allocation8 + $0x58] sm:$0xf0] }
 0x238   : > { %vm2131_vm14 = vcmp.eq.f32.partialorder %v2130_v30, 8.507059e+37  ;;  %v9973_v40 = vor.u32 %v12589_v10, %v9972_v27  ;;  %v14968_v7 = vmul.f32 %v14928_v17, %v14856_v0  ;;  %vm2146_vm0 = vcmp.eq.f32.partialorder %v2145_v2, 8.507059e+37  ;;  %2670 = vmatpush.bf16.msra.mxu3 %v9993_v41  ;;  %v9956_v30 = vld [vmem:[#allocation8 + $0x48] sm:$0xf]  ;;  %v9932_v2 = vld [vmem:[#allocation8 + $0x20] sm:$0xf] }
 0x239   : > { %v2144_v16 = vsel %vm14941_vm12, %v14869_v19, %v2140_v12  ;;  %v2134_v49 = vsel %vm2131_vm14, %v2133_v60, %v2129_v37  ;;  %v9977_v62 = vor.u32 %v12587_v46, %v9974_v63  ;;  %v12585_v19 = vld [vmem:[#allocation8 + $0x54] sm:$0xf0]  ;;  %v9949_v1 = vor.u32 %v12584_v39, %v9948_v59  ;;  %2629 = vmatpush.bf16.msra.mxu0 %v9965_v33  ;;  %v9934_v63 = vld [vmem:[#allocation8 + $0x30] sm:$0xf0]  ;;  %v9942_v33 = vld [vmem:[#allocation8 + $0x38] sm:$0xf0] }
 0x23a   : > { %v9953_v27 = vor.u32 %v12582_v6, %v9950_v61  ;;  %v1720_v5 = vsel %vm14951_vm13, %v14686_v9, %v14873_v8  ;;  %v1765_v3 = vsel %vm14962_vm15, %v14800_v54, %v1761_v15  ;;  %v2149_v10 = vsel %vm2146_vm0, %v2148_v13, %v2144_v16  ;;  %2643 = vmatpush.bf16.msra.mxu1 %v9969_v32  ;;  %v12580_v9 = vld [vmem:[#allocation8 + $0x2c] sm:$0xf0]  ;;  %v12578_v8 = vld [vmem:[#allocation8 + $0x24] sm:$0xf]  ;;  %v12581_v60 = vld [vmem:[#allocation8 + $0x34] sm:$0xf0] }
 0x23b   : > { %v1725_v41 = vsel %vm14892_vm5, %v14860_v58, %v1720_v5  ;;  %v1770_v46 = vsel %vm14896_vm6, %v14863_v51, %v1765_v3  ;;  %2657 = vmatpush.bf16.msra.mxu2 %v9973_v40  ;;  %v9957_v12 = vor.u32 %v12585_v19, %v9956_v30  ;;  %v9961_v39 = vor.u32 %v12583_v38, %v9958_v47  ;;  %v9916_v6 = vld [vmem:[#allocation8] sm:$0xf]  ;;  %v12576_v61 = vld [vmem:[#allocation8 + $0xc] sm:$0xf0]  ;;  %v12574_v16 = vld [vmem:[#allocation8 + $0x4] sm:$0xf] }
 0x23c   : > { %v13444_v37 = vpop.eup %13443  ;;  %v1782_v54 = vmul.f32 %v14906_v55, %v1725_v41  ;;  %v1783_v15 = vmul.f32 %v13440_v34, %v1770_v46  ;;  %2671 = vmatpush.bf16.msra.mxu3 %v9977_v62  ;;  %v2169_v58 = vmul.f32 %v2149_v10, %v14557_v52  ;;  %v2108_v50 = vsub.f32 1.0, %v14937_v36  ;;  %v9918_v40 = vld [vmem:[#allocation8 + $0x10] sm:$0xf0]  ;;  %v9924_v62 = vld [vmem:[#allocation8 + $0x8] sm:$0xf] }
 0x23d   : > { %v2171_v59 = vmul.f32 %v13444_v37, %v2134_v49  ;;  %v2153_v55 = vsub.f32 1.0, %v14968_v7  ;;  %2630 = vmatpush.bf16.msra.mxu0 %v9949_v1  ;;  %v9933_v34 = vor.u32 %v12580_v9, %v9932_v2  ;;  %v9937_v13 = vor.u32 %v12578_v8, %v9934_v63  ;;  %v12577_v30 = vld [vmem:[#allocation8 + $0x14] sm:$0xf0]  ;;  %v12575_v19 = vld [vmem:[#allocation8 + $0xc] sm:$0xf] }
 0x23e   : > { %v1784_v51 = vpack.c.bf16 %v1782_v54, %v1782_v54  ;;  %v1785_v44 = vpack.c.bf16 %v1783_v15, %v1783_v15  ;;  %v13218_v32 = vpack.c.bf16 %v1783_v15, %v1782_v54  ;;  %2644 = vmatpush.bf16.msra.mxu1 %v9953_v27  ;;  %v9941_v28 = vor.u32 %v12581_v60, %v9940_v35  ;;  %v9926_v47 = vld [vmem:[#allocation8 + $0x18] sm:$0xf0]  ;;  %v10162_v36 = vld [vmem:[#allocation5 + $0xe0] sm:$0xf]  ;;  %v12668_v5 = vld [vmem:[#allocation5 + $0xec] sm:$0xf0] }
 0x23f   : > { %2658 = vmatpush.bf16.msra.mxu2 %v9957_v12  ;;  %v9945_v38 = vor.u32 %v12579_v29, %v9942_v33  ;;  %v14988_v7 = vadd.f32 %v2171_v59, %v2169_v58  ;;  %v12666_v27 = vld [vmem:[#allocation5 + $0xe4] sm:$0xf]  ;;  %v10164_v3 = vld [vmem:[#allocation5 + $0xf0] sm:$0xf0]  ;;  %v10170_v10 = vld [vmem:[#allocation5 + $0xe8] sm:$0xf]  ;;  %v2154_v2 = vmul.f32 %v14928_v17, %v2153_v55  ;;  %v9917_v41 = vor.u32 %v12576_v61, %v9916_v6 }
 0x240   : > { %13219 = vst [vmem:[%s14192_s19] sm:$0xff] %v13218_v32   ;;  %v2245_v52 = vunpack.c.l.b16 %v1784_v51  ;;  %v2246_v49 = vunpack.c.l.b16 %v1785_v44  ;;  %2672 = vmatpush.bf16.msra.mxu3 %v9961_v39  ;;  %v9921_v46 = vor.u32 %v12574_v16, %v9918_v40  ;;  %v12669_v37 = vld [vmem:[#allocation5 + $0xf4] sm:$0xf0]  ;;  %v12667_v12 = vld [vmem:[#allocation5 + $0xec] sm:$0xf]  ;;  %v10172_v9 = vld [vmem:[#allocation5 + $0xf8] sm:$0xf0]  ;;  %v9925_v63 = vor.u32 %v12577_v30, %v9924_v62 }
 0x241   : > { %2631 = vmatpush.bf16.msra.mxu0 %v9933_v34  ;;  %v2115_v8 = vand.u32 2147483647, %v14847_v18  ;;  %v10163_v54 = vor.u32 %v12668_v5, %v10162_v36  ;;  %v2109_v15 = vmul.f32 %v14911_v11, %v2108_v50  ;;  %v2117_v59 = vand.u32 2147483648, %v14847_v18  ;;  %v10146_v60 = vld [vmem:[#allocation5 + $0xc0] sm:$0xf] }
 0x242   : > { %v2247_v1 = vpack.c.b16 %v2246_v49, %v2245_v52  ;;  %2645 = vmatpush.bf16.msra.mxu1 %v9937_v13  ;;  %v9929_v39 = vor.u32 %v12575_v19, %v9926_v47  ;;  %v10167_v35 = vor.u32 %v12666_v27, %v10164_v3  ;;  %v12664_v29 = vld [vmem:[#allocation5 + $0xcc] sm:$0xf0]  ;;  %13445 = vtanh.f32 %v14988_v7  ;;  %v12662_v51 = vld [vmem:[#allocation5 + $0xc4] sm:$0xf]  ;;  %v10148_v44 = vld [vmem:[#allocation5 + $0xd0] sm:$0xf0] }
 0x243   : > { %2659 = vmatpush.bf16.msra.mxu2 %v9941_v28  ;;  %v10171_v58 = vor.u32 %v12669_v37, %v10170_v10  ;;  %v10175_v33 = vor.u32 %v12667_v12, %v10172_v9  ;;  %v10154_v32 = vld [vmem:[#allocation5 + $0xc8] sm:$0xf]  ;;  %v2155_v6 = vadd.f32 %v14928_v17, %v2154_v2  ;;  %vm2157_vm1 = vweird.f32 %v14928_v17  ;;  %v12665_v61 = vld [vmem:[#allocation5 + $0xd4] sm:$0xf0]  ;;  %v12663_v50 = vld [vmem:[#allocation5 + $0xcc] sm:$0xf] }
 0x244   : > { %2417 = vmatmul.bf16.vlgmr.msrb.gmra.mxu0 %v2247_v1  ;;  %2673 = vmatpush.bf16.msra.mxu3 %v9945_v38  ;;  %v10156_v55 = vld [vmem:[#allocation5 + $0xd8] sm:$0xf0]  ;;  %13447 = vtanh.f32 %v14877_v57  ;;  %v2160_v34 = vand.u32 2147483647, %v14856_v0  ;;  %v2162_v13 = vand.u32 2147483648, %v14856_v0  ;;  %v10147_v16 = vor.u32 %v12664_v29, %v10146_v60 }
 0x245   : > { %2431 = vmatmul.bf16.vlgmr.msrb.gmra.mxu1 %v2247_v1  ;;  %2445 = vmatmul.bf16.vlgmr.msrb.gmra.mxu2 %v2247_v1  ;;  %v2110_v40 = vadd.f32 %v14911_v11, %v2109_v15  ;;  %vm2112_vm2 = vweird.f32 %v14911_v11  ;;  %vm2156_vm3 = vweird.f32 %v14856_v0  ;;  %v10151_v28 = vor.u32 %v12662_v51, %v10148_v44  ;;  %v10130_v52 = vld [vmem:[#allocation5 + $0xa0] sm:$0xf]  ;;  %v12660_v49 = vld [vmem:[#allocation5 + $0xac] sm:$0xf0]  ;;  %v12658_v62 = vld [vmem:[#allocation5 + $0xa4] sm:$0xf] }
 0x246   : > { %2459 = vmatmul.bf16.vlgmr.msrb.gmra.mxu3 %v2247_v1  ;;  %2632 = vmatpush.bf16.msra.mxu0 %v9917_v41  ;;  %vm15005_vm4 = vmor %vm2156_vm3, %vm2157_vm1  ;;  %v10155_v19 = vor.u32 %v12665_v61, %v10154_v32  ;;  %v10159_v38 = vor.u32 %v12663_v50, %v10156_v55  ;;  %v10132_v47 = vld [vmem:[#allocation5 + $0xb0] sm:$0xf0]  ;;  %v10138_v36 = vld [vmem:[#allocation5 + $0xa8] sm:$0xf]  ;;  %vm2111_vm5 = vweird.f32 %v14847_v18  ;;  %vm15019_vm7 = vcmp.eq.f32.partialorder %v2115_v8, 8.507059e+37 }
 0x247   : > { %2646 = vmatpush.bf16.msra.mxu1 %v9921_v46  ;;  %2660 = vmatpush.bf16.msra.mxu2 %v9925_v63  ;;  %v2159_v0 = vsel %vm15005_vm4, %v14928_v17, %v2155_v6  ;;  %v12661_v5 = vld [vmem:[#allocation5 + $0xb4] sm:$0xf0]  ;;  %v12659_v1 = vld [vmem:[#allocation5 + $0xac] sm:$0xf]  ;;  %v10140_v27 = vld [vmem:[#allocation5 + $0xb8] sm:$0xf0]  ;;  %v10131_v18 = vor.u32 %v12660_v49, %v10130_v52  ;;  %v10135_v37 = vor.u32 %v12658_v62, %v10132_v47 }
 0x248   : > { %2674 = vmatpush.bf16.msra.mxu3 %v9929_v39  ;;  %v13446_v3 = vpop.eup %13445  ;;  %vm15015_vm6 = vmor %vm2111_vm5, %vm2112_vm2  ;;  %v2163_v41 = vor.u32 1.1754944e-38, %v2162_v13  ;;  %v2118_v46 = vor.u32 1.1754944e-38, %v2117_v59  ;;  %vm2161_vm8 = vcmp.eq.f32.partialorder %v2160_v34, 8.507059e+37  ;;  %v10114_v12 = vld [vmem:[#allocation5 + $0x80] sm:$0xf]  ;;  %v10139_v8 = vor.u32 %v12661_v5, %v10138_v36 }
 0x249   : > { %v2114_v17 = vsel %vm15015_vm6, %v14911_v11, %v2110_v40  ;;  %v12656_v9 = vld [vmem:[#allocation5 + $0x8c] sm:$0xf0]  ;;  %v10143_v15 = vor.u32 %v12659_v1, %v10140_v27  ;;  %v12654_v39 = vld [vmem:[#allocation5 + $0x84] sm:$0xf]  ;;  %v10122_v60 = vld [vmem:[#allocation5 + $0x88] sm:$0xf] }
 0x24a   : > { %3019 = vmatpush.bf16.msrb.mxu0 %v10163_v54  ;;  %v13448_v63 = vpop.eup %13447  ;;  %v2164_v54 = vsel %vm2161_vm8, %v2163_v41, %v2159_v0  ;;  %v10124_v51 = vld [vmem:[#allocation5 + $0x98] sm:$0xf0]  ;;  %v2119_v11 = vsel %vm15019_vm7, %v2118_v46, %v2114_v17  ;;  %v10115_v59 = vor.u32 %v12656_v9, %v10114_v12  ;;  %v10098_v6 = vld [vmem:[#allocation5 + $0x60] sm:$0xf]  ;;  %v12652_v61 = vld [vmem:[#allocation5 + $0x6c] sm:$0xf0] }
 0x24b   : > { %3033 = vmatpush.bf16.msrb.mxu1 %v10167_v35  ;;  %3047 = vmatpush.bf16.msrb.mxu2 %v10171_v58  ;;  %v10116_v35 = vld [vmem:[#allocation5 + $0x90] sm:$0xf0]  ;;  %v2177_v29 = vmul.f32 %v13446_v3, %v2164_v54  ;;  %v12657_v58 = vld [vmem:[#allocation5 + $0x94] sm:$0xf0]  ;;  %v2176_v44 = vmul.f32 %v13448_v63, %v2119_v11  ;;  %v12650_v34 = vld [vmem:[#allocation5 + $0x64] sm:$0xf]  ;;  %v10099_v62 = vor.u32 %v12652_v61, %v10098_v6 }
 0x24c   : > { %3061 = vmatpush.bf16.msrb.mxu3 %v10175_v33  ;;  %v12655_v33 = vld [vmem:[#allocation5 + $0x8c] sm:$0xf]  ;;  %v10119_v32 = vor.u32 %v12654_v39, %v10116_v35  ;;  %v10123_v50 = vor.u32 %v12657_v58, %v10122_v60  ;;  %v10100_v13 = vld [vmem:[#allocation5 + $0x70] sm:$0xf0]  ;;  %v10108_v49 = vld [vmem:[#allocation5 + $0x78] sm:$0xf0] }
 0x24d   : > { %v10127_v55 = vor.u32 %v12655_v33, %v10124_v51  ;;  %v15028_v40 = vpack.c.bf16 %v2177_v29, %v2176_v44  ;;  %v12651_v52 = vld [vmem:[#allocation5 + $0x6c] sm:$0xf]  ;;  %v10103_v30 = vor.u32 %v12650_v34, %v10100_v13  ;;  %v12646_v0 = vld [vmem:[#allocation5 + $0x44] sm:$0xf]  ;;  %v10084_v5 = vld [vmem:[#allocation5 + $0x50] sm:$0xf0] }
 0x24e   : > { %3020 = vmatpush.bf16.msrb.mxu0 %v10147_v16  ;;  %v10106_v16 = vld [vmem:[#allocation5 + $0x68] sm:$0xf]  ;;  %v10111_v36 = vor.u32 %v12651_v52, %v10108_v49  ;;  %v12649_v27 = vld [vmem:[#allocation5 + $0x54] sm:$0xf0]  ;;  %v12647_v3 = vld [vmem:[#allocation5 + $0x4c] sm:$0xf]  ;;  %v10087_v41 = vor.u32 %v12646_v0, %v10084_v5 }
 0x24f   : > { %3034 = vmatpush.bf16.msrb.mxu1 %v10151_v28  ;;  %3048 = vmatpush.bf16.msrb.mxu2 %v10155_v19  ;;  %v12653_v28 = vld [vmem:[#allocation5 + $0x74] sm:$0xf0]  ;;  %v10082_v19 = vld [vmem:[#allocation5 + $0x40] sm:$0xf]  ;;  %v10090_v1 = vld [vmem:[#allocation5 + $0x48] sm:$0xf] }
 0x250   : > { %3062 = vmatpush.bf16.msrb.mxu3 %v10159_v38  ;;  %v12648_v38 = vld [vmem:[#allocation5 + $0x4c] sm:$0xf0]  ;;  %v10107_v47 = vor.u32 %v12653_v28, %v10106_v16  ;;  %v10092_v10 = vld [vmem:[#allocation5 + $0x58] sm:$0xf0]  ;;  %v10091_v46 = vor.u32 %v12649_v27, %v10090_v1  ;;  %v12642_v12 = vld [vmem:[#allocation5 + $0x24] sm:$0xf] }
 0x251   : > { %v10083_v2 = vor.u32 %v12648_v38, %v10082_v19  ;;  %v12644_v17 = vld [vmem:[#allocation5 + $0x2c] sm:$0xf0]  ;;  %v10068_v9 = vld [vmem:[#allocation5 + $0x30] sm:$0xf0]  ;;  %v10074_v63 = vld [vmem:[#allocation5 + $0x28] sm:$0xf] }
 0x252   : > { %3021 = vmatpush.bf16.msrb.mxu0 %v10131_v18  ;;  %v10066_v18 = vld [vmem:[#allocation5 + $0x20] sm:$0xf]  ;;  %v12645_v54 = vld [vmem:[#allocation5 + $0x34] sm:$0xf0]  ;;  %v10071_v35 = vor.u32 %v12642_v12, %v10068_v9  ;;  %v12640_v29 = vld [vmem:[#allocation5 + $0xc] sm:$0xf0] }
 0x253   : > { %3035 = vmatpush.bf16.msrb.mxu1 %v10135_v37  ;;  %3049 = vmatpush.bf16.msrb.mxu2 %v10139_v8  ;;  %v10095_v37 = vor.u32 %v12647_v3, %v10092_v10  ;;  %v12643_v8 = vld [vmem:[#allocation5 + $0x2c] sm:$0xf]  ;;  %v10067_v39 = vor.u32 %v12644_v17, %v10066_v18  ;;  %v10050_v60 = vld [vmem:[#allocation5] sm:$0xf]  ;;  %v10075_v58 = vor.u32 %v12645_v54, %v10074_v63  ;;  %v12638_v51 = vld [vmem:[#allocation5 + $0x4] sm:$0xf] }
 0x254   : > { %3063 = vmatpush.bf16.msrb.mxu3 %v10143_v15  ;;  %2633 = vmatmul.bf16.vlgmr.msra.gmra.mxu0 %v15028_v40  ;;  %v10076_v15 = vld [vmem:[#allocation5 + $0x38] sm:$0xf0]  ;;  %v10052_v11 = vld [vmem:[#allocation5 + $0x10] sm:$0xf0]  ;;  %v12641_v44 = vld [vmem:[#allocation5 + $0x14] sm:$0xf0]  ;;  %v10051_v61 = vor.u32 %v12640_v29, %v10050_v60 }
 0x255   : > { %2647 = vmatmul.bf16.vlgmr.msra.gmra.mxu1 %v15028_v40  ;;  %2661 = vmatmul.bf16.vlgmr.msra.gmra.mxu2 %v15028_v40  ;;  %v10079_v33 = vor.u32 %v12643_v8, %v10076_v15  ;;  %v10060_v6 = vld [vmem:[#allocation5 + $0x18] sm:$0xf0]  ;;  %v10296_v13 = vld [vmem:[#allocation10 + $0xe0] sm:$0xf]  ;;  %v12732_v16 = vld [vmem:[#allocation10 + $0xec] sm:$0xf0] }
 0x256   : > { %3022 = vmatpush.bf16.msrb.mxu0 %v10115_v59  ;;  %2675 = vmatmul.bf16.vlgmr.msra.gmra.mxu3 %v15028_v40  ;;  %v10058_v59 = vld [vmem:[#allocation5 + $0x8] sm:$0xf]  ;;  %v12730_v28 = vld [vmem:[#allocation10 + $0xe4] sm:$0xf]  ;;  %v10297_v52 = vor.u32 %v12732_v16, %v10296_v13  ;;  %v10298_v49 = vld [vmem:[#allocation10 + $0xf0] sm:$0xf0] }
 0x257   : > { %3036 = vmatpush.bf16.msrb.mxu1 %v10119_v32  ;;  %3050 = vmatpush.bf16.msrb.mxu2 %v10123_v50  ;;  %v12639_v32 = vld [vmem:[#allocation5 + $0xc] sm:$0xf]  ;;  %v10055_v50 = vor.u32 %v12638_v51, %v10052_v11  ;;  %v10301_v19 = vor.u32 %v12730_v28, %v10298_v49  ;;  %v10280_v27 = vld [vmem:[#allocation10 + $0xc0] sm:$0xf]  ;;  %v12726_v3 = vld [vmem:[#allocation10 + $0xc4] sm:$0xf] }
 0x258   : > { %3064 = vmatpush.bf16.msrb.mxu3 %v10127_v55  ;;  %v10059_v55 = vor.u32 %v12641_v44, %v10058_v59  ;;  %v10063_v34 = vor.u32 %v12639_v32, %v10060_v6  ;;  %v12729_v18 = vld [vmem:[#allocation10 + $0xd4] sm:$0xf0]  ;;  %v10290_v12 = vld [vmem:[#allocation10 + $0xd8] sm:$0xf0]  ;;  %v10264_v63 = vld [vmem:[#allocation10 + $0xa0] sm:$0xf] }
 0x259   : > { %v12724_v54 = vld [vmem:[#allocation10 + $0xac] sm:$0xf0]  ;;  %v12722_v8 = vld [vmem:[#allocation10 + $0xa4] sm:$0xf]  ;;  %v12725_v60 = vld [vmem:[#allocation10 + $0xb4] sm:$0xf0] }
 0x25a   : > { %3023 = vmatpush.bf16.msrb.mxu0 %v10099_v62  ;;  %v10304_v62 = vld [vmem:[#allocation10 + $0xe8] sm:$0xf]  ;;  %v10265_v15 = vor.u32 %v12724_v54, %v10264_v63  ;;  %v10274_v51 = vld [vmem:[#allocation10 + $0xb8] sm:$0xf0]  ;;  %v10248_v6 = vld [vmem:[#allocation10 + $0x80] sm:$0xf] }
 0x25b   : > { %3037 = vmatpush.bf16.msrb.mxu1 %v10103_v30  ;;  %3051 = vmatpush.bf16.msrb.mxu2 %v10107_v47  ;;  %v12733_v30 = vld [vmem:[#allocation10 + $0xf4] sm:$0xf0]  ;;  %v12731_v47 = vld [vmem:[#allocation10 + $0xec] sm:$0xf]  ;;  %v10256_v13 = vld [vmem:[#allocation10 + $0x88] sm:$0xf] }
 0x25c   : > { %3065 = vmatpush.bf16.msrb.mxu3 %v10111_v36  ;;  %v10305_v38 = vor.u32 %v12733_v30, %v10304_v62  ;;  %v10306_v36 = vld [vmem:[#allocation10 + $0xf8] sm:$0xf0]  ;;  %v12721_v16 = vld [vmem:[#allocation10 + $0x94] sm:$0xf0]  ;;  %v12719_v49 = vld [vmem:[#allocation10 + $0x8c] sm:$0xf] }
 0x25d   : > { %v10309_v5 = vor.u32 %v12731_v47, %v10306_v36  ;;  %v10258_v62 = vld [vmem:[#allocation10 + $0x98] sm:$0xf0] }
 0x25e   : > { %3024 = vmatpush.bf16.msrb.mxu0 %v10083_v2  ;;  %v10282_v2 = vld [vmem:[#allocation10 + $0xd0] sm:$0xf0]  ;;  %v10261_v30 = vor.u32 %v12719_v49, %v10258_v62  ;;  %v10242_v63 = vld [vmem:[#allocation10 + $0x78] sm:$0xf0] }
 0x25f   : > { %3038 = vmatpush.bf16.msrb.mxu1 %v10087_v41  ;;  %3052 = vmatpush.bf16.msrb.mxu2 %v10091_v46  ;;  %v10288_v41 = vld [vmem:[#allocation10 + $0xc8] sm:$0xf]  ;;  %v10285_v17 = vor.u32 %v12726_v3, %v10282_v2  ;;  %v12714_v3 = vld [vmem:[#allocation10 + $0x64] sm:$0xf] }
 0x260   : > { %3066 = vmatpush.bf16.msrb.mxu3 %v10095_v37  ;;  %v10289_v46 = vor.u32 %v12729_v18, %v10288_v41  ;;  %v12727_v37 = vld [vmem:[#allocation10 + $0xcc] sm:$0xf]  ;;  %v10234_v18 = vld [vmem:[#allocation10 + $0x70] sm:$0xf0] }
 0x261   : > { %v10293_v9 = vor.u32 %v12727_v37, %v10290_v12  ;;  %v10237_v37 = vor.u32 %v12714_v3, %v10234_v18 }
 0x262   : > { %3025 = vmatpush.bf16.msrb.mxu0 %v10067_v39  ;;  %v10266_v39 = vld [vmem:[#allocation10 + $0xb0] sm:$0xf0] }
 0x263   : > { %3039 = vmatpush.bf16.msrb.mxu1 %v10071_v35  ;;  %3053 = vmatpush.bf16.msrb.mxu2 %v10075_v58  ;;  %v10272_v35 = vld [vmem:[#allocation10 + $0xa8] sm:$0xf]  ;;  %v10269_v29 = vor.u32 %v12722_v8, %v10266_v39 }
 0x264   : > { %3067 = vmatpush.bf16.msrb.mxu3 %v10079_v33  ;;  %v10273_v58 = vor.u32 %v12725_v60, %v10272_v35  ;;  %v12723_v33 = vld [vmem:[#allocation10 + $0xac] sm:$0xf]  ;;  %v12712_v35 = vld [vmem:[#allocation10 + $0x4c] sm:$0xf0] }
 0x265   : > { %v10277_v59 = vor.u32 %v12723_v33, %v10274_v51  ;;  %v12710_v33 = vld [vmem:[#allocation10 + $0x44] sm:$0xf]  ;;  %v10218_v51 = vld [vmem:[#allocation10 + $0x50] sm:$0xf0] }
 0x266   : > { %3026 = vmatpush.bf16.msrb.mxu0 %v10051_v61  ;;  %v12720_v61 = vld [vmem:[#allocation10 + $0x8c] sm:$0xf0] }
 0x267   : > { %3040 = vmatpush.bf16.msrb.mxu1 %v10055_v50  ;;  %3054 = vmatpush.bf16.msrb.mxu2 %v10059_v55  ;;  %v12718_v50 = vld [vmem:[#allocation10 + $0x84] sm:$0xf]  ;;  %v10249_v55 = vor.u32 %v12720_v61, %v10248_v6 }
 0x268   : > { %3068 = vmatpush.bf16.msrb.mxu3 %v10063_v34  ;;  %v10250_v34 = vld [vmem:[#allocation10 + $0x90] sm:$0xf0] }
 0x269   : > { %3027 = vmatmul.bf16.vlgmr.msrb.gmra.mxu0 %v15028_v40  ;;  %v10253_v28 = vor.u32 %v12718_v50, %v10250_v34  ;;  %v10221_v50 = vor.u32 %v12710_v33, %v10218_v51  ;;  %v12711_v34 = vld [vmem:[#allocation10 + $0x4c] sm:$0xf] }
 0x26a   : > { %3041 = vmatmul.bf16.vlgmr.msrb.gmra.mxu1 %v15028_v40  ;;  %3055 = vmatmul.bf16.vlgmr.msrb.gmra.mxu2 %v15028_v40 }
 0x26b   : > { %3069 = vmatmul.bf16.vlgmr.msrb.gmra.mxu3 %v15028_v40  ;;  %3440 = vmatpush.bf16.msra.mxu0 %v10297_v52  ;;  %v12728_v40 = vld [vmem:[#allocation10 + $0xcc] sm:$0xf0]  ;;  %v10257_v52 = vor.u32 %v12721_v16, %v10256_v13  ;;  %v10226_v13 = vld [vmem:[#allocation10 + $0x58] sm:$0xf0] }
 0x26c   : > { %3454 = vmatpush.bf16.msra.mxu1 %v10301_v19  ;;  %3468 = vmatpush.bf16.msra.mxu2 %v10305_v38  ;;  %v10281_v10 = vor.u32 %v12728_v40, %v10280_v27  ;;  %v10232_v27 = vld [vmem:[#allocation10 + $0x60] sm:$0xf]  ;;  %v12716_v40 = vld [vmem:[#allocation10 + $0x6c] sm:$0xf0] }
 0x26d   : > { %3482 = vmatpush.bf16.msra.mxu3 %v10309_v5  ;;  %v10233_v41 = vor.u32 %v12716_v40, %v10232_v27  ;;  %v12708_v27 = vld [vmem:[#allocation10 + $0x2c] sm:$0xf0] }
 0x26f   : > { %3441 = vmatpush.bf16.msra.mxu0 %v10281_v10 }
 0x270   : > { %3455 = vmatpush.bf16.msra.mxu1 %v10285_v17  ;;  %3469 = vmatpush.bf16.msra.mxu2 %v10289_v46  ;;  %v10240_v17 = vld [vmem:[#allocation10 + $0x68] sm:$0xf]  ;;  %v12717_v46 = vld [vmem:[#allocation10 + $0x74] sm:$0xf0] }
 0x271   : > { %3483 = vmatpush.bf16.msra.mxu3 %v10293_v9  ;;  %v10241_v12 = vor.u32 %v12717_v46, %v10240_v17  ;;  %v12715_v9 = vld [vmem:[#allocation10 + $0x6c] sm:$0xf] }
 0x273   : > { %3442 = vmatpush.bf16.msra.mxu0 %v10265_v15 }
 0x274   : > { %3456 = vmatpush.bf16.msra.mxu1 %v10269_v29  ;;  %3470 = vmatpush.bf16.msra.mxu2 %v10273_v58 }
 0x275   : > { %3484 = vmatpush.bf16.msra.mxu3 %v10277_v59  ;;  %v10224_v59 = vld [vmem:[#allocation10 + $0x48] sm:$0xf] }
 0x277   : > { %3443 = vmatpush.bf16.msra.mxu0 %v10249_v55  ;;  %v12713_v55 = vld [vmem:[#allocation10 + $0x54] sm:$0xf0] }
 0x278   : > { %3457 = vmatpush.bf16.msra.mxu1 %v10253_v28  ;;  %3471 = vmatpush.bf16.msra.mxu2 %v10257_v52  ;;  %v10225_v28 = vor.u32 %v12713_v55, %v10224_v59  ;;  %v10229_v52 = vor.u32 %v12711_v34, %v10226_v13 }
 0x279   : > { %3485 = vmatpush.bf16.msra.mxu3 %v10261_v30 }
 0x27b   : > { %3444 = vmatpush.bf16.msra.mxu0 %v10233_v41  ;;  %v10202_v41 = vld [vmem:[#allocation10 + $0x30] sm:$0xf0] }
 0x27c   : > { %3458 = vmatpush.bf16.msra.mxu1 %v10237_v37  ;;  %3472 = vmatpush.bf16.msra.mxu2 %v10241_v12 }
 0x280   : > { %3459 = vmatpush.bf16.msra.mxu1 %v10221_v50  ;;  %3473 = vmatpush.bf16.msra.mxu2 %v10225_v28 }
 0x2c1   : > { %v2418_v0 = vpop.f32.mrf.mxu0 }
 0x2c2   : > { %v15038_v1 = vpop.f32.mrf.mxu1 }
 0x2c8   : > { %v2446_v11 = vpop.f32.mrf.mxu2 }
 0x2c9   : > { %v2420_v44 = vpop.f32.mrf.mxu0  ;;  %v15042_v19 = vpop.f32.mrf.mxu3 }
 0x2ca   : > { %v15040_v32 = vpop.f32.mrf.mxu1 }
 0x2d0   : > { %v15044_v38 = vpop.f32.mrf.mxu2 }
 0x2d1   : > { %v2634_v47 = vpop.f32.mrf.mxu0  ;;  %v15049_v15 = vpop.f32.mrf.mxu3 }
 0x2d2   : > { %v2635_v36 = vadd.f32 %v2634_v47, %v2418_v0  ;;  %v2648_v5 = vpop.f32.mrf.mxu1  ;;  %v10245_v0 = vor.u32 %v12715_v9, %v10242_v63  ;;  %v10208_v9 = vld [vmem:[#allocation10 + $0x28] sm:$0xf]  ;;  %v12709_v63 = vld [vmem:[#allocation10 + $0x34] sm:$0xf0] }
 0x2d3   : > { %v2649_v2 = vadd.f32 %v2648_v5, %v15038_v1  ;;  %v10216_v1 = vld [vmem:[#allocation10 + $0x40] sm:$0xf] }
 0x2d4   : > { %v2681_v10 = vadd.f32 %v2635_v36, %v14595_v31  ;;  %3486 = vmatpush.bf16.msra.mxu3 %v10245_v0  ;;  %v10217_v58 = vor.u32 %v12712_v35, %v10216_v1  ;;  %v10200_v5 = vld [vmem:[#allocation10 + $0x20] sm:$0xf]  ;;  %v10209_v35 = vor.u32 %v12709_v63, %v10208_v9 }
 0x2d5   : > { %v2682_v8 = vadd.f32 %v2649_v2, %v14598_v43  ;;  %v12706_v2 = vld [vmem:[#allocation10 + $0x24] sm:$0xf] }
 0x2d6   : > { %v10042_v54 = vmul.f32 -1.442695, %v2681_v10  ;;  %3445 = vmatpush.bf16.msra.mxu0 %v10217_v58  ;;  %v10201_v10 = vor.u32 %v12708_v27, %v10200_v5  ;;  %v10205_v12 = vor.u32 %v12706_v2, %v10202_v41  ;;  %3474 = vmatpush.bf16.msra.mxu2 %v10209_v35  ;;  %v551_v5 = vadd.f32 %v14325_v25, %v14416_v48 }
 0x2d7   : > { %v10043_v39 = vmul.f32 -1.442695, %v2682_v8  ;;  %v10210_v8 = vld [vmem:[#allocation10 + $0x38] sm:$0xf0] }
 0x2d8   : > { %13449 = vpow2.f32 %v10042_v54  ;;  %v2662_v60 = vpop.f32.mrf.mxu2  ;;  %3487 = vmatpush.bf16.msra.mxu3 %v10229_v52  ;;  %v12707_v54 = vld [vmem:[#allocation10 + $0x2c] sm:$0xf]  ;;  %3460 = vmatpush.bf16.msra.mxu1 %v10205_v12 }
 0x2d9   : > { %v2636_v29 = vpop.f32.mrf.mxu0  ;;  %13451 = vpow2.f32 %v10043_v39  ;;  %v2663_v6 = vadd.f32 %v2662_v60, %v2446_v11  ;;  %v2676_v18 = vpop.f32.mrf.mxu3  ;;  %v500_v39 = vadd.f32 %v14315_v20, %v14413_v45  ;;  %v10213_v60 = vor.u32 %v12707_v54, %v10210_v8 }
 0x2da   : > { %v2637_v61 = vadd.f32 %v2636_v29, %v2420_v44  ;;  %v2650_v16 = vpop.f32.mrf.mxu1  ;;  %3446 = vmatpush.bf16.msra.mxu0 %v10201_v10 }
 0x2db   : > { %v2651_v62 = vadd.f32 %v2650_v16, %v15040_v32  ;;  %v2683_v47 = vadd.f32 %v2663_v6, %v14603_v56  ;;  %v2677_v6 = vadd.f32 %v2676_v18, %v15042_v19 }
 0x2dc   : > { %v2685_v49 = vadd.f32 %v2637_v61, %v14595_v31  ;;  %3488 = vmatpush.bf16.msra.mxu3 %v10213_v60 }
 0x2dd   : > { %v2686_v44 = vadd.f32 %v2651_v62, %v14598_v43  ;;  %v10044_v46 = vmul.f32 -1.442695, %v2683_v47  ;;  %v15083_v62 = vadd.f32 %v14319_v22, %v14425_v42  ;;  %v502_v22 = vadd.f32 %v14323_v24, %v14413_v45 }
 0x2de   : > { %v13450_v30 = vpop.eup %13449  ;;  %v10045_v11 = vmul.f32 -1.442695, %v2685_v49  ;;  %v549_v49 = vadd.f32 %v14317_v21, %v14416_v48 }
 0x2df   : > { %v15055_v36 = vadd.f32 1.0, %v13450_v30  ;;  %v13452_v40 = vpop.eup %13451  ;;  %v10046_v3 = vmul.f32 -1.442695, %v2686_v44  ;;  %v2684_v30 = vadd.f32 %v2677_v6, %v14626_v53 }
 0x2e0   : > { %v15058_v32 = vadd.f32 1.0, %v13452_v40  ;;  %v2664_v17 = vpop.f32.mrf.mxu2 }
 0x2e1   : > { %13453 = vrcp.f32 %v15055_v36  ;;  %v2665_v37 = vadd.f32 %v2664_v17, %v15044_v38  ;;  %v2678_v34 = vpop.f32.mrf.mxu3  ;;  %v2722_v40 = vand.u32 2147483647, %v15055_v36  ;;  %vm2718_vm9 = vweird.f32 %v15055_v36 }
 0x2e2   : > { %13455 = vpow2.f32 %v10045_v11  ;;  %v2679_v47 = vadd.f32 %v2678_v34, %v15049_v15  ;;  %v15090_v11 = vadd.f32 %v14321_v23, %v14436_v4  ;;  %v15102_v15 = vadd.f32 %v14327_v26, %v14425_v42 }
 0x2e3   : > { %13457 = vrcp.f32 %v15058_v32  ;;  %v2687_v1 = vadd.f32 %v2665_v37, %v14603_v56  ;;  %v2739_v23 = vand.u32 2147483648, %v15058_v32  ;;  %v2737_v10 = vand.u32 2147483647, %v15058_v32 }
 0x2e4   : > { %13459 = vpow2.f32 %v10046_v3  ;;  %v2724_v3 = vand.u32 2147483648, %v15055_v36  ;;  %v2688_v25 = vadd.f32 %v2679_v47, %v14626_v53  ;;  %vm2733_vm10 = vweird.f32 %v15058_v32 }
 0x2e5   : > { %13461 = vpow2.f32 %v10044_v46  ;;  %v10047_v50 = vmul.f32 -1.442695, %v2687_v1  ;;  %vm15120_vm12 = vcmp.eq.f32.partialorder %v2722_v40, 8.507059e+37  ;;  %v2740_v54 = vor.u32 1.1754944e-38, %v2739_v23 }
 0x2e6   : > { %v3028_v0 = vpop.f32.mrf.mxu0  ;;  %v2725_v8 = vor.u32 1.1754944e-38, %v2724_v3  ;;  %vm15126_vm13 = vcmp.eq.f32.partialorder %v2737_v10, 8.507059e+37  ;;  %v12704_v10 = vld [vmem:[#allocation10 + $0xc] sm:$0xf0] }
 0x2e7   : > { %v15065_v38 = vpop.eup %13453  ;;  %v3075_v29 = vadd.f32 %v3028_v0, %v500_v39  ;;  %v3042_v52 = vpop.f32.mrf.mxu1  ;;  %v12702_v0 = vld [vmem:[#allocation10 + $0x4] sm:$0xf] }
 0x2e8   : > { %v13456_v58 = vpop.eup %13455  ;;  %v2714_v33 = vmul.f32 %v15065_v38, %v15055_v36  ;;  %v3076_v21 = vadd.f32 %v3042_v52, %v549_v49  ;;  %vm2719_vm11 = vweird.f32 %v15065_v38 }
 0x2e9   : > { %v15069_v51 = vpop.eup %13457  ;;  %v15074_v61 = vadd.f32 1.0, %v13456_v58  ;;  %v10176_v13 = vmul.f32 -1.442695, %v3075_v29  ;;  %vm15140_vm15 = vmor %vm2718_vm9, %vm2719_vm11 }
 0x2ea   : > { %v13460_v59 = vpop.eup %13459  ;;  %v2729_v20 = vmul.f32 %v15069_v51, %v15058_v32  ;;  %v2715_v28 = vsub.f32 1.0, %v2714_v33  ;;  %v10177_v18 = vmul.f32 -1.442695, %v3076_v21  ;;  %vm2734_vm14 = vweird.f32 %v15069_v51 }
 0x2eb   : > { %v15076_v55 = vadd.f32 1.0, %v13460_v59  ;;  %v13462_v16 = vpop.eup %13461  ;;  %13463 = vrcp.f32 %v15074_v61  ;;  %v2767_v34 = vand.u32 2147483647, %v15074_v61  ;;  %vm15157_vm0 = vmor %vm2733_vm10, %vm2734_vm14  ;;  %vm2763_vm2 = vweird.f32 %v15074_v61 }
 0x2ec   : > { %v2730_v19 = vsub.f32 1.0, %v2729_v20  ;;  %v15092_v44 = vadd.f32 1.0, %v13462_v16  ;;  %v2716_v27 = vmul.f32 %v15065_v38, %v2715_v28  ;;  %v2769_v49 = vand.u32 2147483648, %v15074_v61  ;;  %v10424_v28 = vld [vmem:[#allocation8 + $0xe0] sm:$0xf] }
 0x2ed   : > { %13465 = vrcp.f32 %v15076_v55  ;;  %v3056_v9 = vpop.f32.mrf.mxu2  ;;  %v2784_v6 = vand.u32 2147483648, %v15076_v55  ;;  %vm2778_vm1 = vweird.f32 %v15076_v55  ;;  %v2782_v32 = vand.u32 2147483647, %v15076_v55 }
 0x2ee   : > { %13467 = vpow2.f32 %v10047_v50  ;;  %v2731_v24 = vmul.f32 %v15069_v51, %v2730_v19  ;;  %v2717_v46 = vadd.f32 %v15065_v38, %v2716_v27  ;;  %v2752_v60 = vand.u32 2147483647, %v15092_v44 }
 0x2ef   : > { %13469 = vpow2.f32 %v10176_v13  ;;  %v2754_v29 = vand.u32 2147483648, %v15092_v44  ;;  %v3030_v13 = vpop.f32.mrf.mxu0  ;;  %v3044_v16 = vpop.f32.mrf.mxu1  ;;  %v3077_v19 = vadd.f32 %v3056_v9, %v15083_v62  ;;  %vm15183_vm3 = vcmp.eq.f32.partialorder %v2767_v34, 8.507059e+37  ;;  %v10184_v62 = vld [vmem:[#allocation10] sm:$0xf]  ;;  %v12703_v34 = vld [vmem:[#allocation10 + $0xc] sm:$0xf] }
 0x2f0   : > { %13471 = vtanh.f32 %v2684_v30  ;;  %v2732_v1 = vadd.f32 %v15069_v51, %v2731_v24  ;;  %v2721_v20 = vsel %vm15140_vm15, %v15065_v38, %v2717_v46  ;;  %v3079_v21 = vadd.f32 %v3030_v13, %v502_v22 }
 0x2f1   : > { %v15107_v2 = vpop.eup %13463  ;;  %13473 = vrcp.f32 %v15092_v44  ;;  %v2726_v30 = vsel %vm15120_vm12, %v2725_v8, %v2721_v20  ;;  %v3080_v27 = vadd.f32 %v3044_v16, %v551_v5  ;;  %v10178_v46 = vmul.f32 -1.442695, %v3077_v19  ;;  %v10192_v20 = vld [vmem:[#allocation10 + $0x8] sm:$0xf] }
 0x2f2   : > { %v2759_v26 = vmul.f32 %v15107_v2, %v15074_v61  ;;  %13475 = vtanh.f32 %v2688_v25  ;;  %v2736_v52 = vsel %vm15157_vm0, %v15069_v51, %v2732_v1  ;;  %v15180_v51 = vor.u32 1.1754944e-38, %v2784_v6  ;;  %v12705_v6 = vld [vmem:[#allocation10 + $0x14] sm:$0xf0] }
 0x2f3   : > { %v15112_v41 = vpop.eup %13465  ;;  %13477 = vpow2.f32 %v10177_v18  ;;  %v2741_v22 = vsel %vm15126_vm13, %v2740_v54, %v2736_v52  ;;  %vm2764_vm4 = vweird.f32 %v15107_v2  ;;  %v10179_v37 = vmul.f32 -1.442695, %v3079_v21  ;;  %v10426_v21 = vld [vmem:[#allocation8 + $0xf0] sm:$0xf0] }
 0x2f4   : > { %v13468_v17 = vpop.eup %13467  ;;  %v2774_v12 = vmul.f32 %v15112_v41, %v15076_v55  ;;  %v2760_v39 = vsub.f32 1.0, %v2759_v26  ;;  %v3070_v26 = vpop.f32.mrf.mxu3  ;;  %vm2779_vm5 = vweird.f32 %v15112_v41  ;;  %v10180_v54 = vmul.f32 -1.442695, %v3080_v27  ;;  %vm15207_vm6 = vmor %vm2763_vm2, %vm2764_vm4  ;;  %v10432_v27 = vld [vmem:[#allocation8 + $0xe8] sm:$0xf] }
 0x2f5   : > { %v13470_v63 = vpop.eup %13469  ;;  %v15148_v50 = vadd.f32 1.0, %v13468_v17  ;;  %v10185_v8 = vor.u32 %v12704_v10, %v10184_v62  ;;  %v15201_v1 = vmul.f32 %v2741_v22, %v14797_v14  ;;  %v10194_v14 = vld [vmem:[#allocation10 + $0x18] sm:$0xf0]  ;;  %v2770_v61 = vor.u32 1.1754944e-38, %v2769_v49  ;;  %vm15225_vm7 = vmor %vm2778_vm1, %vm2779_vm5  ;;  %v12701_v10 = vld [vmem:[#allocation8 + $0xf4] sm:$0xf0] }
 0x2f6   : > { %v15132_v35 = vadd.f32 1.0, %v13470_v63  ;;  %v2775_v33 = vsub.f32 1.0, %v2774_v12  ;;  %v13472_v59 = vpop.eup %13471  ;;  %v2761_v38 = vmul.f32 %v15107_v2, %v2760_v39  ;;  %v3058_v12 = vpop.f32.mrf.mxu2  ;;  %v10186_v39 = vld [vmem:[#allocation10 + $0x10] sm:$0xf0]  ;;  %vm15234_vm8 = vcmp.eq.f32.partialorder %v2782_v32, 8.507059e+37 }
 0x2f7   : > { %v15151_v36 = vpop.eup %13473  ;;  %v2797_v5 = vand.u32 2147483647, %v15148_v50  ;;  %v15192_v18 = vmul.f32 %v13472_v59, %v2726_v30  ;;  %v3078_v59 = vadd.f32 %v3070_v26, %v15090_v11  ;;  %v3081_v16 = vadd.f32 %v3058_v12, %v15102_v15  ;;  %3447 = vmatpush.bf16.msra.mxu0 %v10185_v8  ;;  %v12698_v15 = vld [vmem:[#allocation8 + $0xe4] sm:$0xf]  ;;  %v10434_v22 = vld [vmem:[#allocation8 + $0xf8] sm:$0xf0] }
 0x2f8   : > { %13479 = vrcp.f32 %v15132_v35  ;;  %v2776_v47 = vmul.f32 %v15112_v41, %v2775_v33  ;;  %v15174_v40 = vpop.eup %13475  ;;  %v15178_v23 = vmul.f32 %v15151_v36, %v15092_v44  ;;  %v2762_v25 = vadd.f32 %v15107_v2, %v2761_v38  ;;  %v12700_v38 = vld [vmem:[#allocation8 + $0xec] sm:$0xf0] }
 0x2f9   : > { %13481 = vrcp.f32 %v15148_v50  ;;  %v13478_v24 = vpop.eup %13477  ;;  %v3118_v49 = vand.u32 2147483648, %v15132_v35  ;;  %v10189_v55 = vor.u32 %v12702_v0, %v10186_v39  ;;  %vm3112_vm9 = vweird.f32 %v15132_v35  ;;  %v12694_v0 = vld [vmem:[#allocation8 + $0xc4] sm:$0xf]  ;;  %v10410_v39 = vld [vmem:[#allocation8 + $0xd0] sm:$0xf0] }
 0x2fa   : > { %v15194_v17 = vadd.f32 1.0, %v13478_v24  ;;  %v2777_v63 = vadd.f32 %v15112_v41, %v2776_v47  ;;  %v2766_v13 = vsel %vm15207_vm6, %v15107_v2, %v2762_v25  ;;  %v3116_v2 = vand.u32 2147483647, %v15132_v35  ;;  %v12699_v24 = vld [vmem:[#allocation8 + $0xec] sm:$0xf] }
 0x2fb   : > { %v2771_v62 = vsel %vm15183_vm3, %v2770_v61, %v2766_v13  ;;  %v10181_v32 = vmul.f32 -1.442695, %v3081_v16  ;;  %3461 = vmatpush.bf16.msra.mxu1 %v10189_v55  ;;  %v10193_v25 = vor.u32 %v12705_v6, %v10192_v20  ;;  %v10197_v26 = vor.u32 %v12703_v34, %v10194_v14  ;;  %v12697_v34 = vld [vmem:[#allocation8 + $0xd4] sm:$0xf0] }
 0x2fc   : > { %13483 = vrcp.f32 %v15194_v17  ;;  %v2781_v30 = vsel %vm15225_vm7, %v15112_v41, %v2777_v63  ;;  %vm15248_vm11 = vcmp.eq.f32.partialorder %v3116_v2, 8.507059e+37  ;;  %v10425_v8 = vor.u32 %v12700_v38, %v10424_v28 }
 0x2fd   : > { %13485 = vpow2.f32 %v10179_v37  ;;  %v12696_v37 = vld [vmem:[#allocation8 + $0xcc] sm:$0xf0]  ;;  %v2786_v3 = vsel %vm15234_vm8, %v15180_v51, %v2781_v30  ;;  %3475 = vmatpush.bf16.msra.mxu2 %v10193_v25  ;;  %3489 = vmatpush.bf16.msra.mxu3 %v10197_v26  ;;  %v10429_v6 = vor.u32 %v12698_v15, %v10426_v21  ;;  %v10416_v51 = vld [vmem:[#allocation8 + $0xc8] sm:$0xf]  ;;  %v10433_v61 = vor.u32 %v12701_v10, %v10432_v27  ;;  %v10418_v25 = vld [vmem:[#allocation8 + $0xd8] sm:$0xf0] }
 0x2fe   : > { %v15196_v9 = vpop.eup %13479  ;;  %13487 = vpow2.f32 %v10178_v46  ;;  %v10408_v46 = vld [vmem:[#allocation8 + $0xc0] sm:$0xf]  ;;  %3656 = vmatpush.bf16.msrb.mxu0 %v10425_v8  ;;  %v10437_v16 = vor.u32 %v12699_v24, %v10434_v22  ;;  %v10413_v2 = vor.u32 %v12694_v0, %v10410_v39  ;;  %v10417_v30 = vor.u32 %v12697_v34, %v10416_v51  ;;  %v17915_v27 = vld [vmem:[#allocation58_spill] sm:$0xff]  ;;  %v12690_v8 = vld [vmem:[#allocation8 + $0xa4] sm:$0xf] }
 0x2ff   : > { %v3108_v33 = vmul.f32 %v15196_v9, %v15132_v35  ;;  %v15219_v52 = vpop.eup %13481  ;;  %13489 = vpow2.f32 %v10180_v54  ;;  %vm3113_vm10 = vweird.f32 %v15196_v9  ;;  %v3119_v54 = vor.u32 1.1754944e-38, %v3118_v49  ;;  %3670 = vmatpush.bf16.msrb.mxu1 %v10429_v6  ;;  %v10394_v0 = vld [vmem:[#allocation8 + $0xb0] sm:$0xf0]  ;;  %v10400_v6 = vld [vmem:[#allocation8 + $0xa8] sm:$0xf] }
 0x300   : > { %13491 = vtanh.f32 %v3078_v59  ;;  %v3133_v59 = vand.u32 2147483648, %v15194_v17  ;;  %vm3114_vm12 = vmor %vm3112_vm9, %vm3113_vm10  ;;  %v10409_v28 = vor.u32 %v12696_v37, %v10408_v46  ;;  %v2789_v21 = vmul.f32 %v15219_v52, %v15148_v50  ;;  %v12692_v37 = vld [vmem:[#allocation8 + $0xac] sm:$0xf0] }
 0x301   : > { %v3109_v19 = vsub.f32 1.0, %v3108_v33  ;;  %13493 = vpow2.f32 %v10181_v32  ;;  %3684 = vmatpush.bf16.msrb.mxu2 %v10433_v61  ;;  %3698 = vmatpush.bf16.msrb.mxu3 %v10437_v16  ;;  %v2806_v10 = vmul.f32 %v2786_v3, %v17915_v27  ;;  %v2808_v24 = vmul.f32 %v15174_v40, %v2771_v62  ;;  %v12695_v32 = vld [vmem:[#allocation8 + $0xcc] sm:$0xf]  ;;  %v10392_v62 = vld [vmem:[#allocation8 + $0xa0] sm:$0xf] }
 0x302   : > { %v15243_v12 = vpop.eup %13483  ;;  %3657 = vmatpush.bf16.msrb.mxu0 %v10409_v28  ;;  %v2745_v22 = vsub.f32 1.0, %v15178_v23  ;;  %vm3127_vm14 = vweird.f32 %v15194_v17  ;;  %v2799_v26 = vand.u32 2147483648, %v15148_v50  ;;  %v3134_v40 = vor.u32 1.1754944e-38, %v3133_v59  ;;  %v12691_v61 = vld [vmem:[#allocation8 + $0xac] sm:$0xf] }
 0x303   : > { %v3110_v41 = vmul.f32 %v15196_v9, %v3109_v19  ;;  %v13486_v58 = vpop.eup %13485  ;;  %v3123_v33 = vmul.f32 %v15243_v12, %v15194_v17  ;;  %vm3128_vm13 = vweird.f32 %v15243_v12  ;;  %3671 = vmatpush.bf16.msrb.mxu1 %v10413_v2  ;;  %v15290_v63 = vadd.f32 %v15192_v18, %v15201_v1  ;;  %v12693_v18 = vld [vmem:[#allocation8 + $0xb4] sm:$0xf0]  ;;  %v10402_v16 = vld [vmem:[#allocation8 + $0xb8] sm:$0xf0]  ;;  %v12684_v46 = vld [vmem:[#allocation8 + $0x6c] sm:$0xf0] }
 0x304   : > { %v13488_v14 = vpop.eup %13487  ;;  %v15260_v13 = vadd.f32 1.0, %v13486_v58  ;;  %vm15282_vm15 = vmor %vm3127_vm14, %vm3128_vm13  ;;  %v15299_v58 = vor.u32 1.1754944e-38, %v2754_v29  ;;  %v15301_v59 = vadd.f32 %v2808_v24, %v2806_v10  ;;  %v15304_v1 = vmul.f32 %v15151_v36, %v2745_v22  ;;  %v10376_v29 = vld [vmem:[#allocation8 + $0x80] sm:$0xf]  ;;  %v12689_v22 = vld [vmem:[#allocation8 + $0x94] sm:$0xf0] }
 0x305   : > { %v3111_v20 = vadd.f32 %v15196_v9, %v3110_v41  ;;  %v13490_v38 = vpop.eup %13489  ;;  %v3124_v11 = vsub.f32 1.0, %v3123_v33  ;;  %3685 = vmatpush.bf16.msrb.mxu2 %v10417_v30  ;;  %v2790_v33 = vsub.f32 1.0, %v2789_v21  ;;  %v15306_v51 = vadd.f32 1.0, %v13488_v14  ;;  %v10384_v21 = vld [vmem:[#allocation8 + $0x88] sm:$0xf] }
 0x306   : > { %v13492_v49 = vpop.eup %13491  ;;  %13495 = vrcp.f32 %v15260_v13  ;;  %v15266_v35 = vadd.f32 1.0, %v13490_v38  ;;  %vm2749_vm1 = vweird.f32 %v15151_v36  ;;  %v15314_v38 = vor.u32 1.1754944e-38, %v2799_v26  ;;  %v10360_v26 = vld [vmem:[#allocation8 + $0x60] sm:$0xf] }
 0x307   : > { %v3115_v19 = vsel %vm3114_vm12, %v15196_v9, %v3111_v20  ;;  %v3125_v47 = vmul.f32 %v15243_v12, %v3124_v11  ;;  %v3131_v9 = vand.u32 2147483647, %v15194_v17  ;;  %v13494_v23 = vpop.eup %13493  ;;  %v17918_v17 = vld [vmem:[#allocation17_spill] sm:$0xff]  ;;  %v10421_v2 = vor.u32 %v12695_v32, %v10418_v25 }
 0x308   : > { %v3120_v15 = vsel %vm15248_vm11, %v3119_v54, %v3115_v19  ;;  %13497 = vrcp.f32 %v15266_v35  ;;  %v649_v3 = vadd.f32 %v17918_v17, %v14436_v4  ;;  %v15316_v11 = vadd.f32 1.0, %v13494_v23  ;;  %v3072_v19 = vpop.f32.mrf.mxu3  ;;  %v12682_v23 = vld [vmem:[#allocation8 + $0x64] sm:$0xf] }
 0x309   : > { %v3201_v55 = vmul.f32 %v13492_v49, %v3120_v15  ;;  %v3126_v41 = vadd.f32 %v15243_v12, %v3125_v47  ;;  %vm3132_vm0 = vcmp.eq.f32.partialorder %v3131_v9, 8.507059e+37  ;;  %v10393_v14 = vor.u32 %v12692_v37, %v10392_v62  ;;  %v12688_v49 = vld [vmem:[#allocation8 + $0x8c] sm:$0xf0]  ;;  %v12686_v15 = vld [vmem:[#allocation8 + $0x84] sm:$0xf]  ;;  %3699 = vmatpush.bf16.msrb.mxu3 %v10421_v2 }
 0x30a   : > { %13499 = vtanh.f32 %v15290_v63  ;;  %v10378_v9 = vld [vmem:[#allocation8 + $0x90] sm:$0xf0]  ;;  %vm2748_vm2 = vweird.f32 %v15092_v44  ;;  %v2791_v27 = vmul.f32 %v15219_v52, %v2790_v33  ;;  %v10397_v10 = vor.u32 %v12690_v8, %v10394_v0  ;;  %v10368_v33 = vld [vmem:[#allocation8 + $0x68] sm:$0xf] }
 0x30b   : > { %v3130_v54 = vsel %vm15282_vm15, %v15243_v12, %v3126_v41  ;;  %13501 = vtanh.f32 %v15301_v59  ;;  %3658 = vmatpush.bf16.msrb.mxu0 %v10393_v14  ;;  %v10401_v24 = vor.u32 %v12693_v18, %v10400_v6  ;;  %v12687_v41 = vld [vmem:[#allocation8 + $0x8c] sm:$0xf]  ;;  %v3082_v25 = vadd.f32 %v3072_v19, %v649_v3  ;;  %v10362_v0 = vld [vmem:[#allocation8 + $0x70] sm:$0xf0]  ;;  %v12680_v14 = vld [vmem:[#allocation8 + $0x4c] sm:$0xf0] }
 0x30c   : > { %v15295_v39 = vpop.eup %13495  ;;  %v3135_v20 = vsel %vm3132_vm0, %v3134_v40, %v3130_v54  ;;  %13503 = vrcp.f32 %v15306_v51  ;;  %vm3157_vm3 = vweird.f32 %v15260_v13  ;;  %3672 = vmatpush.bf16.msrb.mxu1 %v10397_v10  ;;  %v10405_v62 = vor.u32 %v12691_v61, %v10402_v16  ;;  %v10344_v61 = vld [vmem:[#allocation8 + $0x40] sm:$0xf]  ;;  %vm15386_vm11 = vmor %vm2748_vm2, %vm2749_vm1 }
 0x30d   : > { %v3199_v12 = vmul.f32 %v3135_v20, %v14877_v57  ;;  %v3153_v34 = vmul.f32 %v15295_v39, %v15260_v13  ;;  %13505 = vrcp.f32 %v15316_v11  ;;  %3686 = vmatpush.bf16.msrb.mxu2 %v10401_v24  ;;  %v10377_v37 = vor.u32 %v12688_v49, %v10376_v29  ;;  %v12685_v20 = vld [vmem:[#allocation8 + $0x74] sm:$0xf0]  ;;  %v15346_v49 = vld [vmem:[#allocation8 + $0x44] sm:$0xf]  ;;  %v10346_v24 = vld [vmem:[#allocation8 + $0x50] sm:$0xf0] }
 0x30e   : > { %v15311_v28 = vpop.eup %13497  ;;  %vm15332_vm4 = vcmp.eq.f32.partialorder %v2752_v60, 8.507059e+37  ;;  %vm3158_vm5 = vweird.f32 %v15295_v39  ;;  %v10381_v54 = vor.u32 %v12686_v15, %v10378_v9  ;;  %v10385_v8 = vor.u32 %v12689_v22, %v10384_v21  ;;  %3700 = vmatpush.bf16.msrb.mxu3 %v10405_v62  ;;  %v12679_v62 = vld [vmem:[#allocation8 + $0x4c] sm:$0xf] }
 0x30f   : > { %v15319_v57 = vadd.f32 %v3201_v55, %v3199_v12  ;;  %v3154_v30 = vsub.f32 1.0, %v3153_v34  ;;  %v3168_v47 = vmul.f32 %v15311_v28, %v15266_v35  ;;  %v10386_v55 = vld [vmem:[#allocation8 + $0x98] sm:$0xf0]  ;;  %vm3173_vm6 = vweird.f32 %v15311_v28  ;;  %3659 = vmatpush.bf16.msrb.mxu0 %v10377_v37  ;;  %v12683_v12 = vld [vmem:[#allocation8 + $0x6c] sm:$0xf]  ;;  %vm15354_vm8 = vmor %vm3157_vm3, %vm3158_vm5 }
 0x310   : > { %v10389_v18 = vor.u32 %v12687_v41, %v10386_v55  ;;  %v10361_v60 = vor.u32 %v12684_v46, %v10360_v26  ;;  %v10370_v34 = vld [vmem:[#allocation8 + $0x78] sm:$0xf0]  ;;  %v15340_v16 = vpop.eup %13499  ;;  %vm3172_vm7 = vweird.f32 %v15266_v35  ;;  %v3178_v29 = vand.u32 2147483648, %v15266_v35  ;;  %3673 = vmatpush.bf16.msrb.mxu1 %v10381_v54  ;;  %v10352_v26 = vld [vmem:[#allocation8 + $0x48] sm:$0xf] }
 0x311   : > { %v3169_v32 = vsub.f32 1.0, %v3168_v47  ;;  %v3155_v40 = vmul.f32 %v15295_v39, %v3154_v30  ;;  %v3163_v19 = vand.u32 2147483648, %v15260_v13  ;;  %v15348_v15 = vpop.eup %13501  ;;  %v3161_v47 = vand.u32 2147483647, %v15260_v13  ;;  %3687 = vmatpush.bf16.msrb.mxu2 %v10385_v8  ;;  %vm15370_vm10 = vmor %vm3172_vm7, %vm3173_vm6  ;;  %v12681_v46 = vld [vmem:[#allocation8 + $0x54] sm:$0xf0] }
 0x312   : > { %v3176_v9 = vand.u32 2147483647, %v15266_v35  ;;  %v10365_v21 = vor.u32 %v12682_v23, %v10362_v0  ;;  %v10369_v10 = vor.u32 %v12685_v20, %v10368_v33  ;;  %v15360_v22 = vpop.eup %13503  ;;  %v2747_v41 = vadd.f32 %v15151_v36, %v15304_v1  ;;  %3701 = vmatpush.bf16.msrb.mxu3 %v10389_v18  ;;  %v10354_v37 = vld [vmem:[#allocation8 + $0x58] sm:$0xf0]  ;;  %v12674_v0 = vld [vmem:[#allocation8 + $0x24] sm:$0xf] }
 0x313   : > { %v3170_v3 = vmul.f32 %v15311_v28, %v3169_v32  ;;  %v3156_v6 = vadd.f32 %v15295_v39, %v3155_v40  ;;  %v2792_v55 = vadd.f32 %v15219_v52, %v2791_v27  ;;  %vm2794_vm9 = vweird.f32 %v15219_v52  ;;  %v15377_v40 = vpop.eup %13505  ;;  %3660 = vmatpush.bf16.msrb.mxu0 %v10361_v60  ;;  %v10330_v18 = vld [vmem:[#allocation8 + $0x30] sm:$0xf0]  ;;  %v10336_v60 = vld [vmem:[#allocation8 + $0x28] sm:$0xf]  ;;  %v10312_v30 = vld [vmem:[#allocation8] sm:$0xf] }
 0x314   : > { %13507 = vtanh.f32 %v3082_v25  ;;  %v10373_v35 = vor.u32 %v12683_v12, %v10370_v34  ;;  %v10345_v27 = vor.u32 %v12680_v14, %v10344_v61  ;;  %vm2793_vm12 = vweird.f32 %v15148_v50  ;;  %v12676_v25 = vld [vmem:[#allocation8 + $0x2c] sm:$0xf0]  ;;  %3674 = vmatpush.bf16.msrb.mxu1 %v10365_v21  ;;  %v12677_v12 = vld [vmem:[#allocation8 + $0x34] sm:$0xf0]  ;;  %v10314_v13 = vld [vmem:[#allocation8 + $0x10] sm:$0xf0] }
 0x315   : > { %v3171_v2 = vadd.f32 %v15311_v28, %v3170_v3  ;;  %v3160_v32 = vsel %vm15354_vm8, %v15295_v39, %v3156_v6  ;;  %v3179_v23 = vor.u32 1.1754944e-38, %v3178_v29  ;;  %v3164_v3 = vor.u32 1.1754944e-38, %v3163_v19  ;;  %vm15393_vm13 = vmor %vm2793_vm12, %vm2794_vm9  ;;  %3688 = vmatpush.bf16.msrb.mxu2 %v10369_v10  ;;  %v12675_v29 = vld [vmem:[#allocation8 + $0x2c] sm:$0xf]  ;;  %v10338_v19 = vld [vmem:[#allocation8 + $0x38] sm:$0xf0] }
 0x316   : > { %vm3162_vm14 = vcmp.eq.f32.partialorder %v3161_v47, 8.507059e+37  ;;  %vm3177_vm15 = vcmp.eq.f32.partialorder %v3176_v9, 8.507059e+37  ;;  %v10349_v44 = vor.u32 %v15346_v49, %v10346_v24  ;;  %v10353_v8 = vor.u32 %v12681_v46, %v10352_v26  ;;  %3702 = vmatpush.bf16.msrb.mxu3 %v10373_v35  ;;  %v12672_v47 = vld [vmem:[#allocation8 + $0xc] sm:$0xf0]  ;;  %v10320_v26 = vld [vmem:[#allocation8 + $0x8] sm:$0xf] }
 0x317   : > { %v3175_v1 = vsel %vm15370_vm10, %v15311_v28, %v3171_v2  ;;  %v10328_v28 = vld [vmem:[#allocation8 + $0x20] sm:$0xf]  ;;  %v3165_v33 = vsel %vm3162_vm14, %v3164_v3, %v3160_v32  ;;  %v10357_v6 = vor.u32 %v12679_v62, %v10354_v37  ;;  %v2751_v34 = vsel %vm15386_vm11, %v15151_v36, %v2747_v41  ;;  %3661 = vmatpush.bf16.msrb.mxu0 %v10345_v27  ;;  %v12673_v46 = vld [vmem:[#allocation8 + $0x14] sm:$0xf0]  ;;  %v10322_v27 = vld [vmem:[#allocation8 + $0x18] sm:$0xf0] }
 0x318   : > { %v3180_v20 = vsel %vm3177_vm15, %v3179_v23, %v3175_v1  ;;  %vm2798_vm0 = vcmp.eq.f32.partialorder %v2797_v5, 8.507059e+37  ;;  %v10329_v61 = vor.u32 %v12676_v25, %v10328_v28  ;;  %v2756_v2 = vsel %vm15332_vm4, %v15299_v58, %v2751_v34  ;;  %3675 = vmatpush.bf16.msrb.mxu1 %v10349_v44  ;;  %v12671_v1 = vld [vmem:[#allocation8 + $0xc] sm:$0xf]  ;;  %v10558_v62 = vld [vmem:[#allocation5 + $0xe0] sm:$0xf] }
 0x319   : > { %v2796_v14 = vsel %vm15393_vm13, %v15219_v52, %v2792_v55  ;;  %v3138_v49 = vmul.f32 %v15360_v22, %v15306_v51  ;;  %v3183_v50 = vmul.f32 %v15377_v40, %v15316_v11  ;;  %v2813_v5 = vmul.f32 %v15340_v16, %v2756_v2  ;;  %3689 = vmatpush.bf16.msrb.mxu2 %v10353_v8  ;;  %v12670_v55 = vld [vmem:[#allocation8 + $0x4] sm:$0xf]  ;;  %v12764_v39 = vld [vmem:[#allocation5 + $0xec] sm:$0xf0]  ;;  %v10560_v28 = vld [vmem:[#allocation5 + $0xf0] sm:$0xf0] }
 0x31a   : > { %v2801_v36 = vsel %vm2798_vm0, %v15314_v38, %v2796_v14  ;;  %v13508_v9 = vpop.eup %13507  ;;  %v10333_v58 = vor.u32 %v12674_v0, %v10330_v18  ;;  %v10337_v17 = vor.u32 %v12677_v12, %v10336_v60  ;;  %v3200_v52 = vmul.f32 %v3180_v20, %v14988_v7  ;;  %3703 = vmatpush.bf16.msrb.mxu3 %v10357_v6  ;;  %v12762_v23 = vld [vmem:[#allocation5 + $0xe4] sm:$0xf]  ;;  %v10566_v25 = vld [vmem:[#allocation5 + $0xe8] sm:$0xf]  ;;  %v12765_v54 = vld [vmem:[#allocation5 + $0xf4] sm:$0xf0] }
 0x31b   : > { %v2814_v21 = vmul.f32 %v15348_v15, %v2801_v36  ;;  %v3202_v10 = vmul.f32 %v13508_v9, %v3165_v33  ;;  %v10341_v24 = vor.u32 %v12675_v29, %v10338_v19  ;;  %v2815_v41 = vpack.c.bf16 %v2813_v5, %v2813_v5  ;;  %3662 = vmatpush.bf16.msrb.mxu0 %v10329_v61  ;;  %v12763_v33 = vld [vmem:[#allocation5 + $0xec] sm:$0xf]  ;;  %v10568_v20 = vld [vmem:[#allocation5 + $0xf8] sm:$0xf0]  ;;  %v10542_v29 = vld [vmem:[#allocation5 + $0xc0] sm:$0xf] }
 0x31c   : > { %v10313_v32 = vor.u32 %v12672_v47, %v10312_v30  ;;  %v3184_v35 = vsub.f32 1.0, %v3183_v50  ;;  %v3139_v15 = vsub.f32 1.0, %v3138_v49  ;;  %3676 = vmatpush.bf16.msrb.mxu1 %v10333_v58  ;;  %v10317_v8 = vor.u32 %v12670_v55, %v10314_v13  ;;  %v12760_v19 = vld [vmem:[#allocation5 + $0xcc] sm:$0xf0]  ;;  %v12758_v2 = vld [vmem:[#allocation5 + $0xc4] sm:$0xf] }
 0x31d   : > { %v2816_v38 = vpack.c.bf16 %v2814_v21, %v2814_v21  ;;  %v13223_v16 = vpack.c.bf16 %v2814_v21, %v2813_v5  ;;  %3690 = vmatpush.bf16.msrb.mxu2 %v10337_v17  ;;  %v3276_v7 = vunpack.c.l.b16 %v2815_v41  ;;  %v15418_v3 = vadd.f32 %v3202_v10, %v3200_v52  ;;  %v10544_v50 = vld [vmem:[#allocation5 + $0xd0] sm:$0xf0]  ;;  %v10550_v36 = vld [vmem:[#allocation5 + $0xc8] sm:$0xf]  ;;  %v12761_v5 = vld [vmem:[#allocation5 + $0xd4] sm:$0xf0] }
 0x31e   : > { %3704 = vmatpush.bf16.msrb.mxu3 %v10341_v24  ;;  %v10321_v0 = vor.u32 %v12673_v46, %v10320_v26  ;;  %v3146_v6 = vand.u32 2147483647, %v15306_v51  ;;  %v3185_v18 = vmul.f32 %v15377_v40, %v3184_v35  ;;  %v10325_v60 = vor.u32 %v12671_v1, %v10322_v27  ;;  %v12759_v47 = vld [vmem:[#allocation5 + $0xcc] sm:$0xf]  ;;  %v10552_v9 = vld [vmem:[#allocation5 + $0xd8] sm:$0xf0] }
 0x31f   : > { %13255 = vst [vmem:[%s14192_s19 + $0x8] sm:$0xff] %v13223_v16   ;;  %v3277_v37 = vunpack.c.l.b16 %v2816_v38  ;;  %3663 = vmatpush.bf16.msrb.mxu0 %v10313_v32  ;;  %v10559_v12 = vor.u32 %v12764_v39, %v10558_v62  ;;  %v10563_v34 = vor.u32 %v12762_v23, %v10560_v28  ;;  %v10567_v61 = vor.u32 %v12765_v54, %v10566_v25  ;;  %v10526_v24 = vld [vmem:[#allocation5 + $0xa0] sm:$0xf]  ;;  %v12756_v41 = vld [vmem:[#allocation5 + $0xac] sm:$0xf0] }
 0x320   : > { %v3140_v14 = vmul.f32 %v15360_v22, %v3139_v15  ;;  %v10571_v49 = vor.u32 %v12763_v33, %v10568_v20  ;;  %v3191_v30 = vand.u32 2147483647, %v15316_v11  ;;  %13509 = vtanh.f32 %v15418_v3  ;;  %3677 = vmatpush.bf16.msrb.mxu1 %v10317_v8  ;;  %v12754_v55 = vld [vmem:[#allocation5 + $0xa4] sm:$0xf]  ;;  %v10528_v16 = vld [vmem:[#allocation5 + $0xb0] sm:$0xf0] }
 0x321   : > { %v3278_v44 = vpack.c.b16 %v3277_v37, %v3276_v7  ;;  %3691 = vmatpush.bf16.msrb.mxu2 %v10321_v0  ;;  %v3186_v58 = vadd.f32 %v15377_v40, %v3185_v18  ;;  %vm3188_vm1 = vweird.f32 %v15377_v40  ;;  %v3193_v17 = vand.u32 2147483648, %v15316_v11  ;;  %v10534_v32 = vld [vmem:[#allocation5 + $0xa8] sm:$0xf]  ;;  %v12757_v26 = vld [vmem:[#allocation5 + $0xb4] sm:$0xf0] }
 0x322   : > { %3705 = vmatpush.bf16.msrb.mxu3 %v10325_v60  ;;  %v10543_v21 = vor.u32 %v12760_v19, %v10542_v29  ;;  %vm3143_vm2 = vweird.f32 %v15360_v22  ;;  %13511 = vtanh.f32 %v15319_v57  ;;  %v10547_v52 = vor.u32 %v12758_v2, %v10544_v50  ;;  %v12755_v35 = vld [vmem:[#allocation5 + $0xac] sm:$0xf]  ;;  %v10536_v27 = vld [vmem:[#allocation5 + $0xb8] sm:$0xf0]  ;;  %v10510_v25 = vld [vmem:[#allocation5 + $0x80] sm:$0xf] }
 0x323   : > { %3448 = vmatmul.bf16.vlgmr.msra.gmra.mxu0 %v3278_v44  ;;  %3462 = vmatmul.bf16.vlgmr.msra.gmra.mxu1 %v3278_v44  ;;  %v10551_v10 = vor.u32 %v12761_v5, %v10550_v36  ;;  %v3141_v13 = vadd.f32 %v15360_v22, %v3140_v14  ;;  %vm3187_vm3 = vweird.f32 %v15316_v11  ;;  %v10555_v38 = vor.u32 %v12759_v47, %v10552_v9  ;;  %v12752_v54 = vld [vmem:[#allocation5 + $0x8c] sm:$0xf0]  ;;  %v10512_v0 = vld [vmem:[#allocation5 + $0x90] sm:$0xf0]  ;;  %v10518_v33 = vld [vmem:[#allocation5 + $0x88] sm:$0xf] }
 0x324   : > { %3476 = vmatmul.bf16.vlgmr.msra.gmra.mxu2 %v3278_v44  ;;  %3490 = vmatmul.bf16.vlgmr.msra.gmra.mxu3 %v3278_v44  ;;  %vm3142_vm4 = vweird.f32 %v15306_v51  ;;  %v3148_v46 = vand.u32 2147483648, %v15306_v51  ;;  %vm15436_vm5 = vmor %vm3187_vm3, %vm3188_vm1  ;;  %vm15449_vm7 = vcmp.eq.f32.partialorder %v3191_v30, 8.507059e+37  ;;  %v3194_v7 = vor.u32 1.1754944e-38, %v3193_v17  ;;  %v12750_v44 = vld [vmem:[#allocation5 + $0x84] sm:$0xf] }
 0x325   : > { %4050 = vmatpush.bf16.msra.mxu0 %v10559_v12  ;;  %4064 = vmatpush.bf16.msra.mxu1 %v10563_v34  ;;  %vm15442_vm6 = vmor %vm3142_vm4, %vm3143_vm2  ;;  %v3190_v62 = vsel %vm15436_vm5, %v15377_v40, %v3186_v58  ;;  %v10527_v37 = vor.u32 %v12756_v41, %v10526_v24  ;;  %v10531_v23 = vor.u32 %v12754_v55, %v10528_v16  ;;  %v12753_v20 = vld [vmem:[#allocation5 + $0x94] sm:$0xf0]  ;;  %v12751_v34 = vld [vmem:[#allocation5 + $0x8c] sm:$0xf]  ;;  %vm3147_vm8 = vcmp.eq.f32.partialorder %v3146_v6, 8.507059e+37 }
 0x326   : > { %4078 = vmatpush.bf16.msra.mxu2 %v10567_v61  ;;  %4092 = vmatpush.bf16.msra.mxu3 %v10571_v49  ;;  %v13510_v39 = vpop.eup %13509  ;;  %v10535_v28 = vor.u32 %v12757_v26, %v10534_v32  ;;  %v3145_v8 = vsel %vm15442_vm6, %v15360_v22, %v3141_v13  ;;  %v10539_v40 = vor.u32 %v12755_v35, %v10536_v27  ;;  %v3149_v60 = vor.u32 1.1754944e-38, %v3148_v46  ;;  %v10520_v61 = vld [vmem:[#allocation5 + $0x98] sm:$0xf0]  ;;  %v10494_v49 = vld [vmem:[#allocation5 + $0x60] sm:$0xf] }
 0x327   : > { %v3195_v12 = vsel %vm15449_vm7, %v3194_v7, %v3190_v62  ;;  %v10511_v19 = vor.u32 %v12752_v54, %v10510_v25  ;;  %v10515_v22 = vor.u32 %v12750_v44, %v10512_v0  ;;  %v10519_v14 = vor.u32 %v12753_v20, %v10518_v33  ;;  %v12748_v50 = vld [vmem:[#allocation5 + $0x6c] sm:$0xf0]  ;;  %v12746_v36 = vld [vmem:[#allocation5 + $0x64] sm:$0xf]  ;;  %v10496_v47 = vld [vmem:[#allocation5 + $0x70] sm:$0xf0] }
 0x328   : > { %v13512_v18 = vpop.eup %13511  ;;  %v3208_v29 = vmul.f32 %v13510_v39, %v3195_v12  ;;  %v3150_v2 = vsel %vm3147_vm8, %v3149_v60, %v3145_v8  ;;  %v10523_v30 = vor.u32 %v12751_v34, %v10520_v61  ;;  %v10502_v9 = vld [vmem:[#allocation5 + $0x68] sm:$0xf]  ;;  %v12749_v58 = vld [vmem:[#allocation5 + $0x74] sm:$0xf0]  ;;  %v12747_v17 = vld [vmem:[#allocation5 + $0x6c] sm:$0xf] }
 0x329   : > { %4051 = vmatpush.bf16.msra.mxu0 %v10543_v21  ;;  %4065 = vmatpush.bf16.msra.mxu1 %v10547_v52  ;;  %v3207_v5 = vmul.f32 %v13512_v18, %v3150_v2  ;;  %v10504_v51 = vld [vmem:[#allocation5 + $0x78] sm:$0xf0]  ;;  %v10495_v21 = vor.u32 %v12748_v50, %v10494_v49  ;;  %v10499_v52 = vor.u32 %v12746_v36, %v10496_v47  ;;  %v10478_v24 = vld [vmem:[#allocation5 + $0x40] sm:$0xf]  ;;  %v12744_v41 = vld [vmem:[#allocation5 + $0x4c] sm:$0xf0] }
 0x32a   : > { %4079 = vmatpush.bf16.msra.mxu2 %v10551_v10  ;;  %4093 = vmatpush.bf16.msra.mxu3 %v10555_v38  ;;  %v10503_v10 = vor.u32 %v12749_v58, %v10502_v9  ;;  %v12742_v55 = vld [vmem:[#allocation5 + $0x44] sm:$0xf]  ;;  %v10507_v13 = vor.u32 %v12747_v17, %v10504_v51  ;;  %v10480_v38 = vld [vmem:[#allocation5 + $0x50] sm:$0xf0]  ;;  %v10486_v16 = vld [vmem:[#allocation5 + $0x48] sm:$0xf]  ;;  %v10479_v1 = vor.u32 %v12744_v41, %v10478_v24 }
 0x32b   : > { %v15460_v6 = vpack.c.bf16 %v3208_v29, %v3207_v5  ;;  %v12745_v32 = vld [vmem:[#allocation5 + $0x54] sm:$0xf0]  ;;  %v12743_v26 = vld [vmem:[#allocation5 + $0x4c] sm:$0xf]  ;;  %v10488_v46 = vld [vmem:[#allocation5 + $0x58] sm:$0xf0]  ;;  %v10483_v35 = vor.u32 %v12742_v55, %v10480_v38 }
 0x32c   : > { %v10487_v27 = vor.u32 %v12745_v32, %v10486_v16  ;;  %v10462_v11 = vld [vmem:[#allocation5 + $0x20] sm:$0xf]  ;;  %v12740_v62 = vld [vmem:[#allocation5 + $0x2c] sm:$0xf0]  ;;  %v12738_v15 = vld [vmem:[#allocation5 + $0x24] sm:$0xf]  ;;  %v10491_v7 = vor.u32 %v12743_v26, %v10488_v46 }
 0x32d   : > { %4052 = vmatpush.bf16.msra.mxu0 %v10527_v37  ;;  %4066 = vmatpush.bf16.msra.mxu1 %v10531_v23  ;;  %v10464_v37 = vld [vmem:[#allocation5 + $0x30] sm:$0xf0]  ;;  %v10470_v39 = vld [vmem:[#allocation5 + $0x28] sm:$0xf]  ;;  %v12741_v23 = vld [vmem:[#allocation5 + $0x34] sm:$0xf0]  ;;  %v10463_v54 = vor.u32 %v12740_v62, %v10462_v11 }
 0x32e   : > { %4080 = vmatpush.bf16.msra.mxu2 %v10535_v28  ;;  %4094 = vmatpush.bf16.msra.mxu3 %v10539_v40  ;;  %v12739_v28 = vld [vmem:[#allocation5 + $0x2c] sm:$0xf]  ;;  %v10472_v25 = vld [vmem:[#allocation5 + $0x38] sm:$0xf0]  ;;  %v10467_v44 = vor.u32 %v12738_v15, %v10464_v37  ;;  %v10471_v8 = vor.u32 %v12741_v23, %v10470_v39  ;;  %v10446_v40 = vld [vmem:[#allocation5] sm:$0xf] }
 0x32f   : > { %v12736_v0 = vld [vmem:[#allocation5 + $0xc] sm:$0xf0]  ;;  %v12734_v33 = vld [vmem:[#allocation5 + $0x4] sm:$0xf]  ;;  %v10475_v20 = vor.u32 %v12739_v28, %v10472_v25  ;;  %v10448_v18 = vld [vmem:[#allocation5 + $0x10] sm:$0xf0] }
 0x330   : > { %v10454_v60 = vld [vmem:[#allocation5 + $0x8] sm:$0xf]  ;;  %v12737_v12 = vld [vmem:[#allocation5 + $0x14] sm:$0xf0]  ;;  %v12735_v34 = vld [vmem:[#allocation5 + $0xc] sm:$0xf]  ;;  %v10447_v29 = vor.u32 %v12736_v0, %v10446_v40 }
 0x331   : > { %4053 = vmatpush.bf16.msra.mxu0 %v10511_v19  ;;  %4067 = vmatpush.bf16.msra.mxu1 %v10515_v22  ;;  %v10456_v61 = vld [vmem:[#allocation5 + $0x18] sm:$0xf0]  ;;  %v10451_v19 = vor.u32 %v12734_v33, %v10448_v18  ;;  %v10455_v2 = vor.u32 %v12737_v12, %v10454_v60  ;;  %v12828_v49 = vld [vmem:[#allocation10 + $0xec] sm:$0xf0]  ;;  %v12826_v50 = vld [vmem:[#allocation10 + $0xe4] sm:$0xf] }
 0x332   : > { %4081 = vmatpush.bf16.msra.mxu2 %v10519_v14  ;;  %4095 = vmatpush.bf16.msra.mxu3 %v10523_v30  ;;  %v10459_v22 = vor.u32 %v12735_v34, %v10456_v61  ;;  %v10692_v14 = vld [vmem:[#allocation10 + $0xe0] sm:$0xf]  ;;  %v10694_v5 = vld [vmem:[#allocation10 + $0xf0] sm:$0xf0]  ;;  %v10700_v30 = vld [vmem:[#allocation10 + $0xe8] sm:$0xf] }
 0x333   : > { %3664 = vmatmul.bf16.vlgmr.msrb.gmra.mxu0 %v15460_v6  ;;  %3678 = vmatmul.bf16.vlgmr.msrb.gmra.mxu1 %v15460_v6  ;;  %v10693_v36 = vor.u32 %v12828_v49, %v10692_v14  ;;  %v12829_v47 = vld [vmem:[#allocation10 + $0xf4] sm:$0xf0]  ;;  %v10697_v9 = vor.u32 %v12826_v50, %v10694_v5  ;;  %v12827_v17 = vld [vmem:[#allocation10 + $0xec] sm:$0xf]  ;;  %v10702_v51 = vld [vmem:[#allocation10 + $0xf8] sm:$0xf0] }
 0x334   : > { %3692 = vmatmul.bf16.vlgmr.msrb.gmra.mxu2 %v15460_v6  ;;  %3706 = vmatmul.bf16.vlgmr.msrb.gmra.mxu3 %v15460_v6  ;;  %v10701_v58 = vor.u32 %v12829_v47, %v10700_v30  ;;  %v10676_v24 = vld [vmem:[#allocation10 + $0xc0] sm:$0xf]  ;;  %v12822_v41 = vld [vmem:[#allocation10 + $0xc4] sm:$0xf]  ;;  %v10684_v38 = vld [vmem:[#allocation10 + $0xc8] sm:$0xf] }
 0x335   : > { %4054 = vmatpush.bf16.msra.mxu0 %v10495_v21  ;;  %4068 = vmatpush.bf16.msra.mxu1 %v10499_v52  ;;  %v10705_v21 = vor.u32 %v12827_v17, %v10702_v51  ;;  %v12825_v16 = vld [vmem:[#allocation10 + $0xd4] sm:$0xf0]  ;;  %v12823_v46 = vld [vmem:[#allocation10 + $0xcc] sm:$0xf]  ;;  %v12820_v11 = vld [vmem:[#allocation10 + $0xac] sm:$0xf0] }
 0x336   : > { %4082 = vmatpush.bf16.msra.mxu2 %v10503_v10  ;;  %4096 = vmatpush.bf16.msra.mxu3 %v10507_v13  ;;  %v10678_v13 = vld [vmem:[#allocation10 + $0xd0] sm:$0xf0]  ;;  %v10685_v26 = vor.u32 %v12825_v16, %v10684_v38  ;;  %v12818_v62 = vld [vmem:[#allocation10 + $0xa4] sm:$0xf]  ;;  %v10668_v37 = vld [vmem:[#allocation10 + $0xa8] sm:$0xf] }
 0x337   : > { %v10681_v32 = vor.u32 %v12822_v41, %v10678_v13  ;;  %v12821_v39 = vld [vmem:[#allocation10 + $0xb4] sm:$0xf0]  ;;  %v12819_v25 = vld [vmem:[#allocation10 + $0xac] sm:$0xf]  ;;  %v10644_v33 = vld [vmem:[#allocation10 + $0x80] sm:$0xf] }
 0x338   : > { %v10669_v28 = vor.u32 %v12821_v39, %v10668_v37  ;;  %v12814_v18 = vld [vmem:[#allocation10 + $0x84] sm:$0xf]  ;;  %v10646_v12 = vld [vmem:[#allocation10 + $0x90] sm:$0xf0]  ;;  %v10652_v34 = vld [vmem:[#allocation10 + $0x88] sm:$0xf] }
 0x339   : > { %4055 = vmatpush.bf16.msra.mxu0 %v10479_v1  ;;  %4069 = vmatpush.bf16.msra.mxu1 %v10483_v35  ;;  %v10686_v1 = vld [vmem:[#allocation10 + $0xd8] sm:$0xf0]  ;;  %v12817_v61 = vld [vmem:[#allocation10 + $0x94] sm:$0xf0]  ;;  %v10628_v47 = vld [vmem:[#allocation10 + $0x60] sm:$0xf] }
 0x33a   : > { %4083 = vmatpush.bf16.msra.mxu2 %v10487_v27  ;;  %4097 = vmatpush.bf16.msra.mxu3 %v10491_v7  ;;  %v10689_v35 = vor.u32 %v12823_v46, %v10686_v1  ;;  %v10660_v27 = vld [vmem:[#allocation10 + $0xa0] sm:$0xf]  ;;  %v10662_v7 = vld [vmem:[#allocation10 + $0xb0] sm:$0xf0]  ;;  %v12811_v38 = vld [vmem:[#allocation10 + $0x6c] sm:$0xf] }
 0x33b   : > { %v10661_v15 = vor.u32 %v12820_v11, %v10660_v27  ;;  %v10665_v23 = vor.u32 %v12818_v62, %v10662_v7  ;;  %v10638_v16 = vld [vmem:[#allocation10 + $0x78] sm:$0xf0]  ;;  %v12808_v1 = vld [vmem:[#allocation10 + $0x4c] sm:$0xf0]  ;;  %v12806_v11 = vld [vmem:[#allocation10 + $0x44] sm:$0xf] }
 0x33c   : > { %v10614_v62 = vld [vmem:[#allocation10 + $0x50] sm:$0xf0] }
 0x33d   : > { %4056 = vmatpush.bf16.msra.mxu0 %v10463_v54  ;;  %4070 = vmatpush.bf16.msra.mxu1 %v10467_v44  ;;  %v10670_v54 = vld [vmem:[#allocation10 + $0xb8] sm:$0xf0] }
 0x33e   : > { %4084 = vmatpush.bf16.msra.mxu2 %v10471_v8  ;;  %4098 = vmatpush.bf16.msra.mxu3 %v10475_v20  ;;  %v10673_v8 = vor.u32 %v12819_v25, %v10670_v54  ;;  %v12816_v20 = vld [vmem:[#allocation10 + $0x8c] sm:$0xf0]  ;;  %v12807_v25 = vld [vmem:[#allocation10 + $0x4c] sm:$0xf]  ;;  %v10622_v54 = vld [vmem:[#allocation10 + $0x58] sm:$0xf0] }
 0x33f   : > { %v10645_v60 = vor.u32 %v12816_v20, %v10644_v33 }
 0x341   : > { %4057 = vmatpush.bf16.msra.mxu0 %v10447_v29  ;;  %4071 = vmatpush.bf16.msra.mxu1 %v10451_v19  ;;  %v10649_v29 = vor.u32 %v12814_v18, %v10646_v12  ;;  %v10653_v19 = vor.u32 %v12817_v61, %v10652_v34  ;;  %v10625_v18 = vor.u32 %v12807_v25, %v10622_v54 }
 0x342   : > { %4085 = vmatpush.bf16.msra.mxu2 %v10455_v2  ;;  %4099 = vmatpush.bf16.msra.mxu3 %v10459_v22  ;;  %v12815_v2 = vld [vmem:[#allocation10 + $0x8c] sm:$0xf]  ;;  %v10654_v22 = vld [vmem:[#allocation10 + $0x98] sm:$0xf0] }
 0x343   : > { %v10657_v14 = vor.u32 %v12815_v2, %v10654_v22  ;;  %v10596_v2 = vld [vmem:[#allocation10 + $0x20] sm:$0xf] }
 0x344   : > { %4058 = vmatmul.bf16.vlgmr.msra.gmra.mxu0 %v15460_v6  ;;  %4072 = vmatmul.bf16.vlgmr.msra.gmra.mxu1 %v15460_v6 }
 0x345   : > { %4086 = vmatmul.bf16.vlgmr.msra.gmra.mxu2 %v15460_v6  ;;  %4100 = vmatmul.bf16.vlgmr.msra.gmra.mxu3 %v15460_v6  ;;  %v12824_v6 = vld [vmem:[#allocation10 + $0xcc] sm:$0xf0] }
 0x346   : > { %4471 = vmatpush.bf16.msrb.mxu0 %v10693_v36  ;;  %4485 = vmatpush.bf16.msrb.mxu1 %v10697_v9  ;;  %v10677_v55 = vor.u32 %v12824_v6, %v10676_v24  ;;  %v12812_v9 = vld [vmem:[#allocation10 + $0x6c] sm:$0xf0]  ;;  %v10636_v24 = vld [vmem:[#allocation10 + $0x68] sm:$0xf]  ;;  %v12813_v6 = vld [vmem:[#allocation10 + $0x74] sm:$0xf0] }
 0x347   : > { %4499 = vmatpush.bf16.msrb.mxu2 %v10701_v58  ;;  %4513 = vmatpush.bf16.msrb.mxu3 %v10705_v21  ;;  %v12810_v58 = vld [vmem:[#allocation10 + $0x64] sm:$0xf]  ;;  %v10629_v51 = vor.u32 %v12812_v9, %v10628_v47  ;;  %v10630_v21 = vld [vmem:[#allocation10 + $0x70] sm:$0xf0]  ;;  %v10637_v13 = vor.u32 %v12813_v6, %v10636_v24  ;;  %v10604_v9 = vld [vmem:[#allocation10 + $0x28] sm:$0xf] }
 0x348   : > { %v10598_v47 = vld [vmem:[#allocation10 + $0x30] sm:$0xf0]  ;;  %v10580_v24 = vld [vmem:[#allocation10] sm:$0xf]  ;;  %v12800_v6 = vld [vmem:[#allocation10 + $0xc] sm:$0xf0] }
 0x34a   : > { %4472 = vmatpush.bf16.msrb.mxu0 %v10677_v55  ;;  %4486 = vmatpush.bf16.msrb.mxu1 %v10681_v32  ;;  %v10633_v55 = vor.u32 %v12810_v58, %v10630_v21  ;;  %v12805_v58 = vld [vmem:[#allocation10 + $0x34] sm:$0xf0]  ;;  %v10606_v21 = vld [vmem:[#allocation10 + $0x38] sm:$0xf0] }
 0x34b   : > { %4500 = vmatpush.bf16.msrb.mxu2 %v10685_v26  ;;  %4514 = vmatpush.bf16.msrb.mxu3 %v10689_v35 }
 0x34e   : > { %4473 = vmatpush.bf16.msrb.mxu0 %v10661_v15  ;;  %4487 = vmatpush.bf16.msrb.mxu1 %v10665_v23  ;;  %v10620_v15 = vld [vmem:[#allocation10 + $0x48] sm:$0xf]  ;;  %v10617_v23 = vor.u32 %v12806_v11, %v10614_v62 }
 0x34f   : > { %4501 = vmatpush.bf16.msrb.mxu2 %v10669_v28  ;;  %4515 = vmatpush.bf16.msrb.mxu3 %v10673_v8  ;;  %v12809_v28 = vld [vmem:[#allocation10 + $0x54] sm:$0xf0] }
 0x350   : > { %v10621_v20 = vor.u32 %v12809_v28, %v10620_v15 }
 0x352   : > { %4474 = vmatpush.bf16.msrb.mxu0 %v10645_v60  ;;  %4488 = vmatpush.bf16.msrb.mxu1 %v10649_v29 }
 0x353   : > { %4502 = vmatpush.bf16.msrb.mxu2 %v10653_v19  ;;  %4516 = vmatpush.bf16.msrb.mxu3 %v10657_v14 }
 0x356   : > { %4475 = vmatpush.bf16.msrb.mxu0 %v10629_v51  ;;  %4489 = vmatpush.bf16.msrb.mxu1 %v10633_v55  ;;  %v12803_v51 = vld [vmem:[#allocation10 + $0x2c] sm:$0xf] }
 0x357   : > { %4503 = vmatpush.bf16.msrb.mxu2 %v10637_v13 }
 0x35a   : > { %4490 = vmatpush.bf16.msrb.mxu1 %v10617_v23 }
 0x35b   : > { %4504 = vmatpush.bf16.msrb.mxu2 %v10621_v20 }
 0x3a0   : > { %v3449_v52 = vpop.f32.mrf.mxu0  ;;  %v15470_v10 = vpop.f32.mrf.mxu1 }
 0x3a7   : > { %v3477_v44 = vpop.f32.mrf.mxu2  ;;  %v15476_v49 = vpop.f32.mrf.mxu3 }
 0x3a8   : > { %v15472_v40 = vpop.f32.mrf.mxu0  ;;  %v15474_v0 = vpop.f32.mrf.mxu1 }
 0x3af   : > { %v15478_v50 = vpop.f32.mrf.mxu2  ;;  %v15483_v7 = vpop.f32.mrf.mxu3 }
 0x3b0   : > { %v3665_v36 = vpop.f32.mrf.mxu0  ;;  %v3679_v30 = vpop.f32.mrf.mxu1 }
 0x3b1   : > { %v3666_v5 = vadd.f32 %v3665_v36, %v3449_v52  ;;  %v3680_v17 = vadd.f32 %v3679_v30, %v15470_v10  ;;  %v10641_v52 = vor.u32 %v12811_v38, %v10638_v16  ;;  %v10612_v10 = vld [vmem:[#allocation10 + $0x40] sm:$0xf]  ;;  %v10605_v16 = vor.u32 %v12805_v58, %v10604_v9 }
 0x3b2   : > { %v10613_v27 = vor.u32 %v12808_v1, %v10612_v10 }
 0x3b3   : > { %v3712_v41 = vadd.f32 %v3666_v5, %v14595_v31  ;;  %v3713_v32 = vadd.f32 %v3680_v17, %v14598_v43  ;;  %4517 = vmatpush.bf16.msrb.mxu3 %v10641_v52  ;;  %v17935_v52 = vld [vmem:[#allocation18_spill] sm:$0xff]  ;;  %4505 = vmatpush.bf16.msrb.mxu2 %v10605_v16 }
 0x3b4   : > { %4476 = vmatpush.bf16.msrb.mxu0 %v10613_v27 }
 0x3b5   : > { %v10438_v26 = vmul.f32 -1.442695, %v3712_v41  ;;  %v10439_v46 = vmul.f32 -1.442695, %v3713_v32 }
 0x3b7   : > { %13513 = vpow2.f32 %v10438_v26  ;;  %v3693_v35 = vpop.f32.mrf.mxu2  ;;  %4518 = vmatpush.bf16.msrb.mxu3 %v10625_v18  ;;  %v3707_v17 = vpop.f32.mrf.mxu3  ;;  %v505_v26 = vadd.f32 %v17935_v52, %v14413_v45 }
 0x3b8   : > { %13515 = vpow2.f32 %v10439_v46  ;;  %v3694_v37 = vadd.f32 %v3693_v35, %v3477_v44  ;;  %v3667_v39 = vpop.f32.mrf.mxu0  ;;  %v3681_v33 = vpop.f32.mrf.mxu1  ;;  %v10609_v46 = vor.u32 %v12803_v51, %v10606_v21  ;;  %v10581_v35 = vor.u32 %v12800_v6, %v10580_v24 }
 0x3b9   : > { %v3668_v8 = vadd.f32 %v3667_v39, %v15472_v40  ;;  %v3682_v12 = vadd.f32 %v3681_v33, %v15474_v0  ;;  %v12804_v40 = vld [vmem:[#allocation10 + $0x2c] sm:$0xf0]  ;;  %v12802_v0 = vld [vmem:[#allocation10 + $0x24] sm:$0xf]  ;;  %v3708_v39 = vadd.f32 %v3707_v17, %v15476_v49  ;;  %v17937_v49 = vld [vmem:[#allocation20_spill] sm:$0xff] }
 0x3ba   : > { %v3714_v60 = vadd.f32 %v3694_v37, %v14603_v56  ;;  %v10597_v5 = vor.u32 %v12804_v40, %v10596_v2  ;;  %v10601_v38 = vor.u32 %v12802_v0, %v10598_v47  ;;  %v15521_v18 = vadd.f32 %v17937_v49, %v14425_v42  ;;  %v17940_v2 = vld [vmem:[#allocation23_spill] sm:$0xff] }
 0x3bb   : > { %v3716_v34 = vadd.f32 %v3668_v8, %v14595_v31  ;;  %v3717_v61 = vadd.f32 %v3682_v12, %v14598_v43  ;;  %4519 = vmatpush.bf16.msrb.mxu3 %v10609_v46  ;;  %v15532_v40 = vadd.f32 %v17940_v2, %v14416_v48 }
 0x3bc   : > { %v10440_v44 = vmul.f32 -1.442695, %v3714_v60  ;;  %4477 = vmatpush.bf16.msrb.mxu0 %v10597_v5  ;;  %4491 = vmatpush.bf16.msrb.mxu1 %v10601_v38  ;;  %v17938_v60 = vld [vmem:[#allocation21_spill] sm:$0xff] }
 0x3bd   : > { %v13514_v29 = vpop.eup %13513  ;;  %v10441_v19 = vmul.f32 -1.442695, %v3716_v34  ;;  %v10442_v36 = vmul.f32 -1.442695, %v3717_v61  ;;  %v15525_v12 = vadd.f32 %v17938_v60, %v14436_v4 }
 0x3be   : > { %v13516_v22 = vpop.eup %13515  ;;  %v15490_v14 = vadd.f32 1.0, %v13514_v29  ;;  %13517 = vpow2.f32 %v10440_v44  ;;  %v3715_v44 = vadd.f32 %v3708_v39, %v14626_v53  ;;  %v17939_v29 = vld [vmem:[#allocation22_spill] sm:$0xff] }
 0x3bf   : > { %v15492_v30 = vadd.f32 1.0, %v13516_v22  ;;  %13519 = vpow2.f32 %v10441_v19  ;;  %v3695_v55 = vpop.f32.mrf.mxu2  ;;  %v3709_v61 = vpop.f32.mrf.mxu3  ;;  %v507_v19 = vadd.f32 %v17939_v29, %v14413_v45  ;;  %v17941_v22 = vld [vmem:[#allocation24_spill] sm:$0xff] }
 0x3c0   : > { %13521 = vrcp.f32 %v15490_v14  ;;  %v3696_v11 = vadd.f32 %v3695_v55, %v15478_v50  ;;  %4478 = vmatpush.bf16.msrb.mxu0 %v10581_v35  ;;  %v17936_v50 = vld [vmem:[#allocation19_spill] sm:$0xff]  ;;  %v3753_v47 = vand.u32 2147483647, %v15490_v14  ;;  %v3755_v9 = vand.u32 2147483648, %v15490_v14 }
 0x3c1   : > { %13523 = vrcp.f32 %v15492_v30  ;;  %v4059_v13 = vpop.f32.mrf.mxu0  ;;  %v4073_v54 = vpop.f32.mrf.mxu1  ;;  %v554_v8 = vadd.f32 %v17936_v50, %v14416_v48  ;;  %v3770_v17 = vand.u32 2147483648, %v15492_v30  ;;  %v3710_v21 = vadd.f32 %v3709_v61, %v15483_v7 }
 0x3c2   : > { %13525 = vpow2.f32 %v10442_v36  ;;  %v4106_v62 = vadd.f32 %v4059_v13, %v505_v26  ;;  %v3718_v33 = vadd.f32 %v3696_v11, %v14603_v56  ;;  %v15536_v36 = vadd.f32 %v17941_v22, %v14425_v42 }
 0x3c3   : > { %v4107_v5 = vadd.f32 %v4073_v54, %v554_v8  ;;  %v3768_v6 = vand.u32 2147483647, %v15492_v30  ;;  %vm3764_vm9 = vweird.f32 %v15492_v30  ;;  %vm3749_vm10 = vweird.f32 %v15490_v14 }
 0x3c4   : > { %v13518_v41 = vpop.eup %13517  ;;  %v10572_v20 = vmul.f32 -1.442695, %v4106_v62  ;;  %v10443_v51 = vmul.f32 -1.442695, %v3718_v33  ;;  %vm15555_vm11 = vcmp.eq.f32.partialorder %v3753_v47, 8.507059e+37  ;;  %v3771_v46 = vor.u32 1.1754944e-38, %v3770_v17 }
 0x3c5   : > { %v13520_v32 = vpop.eup %13519  ;;  %v15513_v25 = vadd.f32 1.0, %v13518_v41  ;;  %v10573_v38 = vmul.f32 -1.442695, %v4107_v5  ;;  %v3719_v11 = vadd.f32 %v3710_v21, %v14626_v53  ;;  %vm15568_vm14 = vcmp.eq.f32.partialorder %v3768_v6, 8.507059e+37 }
 0x3c6   : > { %v15498_v10 = vpop.eup %13521  ;;  %v15500_v1 = vadd.f32 1.0, %v13520_v32  ;;  %v3756_v32 = vor.u32 1.1754944e-38, %v3755_v9 }
 0x3c7   : > { %v15502_v27 = vpop.eup %13523  ;;  %v3745_v37 = vmul.f32 %v15498_v10, %v15490_v14  ;;  %v3785_v13 = vand.u32 2147483648, %v15513_v25  ;;  %vm3750_vm13 = vweird.f32 %v15498_v10 }
 0x3c8   : > { %v13526_v15 = vpop.eup %13525  ;;  %13527 = vrcp.f32 %v15500_v1  ;;  %v3760_v28 = vmul.f32 %v15502_v27, %v15492_v30  ;;  %v4087_v26 = vpop.f32.mrf.mxu2  ;;  %vm3765_vm12 = vweird.f32 %v15502_v27  ;;  %v3798_v33 = vand.u32 2147483647, %v15500_v1  ;;  %vm15584_vm15 = vmor %vm3749_vm10, %vm3750_vm13 }
 0x3c9   : > { %v15509_v23 = vadd.f32 1.0, %v13526_v15  ;;  %v3746_v34 = vsub.f32 1.0, %v3745_v37  ;;  %v3783_v15 = vand.u32 2147483647, %v15513_v25  ;;  %v15572_v50 = vor.u32 1.1754944e-38, %v3785_v13  ;;  %vm15600_vm2 = vmor %vm3764_vm9, %vm3765_vm12  ;;  %v4075_v6 = vpop.f32.mrf.mxu1 }
 0x3ca   : > { %v3761_v0 = vsub.f32 1.0, %v3760_v28  ;;  %v4061_v28 = vpop.f32.mrf.mxu0  ;;  %vm3794_vm0 = vweird.f32 %v15500_v1  ;;  %vm15611_vm3 = vcmp.eq.f32.partialorder %v3798_v33, 8.507059e+37  ;;  %v10582_v13 = vld [vmem:[#allocation10 + $0x10] sm:$0xf0] }
 0x3cb   : > { %13529 = vrcp.f32 %v15509_v23  ;;  %v3747_v24 = vmul.f32 %v15498_v10, %v3746_v34  ;;  %v3815_v8 = vand.u32 2147483648, %v15509_v23  ;;  %v3800_v34 = vand.u32 2147483648, %v15500_v1 }
 0x3cc   : > { %13531 = vrcp.f32 %v15513_v25  ;;  %v3762_v7 = vmul.f32 %v15502_v27, %v3761_v0  ;;  %v4110_v22 = vadd.f32 %v4061_v28, %v507_v19  ;;  %vm3809_vm1 = vweird.f32 %v15509_v23 }
 0x3cd   : > { %13533 = vpow2.f32 %v10572_v20  ;;  %v3748_v37 = vadd.f32 %v15498_v10, %v3747_v24  ;;  %v3813_v0 = vand.u32 2147483647, %v15509_v23  ;;  %v15604_v19 = vor.u32 1.1754944e-38, %v3815_v8  ;;  %v4101_v24 = vpop.f32.mrf.mxu3 }
 0x3ce   : > { %v15541_v58 = vpop.eup %13527  ;;  %13535 = vtanh.f32 %v3715_v44  ;;  %v3763_v49 = vadd.f32 %v15502_v27, %v3762_v7  ;;  %v10575_v9 = vmul.f32 -1.442695, %v4110_v22  ;;  %v3801_v30 = vor.u32 1.1754944e-38, %v3800_v34  ;;  %v12799_v34 = vld [vmem:[#allocation10 + $0xc] sm:$0xf] }
 0x3cf   : > { %v3790_v41 = vmul.f32 %v15541_v58, %v15500_v1  ;;  %13537 = vpow2.f32 %v10443_v51  ;;  %v3752_v5 = vsel %vm15584_vm15, %v15498_v10, %v3748_v37  ;;  %v4108_v10 = vadd.f32 %v4087_v26, %v15521_v18  ;;  %v10590_v22 = vld [vmem:[#allocation10 + $0x18] sm:$0xf0] }
 0x3d0   : > { %13539 = vpow2.f32 %v10573_v38  ;;  %v3767_v17 = vsel %vm15600_vm2, %v15502_v27, %v3763_v49  ;;  %v3757_v18 = vsel %vm15555_vm11, %v3756_v32, %v3752_v5  ;;  %vm3795_vm4 = vweird.f32 %v15541_v58  ;;  %v10588_v49 = vld [vmem:[#allocation10 + $0x8] sm:$0xf] }
 0x3d1   : > { %v15549_v55 = vpop.eup %13529  ;;  %v3791_v35 = vsub.f32 1.0, %v3790_v41  ;;  %v12798_v41 = vld [vmem:[#allocation10 + $0x4] sm:$0xf]  ;;  %vm15621_vm5 = vcmp.eq.f32.partialorder %v3813_v0, 8.507059e+37  ;;  %v3772_v37 = vsel %vm15568_vm14, %v3771_v46, %v3767_v17  ;;  %v4109_v16 = vadd.f32 %v4101_v24, %v15525_v12  ;;  %vm15638_vm7 = vmor %vm3794_vm0, %vm3795_vm4 }
 0x3d2   : > { %v3805_v52 = vmul.f32 %v15549_v55, %v15509_v23  ;;  %v15562_v62 = vpop.eup %13531  ;;  %v4111_v32 = vadd.f32 %v4075_v6, %v15532_v40  ;;  %v10585_v28 = vor.u32 %v12798_v41, %v10582_v13  ;;  %vm3810_vm6 = vweird.f32 %v15549_v55  ;;  %v12796_v6 = vld [vmem:[#allocation8 + $0xec] sm:$0xf0]  ;;  %v10822_v41 = vld [vmem:[#allocation8 + $0xf0] sm:$0xf0] }
 0x3d3   : > { %v13534_v54 = vpop.eup %13533  ;;  %v3775_v61 = vmul.f32 %v15562_v62, %v15513_v25  ;;  %v3792_v2 = vmul.f32 %v15541_v58, %v3791_v35  ;;  %v10574_v29 = vmul.f32 -1.442695, %v4108_v10  ;;  %vm15661_vm8 = vmor %vm3809_vm1, %vm3810_vm6  ;;  %vm3780_vm1 = vweird.f32 %v15562_v62 }
 0x3d4   : > { %v13536_v20 = vpop.eup %13535  ;;  %v3806_v60 = vsub.f32 1.0, %v3805_v52  ;;  %v15578_v44 = vadd.f32 1.0, %v13534_v54  ;;  %4492 = vmatpush.bf16.msrb.mxu1 %v10585_v28  ;;  %vm3779_vm2 = vweird.f32 %v15513_v25 }
 0x3d5   : > { %v13538_v14 = vpop.eup %13537  ;;  %v3776_v7 = vsub.f32 1.0, %v3775_v61  ;;  %v3793_v52 = vadd.f32 %v15541_v58, %v3792_v2  ;;  %v15633_v8 = vmul.f32 %v13536_v20, %v3757_v18  ;;  %v15654_v61 = vmul.f32 %v3772_v37, %v15290_v63  ;;  %v10828_v18 = vld [vmem:[#allocation8 + $0xe8] sm:$0xf] }
 0x3d6   : > { %13541 = vrcp.f32 %v15578_v44  ;;  %v3807_v51 = vmul.f32 %v15549_v55, %v3806_v60  ;;  %v13540_v38 = vpop.eup %13539  ;;  %v15619_v27 = vadd.f32 1.0, %v13538_v14  ;;  %v12801_v60 = vld [vmem:[#allocation10 + $0x14] sm:$0xf0]  ;;  %v10576_v2 = vmul.f32 -1.442695, %v4111_v32 }
 0x3d7   : > { %13543 = vtanh.f32 %v3719_v11  ;;  %v15625_v35 = vadd.f32 1.0, %v13540_v38  ;;  %v4089_v11 = vpop.f32.mrf.mxu2  ;;  %v15645_v40 = vmul.f32 %v15562_v62, %v3776_v7  ;;  %v3797_v46 = vsel %vm15638_vm7, %v15541_v58, %v3793_v52  ;;  %v12797_v52 = vld [vmem:[#allocation8 + $0xf4] sm:$0xf0]  ;;  %v10830_v32 = vld [vmem:[#allocation8 + $0xf8] sm:$0xf0] }
 0x3d8   : > { %13545 = vpow2.f32 %v10575_v9  ;;  %v3808_v39 = vadd.f32 %v15549_v55, %v3807_v51  ;;  %v4112_v1 = vadd.f32 %v4089_v11, %v15536_v36  ;;  %v3828_v36 = vand.u32 2147483647, %v15619_v27  ;;  %v10820_v51 = vld [vmem:[#allocation8 + $0xe0] sm:$0xf] }
 0x3d9   : > { %13547 = vrcp.f32 %v15625_v35  ;;  %v4147_v0 = vand.u32 2147483647, %v15578_v44  ;;  %v3802_v14 = vsel %vm15611_vm3, %v3801_v30, %v3797_v46  ;;  %v4149_v23 = vand.u32 2147483648, %v15578_v44 }
 0x3da   : > { %13549 = vrcp.f32 %v15619_v27  ;;  %v3812_v47 = vsel %vm15661_vm8, %v15549_v55, %v3808_v39  ;;  %v10577_v17 = vmul.f32 -1.442695, %v4112_v1  ;;  %vm4143_vm10 = vweird.f32 %v15578_v44  ;;  %v12794_v55 = vld [vmem:[#allocation8 + $0xe4] sm:$0xf]  ;;  %v12792_v1 = vld [vmem:[#allocation8 + $0xcc] sm:$0xf0] }
 0x3db   : > { %13551 = vtanh.f32 %v4109_v16  ;;  %v10589_v21 = vor.u32 %v12801_v60, %v10588_v49  ;;  %v10593_v30 = vor.u32 %v12799_v34, %v10590_v22  ;;  %v3817_v13 = vsel %vm15621_vm5, %v15604_v19, %v3812_v47  ;;  %v12795_v16 = vld [vmem:[#allocation8 + $0xec] sm:$0xf]  ;;  %v12790_v47 = vld [vmem:[#allocation8 + $0xc4] sm:$0xf] }
 0x3dc   : > { %v15631_v54 = vpop.eup %13541  ;;  %13553 = vpow2.f32 %v10576_v2  ;;  %vm15695_vm12 = vcmp.eq.f32.partialorder %v4147_v0, 8.507059e+37  ;;  %v4150_v26 = vor.u32 1.1754944e-38, %v4149_v23  ;;  %v10825_v46 = vor.u32 %v12794_v55, %v10822_v41  ;;  %v10806_v23 = vld [vmem:[#allocation8 + $0xd0] sm:$0xf0] }
 0x3dd   : > { %v13544_v12 = vpop.eup %13543  ;;  %v4139_v20 = vmul.f32 %v15631_v54, %v15578_v44  ;;  %vm4144_vm9 = vweird.f32 %v15631_v54  ;;  %13555 = vpow2.f32 %v10574_v29  ;;  %4506 = vmatpush.bf16.msrb.mxu2 %v10589_v21  ;;  %4520 = vmatpush.bf16.msrb.mxu3 %v10593_v30  ;;  %v3837_v60 = vmul.f32 %v3817_v13, %v15301_v59 }
 0x3de   : > { %v13546_v63 = vpop.eup %13545  ;;  %v3839_v44 = vmul.f32 %v13544_v12, %v3802_v14  ;;  %vm15691_vm11 = vmor %vm4143_vm10, %vm4144_vm9  ;;  %v10821_v12 = vor.u32 %v12796_v6, %v10820_v51  ;;  %v4164_v34 = vand.u32 2147483648, %v15625_v35  ;;  %v4162_v2 = vand.u32 2147483647, %v15625_v35  ;;  %4701 = vmatpush.bf16.msra.mxu1 %v10825_v46  ;;  %v10790_v46 = vld [vmem:[#allocation8 + $0xb0] sm:$0xf0] }
 0x3df   : > { %v4140_v5 = vsub.f32 1.0, %v4139_v20  ;;  %v15675_v9 = vadd.f32 1.0, %v13546_v63  ;;  %v15677_v24 = vpop.eup %13547  ;;  %v10804_v20 = vld [vmem:[#allocation8 + $0xc0] sm:$0xf]  ;;  %v10829_v0 = vor.u32 %v12797_v52, %v10828_v18  ;;  %v10833_v63 = vor.u32 %v12795_v16, %v10830_v32  ;;  %v12791_v18 = vld [vmem:[#allocation8 + $0xcc] sm:$0xf] }
 0x3e0   : > { %v4154_v38 = vmul.f32 %v15677_v24, %v15625_v35  ;;  %v15687_v11 = vpop.eup %13549  ;;  %vm4159_vm13 = vweird.f32 %v15677_v24  ;;  %4687 = vmatpush.bf16.msra.mxu0 %v10821_v12  ;;  %v10805_v14 = vor.u32 %v12792_v1, %v10804_v20  ;;  %vm4158_vm14 = vweird.f32 %v15625_v35  ;;  %v10812_v35 = vld [vmem:[#allocation8 + $0xc8] sm:$0xf]  ;;  %v10814_v52 = vld [vmem:[#allocation8 + $0xd8] sm:$0xf0]  ;;  %v10788_v16 = vld [vmem:[#allocation8 + $0xa0] sm:$0xf] }
 0x3e1   : > { %v4141_v10 = vmul.f32 %v15631_v54, %v4140_v5  ;;  %13557 = vrcp.f32 %v15675_v9  ;;  %v13552_v28 = vpop.eup %13551  ;;  %v3820_v59 = vmul.f32 %v15687_v11, %v15619_v27  ;;  %v3830_v30 = vand.u32 2147483648, %v15619_v27  ;;  %vm15727_vm15 = vmor %vm4158_vm14, %vm4159_vm13  ;;  %4715 = vmatpush.bf16.msra.mxu2 %v10829_v0  ;;  %4729 = vmatpush.bf16.msra.mxu3 %v10833_v63  ;;  %v17964_v32 = vld [vmem:[#allocation25_spill] sm:$0xff]  ;;  %v12784_v0 = vld [vmem:[#allocation8 + $0x8c] sm:$0xf0] }
 0x3e2   : > { %13559 = vpow2.f32 %v10577_v17  ;;  %v4155_v33 = vsub.f32 1.0, %v4154_v38  ;;  %v13554_v49 = vpop.eup %13553  ;;  %v15717_v17 = vadd.f32 %v15633_v8, %v15654_v61  ;;  %v15723_v6 = vadd.f32 %v3839_v44, %v3837_v60  ;;  %v12793_v61 = vld [vmem:[#allocation8 + $0xd4] sm:$0xf0]  ;;  %v12786_v12 = vld [vmem:[#allocation8 + $0xa4] sm:$0xf]  ;;  %vm15830_vm13 = vmor %vm3779_vm2, %vm3780_vm1 }
 0x3e3   : > { %v4142_v7 = vadd.f32 %v15631_v54, %v4141_v10  ;;  %v13556_v5 = vpop.eup %13555  ;;  %v4165_v41 = vor.u32 1.1754944e-38, %v4164_v34  ;;  %vm4163_vm0 = vcmp.eq.f32.partialorder %v4162_v2, 8.507059e+37  ;;  %v3821_v44 = vsub.f32 1.0, %v3820_v59  ;;  %v12789_v60 = vld [vmem:[#allocation8 + $0xb4] sm:$0xf0] }
 0x3e4   : > { %v4156_v22 = vmul.f32 %v15677_v24, %v4155_v33  ;;  %v15733_v13 = vadd.f32 1.0, %v13556_v5  ;;  %4688 = vmatpush.bf16.msra.mxu0 %v10805_v14  ;;  %v10813_v1 = vor.u32 %v12793_v61, %v10812_v35  ;;  %v12787_v34 = vld [vmem:[#allocation8 + $0xac] sm:$0xf]  ;;  %v10798_v5 = vld [vmem:[#allocation8 + $0xb8] sm:$0xf0]  ;;  %vm3824_vm3 = vweird.f32 %v15619_v27 }
 0x3e5   : > { %v4146_v39 = vsel %vm15691_vm11, %v15631_v54, %v4142_v7  ;;  %v15709_v54 = vadd.f32 1.0, %v13554_v49  ;;  %v10809_v7 = vor.u32 %v12790_v47, %v10806_v23  ;;  %v10796_v49 = vld [vmem:[#allocation8 + $0xa8] sm:$0xf]  ;;  %v15757_v59 = vld [vmem:[#allocation8 + $0x80] sm:$0xf]  ;;  %v3822_v63 = vmul.f32 %v15687_v11, %v3821_v44 }
 0x3e6   : > { %v4151_v29 = vsel %vm15695_vm12, %v4150_v26, %v4146_v39  ;;  %v4157_v51 = vadd.f32 %v15677_v24, %v4156_v22  ;;  %v4103_v39 = vpop.f32.mrf.mxu3  ;;  %v10817_v22 = vor.u32 %v12791_v18, %v10814_v52  ;;  %4716 = vmatpush.bf16.msra.mxu2 %v10813_v1  ;;  %v12782_v47 = vld [vmem:[#allocation8 + $0x84] sm:$0xf]  ;;  %v10774_v23 = vld [vmem:[#allocation8 + $0x90] sm:$0xf0]  ;;  %vm4188_vm4 = vweird.f32 %v15675_v9  ;;  %v10782_v35 = vld [vmem:[#allocation8 + $0x98] sm:$0xf0] }
 0x3e7   : > { %v4232_v58 = vmul.f32 %v13552_v28, %v4151_v29  ;;  %v15713_v10 = vpop.eup %13557  ;;  %13561 = vrcp.f32 %v15709_v54  ;;  %v654_v28 = vadd.f32 %v17964_v32, %v14436_v4  ;;  %4702 = vmatpush.bf16.msra.mxu1 %v10809_v7  ;;  %v10797_v55 = vor.u32 %v12789_v60, %v10796_v49  ;;  %v15781_v44 = vld [vmem:[#allocation8 + $0x60] sm:$0xf]  ;;  %v12770_v60 = vld [vmem:[#allocation8 + $0x24] sm:$0xf] }
 0x3e8   : > { %v13560_v21 = vpop.eup %13559  ;;  %v4184_v8 = vmul.f32 %v15713_v10, %v15675_v9  ;;  %v4161_v38 = vsel %vm15727_vm15, %v15677_v24, %v4157_v51  ;;  %13563 = vtanh.f32 %v15717_v17  ;;  %v12788_v24 = vld [vmem:[#allocation8 + $0xac] sm:$0xf0]  ;;  %4730 = vmatpush.bf16.msra.mxu3 %v10817_v22  ;;  %vm15769_vm5 = vcmp.eq.f32.partialorder %v3783_v15, 8.507059e+37 }
 0x3e9   : > { %v4166_v37 = vsel %vm4163_vm0, %v4165_v41, %v4161_v38  ;;  %v15738_v26 = vadd.f32 1.0, %v13560_v21  ;;  %13565 = vtanh.f32 %v15723_v6  ;;  %v10789_v51 = vor.u32 %v12788_v24, %v10788_v16  ;;  %v12785_v41 = vld [vmem:[#allocation8 + $0x94] sm:$0xf0]  ;;  %v10734_v38 = vld [vmem:[#allocation8 + $0x38] sm:$0xf0] }
 0x3ea   : > { %v4185_v19 = vsub.f32 1.0, %v4184_v8  ;;  %v4230_v33 = vmul.f32 %v4166_v37, %v15319_v57  ;;  %v15751_v57 = vadd.f32 %v15562_v62, %v15645_v40  ;;  %13567 = vrcp.f32 %v15733_v13  ;;  %v12783_v8 = vld [vmem:[#allocation8 + $0x8c] sm:$0xf]  ;;  %v15783_v37 = vld [vmem:[#allocation8 + $0x6c] sm:$0xf0]  ;;  %4717 = vmatpush.bf16.msra.mxu2 %v10797_v55 }
 0x3eb   : > { %13569 = vrcp.f32 %v15738_v26  ;;  %v4113_v40 = vadd.f32 %v4103_v39, %v654_v28  ;;  %v10793_v21 = vor.u32 %v12786_v12, %v10790_v46  ;;  %vm15775_vm6 = vcmp.eq.f32.partialorder %v3828_v36, 8.507059e+37  ;;  %4689 = vmatpush.bf16.msra.mxu0 %v10789_v51  ;;  %v12778_v28 = vld [vmem:[#allocation8 + $0x64] sm:$0xf]  ;;  %v10758_v46 = vld [vmem:[#allocation8 + $0x70] sm:$0xf0] }
 0x3ec   : > { %v4186_v20 = vmul.f32 %v15713_v10, %v4185_v19  ;;  %v15755_v2 = vadd.f32 %v4232_v58, %v4230_v33  ;;  %v15764_v58 = vld [vmem:[#allocation8 + $0x88] sm:$0xf]  ;;  %vm4189_vm7 = vweird.f32 %v15713_v10  ;;  %v10801_v52 = vor.u32 %v12787_v34, %v10798_v5  ;;  %v12781_v5 = vld [vmem:[#allocation8 + $0x74] sm:$0xf0]  ;;  %v10742_v55 = vld [vmem:[#allocation8 + $0x50] sm:$0xf0] }
 0x3ed   : > { %v15747_v29 = vpop.eup %13561  ;;  %v4192_v19 = vand.u32 2147483647, %v15675_v9  ;;  %v4194_v16 = vand.u32 2147483648, %v15675_v9  ;;  %4703 = vmatpush.bf16.msra.mxu1 %v10793_v21  ;;  %v10773_v36 = vor.u32 %v12784_v0, %v15757_v59  ;;  %v10777_v32 = vor.u32 %v12782_v47, %v10774_v23  ;;  %vm15804_vm10 = vmor %vm4188_vm4, %vm4189_vm7  ;;  %v12779_v59 = vld [vmem:[#allocation8 + $0x6c] sm:$0xf] }
 0x3ee   : > { %v4199_v14 = vmul.f32 %v15747_v29, %v15709_v54  ;;  %v4187_v18 = vadd.f32 %v15713_v10, %v4186_v20  ;;  %v15785_v15 = vpop.eup %13563  ;;  %vm4204_vm8 = vweird.f32 %v15747_v29  ;;  %v4209_v24 = vand.u32 2147483648, %v15709_v54  ;;  %v10764_v20 = vld [vmem:[#allocation8 + $0x68] sm:$0xf]  ;;  %4731 = vmatpush.bf16.msra.mxu3 %v10801_v52  ;;  %v10740_v47 = vld [vmem:[#allocation8 + $0x40] sm:$0xf] }
 0x3ef   : > { %v15790_v33 = vpop.eup %13565  ;;  %v10781_v12 = vor.u32 %v12785_v41, %v15764_v58  ;;  %v3823_v49 = vadd.f32 %v15687_v11, %v3822_v63  ;;  %vm3825_vm9 = vweird.f32 %v15687_v11  ;;  %v4207_v34 = vand.u32 2147483647, %v15709_v54  ;;  %v12776_v23 = vld [vmem:[#allocation8 + $0x4c] sm:$0xf0]  ;;  %4690 = vmatpush.bf16.msra.mxu0 %v10773_v36  ;;  %v10750_v36 = vld [vmem:[#allocation8 + $0x58] sm:$0xf0] }
 0x3f0   : > { %v4200_v7 = vsub.f32 1.0, %v4199_v14  ;;  %v15796_v1 = vpop.eup %13567  ;;  %v10785_v22 = vor.u32 %v12783_v8, %v10782_v35  ;;  %vm4203_vm11 = vweird.f32 %v15709_v54  ;;  %v4191_v63 = vsel %vm15804_vm10, %v15713_v10, %v4187_v18  ;;  %v10766_v14 = vld [vmem:[#allocation8 + $0x78] sm:$0xf0]  ;;  %vm15841_vm15 = vmor %vm3824_vm3, %vm3825_vm9  ;;  %v12766_v51 = vld [vmem:[#allocation8 + $0x4] sm:$0xf] }
 0x3f1   : > { %v15809_v0 = vpop.eup %13569  ;;  %13571 = vtanh.f32 %v4113_v40  ;;  %v3831_v58 = vor.u32 1.1754944e-38, %v3830_v30  ;;  %vm15820_vm12 = vmor %vm4203_vm11, %vm4204_vm8  ;;  %v4195_v54 = vor.u32 1.1754944e-38, %v4194_v16  ;;  %4704 = vmatpush.bf16.msra.mxu1 %v10777_v32  ;;  %v10757_v10 = vor.u32 %v15783_v37, %v15781_v44  ;;  %v12774_v40 = vld [vmem:[#allocation8 + $0x44] sm:$0xf]  ;;  %4718 = vmatpush.bf16.msra.mxu2 %v10781_v12  ;;  %v10748_v44 = vld [vmem:[#allocation8 + $0x48] sm:$0xf] }
 0x3f2   : > { %v4201_v39 = vmul.f32 %v15747_v29, %v4200_v7  ;;  %v10761_v21 = vor.u32 %v12778_v28, %v10758_v46  ;;  %v4210_v41 = vor.u32 1.1754944e-38, %v4209_v24  ;;  %vm4193_vm14 = vcmp.eq.f32.partialorder %v4192_v19, 8.507059e+37  ;;  %4732 = vmatpush.bf16.msra.mxu3 %v10785_v22  ;;  %v12775_v16 = vld [vmem:[#allocation8 + $0x4c] sm:$0xf]  ;;  %v12772_v24 = vld [vmem:[#allocation8 + $0x2c] sm:$0xf0] }
 0x3f3   : > { %v10765_v35 = vor.u32 %v12781_v5, %v10764_v20  ;;  %v15847_v25 = vmul.f32 %v15809_v0, %v15738_v26  ;;  %v4196_v18 = vsel %vm4193_vm14, %v4195_v54, %v4191_v63  ;;  %vm4208_vm0 = vcmp.eq.f32.partialorder %v4207_v34, 8.507059e+37  ;;  %4691 = vmatpush.bf16.msra.mxu0 %v10757_v10  ;;  %v10710_v10 = vld [vmem:[#allocation8 + $0x10] sm:$0xf0]  ;;  %v10718_v7 = vld [vmem:[#allocation8 + $0x18] sm:$0xf0] }
 0x3f4   : > { %v4202_v9 = vadd.f32 %v15747_v29, %v4201_v39  ;;  %v10769_v52 = vor.u32 %v12779_v59, %v10766_v14  ;;  %v10741_v37 = vor.u32 %v12776_v23, %v10740_v47  ;;  %v10745_v19 = vor.u32 %v12774_v40, %v10742_v55  ;;  %v10724_v39 = vld [vmem:[#allocation8 + $0x20] sm:$0xf]  ;;  %v12771_v59 = vld [vmem:[#allocation8 + $0x2c] sm:$0xf] }
 0x3f5   : > { %v3782_v27 = vsel %vm15830_vm13, %v15562_v62, %v15751_v57  ;;  %v3827_v32 = vsel %vm15841_vm15, %v15687_v11, %v3823_v49  ;;  %4705 = vmatpush.bf16.msra.mxu1 %v10761_v21  ;;  %v4169_v62 = vmul.f32 %v15796_v1, %v15733_v13  ;;  %4719 = vmatpush.bf16.msra.mxu2 %v10765_v35  ;;  %v10726_v11 = vld [vmem:[#allocation8 + $0x30] sm:$0xf0]  ;;  %v10732_v49 = vld [vmem:[#allocation8 + $0x28] sm:$0xf]  ;;  %v10708_v23 = vld [vmem:[#allocation8] sm:$0xf]  ;;  %vm4219_vm1 = vweird.f32 %v15809_v0 }
 0x3f6   : > { %v4206_v8 = vsel %vm15820_vm12, %v15747_v29, %v4202_v9  ;;  %v12777_v29 = vld [vmem:[#allocation8 + $0x54] sm:$0xf0]  ;;  %v3787_v12 = vsel %vm15769_vm5, %v15572_v50, %v3782_v27  ;;  %v3832_v46 = vsel %vm15775_vm6, %v3831_v58, %v3827_v32  ;;  %4733 = vmatpush.bf16.msra.mxu3 %v10769_v52  ;;  %v10753_v61 = vor.u32 %v12775_v16, %v10750_v36  ;;  %v12768_v58 = vld [vmem:[#allocation8 + $0xc] sm:$0xf0]  ;;  %v10716_v21 = vld [vmem:[#allocation8 + $0x8] sm:$0xf] }
 0x3f7   : > { %v4211_v28 = vsel %vm4208_vm0, %v4210_v41, %v4206_v8  ;;  %v13572_v20 = vpop.eup %13571  ;;  %v10749_v57 = vor.u32 %v12777_v29, %v10748_v44  ;;  %v3844_v34 = vmul.f32 %v15785_v15, %v3787_v12  ;;  %v3845_v22 = vmul.f32 %v15790_v33, %v3832_v46  ;;  %v12773_v50 = vld [vmem:[#allocation8 + $0x34] sm:$0xf0]  ;;  %4692 = vmatpush.bf16.msra.mxu0 %v10741_v37  ;;  %v12767_v8 = vld [vmem:[#allocation8 + $0xc] sm:$0xf]  ;;  %v12860_v52 = vld [vmem:[#allocation5 + $0xec] sm:$0xf0] }
 0x3f8   : > { %v4233_v5 = vmul.f32 %v13572_v20, %v4196_v18  ;;  %v4231_v63 = vmul.f32 %v4211_v28, %v15418_v3  ;;  %v4215_v54 = vsub.f32 1.0, %v15847_v25  ;;  %v10725_v15 = vor.u32 %v12772_v24, %v10724_v39  ;;  %v12769_v41 = vld [vmem:[#allocation8 + $0x14] sm:$0xf0]  ;;  %v10954_v18 = vld [vmem:[#allocation5 + $0xe0] sm:$0xf] }
 0x3f9   : > { %v3846_v9 = vpack.c.bf16 %v3844_v34, %v3844_v34  ;;  %v3847_v14 = vpack.c.bf16 %v3845_v22, %v3845_v22  ;;  %v13228_v47 = vpack.c.bf16 %v3845_v22, %v3844_v34  ;;  %4706 = vmatpush.bf16.msra.mxu1 %v10745_v19  ;;  %v10729_v33 = vor.u32 %v12770_v60, %v10726_v11  ;;  %v12858_v29 = vld [vmem:[#allocation5 + $0xe4] sm:$0xf]  ;;  %v10956_v37 = vld [vmem:[#allocation5 + $0xf0] sm:$0xf0]  ;;  %v10962_v19 = vld [vmem:[#allocation5 + $0xe8] sm:$0xf] }
 0x3fa   : > { %v4170_v40 = vsub.f32 1.0, %v4169_v62  ;;  %4720 = vmatpush.bf16.msra.mxu2 %v10749_v57  ;;  %v10733_v55 = vor.u32 %v12773_v50, %v10732_v49  ;;  %4734 = vmatpush.bf16.msra.mxu3 %v10753_v61  ;;  %v10737_v35 = vor.u32 %v12771_v59, %v10734_v38  ;;  %v15868_v25 = vadd.f32 %v4233_v5, %v4231_v63  ;;  %v12861_v32 = vld [vmem:[#allocation5 + $0xf4] sm:$0xf0]  ;;  %v12859_v28 = vld [vmem:[#allocation5 + $0xec] sm:$0xf] }
 0x3fb   : > { %13256 = vst [vmem:[%s14192_s19 + $0x10] sm:$0xff] %v13228_v47   ;;  %v4307_v3 = vunpack.c.l.b16 %v3846_v9  ;;  %v4308_v30 = vunpack.c.l.b16 %v3847_v14  ;;  %v4216_v16 = vmul.f32 %v15809_v0, %v4215_v54  ;;  %4693 = vmatpush.bf16.msra.mxu0 %v10725_v15  ;;  %v10709_v36 = vor.u32 %v12768_v58, %v10708_v23  ;;  %v10964_v39 = vld [vmem:[#allocation5 + $0xf8] sm:$0xf0]  ;;  %v10938_v11 = vld [vmem:[#allocation5 + $0xc0] sm:$0xf] }
 0x3fc   : > { %v10713_v27 = vor.u32 %v12766_v51, %v10710_v10  ;;  %v4177_v24 = vand.u32 2147483647, %v15733_v13  ;;  %v10717_v12 = vor.u32 %v12769_v41, %v10716_v21  ;;  %v10955_v46 = vor.u32 %v12860_v52, %v10954_v18  ;;  %v12856_v49 = vld [vmem:[#allocation5 + $0xcc] sm:$0xf0]  ;;  %v12854_v5 = vld [vmem:[#allocation5 + $0xc4] sm:$0xf] }
 0x3fd   : > { %v4309_v44 = vpack.c.b16 %v4308_v30, %v4307_v3  ;;  %4707 = vmatpush.bf16.msra.mxu1 %v10729_v33  ;;  %v4171_v20 = vmul.f32 %v15796_v1, %v4170_v40  ;;  %v4179_v62 = vand.u32 2147483648, %v15733_v13  ;;  %v10721_v57 = vor.u32 %v12767_v8, %v10718_v7  ;;  %v10940_v61 = vld [vmem:[#allocation5 + $0xd0] sm:$0xf0]  ;;  %v10946_v50 = vld [vmem:[#allocation5 + $0xc8] sm:$0xf] }
 0x3fe   : > { %4721 = vmatpush.bf16.msra.mxu2 %v10733_v55  ;;  %4735 = vmatpush.bf16.msra.mxu3 %v10737_v35  ;;  %v10959_v60 = vor.u32 %v12858_v29, %v10956_v37  ;;  %13573 = vtanh.f32 %v15868_v25  ;;  %v10963_v34 = vor.u32 %v12861_v32, %v10962_v19  ;;  %v10967_v22 = vor.u32 %v12859_v28, %v10964_v39  ;;  %v12857_v38 = vld [vmem:[#allocation5 + $0xd4] sm:$0xf0]  ;;  %v12855_v63 = vld [vmem:[#allocation5 + $0xcc] sm:$0xf]  ;;  %v10948_v9 = vld [vmem:[#allocation5 + $0xd8] sm:$0xf0] }
 0x3ff   : > { %4479 = vmatmul.bf16.vlgmr.msrb.gmra.mxu0 %v4309_v44  ;;  %4493 = vmatmul.bf16.vlgmr.msrb.gmra.mxu1 %v4309_v44  ;;  %v4217_v59 = vadd.f32 %v15809_v0, %v4216_v16  ;;  %13575 = vtanh.f32 %v15755_v2  ;;  %v4222_v14 = vand.u32 2147483647, %v15738_v26  ;;  %v4224_v47 = vand.u32 2147483648, %v15738_v26  ;;  %v10922_v54 = vld [vmem:[#allocation5 + $0xa0] sm:$0xf] }
 0x400   : > { %4507 = vmatmul.bf16.vlgmr.msrb.gmra.mxu2 %v4309_v44  ;;  %4521 = vmatmul.bf16.vlgmr.msrb.gmra.mxu3 %v4309_v44  ;;  %v10939_v23 = vor.u32 %v12856_v49, %v10938_v11  ;;  %v4172_v58 = vadd.f32 %v15796_v1, %v4171_v20  ;;  %vm4174_vm2 = vweird.f32 %v15796_v1  ;;  %vm4218_vm3 = vweird.f32 %v15738_v26  ;;  %v12852_v15 = vld [vmem:[#allocation5 + $0xac] sm:$0xf0]  ;;  %v12850_v33 = vld [vmem:[#allocation5 + $0xa4] sm:$0xf]  ;;  %v10924_v55 = vld [vmem:[#allocation5 + $0xb0] sm:$0xf0] }
 0x401   : > { %4694 = vmatpush.bf16.msra.mxu0 %v10709_v36  ;;  %4708 = vmatpush.bf16.msra.mxu1 %v10713_v27  ;;  %v10943_v51 = vor.u32 %v12854_v5, %v10940_v61  ;;  %vm15885_vm4 = vmor %vm4218_vm3, %vm4219_vm1  ;;  %v10947_v21 = vor.u32 %v12857_v38, %v10946_v50  ;;  %v10951_v40 = vor.u32 %v12855_v63, %v10948_v9  ;;  %v10930_v3 = vld [vmem:[#allocation5 + $0xa8] sm:$0xf]  ;;  %vm4173_vm5 = vweird.f32 %v15733_v13  ;;  %v12853_v30 = vld [vmem:[#allocation5 + $0xb4] sm:$0xf0] }
 0x402   : > { %4722 = vmatpush.bf16.msra.mxu2 %v10717_v12  ;;  %4736 = vmatpush.bf16.msra.mxu3 %v10721_v57  ;;  %v4221_v26 = vsel %vm15885_vm4, %v15809_v0, %v4217_v59  ;;  %v12851_v41 = vld [vmem:[#allocation5 + $0xac] sm:$0xf]  ;;  %v10932_v8 = vld [vmem:[#allocation5 + $0xb8] sm:$0xf0]  ;;  %vm15895_vm6 = vmor %vm4173_vm5, %vm4174_vm2  ;;  %vm15899_vm7 = vcmp.eq.f32.partialorder %v4177_v24, 8.507059e+37  ;;  %v4225_v52 = vor.u32 1.1754944e-38, %v4224_v47  ;;  %v10923_v13 = vor.u32 %v12852_v15, %v10922_v54 }
 0x403   : > { %v4176_v0 = vsel %vm15895_vm6, %v15796_v1, %v4172_v58  ;;  %v4180_v44 = vor.u32 1.1754944e-38, %v4179_v62  ;;  %vm4223_vm8 = vcmp.eq.f32.partialorder %v4222_v14, 8.507059e+37  ;;  %v10927_v29 = vor.u32 %v12850_v33, %v10924_v55  ;;  %v10906_v37 = vld [vmem:[#allocation5 + $0x80] sm:$0xf]  ;;  %v12848_v19 = vld [vmem:[#allocation5 + $0x8c] sm:$0xf0] }
 0x404   : > { %v13574_v35 = vpop.eup %13573  ;;  %v4226_v36 = vsel %vm4223_vm8, %v4225_v52, %v4221_v26  ;;  %v10931_v27 = vor.u32 %v12853_v30, %v10930_v3  ;;  %v10935_v32 = vor.u32 %v12851_v41, %v10932_v8  ;;  %v12846_v28 = vld [vmem:[#allocation5 + $0x84] sm:$0xf]  ;;  %v10908_v39 = vld [vmem:[#allocation5 + $0x90] sm:$0xf0]  ;;  %v10914_v24 = vld [vmem:[#allocation5 + $0x88] sm:$0xf]  ;;  %v10907_v62 = vor.u32 %v12848_v19, %v10906_v37 }
 0x405   : > { %5081 = vmatpush.bf16.msrb.mxu0 %v10955_v46  ;;  %5095 = vmatpush.bf16.msrb.mxu1 %v10959_v60  ;;  %v13576_v16 = vpop.eup %13575  ;;  %v4239_v12 = vmul.f32 %v13574_v35, %v4226_v36  ;;  %v12849_v46 = vld [vmem:[#allocation5 + $0x94] sm:$0xf0]  ;;  %v12847_v20 = vld [vmem:[#allocation5 + $0x8c] sm:$0xf]  ;;  %v10916_v57 = vld [vmem:[#allocation5 + $0x98] sm:$0xf0]  ;;  %v4181_v1 = vsel %vm15899_vm7, %v4180_v44, %v4176_v0  ;;  %v10911_v11 = vor.u32 %v12846_v28, %v10908_v39 }
 0x406   : > { %5109 = vmatpush.bf16.msrb.mxu2 %v10963_v34  ;;  %5123 = vmatpush.bf16.msrb.mxu3 %v10967_v22  ;;  %v4238_v60 = vmul.f32 %v13576_v16, %v4181_v1  ;;  %v10890_v49 = vld [vmem:[#allocation5 + $0x60] sm:$0xf]  ;;  %v12844_v34 = vld [vmem:[#allocation5 + $0x6c] sm:$0xf0]  ;;  %v10915_v22 = vor.u32 %v12849_v46, %v10914_v24  ;;  %v10919_v5 = vor.u32 %v12847_v20, %v10916_v57  ;;  %v12842_v61 = vld [vmem:[#allocation5 + $0x64] sm:$0xf] }
 0x407   : > { %v10892_v50 = vld [vmem:[#allocation5 + $0x70] sm:$0xf0]  ;;  %v10898_v59 = vld [vmem:[#allocation5 + $0x68] sm:$0xf]  ;;  %v12845_v63 = vld [vmem:[#allocation5 + $0x74] sm:$0xf0]  ;;  %v10891_v47 = vor.u32 %v12844_v34, %v10890_v49 }
 0x408   : > { %v15908_v38 = vpack.c.bf16 %v4239_v12, %v4238_v60  ;;  %v12843_v9 = vld [vmem:[#allocation5 + $0x6c] sm:$0xf]  ;;  %v10900_v14 = vld [vmem:[#allocation5 + $0x78] sm:$0xf0]  ;;  %v10874_v58 = vld [vmem:[#allocation5 + $0x40] sm:$0xf]  ;;  %v10899_v54 = vor.u32 %v12845_v63, %v10898_v59 }
 0x409   : > { %5082 = vmatpush.bf16.msrb.mxu0 %v10939_v23  ;;  %5096 = vmatpush.bf16.msrb.mxu1 %v10943_v51  ;;  %v10895_v23 = vor.u32 %v12842_v61, %v10892_v50  ;;  %v12840_v51 = vld [vmem:[#allocation5 + $0x4c] sm:$0xf0]  ;;  %v10903_v15 = vor.u32 %v12843_v9, %v10900_v14  ;;  %v12838_v33 = vld [vmem:[#allocation5 + $0x44] sm:$0xf]  ;;  %v10876_v10 = vld [vmem:[#allocation5 + $0x50] sm:$0xf0] }
 0x40a   : > { %5110 = vmatpush.bf16.msrb.mxu2 %v10947_v21  ;;  %5124 = vmatpush.bf16.msrb.mxu3 %v10951_v40  ;;  %v10882_v21 = vld [vmem:[#allocation5 + $0x48] sm:$0xf]  ;;  %v12841_v40 = vld [vmem:[#allocation5 + $0x54] sm:$0xf0]  ;;  %v12839_v55 = vld [vmem:[#allocation5 + $0x4c] sm:$0xf]  ;;  %v10875_v26 = vor.u32 %v12840_v51, %v10874_v58  ;;  %v10879_v30 = vor.u32 %v12838_v33, %v10876_v10 }
 0x40b   : > { %v10884_v3 = vld [vmem:[#allocation5 + $0x58] sm:$0xf0]  ;;  %v10858_v41 = vld [vmem:[#allocation5 + $0x20] sm:$0xf]  ;;  %v12836_v8 = vld [vmem:[#allocation5 + $0x2c] sm:$0xf0]  ;;  %v10883_v35 = vor.u32 %v12841_v40, %v10882_v21 }
 0x40c   : > { %v10887_v7 = vor.u32 %v12839_v55, %v10884_v3  ;;  %v12834_v18 = vld [vmem:[#allocation5 + $0x24] sm:$0xf]  ;;  %v10860_v52 = vld [vmem:[#allocation5 + $0x30] sm:$0xf0]  ;;  %v12837_v0 = vld [vmem:[#allocation5 + $0x34] sm:$0xf0]  ;;  %v10859_v37 = vor.u32 %v12836_v8, %v10858_v41 }
 0x40d   : > { %5083 = vmatpush.bf16.msrb.mxu0 %v10923_v13  ;;  %5097 = vmatpush.bf16.msrb.mxu1 %v10927_v29  ;;  %v10866_v13 = vld [vmem:[#allocation5 + $0x28] sm:$0xf]  ;;  %v12835_v44 = vld [vmem:[#allocation5 + $0x2c] sm:$0xf]  ;;  %v10868_v29 = vld [vmem:[#allocation5 + $0x38] sm:$0xf0]  ;;  %v10863_v19 = vor.u32 %v12834_v18, %v10860_v52 }
 0x40e   : > { %5111 = vmatpush.bf16.msrb.mxu2 %v10931_v27  ;;  %5125 = vmatpush.bf16.msrb.mxu3 %v10935_v32  ;;  %v10842_v16 = vld [vmem:[#allocation5] sm:$0xf]  ;;  %v12832_v36 = vld [vmem:[#allocation5 + $0xc] sm:$0xf0]  ;;  %v10867_v27 = vor.u32 %v12837_v0, %v10866_v13  ;;  %v10871_v32 = vor.u32 %v12835_v44, %v10868_v29  ;;  %v12830_v28 = vld [vmem:[#allocation5 + $0x4] sm:$0xf] }
 0x40f   : > { %4695 = vmatmul.bf16.vlgmr.msra.gmra.mxu0 %v15908_v38  ;;  %4709 = vmatmul.bf16.vlgmr.msra.gmra.mxu1 %v15908_v38  ;;  %v10844_v39 = vld [vmem:[#allocation5 + $0x10] sm:$0xf0]  ;;  %v10850_v24 = vld [vmem:[#allocation5 + $0x8] sm:$0xf]  ;;  %v12833_v12 = vld [vmem:[#allocation5 + $0x14] sm:$0xf0]  ;;  %v10843_v57 = vor.u32 %v12832_v36, %v10842_v16 }
 0x410   : > { %4723 = vmatmul.bf16.vlgmr.msra.gmra.mxu2 %v15908_v38  ;;  %4737 = vmatmul.bf16.vlgmr.msra.gmra.mxu3 %v15908_v38  ;;  %v12831_v46 = vld [vmem:[#allocation5 + $0xc] sm:$0xf]  ;;  %v10852_v20 = vld [vmem:[#allocation5 + $0x18] sm:$0xf0]  ;;  %v10847_v1 = vor.u32 %v12830_v28, %v10844_v39  ;;  %v12924_v49 = vld [vmem:[#allocation10 + $0xec] sm:$0xf0] }
 0x411   : > { %5084 = vmatpush.bf16.msrb.mxu0 %v10907_v62  ;;  %5098 = vmatpush.bf16.msrb.mxu1 %v10911_v11  ;;  %v10851_v62 = vor.u32 %v12833_v12, %v10850_v24  ;;  %v10855_v60 = vor.u32 %v12831_v46, %v10852_v20  ;;  %v11088_v11 = vld [vmem:[#allocation10 + $0xe0] sm:$0xf]  ;;  %v12922_v34 = vld [vmem:[#allocation10 + $0xe4] sm:$0xf]  ;;  %v11096_v61 = vld [vmem:[#allocation10 + $0xe8] sm:$0xf] }
 0x412   : > { %5112 = vmatpush.bf16.msrb.mxu2 %v10915_v22  ;;  %5126 = vmatpush.bf16.msrb.mxu3 %v10919_v5  ;;  %v11089_v22 = vor.u32 %v12924_v49, %v11088_v11  ;;  %v11090_v5 = vld [vmem:[#allocation10 + $0xf0] sm:$0xf0]  ;;  %v12925_v50 = vld [vmem:[#allocation10 + $0xf4] sm:$0xf0]  ;;  %v12923_v9 = vld [vmem:[#allocation10 + $0xec] sm:$0xf] }
 0x413   : > { %v11093_v59 = vor.u32 %v12922_v34, %v11090_v5  ;;  %v11097_v63 = vor.u32 %v12925_v50, %v11096_v61  ;;  %v11098_v14 = vld [vmem:[#allocation10 + $0xf8] sm:$0xf0]  ;;  %v11072_v51 = vld [vmem:[#allocation10 + $0xc0] sm:$0xf]  ;;  %v11074_v33 = vld [vmem:[#allocation10 + $0xd0] sm:$0xf0] }
 0x414   : > { %v11080_v10 = vld [vmem:[#allocation10 + $0xc8] sm:$0xf]  ;;  %v12921_v21 = vld [vmem:[#allocation10 + $0xd4] sm:$0xf0]  ;;  %v12919_v3 = vld [vmem:[#allocation10 + $0xcc] sm:$0xf] }
 0x415   : > { %5085 = vmatpush.bf16.msrb.mxu0 %v10891_v47  ;;  %5099 = vmatpush.bf16.msrb.mxu1 %v10895_v23  ;;  %v11101_v23 = vor.u32 %v12923_v9, %v11098_v14  ;;  %v11081_v55 = vor.u32 %v12921_v21, %v11080_v10  ;;  %v11056_v41 = vld [vmem:[#allocation10 + $0xa0] sm:$0xf]  ;;  %v12916_v8 = vld [vmem:[#allocation10 + $0xac] sm:$0xf0]  ;;  %v11058_v18 = vld [vmem:[#allocation10 + $0xb0] sm:$0xf0] }
 0x416   : > { %5113 = vmatpush.bf16.msrb.mxu2 %v10899_v54  ;;  %5127 = vmatpush.bf16.msrb.mxu3 %v10903_v15  ;;  %v12918_v54 = vld [vmem:[#allocation10 + $0xc4] sm:$0xf]  ;;  %v11064_v52 = vld [vmem:[#allocation10 + $0xa8] sm:$0xf]  ;;  %v12917_v13 = vld [vmem:[#allocation10 + $0xb4] sm:$0xf0] }
 0x417   : > { %v11077_v40 = vor.u32 %v12918_v54, %v11074_v33  ;;  %v11065_v44 = vor.u32 %v12917_v13, %v11064_v52  ;;  %v12915_v29 = vld [vmem:[#allocation10 + $0xac] sm:$0xf]  ;;  %v12912_v28 = vld [vmem:[#allocation10 + $0x8c] sm:$0xf0]  ;;  %v12910_v39 = vld [vmem:[#allocation10 + $0x84] sm:$0xf] }
 0x418   : > { %v11042_v12 = vld [vmem:[#allocation10 + $0x90] sm:$0xf0]  ;;  %v11048_v46 = vld [vmem:[#allocation10 + $0x88] sm:$0xf]  ;;  %v12913_v20 = vld [vmem:[#allocation10 + $0x94] sm:$0xf0] }
 0x419   : > { %5086 = vmatpush.bf16.msrb.mxu0 %v10875_v26  ;;  %5100 = vmatpush.bf16.msrb.mxu1 %v10879_v30  ;;  %v11082_v26 = vld [vmem:[#allocation10 + $0xd8] sm:$0xf0]  ;;  %v11024_v50 = vld [vmem:[#allocation10 + $0x60] sm:$0xf]  ;;  %v12909_v54 = vld [vmem:[#allocation10 + $0x74] sm:$0xf0] }
 0x41a   : > { %5114 = vmatpush.bf16.msrb.mxu2 %v10883_v35  ;;  %5128 = vmatpush.bf16.msrb.mxu3 %v10887_v7  ;;  %v11085_v30 = vor.u32 %v12919_v3, %v11082_v26  ;;  %v12914_v35 = vld [vmem:[#allocation10 + $0xa4] sm:$0xf]  ;;  %v11057_v7 = vor.u32 %v12916_v8, %v11056_v41  ;;  %v12907_v10 = vld [vmem:[#allocation10 + $0x6c] sm:$0xf]  ;;  %v11034_v21 = vld [vmem:[#allocation10 + $0x78] sm:$0xf0] }
 0x41b   : > { %v11061_v0 = vor.u32 %v12914_v35, %v11058_v18  ;;  %v11010_v18 = vld [vmem:[#allocation10 + $0x50] sm:$0xf0]  ;;  %v11016_v52 = vld [vmem:[#allocation10 + $0x48] sm:$0xf] }
 0x41d   : > { %5087 = vmatpush.bf16.msrb.mxu0 %v10859_v37  ;;  %5101 = vmatpush.bf16.msrb.mxu1 %v10863_v19  ;;  %v11066_v37 = vld [vmem:[#allocation10 + $0xb8] sm:$0xf0] }
 0x41e   : > { %5115 = vmatpush.bf16.msrb.mxu2 %v10867_v27  ;;  %5129 = vmatpush.bf16.msrb.mxu3 %v10871_v32  ;;  %v11069_v16 = vor.u32 %v12915_v29, %v11066_v37  ;;  %v11040_v32 = vld [vmem:[#allocation10 + $0x80] sm:$0xf]  ;;  %v12905_v29 = vld [vmem:[#allocation10 + $0x54] sm:$0xf0]  ;;  %v12903_v37 = vld [vmem:[#allocation10 + $0x4c] sm:$0xf] }
 0x41f   : > { %v11041_v24 = vor.u32 %v12912_v28, %v11040_v32  ;;  %v11017_v28 = vor.u32 %v12905_v29, %v11016_v52 }
 0x421   : > { %5088 = vmatpush.bf16.msrb.mxu0 %v10843_v57  ;;  %5102 = vmatpush.bf16.msrb.mxu1 %v10847_v1  ;;  %v11045_v57 = vor.u32 %v12910_v39, %v11042_v12  ;;  %v11049_v1 = vor.u32 %v12913_v20, %v11048_v46 }
 0x422   : > { %5116 = vmatpush.bf16.msrb.mxu2 %v10851_v62  ;;  %5130 = vmatpush.bf16.msrb.mxu3 %v10855_v60  ;;  %v12911_v62 = vld [vmem:[#allocation10 + $0x8c] sm:$0xf]  ;;  %v11050_v60 = vld [vmem:[#allocation10 + $0x98] sm:$0xf0] }
 0x423   : > { %v11053_v11 = vor.u32 %v12911_v62, %v11050_v60  ;;  %v12900_v62 = vld [vmem:[#allocation10 + $0x2c] sm:$0xf0] }
 0x424   : > { %5089 = vmatmul.bf16.vlgmr.msrb.gmra.mxu0 %v15908_v38  ;;  %5103 = vmatmul.bf16.vlgmr.msrb.gmra.mxu1 %v15908_v38 }
 0x425   : > { %5117 = vmatmul.bf16.vlgmr.msrb.gmra.mxu2 %v15908_v38  ;;  %5131 = vmatmul.bf16.vlgmr.msrb.gmra.mxu3 %v15908_v38  ;;  %v12920_v38 = vld [vmem:[#allocation10 + $0xcc] sm:$0xf0] }
 0x426   : > { %5502 = vmatpush.bf16.msra.mxu0 %v11089_v22  ;;  %5516 = vmatpush.bf16.msra.mxu1 %v11093_v59  ;;  %v11073_v15 = vor.u32 %v12920_v38, %v11072_v51  ;;  %v12908_v59 = vld [vmem:[#allocation10 + $0x6c] sm:$0xf0]  ;;  %v11026_v51 = vld [vmem:[#allocation10 + $0x70] sm:$0xf0]  ;;  %v11032_v38 = vld [vmem:[#allocation10 + $0x68] sm:$0xf] }
 0x427   : > { %5530 = vmatpush.bf16.msra.mxu2 %v11097_v63  ;;  %5544 = vmatpush.bf16.msra.mxu3 %v11101_v23  ;;  %v12906_v63 = vld [vmem:[#allocation10 + $0x64] sm:$0xf]  ;;  %v11025_v23 = vor.u32 %v12908_v59, %v11024_v50  ;;  %v11033_v33 = vor.u32 %v12909_v54, %v11032_v38  ;;  %v12899_v38 = vld [vmem:[#allocation10 + $0x2c] sm:$0xf]  ;;  %v11002_v54 = vld [vmem:[#allocation10 + $0x38] sm:$0xf0] }
 0x42a   : > { %5503 = vmatpush.bf16.msra.mxu0 %v11073_v15  ;;  %5517 = vmatpush.bf16.msra.mxu1 %v11077_v40  ;;  %v11029_v15 = vor.u32 %v12906_v63, %v11026_v51  ;;  %v12901_v51 = vld [vmem:[#allocation10 + $0x34] sm:$0xf0] }
 0x42b   : > { %5531 = vmatpush.bf16.msra.mxu2 %v11081_v55  ;;  %5545 = vmatpush.bf16.msra.mxu3 %v11085_v30  ;;  %v12904_v30 = vld [vmem:[#allocation10 + $0x4c] sm:$0xf0] }
 0x42e   : > { %5504 = vmatpush.bf16.msra.mxu0 %v11057_v7  ;;  %5518 = vmatpush.bf16.msra.mxu1 %v11061_v0  ;;  %v12902_v7 = vld [vmem:[#allocation10 + $0x44] sm:$0xf] }
 0x42f   : > { %5532 = vmatpush.bf16.msra.mxu2 %v11065_v44  ;;  %5546 = vmatpush.bf16.msra.mxu3 %v11069_v16  ;;  %v11013_v44 = vor.u32 %v12902_v7, %v11010_v18  ;;  %v11018_v16 = vld [vmem:[#allocation10 + $0x58] sm:$0xf0] }
 0x430   : > { %v11021_v39 = vor.u32 %v12903_v37, %v11018_v16  ;;  %v17984_v16 = vld [vmem:[#allocation27_spill] sm:$0xff] }
 0x432   : > { %5505 = vmatpush.bf16.msra.mxu0 %v11041_v24  ;;  %5519 = vmatpush.bf16.msra.mxu1 %v11045_v57 }
 0x433   : > { %5533 = vmatpush.bf16.msra.mxu2 %v11049_v1  ;;  %5547 = vmatpush.bf16.msra.mxu3 %v11053_v11  ;;  %v10992_v1 = vld [vmem:[#allocation10 + $0x20] sm:$0xf] }
 0x436   : > { %5506 = vmatpush.bf16.msra.mxu0 %v11025_v23  ;;  %5520 = vmatpush.bf16.msra.mxu1 %v11029_v15  ;;  %v11000_v23 = vld [vmem:[#allocation10 + $0x28] sm:$0xf] }
 0x437   : > { %5534 = vmatpush.bf16.msra.mxu2 %v11033_v33  ;;  %v17983_v33 = vld [vmem:[#allocation26_spill] sm:$0xff] }
 0x43a   : > { %5521 = vmatpush.bf16.msra.mxu1 %v11013_v44 }
 0x43b   : > { %5535 = vmatpush.bf16.msra.mxu2 %v11017_v28  ;;  %v17985_v28 = vld [vmem:[#allocation28_spill] sm:$0xff] }
 0x47c   : > { %v4480_v47 = vpop.f32.mrf.mxu0  ;;  %v15918_v58 = vpop.f32.mrf.mxu1 }
 0x483   : > { %v4508_v19 = vpop.f32.mrf.mxu2  ;;  %v15922_v49 = vpop.f32.mrf.mxu3 }
 0x484   : > { %v4482_v36 = vpop.f32.mrf.mxu0  ;;  %v15920_v27 = vpop.f32.mrf.mxu1 }
 0x48b   : > { %v15924_v34 = vpop.f32.mrf.mxu2  ;;  %v15929_v3 = vpop.f32.mrf.mxu3 }
 0x48c   : > { %v4696_v22 = vpop.f32.mrf.mxu0  ;;  %v4710_v61 = vpop.f32.mrf.mxu1 }
 0x48d   : > { %v4697_v5 = vadd.f32 %v4696_v22, %v4480_v47  ;;  %v4711_v14 = vadd.f32 %v4710_v61, %v15918_v58  ;;  %v11037_v47 = vor.u32 %v12907_v10, %v11034_v21  ;;  %v11008_v58 = vld [vmem:[#allocation10 + $0x40] sm:$0xf]  ;;  %v10993_v22 = vor.u32 %v12900_v62, %v10992_v1  ;;  %v10994_v61 = vld [vmem:[#allocation10 + $0x30] sm:$0xf0]  ;;  %v17987_v1 = vld [vmem:[#allocation30_spill] sm:$0xff] }
 0x48e   : > { %v11009_v35 = vor.u32 %v12904_v30, %v11008_v58  ;;  %v510_v10 = vadd.f32 %v17983_v33, %v14413_v45  ;;  %v512_v62 = vadd.f32 %v17987_v1, %v14413_v45 }
 0x48f   : > { %v4743_v9 = vadd.f32 %v4697_v5, %v14595_v31  ;;  %v4744_v55 = vadd.f32 %v4711_v14, %v14598_v43  ;;  %5548 = vmatpush.bf16.msra.mxu3 %v11037_v47  ;;  %v12898_v5 = vld [vmem:[#allocation10 + $0x24] sm:$0xf] }
 0x490   : > { %5507 = vmatpush.bf16.msra.mxu0 %v11009_v35  ;;  %v10997_v14 = vor.u32 %v12898_v5, %v10994_v61 }
 0x491   : > { %v10834_v40 = vmul.f32 -1.442695, %v4743_v9  ;;  %v10835_v26 = vmul.f32 -1.442695, %v4744_v55  ;;  %v11005_v55 = vor.u32 %v12899_v38, %v11002_v54 }
 0x492   : > { %5522 = vmatpush.bf16.msra.mxu1 %v10997_v14 }
 0x493   : > { %13577 = vpow2.f32 %v10834_v40  ;;  %v4724_v41 = vpop.f32.mrf.mxu2  ;;  %5549 = vmatpush.bf16.msra.mxu3 %v11021_v39  ;;  %v4738_v50 = vpop.f32.mrf.mxu3  ;;  %v11001_v40 = vor.u32 %v12901_v51, %v11000_v23  ;;  %v15963_v39 = vadd.f32 %v17985_v28, %v14425_v42 }
 0x494   : > { %v4698_v8 = vpop.f32.mrf.mxu0  ;;  %13579 = vpow2.f32 %v10835_v26  ;;  %v4725_v13 = vadd.f32 %v4724_v41, %v4508_v19  ;;  %v4712_v32 = vpop.f32.mrf.mxu1  ;;  %5508 = vmatpush.bf16.msra.mxu0 %v10993_v22  ;;  %v4739_v35 = vadd.f32 %v4738_v50, %v15922_v49 }
 0x495   : > { %v4699_v0 = vadd.f32 %v4698_v8, %v4482_v36  ;;  %v4713_v12 = vadd.f32 %v4712_v32, %v15920_v27  ;;  %5536 = vmatpush.bf16.msra.mxu2 %v11001_v40  ;;  %v559_v32 = vadd.f32 %v17984_v16, %v14416_v48 }
 0x496   : > { %v4745_v20 = vadd.f32 %v4725_v13, %v14603_v56 }
 0x497   : > { %v4747_v24 = vadd.f32 %v4699_v0, %v14595_v31  ;;  %v4748_v36 = vadd.f32 %v4713_v12, %v14598_v43  ;;  %5550 = vmatpush.bf16.msra.mxu3 %v11005_v55 }
 0x498   : > { %v10836_v63 = vmul.f32 -1.442695, %v4745_v20 }
 0x499   : > { %v13578_v46 = vpop.eup %13577  ;;  %v10837_v19 = vmul.f32 -1.442695, %v4747_v24  ;;  %v10838_v11 = vmul.f32 -1.442695, %v4748_v36  ;;  %v4746_v24 = vadd.f32 %v4739_v35, %v14626_v53 }
 0x49a   : > { %v15935_v57 = vadd.f32 1.0, %v13578_v46  ;;  %v13580_v60 = vpop.eup %13579  ;;  %v17986_v46 = vld [vmem:[#allocation29_spill] sm:$0xff] }
 0x49b   : > { %v15938_v27 = vadd.f32 1.0, %v13580_v60  ;;  %v4726_v59 = vpop.f32.mrf.mxu2  ;;  %v4740_v13 = vpop.f32.mrf.mxu3  ;;  %v15970_v20 = vadd.f32 %v17986_v46, %v14436_v4  ;;  %v17988_v60 = vld [vmem:[#allocation31_spill] sm:$0xff] }
 0x49c   : > { %13581 = vrcp.f32 %v15935_v57  ;;  %v4727_v9 = vadd.f32 %v4726_v59, %v15924_v34  ;;  %v4741_v12 = vadd.f32 %v4740_v13, %v15929_v3  ;;  %v4784_v5 = vand.u32 2147483647, %v15935_v57  ;;  %v17989_v3 = vld [vmem:[#allocation32_spill] sm:$0xff] }
 0x49d   : > { %13583 = vpow2.f32 %v10837_v19  ;;  %v15982_v61 = vadd.f32 %v17989_v3, %v14425_v42  ;;  %v4801_v50 = vand.u32 2147483648, %v15938_v27  ;;  %v4786_v59 = vand.u32 2147483648, %v15935_v57 }
 0x49e   : > { %13585 = vrcp.f32 %v15938_v27  ;;  %v4749_v21 = vadd.f32 %v4727_v9, %v14603_v56  ;;  %vm4780_vm9 = vweird.f32 %v15935_v57  ;;  %v4750_v23 = vadd.f32 %v4741_v12, %v14626_v53 }
 0x49f   : > { %13587 = vpow2.f32 %v10838_v11  ;;  %v561_v11 = vadd.f32 %v17988_v60, %v14416_v48  ;;  %vm4795_vm10 = vweird.f32 %v15938_v27  ;;  %vm16000_vm12 = vcmp.eq.f32.partialorder %v4784_v5, 8.507059e+37 }
 0x4a0   : > { %13589 = vpow2.f32 %v10836_v63  ;;  %v10839_v18 = vmul.f32 -1.442695, %v4749_v21  ;;  %v4799_v63 = vand.u32 2147483647, %v15938_v27 }
 0x4a1   : > { %v5090_v15 = vpop.f32.mrf.mxu0  ;;  %v5104_v37 = vpop.f32.mrf.mxu1 }
 0x4a2   : > { %v15945_v34 = vpop.eup %13581  ;;  %v5137_v47 = vadd.f32 %v5090_v15, %v510_v10  ;;  %v5138_v36 = vadd.f32 %v5104_v37, %v559_v32  ;;  %vm16006_vm13 = vcmp.eq.f32.partialorder %v4799_v63, 8.507059e+37 }
 0x4a3   : > { %v13584_v26 = vpop.eup %13583  ;;  %v4776_v58 = vmul.f32 %v15945_v34, %v15935_v57  ;;  %vm4781_vm11 = vweird.f32 %v15945_v34 }
 0x4a4   : > { %v15949_v30 = vpop.eup %13585  ;;  %v15954_v7 = vadd.f32 1.0, %v13584_v26  ;;  %v10968_v0 = vmul.f32 -1.442695, %v5137_v47  ;;  %v10969_v54 = vmul.f32 -1.442695, %v5138_v36  ;;  %v4802_v47 = vor.u32 1.1754944e-38, %v4801_v50  ;;  %vm16020_vm15 = vmor %vm4780_vm9, %vm4781_vm11 }
 0x4a5   : > { %v13588_v41 = vpop.eup %13587  ;;  %v4791_v8 = vmul.f32 %v15949_v30, %v15938_v27  ;;  %v4777_v29 = vsub.f32 1.0, %v4776_v58  ;;  %v4787_v26 = vor.u32 1.1754944e-38, %v4786_v59  ;;  %vm4796_vm14 = vweird.f32 %v15949_v30 }
 0x4a6   : > { %v15956_v52 = vadd.f32 1.0, %v13588_v41  ;;  %v13590_v44 = vpop.eup %13589  ;;  %13591 = vrcp.f32 %v15954_v7  ;;  %v4829_v28 = vand.u32 2147483647, %v15954_v7  ;;  %vm16037_vm0 = vmor %vm4795_vm10, %vm4796_vm14  ;;  %vm4825_vm2 = vweird.f32 %v15954_v7 }
 0x4a7   : > { %v4792_v49 = vsub.f32 1.0, %v4791_v8  ;;  %v15972_v19 = vadd.f32 1.0, %v13590_v44  ;;  %v4778_v22 = vmul.f32 %v15945_v34, %v4777_v29  ;;  %v4831_v36 = vand.u32 2147483648, %v15954_v7 }
 0x4a8   : > { %13593 = vrcp.f32 %v15956_v52  ;;  %v5118_v40 = vpop.f32.mrf.mxu2  ;;  %v4846_v16 = vand.u32 2147483648, %v15956_v52  ;;  %vm4840_vm1 = vweird.f32 %v15956_v52  ;;  %v4844_v27 = vand.u32 2147483647, %v15956_v52 }
 0x4a9   : > { %13595 = vpow2.f32 %v10839_v18  ;;  %v4793_v14 = vmul.f32 %v15949_v30, %v4792_v49  ;;  %v4779_v33 = vadd.f32 %v15945_v34, %v4778_v22  ;;  %v4814_v18 = vand.u32 2147483647, %v15972_v19  ;;  %v5092_v49 = vpop.f32.mrf.mxu0 }
 0x4aa   : > { %13597 = vpow2.f32 %v10968_v0  ;;  %v4816_v13 = vand.u32 2147483648, %v15972_v19  ;;  %v5139_v1 = vadd.f32 %v5118_v40, %v15963_v39  ;;  %v5141_v5 = vadd.f32 %v5092_v49, %v512_v62  ;;  %v10976_v39 = vld [vmem:[#allocation10] sm:$0xf]  ;;  %v12895_v49 = vld [vmem:[#allocation10 + $0xc] sm:$0xf] }
 0x4ab   : > { %13599 = vtanh.f32 %v4746_v24  ;;  %v4794_v8 = vadd.f32 %v15949_v30, %v4793_v14  ;;  %v4783_v37 = vsel %vm16020_vm15, %v15945_v34, %v4779_v33  ;;  %v5106_v24 = vpop.f32.mrf.mxu1  ;;  %vm16063_vm3 = vcmp.eq.f32.partialorder %v4829_v28, 8.507059e+37  ;;  %v12896_v14 = vld [vmem:[#allocation10 + $0xc] sm:$0xf0]  ;;  %v12897_v28 = vld [vmem:[#allocation10 + $0x14] sm:$0xf0] }
 0x4ac   : > { %v15987_v9 = vpop.eup %13591  ;;  %13601 = vrcp.f32 %v15972_v19  ;;  %v4788_v60 = vsel %vm16000_vm12, %v4787_v26, %v4783_v37  ;;  %v5142_v3 = vadd.f32 %v5106_v24, %v561_v11  ;;  %v10970_v10 = vmul.f32 -1.442695, %v5139_v1 }
 0x4ad   : > { %v4821_v38 = vmul.f32 %v15987_v9, %v15954_v7  ;;  %13603 = vtanh.f32 %v4750_v23  ;;  %v4798_v46 = vsel %vm16037_vm0, %v15949_v30, %v4794_v8  ;;  %v16060_v30 = vor.u32 1.1754944e-38, %v4846_v16  ;;  %v10978_v8 = vld [vmem:[#allocation10 + $0x10] sm:$0xf0]  ;;  %v10984_v16 = vld [vmem:[#allocation10 + $0x8] sm:$0xf] }
 0x4ae   : > { %v15992_v51 = vpop.eup %13593  ;;  %13605 = vpow2.f32 %v10969_v54  ;;  %v4803_v62 = vsel %vm16006_vm13, %v4802_v47, %v4798_v46  ;;  %vm4826_vm4 = vweird.f32 %v15987_v9  ;;  %v5132_v54 = vpop.f32.mrf.mxu3  ;;  %v10972_v26 = vmul.f32 -1.442695, %v5142_v3  ;;  %v12892_v46 = vld [vmem:[#allocation8 + $0xec] sm:$0xf0]  ;;  %v11218_v3 = vld [vmem:[#allocation8 + $0xf0] sm:$0xf0] }
 0x4af   : > { %v13596_v15 = vpop.eup %13595  ;;  %v4836_v21 = vmul.f32 %v15992_v51, %v15956_v52  ;;  %v4822_v41 = vsub.f32 1.0, %v4821_v38  ;;  %vm4841_vm5 = vweird.f32 %v15992_v51  ;;  %v10977_v58 = vor.u32 %v12896_v14, %v10976_v39  ;;  %vm16087_vm6 = vmor %vm4825_vm2, %vm4826_vm4  ;;  %v11224_v39 = vld [vmem:[#allocation8 + $0xe8] sm:$0xf] }
 0x4b0   : > { %v13598_v55 = vpop.eup %13597  ;;  %v16028_v32 = vadd.f32 1.0, %v13596_v15  ;;  %v5120_v40 = vpop.f32.mrf.mxu2  ;;  %v16081_v0 = vmul.f32 %v4803_v62, %v15717_v17  ;;  %v5140_v37 = vadd.f32 %v5132_v54, %v15970_v20  ;;  %v10986_v17 = vld [vmem:[#allocation10 + $0x18] sm:$0xf0]  ;;  %v4832_v7 = vor.u32 1.1754944e-38, %v4831_v36  ;;  %vm16105_vm7 = vmor %vm4840_vm1, %vm4841_vm5  ;;  %v12891_v62 = vld [vmem:[#allocation8 + $0xec] sm:$0xf] }
 0x4b1   : > { %v16012_v35 = vadd.f32 1.0, %v13598_v55  ;;  %v4837_v44 = vsub.f32 1.0, %v4836_v21  ;;  %v13600_v29 = vpop.eup %13599  ;;  %v4823_v34 = vmul.f32 %v15987_v9, %v4822_v41  ;;  %v10971_v21 = vmul.f32 -1.442695, %v5141_v5  ;;  %v12894_v41 = vld [vmem:[#allocation10 + $0x4] sm:$0xf]  ;;  %5509 = vmatpush.bf16.msra.mxu0 %v10977_v58 }
 0x4b2   : > { %v16031_v57 = vpop.eup %13601  ;;  %v4859_v11 = vand.u32 2147483647, %v16028_v32  ;;  %v16072_v15 = vmul.f32 %v13600_v29, %v4788_v60  ;;  %v5143_v12 = vadd.f32 %v5120_v40, %v15982_v61  ;;  %v12890_v61 = vld [vmem:[#allocation8 + $0xe4] sm:$0xf]  ;;  %vm16114_vm8 = vcmp.eq.f32.partialorder %v4844_v27, 8.507059e+37 }
 0x4b3   : > { %13607 = vrcp.f32 %v16012_v35  ;;  %v4838_v22 = vmul.f32 %v15992_v51, %v4837_v44  ;;  %v16054_v50 = vpop.eup %13603  ;;  %v16058_v59 = vmul.f32 %v16031_v57, %v15972_v19  ;;  %v4824_v38 = vadd.f32 %v15987_v9, %v4823_v34  ;;  %v11216_v34 = vld [vmem:[#allocation8 + $0xe0] sm:$0xf]  ;;  %v12888_v40 = vld [vmem:[#allocation8 + $0xcc] sm:$0xf0]  ;;  %v11202_v44 = vld [vmem:[#allocation8 + $0xd0] sm:$0xf0] }
 0x4b4   : > { %13609 = vrcp.f32 %v16028_v32  ;;  %v13606_v23 = vpop.eup %13605  ;;  %v5180_v36 = vand.u32 2147483648, %v16012_v35  ;;  %v10981_v52 = vor.u32 %v12894_v41, %v10978_v8  ;;  %vm5174_vm9 = vweird.f32 %v16012_v35  ;;  %v12886_v8 = vld [vmem:[#allocation8 + $0xc4] sm:$0xf] }
 0x4b5   : > { %v16074_v33 = vadd.f32 1.0, %v13606_v23  ;;  %v4839_v47 = vadd.f32 %v15992_v51, %v4838_v22  ;;  %v4828_v24 = vsel %vm16087_vm6, %v15987_v9, %v4824_v38  ;;  %v5178_v9 = vand.u32 2147483647, %v16012_v35  ;;  %v12893_v23 = vld [vmem:[#allocation8 + $0xf4] sm:$0xf0] }
 0x4b6   : > { %v4833_v14 = vsel %vm16063_vm3, %v4832_v7, %v4828_v24  ;;  %v11226_v38 = vld [vmem:[#allocation8 + $0xf8] sm:$0xf0]  ;;  %v10973_v27 = vmul.f32 -1.442695, %v5143_v12  ;;  %5523 = vmatpush.bf16.msra.mxu1 %v10981_v52  ;;  %v10985_v54 = vor.u32 %v12897_v28, %v10984_v16  ;;  %v5181_v58 = vor.u32 1.1754944e-38, %v5180_v36 }
 0x4b7   : > { %13611 = vrcp.f32 %v16074_v33  ;;  %v4843_v22 = vsel %vm16105_vm7, %v15992_v51, %v4839_v47  ;;  %vm16128_vm11 = vcmp.eq.f32.partialorder %v5178_v9, 8.507059e+37  ;;  %v11217_v41 = vor.u32 %v12892_v46, %v11216_v34 }
 0x4b8   : > { %13613 = vpow2.f32 %v10971_v21  ;;  %v11200_v21 = vld [vmem:[#allocation8 + $0xc0] sm:$0xf]  ;;  %v4848_v63 = vsel %vm16114_vm8, %v16060_v30, %v4843_v22  ;;  %v5195_v16 = vand.u32 2147483648, %v16074_v33  ;;  %5537 = vmatpush.bf16.msra.mxu2 %v10985_v54  ;;  %v11208_v30 = vld [vmem:[#allocation8 + $0xc8] sm:$0xf]  ;;  %v11225_v12 = vor.u32 %v12893_v23, %v11224_v39 }
 0x4b9   : > { %v16076_v55 = vpop.eup %13607  ;;  %13615 = vpow2.f32 %v10970_v10  ;;  %v10989_v10 = vor.u32 %v12895_v49, %v10986_v17  ;;  %v11221_v49 = vor.u32 %v12890_v61, %v11218_v3  ;;  %v12889_v17 = vld [vmem:[#allocation8 + $0xd4] sm:$0xf0]  ;;  %5718 = vmatpush.bf16.msrb.mxu0 %v11217_v41  ;;  %v11229_v34 = vor.u32 %v12891_v62, %v11226_v38  ;;  %v11210_v54 = vld [vmem:[#allocation8 + $0xd8] sm:$0xf0]  ;;  %v11186_v41 = vld [vmem:[#allocation8 + $0xb0] sm:$0xf0] }
 0x4ba   : > { %v5170_v29 = vmul.f32 %v16076_v55, %v16012_v35  ;;  %v16099_v1 = vpop.eup %13609  ;;  %13617 = vpow2.f32 %v10972_v26  ;;  %vm5175_vm10 = vweird.f32 %v16076_v55  ;;  %v11201_v46 = vor.u32 %v12888_v40, %v11200_v21  ;;  %v12884_v21 = vld [vmem:[#allocation8 + $0xac] sm:$0xf0] }
 0x4bb   : > { %13619 = vtanh.f32 %v5140_v37  ;;  %5551 = vmatpush.bf16.msra.mxu3 %v10989_v10  ;;  %vm5176_vm12 = vmor %vm5174_vm9, %vm5175_vm10  ;;  %5732 = vmatpush.bf16.msrb.mxu1 %v11221_v49  ;;  %v11205_v36 = vor.u32 %v12886_v8, %v11202_v44  ;;  %v11209_v5 = vor.u32 %v12889_v17, %v11208_v30  ;;  %v4851_v39 = vmul.f32 %v16099_v1, %v16028_v32  ;;  %v12883_v17 = vld [vmem:[#allocation8 + $0xac] sm:$0xf] }
 0x4bc   : > { %v5171_v60 = vsub.f32 1.0, %v5170_v29  ;;  %13621 = vpow2.f32 %v10973_v27  ;;  %5746 = vmatpush.bf16.msrb.mxu2 %v11225_v12  ;;  %v4868_v23 = vmul.f32 %v4848_v63, %v15723_v6  ;;  %v4870_v62 = vmul.f32 %v16054_v50, %v4833_v14  ;;  %v12887_v27 = vld [vmem:[#allocation8 + $0xcc] sm:$0xf]  ;;  %v11184_v14 = vld [vmem:[#allocation8 + $0xa0] sm:$0xf] }
 0x4bd   : > { %v16123_v47 = vpop.eup %13611  ;;  %5719 = vmatpush.bf16.msrb.mxu0 %v11201_v46  ;;  %v4807_v38 = vsub.f32 1.0, %v16058_v59  ;;  %vm5189_vm14 = vweird.f32 %v16074_v33  ;;  %v4861_v10 = vand.u32 2147483648, %v16028_v32  ;;  %v5196_v50 = vor.u32 1.1754944e-38, %v5195_v16  ;;  %v11194_v12 = vld [vmem:[#allocation8 + $0xb8] sm:$0xf0] }
 0x4be   : > { %v5172_v51 = vmul.f32 %v16076_v55, %v5171_v60  ;;  %v13614_v29 = vpop.eup %13613  ;;  %v5185_v37 = vmul.f32 %v16123_v47, %v16074_v33  ;;  %vm5190_vm13 = vweird.f32 %v16123_v47  ;;  %v16170_v63 = vadd.f32 %v16072_v15, %v16081_v0  ;;  %v12885_v15 = vld [vmem:[#allocation8 + $0xb4] sm:$0xf0]  ;;  %v12876_v6 = vld [vmem:[#allocation8 + $0x6c] sm:$0xf0] }
 0x4bf   : > { %v13616_v24 = vpop.eup %13615  ;;  %v16140_v7 = vadd.f32 1.0, %v13614_v29  ;;  %5760 = vmatpush.bf16.msrb.mxu3 %v11229_v34  ;;  %5733 = vmatpush.bf16.msrb.mxu1 %v11205_v36  ;;  %vm16162_vm15 = vmor %vm5189_vm14, %vm5190_vm13  ;;  %v16179_v44 = vor.u32 1.1754944e-38, %v4816_v13  ;;  %v4852_v29 = vsub.f32 1.0, %v4851_v39  ;;  %v16184_v0 = vmul.f32 %v16031_v57, %v4807_v38  ;;  %v11168_v13 = vld [vmem:[#allocation8 + $0x80] sm:$0xf] }
 0x4c0   : > { %v5173_v28 = vadd.f32 %v16076_v55, %v5172_v51  ;;  %v13618_v20 = vpop.eup %13617  ;;  %v5186_v60 = vsub.f32 1.0, %v5185_v37  ;;  %5747 = vmatpush.bf16.msrb.mxu2 %v11209_v5  ;;  %v16181_v37 = vadd.f32 %v4870_v62, %v4868_v23  ;;  %v16186_v49 = vadd.f32 1.0, %v13616_v24  ;;  %v12880_v36 = vld [vmem:[#allocation8 + $0x8c] sm:$0xf0]  ;;  %v12881_v38 = vld [vmem:[#allocation8 + $0x94] sm:$0xf0] }
 0x4c1   : > { %v13620_v61 = vpop.eup %13619  ;;  %13623 = vrcp.f32 %v16140_v7  ;;  %v16146_v35 = vadd.f32 1.0, %v13618_v20  ;;  %vm4811_vm1 = vweird.f32 %v16031_v57  ;;  %v16194_v46 = vor.u32 1.1754944e-38, %v4861_v10  ;;  %v11152_v10 = vld [vmem:[#allocation8 + $0x60] sm:$0xf] }
 0x4c2   : > { %v5177_v9 = vsel %vm5176_vm12, %v16076_v55, %v5173_v28  ;;  %v5187_v52 = vmul.f32 %v16123_v47, %v5186_v60  ;;  %v5193_v55 = vand.u32 2147483647, %v16074_v33  ;;  %v13622_v59 = vpop.eup %13621  ;;  %v18010_v33 = vld [vmem:[#allocation33_spill] sm:$0xff]  ;;  %v11192_v28 = vld [vmem:[#allocation8 + $0xa8] sm:$0xf]  ;;  %v5134_v60 = vpop.f32.mrf.mxu3  ;;  %v11185_v24 = vor.u32 %v12884_v21, %v11184_v14 }
 0x4c3   : > { %v5182_v22 = vsel %vm16128_vm11, %v5181_v58, %v5177_v9  ;;  %13625 = vrcp.f32 %v16146_v35  ;;  %v659_v40 = vadd.f32 %v18010_v33, %v14436_v4  ;;  %v12882_v58 = vld [vmem:[#allocation8 + $0xa4] sm:$0xf]  ;;  %v16196_v20 = vadd.f32 1.0, %v13622_v59 }
 0x4c4   : > { %v5263_v3 = vmul.f32 %v13620_v61, %v5182_v22  ;;  %v5188_v51 = vadd.f32 %v16123_v47, %v5187_v52  ;;  %vm5194_vm0 = vcmp.eq.f32.partialorder %v5193_v55, 8.507059e+37  ;;  %v11213_v9 = vor.u32 %v12887_v27, %v11210_v54  ;;  %v12878_v61 = vld [vmem:[#allocation8 + $0x84] sm:$0xf]  ;;  %v11170_v52 = vld [vmem:[#allocation8 + $0x90] sm:$0xf0]  ;;  %5720 = vmatpush.bf16.msrb.mxu0 %v11185_v24 }
 0x4c5   : > { %13627 = vtanh.f32 %v16170_v63  ;;  %v11176_v55 = vld [vmem:[#allocation8 + $0x88] sm:$0xf]  ;;  %vm4810_vm2 = vweird.f32 %v15972_v19  ;;  %v4853_v39 = vmul.f32 %v16099_v1, %v4852_v29  ;;  %v11189_v23 = vor.u32 %v12882_v58, %v11186_v41  ;;  %v12874_v59 = vld [vmem:[#allocation8 + $0x64] sm:$0xf]  ;;  %v11154_v41 = vld [vmem:[#allocation8 + $0x70] sm:$0xf0] }
 0x4c6   : > { %v5192_v26 = vsel %vm16162_vm15, %v16123_v47, %v5188_v51  ;;  %13629 = vtanh.f32 %v16181_v37  ;;  %5761 = vmatpush.bf16.msrb.mxu3 %v11213_v9  ;;  %v11193_v62 = vor.u32 %v12885_v15, %v11192_v28  ;;  %v12879_v51 = vld [vmem:[#allocation8 + $0x8c] sm:$0xf]  ;;  %v5144_v54 = vadd.f32 %v5134_v60, %v659_v40  ;;  %v11160_v29 = vld [vmem:[#allocation8 + $0x68] sm:$0xf]  ;;  %v12872_v24 = vld [vmem:[#allocation8 + $0x4c] sm:$0xf0] }
 0x4c7   : > { %v16175_v8 = vpop.eup %13623  ;;  %v5197_v16 = vsel %vm5194_vm0, %v5196_v50, %v5192_v26  ;;  %13631 = vrcp.f32 %v16186_v49  ;;  %vm5219_vm3 = vweird.f32 %v16140_v7  ;;  %5734 = vmatpush.bf16.msrb.mxu1 %v11189_v23  ;;  %v11197_v14 = vor.u32 %v12883_v17, %v11194_v12  ;;  %v11136_v17 = vld [vmem:[#allocation8 + $0x40] sm:$0xf]  ;;  %vm16266_vm11 = vmor %vm4810_vm2, %vm4811_vm1 }
 0x4c8   : > { %v5261_v47 = vmul.f32 %v5197_v16, %v15755_v2  ;;  %v5215_v30 = vmul.f32 %v16175_v8, %v16140_v7  ;;  %13633 = vrcp.f32 %v16196_v20  ;;  %5748 = vmatpush.bf16.msrb.mxu2 %v11193_v62  ;;  %v11169_v21 = vor.u32 %v12880_v36, %v11168_v13  ;;  %v12877_v16 = vld [vmem:[#allocation8 + $0x74] sm:$0xf0]  ;;  %v16226_v36 = vld [vmem:[#allocation8 + $0x44] sm:$0xf]  ;;  %v11138_v62 = vld [vmem:[#allocation8 + $0x50] sm:$0xf0] }
 0x4c9   : > { %v16191_v34 = vpop.eup %13625  ;;  %vm16212_vm4 = vcmp.eq.f32.partialorder %v4814_v18, 8.507059e+37  ;;  %vm5220_vm5 = vweird.f32 %v16175_v8  ;;  %v11173_v26 = vor.u32 %v12878_v61, %v11170_v52  ;;  %v11177_v58 = vor.u32 %v12881_v38, %v11176_v55 }
 0x4ca   : > { %v16199_v2 = vadd.f32 %v5263_v3, %v5261_v47  ;;  %v5216_v22 = vsub.f32 1.0, %v5215_v30  ;;  %v5230_v5 = vmul.f32 %v16191_v34, %v16146_v35  ;;  %v11178_v3 = vld [vmem:[#allocation8 + $0x98] sm:$0xf0]  ;;  %vm5235_vm6 = vweird.f32 %v16191_v34  ;;  %5762 = vmatpush.bf16.msrb.mxu3 %v11197_v14  ;;  %5721 = vmatpush.bf16.msrb.mxu0 %v11169_v21  ;;  %v12875_v47 = vld [vmem:[#allocation8 + $0x6c] sm:$0xf]  ;;  %vm16234_vm8 = vmor %vm5219_vm3, %vm5220_vm5 }
 0x4cb   : > { %v11181_v15 = vor.u32 %v12879_v51, %v11178_v3  ;;  %v11153_v18 = vor.u32 %v12876_v6, %v11152_v10  ;;  %v11162_v30 = vld [vmem:[#allocation8 + $0x78] sm:$0xf0]  ;;  %v16220_v12 = vpop.eup %13627  ;;  %vm5234_vm7 = vweird.f32 %v16146_v35  ;;  %v5240_v13 = vand.u32 2147483648, %v16146_v35  ;;  %5735 = vmatpush.bf16.msrb.mxu1 %v11173_v26  ;;  %v11144_v10 = vld [vmem:[#allocation8 + $0x48] sm:$0xf] }
 0x4cc   : > { %v5231_v27 = vsub.f32 1.0, %v5230_v5  ;;  %v5217_v50 = vmul.f32 %v16175_v8, %v5216_v22  ;;  %v5225_v60 = vand.u32 2147483648, %v16140_v7  ;;  %v16228_v61 = vpop.eup %13629  ;;  %v5223_v5 = vand.u32 2147483647, %v16140_v7  ;;  %5749 = vmatpush.bf16.msrb.mxu2 %v11177_v58  ;;  %vm16250_vm10 = vmor %vm5234_vm7, %vm5235_vm6  ;;  %v12873_v6 = vld [vmem:[#allocation8 + $0x54] sm:$0xf0] }
 0x4cd   : > { %v5238_v52 = vand.u32 2147483647, %v16146_v35  ;;  %v11157_v55 = vor.u32 %v12874_v59, %v11154_v41  ;;  %v11161_v23 = vor.u32 %v12877_v16, %v11160_v29  ;;  %v16240_v38 = vpop.eup %13631  ;;  %v4809_v51 = vadd.f32 %v16031_v57, %v16184_v0  ;;  %v12871_v14 = vld [vmem:[#allocation8 + $0x4c] sm:$0xf]  ;;  %v11146_v21 = vld [vmem:[#allocation8 + $0x58] sm:$0xf0] }
 0x4ce   : > { %v5232_v40 = vmul.f32 %v16191_v34, %v5231_v27  ;;  %v5218_v28 = vadd.f32 %v16175_v8, %v5217_v50  ;;  %v4854_v3 = vadd.f32 %v16099_v1, %v4853_v39  ;;  %vm4856_vm9 = vweird.f32 %v16099_v1  ;;  %v16257_v50 = vpop.eup %13633  ;;  %5763 = vmatpush.bf16.msrb.mxu3 %v11181_v15  ;;  %5722 = vmatpush.bf16.msrb.mxu0 %v11153_v18  ;;  %v12866_v41 = vld [vmem:[#allocation8 + $0x24] sm:$0xf]  ;;  %v11122_v15 = vld [vmem:[#allocation8 + $0x30] sm:$0xf0]  ;;  %v11128_v18 = vld [vmem:[#allocation8 + $0x28] sm:$0xf] }
 0x4cf   : > { %13635 = vtanh.f32 %v5144_v54  ;;  %v11165_v35 = vor.u32 %v12875_v47, %v11162_v30  ;;  %v11137_v39 = vor.u32 %v12872_v24, %v11136_v17  ;;  %vm4855_vm12 = vweird.f32 %v16028_v32  ;;  %v12868_v54 = vld [vmem:[#allocation8 + $0x2c] sm:$0xf0]  ;;  %5736 = vmatpush.bf16.msrb.mxu1 %v11157_v55  ;;  %v12869_v47 = vld [vmem:[#allocation8 + $0x34] sm:$0xf0]  ;;  %v11104_v22 = vld [vmem:[#allocation8] sm:$0xf] }
 0x4d0   : > { %v5233_v9 = vadd.f32 %v16191_v34, %v5232_v40  ;;  %v5222_v27 = vsel %vm16234_vm8, %v16175_v8, %v5218_v28  ;;  %v5241_v59 = vor.u32 1.1754944e-38, %v5240_v13  ;;  %v5226_v40 = vor.u32 1.1754944e-38, %v5225_v60  ;;  %vm16273_vm13 = vmor %vm4855_vm12, %vm4856_vm9  ;;  %5750 = vmatpush.bf16.msrb.mxu2 %v11161_v23  ;;  %v12867_v13 = vld [vmem:[#allocation8 + $0x2c] sm:$0xf]  ;;  %v11130_v60 = vld [vmem:[#allocation8 + $0x38] sm:$0xf0] }
 0x4d1   : > { %vm5224_vm14 = vcmp.eq.f32.partialorder %v5223_v5, 8.507059e+37  ;;  %vm5239_vm15 = vcmp.eq.f32.partialorder %v5238_v52, 8.507059e+37  ;;  %v11141_v19 = vor.u32 %v16226_v36, %v11138_v62  ;;  %v11145_v58 = vor.u32 %v12873_v6, %v11144_v10  ;;  %v12864_v5 = vld [vmem:[#allocation8 + $0xc] sm:$0xf0]  ;;  %v11106_v7 = vld [vmem:[#allocation8 + $0x10] sm:$0xf0] }
 0x4d2   : > { %v5237_v0 = vsel %vm16250_vm10, %v16191_v34, %v5233_v9  ;;  %v11120_v34 = vld [vmem:[#allocation8 + $0x20] sm:$0xf]  ;;  %v5227_v29 = vsel %vm5224_vm14, %v5226_v40, %v5222_v27  ;;  %v11149_v28 = vor.u32 %v12871_v14, %v11146_v21  ;;  %v4813_v30 = vsel %vm16266_vm11, %v16031_v57, %v4809_v51  ;;  %5764 = vmatpush.bf16.msrb.mxu3 %v11165_v35  ;;  %v11112_v10 = vld [vmem:[#allocation8 + $0x8] sm:$0xf]  ;;  %v12865_v6 = vld [vmem:[#allocation8 + $0x14] sm:$0xf0] }
 0x4d3   : > { %v5242_v16 = vsel %vm5239_vm15, %v5241_v59, %v5237_v0  ;;  %vm4860_vm0 = vcmp.eq.f32.partialorder %v4859_v11, 8.507059e+37  ;;  %5723 = vmatpush.bf16.msrb.mxu0 %v11137_v39  ;;  %v11121_v17 = vor.u32 %v12868_v54, %v11120_v34  ;;  %v4818_v9 = vsel %vm16212_vm4, %v16179_v44, %v4813_v30  ;;  %5737 = vmatpush.bf16.msrb.mxu1 %v11141_v19  ;;  %v12863_v0 = vld [vmem:[#allocation8 + $0xc] sm:$0xf]  ;;  %v11114_v39 = vld [vmem:[#allocation8 + $0x18] sm:$0xf0] }
 0x4d4   : > { %v4858_v24 = vsel %vm16273_vm13, %v16099_v1, %v4854_v3  ;;  %v5200_v36 = vmul.f32 %v16240_v38, %v16186_v49  ;;  %v5245_v32 = vmul.f32 %v16257_v50, %v16196_v20  ;;  %v4875_v11 = vmul.f32 %v16220_v12, %v4818_v9  ;;  %5751 = vmatpush.bf16.msrb.mxu2 %v11145_v58  ;;  %v12862_v3 = vld [vmem:[#allocation8 + $0x4] sm:$0xf]  ;;  %v11350_v14 = vld [vmem:[#allocation5 + $0xe0] sm:$0xf]  ;;  %v12956_v8 = vld [vmem:[#allocation5 + $0xec] sm:$0xf0] }
 0x4d5   : > { %v4863_v57 = vsel %vm4860_vm0, %v16194_v46, %v4858_v24  ;;  %v13636_v52 = vpop.eup %13635  ;;  %v11125_v44 = vor.u32 %v12866_v41, %v11122_v15  ;;  %v11129_v33 = vor.u32 %v12869_v47, %v11128_v18  ;;  %v5262_v1 = vmul.f32 %v5242_v16, %v15868_v25  ;;  %v12954_v59 = vld [vmem:[#allocation5 + $0xe4] sm:$0xf]  ;;  %v11352_v34 = vld [vmem:[#allocation5 + $0xf0] sm:$0xf0]  ;;  %v11358_v54 = vld [vmem:[#allocation5 + $0xe8] sm:$0xf] }
 0x4d6   : > { %v4876_v55 = vmul.f32 %v16228_v61, %v4863_v57  ;;  %v5264_v23 = vmul.f32 %v13636_v52, %v5227_v29  ;;  %v11133_v62 = vor.u32 %v12867_v13, %v11130_v60  ;;  %v4877_v51 = vpack.c.bf16 %v4875_v11, %v4875_v11  ;;  %5765 = vmatpush.bf16.msrb.mxu3 %v11149_v28  ;;  %v12957_v26 = vld [vmem:[#allocation5 + $0xf4] sm:$0xf0]  ;;  %v12955_v29 = vld [vmem:[#allocation5 + $0xec] sm:$0xf]  ;;  %v11360_v16 = vld [vmem:[#allocation5 + $0xf8] sm:$0xf0] }
 0x4d7   : > { %5724 = vmatpush.bf16.msrb.mxu0 %v11121_v17  ;;  %v11105_v27 = vor.u32 %v12864_v5, %v11104_v22  ;;  %v5246_v35 = vsub.f32 1.0, %v5245_v32  ;;  %v5201_v61 = vsub.f32 1.0, %v5200_v36  ;;  %5738 = vmatpush.bf16.msrb.mxu1 %v11125_v44  ;;  %v11109_v58 = vor.u32 %v12862_v3, %v11106_v7  ;;  %v11334_v13 = vld [vmem:[#allocation5 + $0xc0] sm:$0xf]  ;;  %v12952_v60 = vld [vmem:[#allocation5 + $0xcc] sm:$0xf0] }
 0x4d8   : > { %v4878_v46 = vpack.c.bf16 %v4876_v55, %v4876_v55  ;;  %v13233_v12 = vpack.c.bf16 %v4876_v55, %v4875_v11  ;;  %5752 = vmatpush.bf16.msrb.mxu2 %v11129_v33  ;;  %v5338_v25 = vunpack.c.l.b16 %v4877_v51  ;;  %v16298_v40 = vadd.f32 %v5264_v23, %v5262_v1  ;;  %v12950_v9 = vld [vmem:[#allocation5 + $0xc4] sm:$0xf]  ;;  %v11336_v32 = vld [vmem:[#allocation5 + $0xd0] sm:$0xf0]  ;;  %v11342_v57 = vld [vmem:[#allocation5 + $0xc8] sm:$0xf] }
 0x4d9   : > { %v11113_v41 = vor.u32 %v12865_v6, %v11112_v10  ;;  %v5208_v28 = vand.u32 2147483647, %v16186_v49  ;;  %v5247_v15 = vmul.f32 %v16257_v50, %v5246_v35  ;;  %v11117_v18 = vor.u32 %v12863_v0, %v11114_v39  ;;  %v12953_v11 = vld [vmem:[#allocation5 + $0xd4] sm:$0xf0]  ;;  %v12951_v5 = vld [vmem:[#allocation5 + $0xcc] sm:$0xf] }
 0x4da   : > { %13257 = vst [vmem:[%s14192_s19 + $0x18] sm:$0xff] %v13233_v12   ;;  %v5339_v21 = vunpack.c.l.b16 %v4878_v46  ;;  %5766 = vmatpush.bf16.msrb.mxu3 %v11133_v62  ;;  %v11351_v47 = vor.u32 %v12956_v8, %v11350_v14  ;;  %v11355_v30 = vor.u32 %v12954_v59, %v11352_v34  ;;  %v11359_v17 = vor.u32 %v12957_v26, %v11358_v54  ;;  %v11344_v52 = vld [vmem:[#allocation5 + $0xd8] sm:$0xf0]  ;;  %v11318_v62 = vld [vmem:[#allocation5 + $0xa0] sm:$0xf] }
 0x4db   : > { %5725 = vmatpush.bf16.msrb.mxu0 %v11105_v27  ;;  %v5202_v24 = vmul.f32 %v16240_v38, %v5201_v61  ;;  %v11363_v36 = vor.u32 %v12955_v29, %v11360_v16  ;;  %v5253_v22 = vand.u32 2147483647, %v16196_v20  ;;  %13637 = vtanh.f32 %v16298_v40  ;;  %5739 = vmatpush.bf16.msrb.mxu1 %v11109_v58  ;;  %v12948_v51 = vld [vmem:[#allocation5 + $0xac] sm:$0xf0]  ;;  %v12946_v3 = vld [vmem:[#allocation5 + $0xa4] sm:$0xf] }
 0x4dc   : > { %v5340_v19 = vpack.c.b16 %v5339_v21, %v5338_v25  ;;  %5753 = vmatpush.bf16.msrb.mxu2 %v11113_v41  ;;  %v5248_v44 = vadd.f32 %v16257_v50, %v5247_v15  ;;  %vm5250_vm1 = vweird.f32 %v16257_v50  ;;  %v5255_v33 = vand.u32 2147483648, %v16196_v20  ;;  %v11320_v12 = vld [vmem:[#allocation5 + $0xb0] sm:$0xf0]  ;;  %v11326_v27 = vld [vmem:[#allocation5 + $0xa8] sm:$0xf] }
 0x4dd   : > { %v11335_v55 = vor.u32 %v12952_v60, %v11334_v13  ;;  %vm5205_vm2 = vweird.f32 %v16240_v38  ;;  %13639 = vtanh.f32 %v16199_v2  ;;  %v11339_v1 = vor.u32 %v12950_v9, %v11336_v32  ;;  %v12949_v10 = vld [vmem:[#allocation5 + $0xb4] sm:$0xf0]  ;;  %v12947_v35 = vld [vmem:[#allocation5 + $0xac] sm:$0xf]  ;;  %v11328_v39 = vld [vmem:[#allocation5 + $0xb8] sm:$0xf0] }
 0x4de   : > { %5510 = vmatmul.bf16.vlgmr.msra.gmra.mxu0 %v5340_v19  ;;  %5524 = vmatmul.bf16.vlgmr.msra.gmra.mxu1 %v5340_v19  ;;  %v11343_v23 = vor.u32 %v12953_v11, %v11342_v57  ;;  %v5203_v7 = vadd.f32 %v16240_v38, %v5202_v24  ;;  %vm5249_vm3 = vweird.f32 %v16196_v20  ;;  %v11347_v46 = vor.u32 %v12951_v5, %v11344_v52  ;;  %v11302_v54 = vld [vmem:[#allocation5 + $0x80] sm:$0xf]  ;;  %v12944_v26 = vld [vmem:[#allocation5 + $0x8c] sm:$0xf0]  ;;  %v11304_v41 = vld [vmem:[#allocation5 + $0x90] sm:$0xf0] }
 0x4df   : > { %5538 = vmatmul.bf16.vlgmr.msra.gmra.mxu2 %v5340_v19  ;;  %5552 = vmatmul.bf16.vlgmr.msra.gmra.mxu3 %v5340_v19  ;;  %vm5204_vm4 = vweird.f32 %v16186_v49  ;;  %v5210_v6 = vand.u32 2147483648, %v16186_v49  ;;  %vm16316_vm5 = vmor %vm5249_vm3, %vm5250_vm1  ;;  %vm16329_vm7 = vcmp.eq.f32.partialorder %v5253_v22, 8.507059e+37  ;;  %v5256_v25 = vor.u32 1.1754944e-38, %v5255_v33  ;;  %v12942_v19 = vld [vmem:[#allocation5 + $0x84] sm:$0xf] }
 0x4e0   : > { %5767 = vmatpush.bf16.msrb.mxu3 %v11117_v18  ;;  %6112 = vmatpush.bf16.msra.mxu0 %v11351_v47  ;;  %vm16322_vm6 = vmor %vm5204_vm4, %vm5205_vm2  ;;  %v5252_v14 = vsel %vm16316_vm5, %v16257_v50, %v5248_v44  ;;  %v11319_v21 = vor.u32 %v12948_v51, %v11318_v62  ;;  %v11323_v59 = vor.u32 %v12946_v3, %v11320_v12  ;;  %v11310_v29 = vld [vmem:[#allocation5 + $0x88] sm:$0xf]  ;;  %v12945_v16 = vld [vmem:[#allocation5 + $0x94] sm:$0xf0]  ;;  %vm5209_vm8 = vcmp.eq.f32.partialorder %v5208_v28, 8.507059e+37 }
 0x4e1   : > { %6126 = vmatpush.bf16.msra.mxu1 %v11355_v30  ;;  %6140 = vmatpush.bf16.msra.mxu2 %v11359_v17  ;;  %v13638_v8 = vpop.eup %13637  ;;  %v11327_v34 = vor.u32 %v12949_v10, %v11326_v27  ;;  %v5207_v58 = vsel %vm16322_vm6, %v16240_v38, %v5203_v7  ;;  %v11331_v50 = vor.u32 %v12947_v35, %v11328_v39  ;;  %v5211_v18 = vor.u32 1.1754944e-38, %v5210_v6  ;;  %v12943_v30 = vld [vmem:[#allocation5 + $0x8c] sm:$0xf]  ;;  %v11312_v17 = vld [vmem:[#allocation5 + $0x98] sm:$0xf0] }
 0x4e2   : > { %v5257_v47 = vsel %vm16329_vm7, %v5256_v25, %v5252_v14  ;;  %v11303_v60 = vor.u32 %v12944_v26, %v11302_v54  ;;  %v11307_v38 = vor.u32 %v12942_v19, %v11304_v41  ;;  %v11311_v24 = vor.u32 %v12945_v16, %v11310_v29  ;;  %v12940_v32 = vld [vmem:[#allocation5 + $0x6c] sm:$0xf0]  ;;  %v12938_v57 = vld [vmem:[#allocation5 + $0x64] sm:$0xf]  ;;  %v11288_v5 = vld [vmem:[#allocation5 + $0x70] sm:$0xf0] }
 0x4e3   : > { %v13640_v15 = vpop.eup %13639  ;;  %v5270_v13 = vmul.f32 %v13638_v8, %v5257_v47  ;;  %v5212_v9 = vsel %vm5209_vm8, %v5211_v18, %v5207_v58  ;;  %v11315_v22 = vor.u32 %v12943_v30, %v11312_v17  ;;  %v11294_v52 = vld [vmem:[#allocation5 + $0x68] sm:$0xf]  ;;  %v12941_v44 = vld [vmem:[#allocation5 + $0x74] sm:$0xf0]  ;;  %v12939_v33 = vld [vmem:[#allocation5 + $0x6c] sm:$0xf] }
 0x4e4   : > { %6154 = vmatpush.bf16.msra.mxu3 %v11363_v36  ;;  %6113 = vmatpush.bf16.msra.mxu0 %v11335_v55  ;;  %v11286_v36 = vld [vmem:[#allocation5 + $0x60] sm:$0xf]  ;;  %v5269_v11 = vmul.f32 %v13640_v15, %v5212_v9  ;;  %v11296_v49 = vld [vmem:[#allocation5 + $0x78] sm:$0xf0]  ;;  %v12936_v51 = vld [vmem:[#allocation5 + $0x4c] sm:$0xf0] }
 0x4e5   : > { %6127 = vmatpush.bf16.msra.mxu1 %v11339_v1  ;;  %6141 = vmatpush.bf16.msra.mxu2 %v11343_v23  ;;  %v11287_v55 = vor.u32 %v12940_v32, %v11286_v36  ;;  %v11291_v1 = vor.u32 %v12938_v57, %v11288_v5  ;;  %v11295_v23 = vor.u32 %v12941_v44, %v11294_v52  ;;  %v11270_v62 = vld [vmem:[#allocation5 + $0x40] sm:$0xf]  ;;  %v12934_v3 = vld [vmem:[#allocation5 + $0x44] sm:$0xf]  ;;  %v11278_v12 = vld [vmem:[#allocation5 + $0x48] sm:$0xf] }
 0x4e6   : > { %v16340_v28 = vpack.c.bf16 %v5270_v13, %v5269_v11  ;;  %v11299_v7 = vor.u32 %v12939_v33, %v11296_v49  ;;  %v12937_v27 = vld [vmem:[#allocation5 + $0x54] sm:$0xf0]  ;;  %v12935_v10 = vld [vmem:[#allocation5 + $0x4c] sm:$0xf]  ;;  %v11280_v6 = vld [vmem:[#allocation5 + $0x58] sm:$0xf0]  ;;  %v11271_v0 = vor.u32 %v12936_v51, %v11270_v62 }
 0x4e7   : > { %v11279_v39 = vor.u32 %v12937_v27, %v11278_v12  ;;  %v11254_v20 = vld [vmem:[#allocation5 + $0x20] sm:$0xf]  ;;  %v12932_v14 = vld [vmem:[#allocation5 + $0x2c] sm:$0xf0]  ;;  %v12930_v61 = vld [vmem:[#allocation5 + $0x24] sm:$0xf]  ;;  %v11283_v25 = vor.u32 %v12935_v10, %v11280_v6 }
 0x4e8   : > { %6155 = vmatpush.bf16.msra.mxu3 %v11347_v46  ;;  %6114 = vmatpush.bf16.msra.mxu0 %v11319_v21  ;;  %v11272_v46 = vld [vmem:[#allocation5 + $0x50] sm:$0xf0]  ;;  %v11262_v8 = vld [vmem:[#allocation5 + $0x28] sm:$0xf]  ;;  %v11264_v54 = vld [vmem:[#allocation5 + $0x38] sm:$0xf0]  ;;  %v11255_v26 = vor.u32 %v12932_v14, %v11254_v20 }
 0x4e9   : > { %6128 = vmatpush.bf16.msra.mxu1 %v11323_v59  ;;  %6142 = vmatpush.bf16.msra.mxu2 %v11327_v34  ;;  %v11275_v35 = vor.u32 %v12934_v3, %v11272_v46  ;;  %v11256_v21 = vld [vmem:[#allocation5 + $0x30] sm:$0xf0]  ;;  %v12933_v59 = vld [vmem:[#allocation5 + $0x34] sm:$0xf0]  ;;  %v12931_v34 = vld [vmem:[#allocation5 + $0x2c] sm:$0xf] }
 0x4ea   : > { %v11259_v19 = vor.u32 %v12930_v61, %v11256_v21  ;;  %v11263_v58 = vor.u32 %v12933_v59, %v11262_v8  ;;  %v12928_v41 = vld [vmem:[#allocation5 + $0xc] sm:$0xf0]  ;;  %v12926_v29 = vld [vmem:[#allocation5 + $0x4] sm:$0xf]  ;;  %v11267_v16 = vor.u32 %v12931_v34, %v11264_v54  ;;  %v11240_v15 = vld [vmem:[#allocation5 + $0x10] sm:$0xf0] }
 0x4eb   : > { %v11246_v18 = vld [vmem:[#allocation5 + $0x8] sm:$0xf]  ;;  %v12929_v47 = vld [vmem:[#allocation5 + $0x14] sm:$0xf0]  ;;  %v12927_v30 = vld [vmem:[#allocation5 + $0xc] sm:$0xf] }
 0x4ec   : > { %6156 = vmatpush.bf16.msra.mxu3 %v11331_v50  ;;  %6115 = vmatpush.bf16.msra.mxu0 %v11303_v60  ;;  %v11238_v50 = vld [vmem:[#allocation5] sm:$0xf]  ;;  %v11248_v17 = vld [vmem:[#allocation5 + $0x18] sm:$0xf0]  ;;  %v11243_v60 = vor.u32 %v12926_v29, %v11240_v15  ;;  %v11247_v9 = vor.u32 %v12929_v47, %v11246_v18  ;;  %v13020_v36 = vld [vmem:[#allocation10 + $0xec] sm:$0xf0] }
 0x4ed   : > { %6129 = vmatpush.bf16.msra.mxu1 %v11307_v38  ;;  %6143 = vmatpush.bf16.msra.mxu2 %v11311_v24  ;;  %v11239_v13 = vor.u32 %v12928_v41, %v11238_v50  ;;  %v11251_v38 = vor.u32 %v12927_v30, %v11248_v17  ;;  %v11484_v24 = vld [vmem:[#allocation10 + $0xe0] sm:$0xf]  ;;  %v13018_v32 = vld [vmem:[#allocation10 + $0xe4] sm:$0xf]  ;;  %v11486_v11 = vld [vmem:[#allocation10 + $0xf0] sm:$0xf0] }
 0x4ee   : > { %5726 = vmatmul.bf16.vlgmr.msrb.gmra.mxu0 %v16340_v28  ;;  %5740 = vmatmul.bf16.vlgmr.msrb.gmra.mxu1 %v16340_v28  ;;  %v11485_v57 = vor.u32 %v13020_v36, %v11484_v24  ;;  %v13021_v5 = vld [vmem:[#allocation10 + $0xf4] sm:$0xf0]  ;;  %v11489_v52 = vor.u32 %v13018_v32, %v11486_v11  ;;  %v13019_v33 = vld [vmem:[#allocation10 + $0xec] sm:$0xf]  ;;  %v11494_v49 = vld [vmem:[#allocation10 + $0xf8] sm:$0xf0] }
 0x4ef   : > { %5754 = vmatmul.bf16.vlgmr.msrb.gmra.mxu2 %v16340_v28  ;;  %5768 = vmatmul.bf16.vlgmr.msrb.gmra.mxu3 %v16340_v28  ;;  %v11468_v62 = vld [vmem:[#allocation10 + $0xc0] sm:$0xf]  ;;  %v13014_v51 = vld [vmem:[#allocation10 + $0xc4] sm:$0xf]  ;;  %v11476_v46 = vld [vmem:[#allocation10 + $0xc8] sm:$0xf] }
 0x4f0   : > { %6157 = vmatpush.bf16.msra.mxu3 %v11315_v22  ;;  %6116 = vmatpush.bf16.msra.mxu0 %v11287_v55  ;;  %v11492_v22 = vld [vmem:[#allocation10 + $0xe8] sm:$0xf]  ;;  %v11497_v55 = vor.u32 %v13019_v33, %v11494_v49  ;;  %v13017_v12 = vld [vmem:[#allocation10 + $0xd4] sm:$0xf0]  ;;  %v13015_v6 = vld [vmem:[#allocation10 + $0xcc] sm:$0xf] }
 0x4f1   : > { %6130 = vmatpush.bf16.msra.mxu1 %v11291_v1  ;;  %6144 = vmatpush.bf16.msra.mxu2 %v11295_v23  ;;  %v11493_v44 = vor.u32 %v13021_v5, %v11492_v22  ;;  %v11477_v10 = vor.u32 %v13017_v12, %v11476_v46  ;;  %v13012_v20 = vld [vmem:[#allocation10 + $0xac] sm:$0xf0]  ;;  %v13010_v14 = vld [vmem:[#allocation10 + $0xa4] sm:$0xf]  ;;  %v11460_v21 = vld [vmem:[#allocation10 + $0xa8] sm:$0xf] }
 0x4f2   : > { %v13013_v8 = vld [vmem:[#allocation10 + $0xb4] sm:$0xf0]  ;;  %v13011_v54 = vld [vmem:[#allocation10 + $0xac] sm:$0xf]  ;;  %v11436_v29 = vld [vmem:[#allocation10 + $0x80] sm:$0xf] }
 0x4f3   : > { %v11461_v34 = vor.u32 %v13013_v8, %v11460_v21  ;;  %v13006_v15 = vld [vmem:[#allocation10 + $0x84] sm:$0xf]  ;;  %v11438_v47 = vld [vmem:[#allocation10 + $0x90] sm:$0xf0]  ;;  %v11444_v30 = vld [vmem:[#allocation10 + $0x88] sm:$0xf] }
 0x4f4   : > { %6158 = vmatpush.bf16.msra.mxu3 %v11299_v7  ;;  %6117 = vmatpush.bf16.msra.mxu0 %v11271_v0  ;;  %v11470_v7 = vld [vmem:[#allocation10 + $0xd0] sm:$0xf0]  ;;  %v11478_v0 = vld [vmem:[#allocation10 + $0xd8] sm:$0xf0]  ;;  %v13009_v17 = vld [vmem:[#allocation10 + $0x94] sm:$0xf0] }
 0x4f5   : > { %6131 = vmatpush.bf16.msra.mxu1 %v11275_v35  ;;  %6145 = vmatpush.bf16.msra.mxu2 %v11279_v39  ;;  %v11473_v27 = vor.u32 %v13014_v51, %v11470_v7  ;;  %v11481_v35 = vor.u32 %v13015_v6, %v11478_v0  ;;  %v11452_v39 = vld [vmem:[#allocation10 + $0xa0] sm:$0xf]  ;;  %v13003_v46 = vld [vmem:[#allocation10 + $0x6c] sm:$0xf]  ;;  %v11430_v12 = vld [vmem:[#allocation10 + $0x78] sm:$0xf0] }
 0x4f6   : > { %v11453_v61 = vor.u32 %v13012_v20, %v11452_v39  ;;  %v11420_v5 = vld [vmem:[#allocation10 + $0x60] sm:$0xf]  ;;  %v13000_v0 = vld [vmem:[#allocation10 + $0x4c] sm:$0xf0]  ;;  %v12998_v20 = vld [vmem:[#allocation10 + $0x44] sm:$0xf] }
 0x4f8   : > { %6159 = vmatpush.bf16.msra.mxu3 %v11283_v25  ;;  %6118 = vmatpush.bf16.msra.mxu0 %v11255_v26  ;;  %v11454_v25 = vld [vmem:[#allocation10 + $0xb0] sm:$0xf0]  ;;  %v11462_v26 = vld [vmem:[#allocation10 + $0xb8] sm:$0xf0] }
 0x4f9   : > { %6132 = vmatpush.bf16.msra.mxu1 %v11259_v19  ;;  %6146 = vmatpush.bf16.msra.mxu2 %v11263_v58  ;;  %v11457_v59 = vor.u32 %v13010_v14, %v11454_v25  ;;  %v11465_v58 = vor.u32 %v13011_v54, %v11462_v26  ;;  %v11406_v14 = vld [vmem:[#allocation10 + $0x50] sm:$0xf0]  ;;  %v12999_v54 = vld [vmem:[#allocation10 + $0x4c] sm:$0xf]  ;;  %v11414_v26 = vld [vmem:[#allocation10 + $0x58] sm:$0xf0] }
 0x4fc   : > { %6160 = vmatpush.bf16.msra.mxu3 %v11267_v16  ;;  %6119 = vmatpush.bf16.msra.mxu0 %v11239_v13  ;;  %v13008_v16 = vld [vmem:[#allocation10 + $0x8c] sm:$0xf0]  ;;  %v11441_v13 = vor.u32 %v13006_v15, %v11438_v47  ;;  %v11417_v15 = vor.u32 %v12999_v54, %v11414_v26 }
 0x4fd   : > { %6133 = vmatpush.bf16.msra.mxu1 %v11243_v60  ;;  %6147 = vmatpush.bf16.msra.mxu2 %v11247_v9  ;;  %v11437_v18 = vor.u32 %v13008_v16, %v11436_v29  ;;  %v11445_v60 = vor.u32 %v13009_v17, %v11444_v30  ;;  %v13007_v9 = vld [vmem:[#allocation10 + $0x8c] sm:$0xf] }
 0x4ff   : > { %6120 = vmatmul.bf16.vlgmr.msra.gmra.mxu0 %v16340_v28 }
 0x500   : > { %6161 = vmatpush.bf16.msra.mxu3 %v11251_v38  ;;  %6134 = vmatmul.bf16.vlgmr.msra.gmra.mxu1 %v16340_v28  ;;  %v11446_v38 = vld [vmem:[#allocation10 + $0x98] sm:$0xf0] }
 0x501   : > { %6148 = vmatmul.bf16.vlgmr.msra.gmra.mxu2 %v16340_v28  ;;  %6533 = vmatpush.bf16.msrb.mxu0 %v11485_v57  ;;  %v11449_v24 = vor.u32 %v13007_v9, %v11446_v38  ;;  %v11388_v9 = vld [vmem:[#allocation10 + $0x20] sm:$0xf] }
 0x502   : > { %6547 = vmatpush.bf16.msrb.mxu1 %v11489_v52  ;;  %6561 = vmatpush.bf16.msrb.mxu2 %v11493_v44  ;;  %v13004_v52 = vld [vmem:[#allocation10 + $0x6c] sm:$0xf0]  ;;  %v13002_v44 = vld [vmem:[#allocation10 + $0x64] sm:$0xf] }
 0x503   : > { %6162 = vmatmul.bf16.vlgmr.msra.gmra.mxu3 %v16340_v28  ;;  %v13016_v28 = vld [vmem:[#allocation10 + $0xcc] sm:$0xf0]  ;;  %v11421_v49 = vor.u32 %v13004_v52, %v11420_v5  ;;  %v11390_v5 = vld [vmem:[#allocation10 + $0x30] sm:$0xf0]  ;;  %v11396_v52 = vld [vmem:[#allocation10 + $0x28] sm:$0xf] }
 0x504   : > { %6575 = vmatpush.bf16.msrb.mxu3 %v11497_v55  ;;  %v11469_v3 = vor.u32 %v13016_v28, %v11468_v62  ;;  %v11422_v55 = vld [vmem:[#allocation10 + $0x70] sm:$0xf0]  ;;  %v11428_v62 = vld [vmem:[#allocation10 + $0x68] sm:$0xf]  ;;  %v13005_v28 = vld [vmem:[#allocation10 + $0x74] sm:$0xf0] }
 0x505   : > { %v11429_v7 = vor.u32 %v13005_v28, %v11428_v62  ;;  %v11372_v62 = vld [vmem:[#allocation10] sm:$0xf]  ;;  %v12992_v28 = vld [vmem:[#allocation10 + $0xc] sm:$0xf0] }
 0x506   : > { %6534 = vmatpush.bf16.msrb.mxu0 %v11469_v3  ;;  %6548 = vmatpush.bf16.msrb.mxu1 %v11473_v27  ;;  %v11425_v3 = vor.u32 %v13002_v44, %v11422_v55  ;;  %v12997_v44 = vld [vmem:[#allocation10 + $0x34] sm:$0xf0]  ;;  %v11398_v55 = vld [vmem:[#allocation10 + $0x38] sm:$0xf0] }
 0x507   : > { %6562 = vmatpush.bf16.msrb.mxu2 %v11477_v10 }
 0x508   : > { %6576 = vmatpush.bf16.msrb.mxu3 %v11481_v35 }
 0x50a   : > { %6535 = vmatpush.bf16.msrb.mxu0 %v11453_v61  ;;  %6549 = vmatpush.bf16.msrb.mxu1 %v11457_v59  ;;  %v11412_v61 = vld [vmem:[#allocation10 + $0x48] sm:$0xf]  ;;  %v11409_v59 = vor.u32 %v12998_v20, %v11406_v14 }
 0x50b   : > { %6563 = vmatpush.bf16.msrb.mxu2 %v11461_v34  ;;  %v13001_v34 = vld [vmem:[#allocation10 + $0x54] sm:$0xf0] }
 0x50c   : > { %6577 = vmatpush.bf16.msrb.mxu3 %v11465_v58  ;;  %v11413_v16 = vor.u32 %v13001_v34, %v11412_v61 }
 0x50e   : > { %6536 = vmatpush.bf16.msrb.mxu0 %v11437_v18  ;;  %6550 = vmatpush.bf16.msrb.mxu1 %v11441_v13 }
 0x50f   : > { %6564 = vmatpush.bf16.msrb.mxu2 %v11445_v60 }
 0x510   : > { %6578 = vmatpush.bf16.msrb.mxu3 %v11449_v24 }
 0x512   : > { %6537 = vmatpush.bf16.msrb.mxu0 %v11421_v49  ;;  %6551 = vmatpush.bf16.msrb.mxu1 %v11425_v3  ;;  %v12995_v49 = vld [vmem:[#allocation10 + $0x2c] sm:$0xf] }
 0x513   : > { %6565 = vmatpush.bf16.msrb.mxu2 %v11429_v7 }
 0x516   : > { %6552 = vmatpush.bf16.msrb.mxu1 %v11409_v59 }
 0x517   : > { %6566 = vmatpush.bf16.msrb.mxu2 %v11413_v16 }
 0x55b   : > { %v5511_v1 = vpop.f32.mrf.mxu0  ;;  %v16350_v23 = vpop.f32.mrf.mxu1 }
 0x562   : > { %v5539_v19 = vpop.f32.mrf.mxu2  ;;  %v16356_v36 = vpop.f32.mrf.mxu3 }
 0x563   : > { %v16352_v50 = vpop.f32.mrf.mxu0  ;;  %v16354_v41 = vpop.f32.mrf.mxu1 }
 0x56a   : > { %v16358_v32 = vpop.f32.mrf.mxu2  ;;  %v16363_v25 = vpop.f32.mrf.mxu3 }
 0x56b   : > { %v5727_v57 = vpop.f32.mrf.mxu0  ;;  %v5741_v22 = vpop.f32.mrf.mxu1 }
 0x56c   : > { %v5728_v11 = vadd.f32 %v5727_v57, %v5511_v1  ;;  %v5742_v33 = vadd.f32 %v5741_v22, %v16350_v23  ;;  %v11433_v1 = vor.u32 %v13003_v46, %v11430_v12  ;;  %v11404_v23 = vld [vmem:[#allocation10 + $0x40] sm:$0xf]  ;;  %v11397_v12 = vor.u32 %v12997_v44, %v11396_v52 }
 0x56d   : > { %v11405_v39 = vor.u32 %v13000_v0, %v11404_v23 }
 0x56e   : > { %v5774_v51 = vadd.f32 %v5728_v11, %v14595_v31  ;;  %v5775_v27 = vadd.f32 %v5742_v33, %v14598_v43  ;;  %6579 = vmatpush.bf16.msrb.mxu3 %v11433_v1  ;;  %v18027_v1 = vld [vmem:[#allocation34_spill] sm:$0xff]  ;;  %6567 = vmatpush.bf16.msrb.mxu2 %v11397_v12 }
 0x56f   : > { %6538 = vmatpush.bf16.msrb.mxu0 %v11405_v39 }
 0x570   : > { %v11230_v10 = vmul.f32 -1.442695, %v5774_v51  ;;  %v11231_v6 = vmul.f32 -1.442695, %v5775_v27 }
 0x572   : > { %13641 = vpow2.f32 %v11230_v10  ;;  %v5755_v35 = vpop.f32.mrf.mxu2  ;;  %6580 = vmatpush.bf16.msrb.mxu3 %v11417_v15  ;;  %v5769_v33 = vpop.f32.mrf.mxu3  ;;  %v515_v10 = vadd.f32 %v18027_v1, %v14413_v45 }
 0x573   : > { %13643 = vpow2.f32 %v11231_v6  ;;  %v5756_v21 = vadd.f32 %v5755_v35, %v5539_v19  ;;  %v5729_v8 = vpop.f32.mrf.mxu0  ;;  %v5743_v29 = vpop.f32.mrf.mxu1  ;;  %v11401_v6 = vor.u32 %v12995_v49, %v11398_v55  ;;  %v11373_v35 = vor.u32 %v12992_v28, %v11372_v62 }
 0x574   : > { %v5730_v58 = vadd.f32 %v5729_v8, %v16352_v50  ;;  %v5744_v47 = vadd.f32 %v5743_v29, %v16354_v41  ;;  %v12996_v50 = vld [vmem:[#allocation10 + $0x2c] sm:$0xf0]  ;;  %v12994_v41 = vld [vmem:[#allocation10 + $0x24] sm:$0xf]  ;;  %v5770_v8 = vadd.f32 %v5769_v33, %v16356_v36  ;;  %v18029_v36 = vld [vmem:[#allocation36_spill] sm:$0xff] }
 0x575   : > { %v5776_v18 = vadd.f32 %v5756_v21, %v14603_v56  ;;  %v11389_v11 = vor.u32 %v12996_v50, %v11388_v9  ;;  %v11393_v46 = vor.u32 %v12994_v41, %v11390_v5  ;;  %v16401_v15 = vadd.f32 %v18029_v36, %v14425_v42  ;;  %v18032_v9 = vld [vmem:[#allocation39_spill] sm:$0xff] }
 0x576   : > { %v5778_v30 = vadd.f32 %v5730_v58, %v14595_v31  ;;  %v5779_v17 = vadd.f32 %v5744_v47, %v14598_v43  ;;  %6581 = vmatpush.bf16.msrb.mxu3 %v11401_v6  ;;  %v16412_v50 = vadd.f32 %v18032_v9, %v14416_v48 }
 0x577   : > { %v11232_v19 = vmul.f32 -1.442695, %v5776_v18  ;;  %6539 = vmatpush.bf16.msrb.mxu0 %v11389_v11  ;;  %6553 = vmatpush.bf16.msrb.mxu1 %v11393_v46  ;;  %v18030_v18 = vld [vmem:[#allocation37_spill] sm:$0xff] }
 0x578   : > { %v13642_v13 = vpop.eup %13641  ;;  %v11233_v60 = vmul.f32 -1.442695, %v5778_v30  ;;  %v11234_v57 = vmul.f32 -1.442695, %v5779_v17  ;;  %v16405_v47 = vadd.f32 %v18030_v18, %v14436_v4 }
 0x579   : > { %v13644_v38 = vpop.eup %13643  ;;  %v16370_v24 = vadd.f32 1.0, %v13642_v13  ;;  %13645 = vpow2.f32 %v11232_v19  ;;  %v5777_v19 = vadd.f32 %v5770_v8, %v14626_v53  ;;  %v18031_v13 = vld [vmem:[#allocation38_spill] sm:$0xff] }
 0x57a   : > { %v16372_v22 = vadd.f32 1.0, %v13644_v38  ;;  %13647 = vpow2.f32 %v11233_v60  ;;  %v5757_v3 = vpop.f32.mrf.mxu2  ;;  %v5771_v17 = vpop.f32.mrf.mxu3  ;;  %v517_v60 = vadd.f32 %v18031_v13, %v14413_v45  ;;  %v18033_v38 = vld [vmem:[#allocation40_spill] sm:$0xff] }
 0x57b   : > { %13649 = vrcp.f32 %v16370_v24  ;;  %v5758_v20 = vadd.f32 %v5757_v3, %v16358_v32  ;;  %6540 = vmatpush.bf16.msrb.mxu0 %v11373_v35  ;;  %v18028_v32 = vld [vmem:[#allocation35_spill] sm:$0xff]  ;;  %v5815_v5 = vand.u32 2147483647, %v16370_v24  ;;  %v5817_v52 = vand.u32 2147483648, %v16370_v24 }
 0x57c   : > { %13651 = vrcp.f32 %v16372_v22  ;;  %v6121_v7 = vpop.f32.mrf.mxu0  ;;  %v564_v58 = vadd.f32 %v18028_v32, %v14416_v48  ;;  %v5832_v33 = vand.u32 2147483648, %v16372_v22  ;;  %v5772_v55 = vadd.f32 %v5771_v17, %v16363_v25 }
 0x57d   : > { %13653 = vpow2.f32 %v11234_v57  ;;  %v6168_v14 = vadd.f32 %v6121_v7, %v515_v10  ;;  %v6135_v26 = vpop.f32.mrf.mxu1  ;;  %v5780_v29 = vadd.f32 %v5758_v20, %v14603_v56  ;;  %v16416_v57 = vadd.f32 %v18033_v38, %v14425_v42 }
 0x57e   : > { %v6169_v11 = vadd.f32 %v6135_v26, %v564_v58  ;;  %v5830_v28 = vand.u32 2147483647, %v16372_v22  ;;  %vm5826_vm9 = vweird.f32 %v16372_v22  ;;  %vm5811_vm10 = vweird.f32 %v16370_v24 }
 0x57f   : > { %v13646_v51 = vpop.eup %13645  ;;  %v11364_v16 = vmul.f32 -1.442695, %v6168_v14  ;;  %v11235_v49 = vmul.f32 -1.442695, %v5780_v29  ;;  %vm16435_vm11 = vcmp.eq.f32.partialorder %v5815_v5, 8.507059e+37  ;;  %v5833_v6 = vor.u32 1.1754944e-38, %v5832_v33 }
 0x580   : > { %v13648_v27 = vpop.eup %13647  ;;  %v16393_v54 = vadd.f32 1.0, %v13646_v51  ;;  %v11365_v46 = vmul.f32 -1.442695, %v6169_v11  ;;  %v5781_v20 = vadd.f32 %v5772_v55, %v14626_v53  ;;  %vm16448_vm14 = vcmp.eq.f32.partialorder %v5830_v28, 8.507059e+37 }
 0x581   : > { %v16378_v23 = vpop.eup %13649  ;;  %v16380_v0 = vadd.f32 1.0, %v13648_v27  ;;  %v5818_v27 = vor.u32 1.1754944e-38, %v5817_v52 }
 0x582   : > { %v16382_v39 = vpop.eup %13651  ;;  %v5807_v21 = vmul.f32 %v16378_v23, %v16370_v24  ;;  %v5847_v7 = vand.u32 2147483648, %v16393_v54  ;;  %vm5812_vm13 = vweird.f32 %v16378_v23 }
 0x583   : > { %v13654_v61 = vpop.eup %13653  ;;  %13655 = vrcp.f32 %v16380_v0  ;;  %v5822_v34 = vmul.f32 %v16382_v39, %v16372_v22  ;;  %vm5827_vm12 = vweird.f32 %v16382_v39  ;;  %v5860_v29 = vand.u32 2147483647, %v16380_v0  ;;  %vm16464_vm15 = vmor %vm5811_vm10, %vm5812_vm13 }
 0x584   : > { %v16389_v59 = vadd.f32 1.0, %v13654_v61  ;;  %v5808_v30 = vsub.f32 1.0, %v5807_v21  ;;  %v6149_v10 = vpop.f32.mrf.mxu2  ;;  %v5845_v61 = vand.u32 2147483647, %v16393_v54  ;;  %v16452_v32 = vor.u32 1.1754944e-38, %v5847_v7  ;;  %vm16480_vm2 = vmor %vm5826_vm9, %vm5827_vm12 }
 0x585   : > { %v5823_v41 = vsub.f32 1.0, %v5822_v34  ;;  %v6123_v34 = vpop.f32.mrf.mxu0  ;;  %vm5856_vm0 = vweird.f32 %v16380_v0  ;;  %vm16491_vm3 = vcmp.eq.f32.partialorder %v5860_v29, 8.507059e+37  ;;  %v6137_v28 = vpop.f32.mrf.mxu1  ;;  %v11374_v7 = vld [vmem:[#allocation10 + $0x10] sm:$0xf0] }
 0x586   : > { %13657 = vrcp.f32 %v16389_v59  ;;  %v5809_v62 = vmul.f32 %v16378_v23, %v5808_v30  ;;  %v5877_v58 = vand.u32 2147483648, %v16389_v59  ;;  %v5862_v30 = vand.u32 2147483648, %v16380_v0 }
 0x587   : > { %13659 = vrcp.f32 %v16393_v54  ;;  %v5824_v25 = vmul.f32 %v16382_v39, %v5823_v41  ;;  %v6172_v38 = vadd.f32 %v6123_v34, %v517_v60  ;;  %vm5871_vm1 = vweird.f32 %v16389_v59 }
 0x588   : > { %13661 = vpow2.f32 %v11364_v16  ;;  %v5810_v21 = vadd.f32 %v16378_v23, %v5809_v62  ;;  %v5875_v41 = vand.u32 2147483647, %v16389_v59  ;;  %v16484_v60 = vor.u32 1.1754944e-38, %v5877_v58  ;;  %v6163_v62 = vpop.f32.mrf.mxu3 }
 0x589   : > { %v16421_v44 = vpop.eup %13655  ;;  %13663 = vtanh.f32 %v5777_v19  ;;  %v5825_v36 = vadd.f32 %v16382_v39, %v5824_v25  ;;  %v11367_v52 = vmul.f32 -1.442695, %v6172_v38  ;;  %v5863_v22 = vor.u32 1.1754944e-38, %v5862_v30  ;;  %v12991_v30 = vld [vmem:[#allocation10 + $0xc] sm:$0xf] }
 0x58a   : > { %v5852_v51 = vmul.f32 %v16421_v44, %v16380_v0  ;;  %13665 = vpow2.f32 %v11235_v49  ;;  %v5814_v11 = vsel %vm16464_vm15, %v16378_v23, %v5810_v21  ;;  %v6170_v23 = vadd.f32 %v6149_v10, %v16401_v15  ;;  %v11382_v38 = vld [vmem:[#allocation10 + $0x18] sm:$0xf0] }
 0x58b   : > { %13667 = vpow2.f32 %v11365_v46  ;;  %v5829_v33 = vsel %vm16480_vm2, %v16382_v39, %v5825_v36  ;;  %v5819_v15 = vsel %vm16435_vm11, %v5818_v27, %v5814_v11  ;;  %vm5857_vm4 = vweird.f32 %v16421_v44  ;;  %v11380_v36 = vld [vmem:[#allocation10 + $0x8] sm:$0xf] }
 0x58c   : > { %v16429_v3 = vpop.eup %13657  ;;  %v5853_v35 = vsub.f32 1.0, %v5852_v51  ;;  %v12990_v51 = vld [vmem:[#allocation10 + $0x4] sm:$0xf]  ;;  %vm16501_vm5 = vcmp.eq.f32.partialorder %v5875_v41, 8.507059e+37  ;;  %v5834_v21 = vsel %vm16448_vm14, %v5833_v6, %v5829_v33  ;;  %v6171_v12 = vadd.f32 %v6163_v62, %v16405_v47  ;;  %vm16518_vm7 = vmor %vm5856_vm0, %vm5857_vm4 }
 0x58d   : > { %v5867_v1 = vmul.f32 %v16429_v3, %v16389_v59  ;;  %v16442_v14 = vpop.eup %13659  ;;  %v6173_v27 = vadd.f32 %v6137_v28, %v16412_v50  ;;  %v11377_v34 = vor.u32 %v12990_v51, %v11374_v7  ;;  %vm5872_vm6 = vweird.f32 %v16429_v3  ;;  %v12988_v28 = vld [vmem:[#allocation8 + $0xec] sm:$0xf0]  ;;  %v11614_v51 = vld [vmem:[#allocation8 + $0xf0] sm:$0xf0] }
 0x58e   : > { %v13662_v26 = vpop.eup %13661  ;;  %v5837_v17 = vmul.f32 %v16442_v14, %v16393_v54  ;;  %v5854_v9 = vmul.f32 %v16421_v44, %v5853_v35  ;;  %v11366_v13 = vmul.f32 -1.442695, %v6170_v23  ;;  %vm16541_vm8 = vmor %vm5871_vm1, %vm5872_vm6  ;;  %vm5842_vm1 = vweird.f32 %v16442_v14 }
 0x58f   : > { %v13664_v16 = vpop.eup %13663  ;;  %v5868_v18 = vsub.f32 1.0, %v5867_v1  ;;  %v16458_v19 = vadd.f32 1.0, %v13662_v26  ;;  %6554 = vmatpush.bf16.msrb.mxu1 %v11377_v34  ;;  %vm5841_vm2 = vweird.f32 %v16393_v54 }
 0x590   : > { %v13666_v24 = vpop.eup %13665  ;;  %v5838_v25 = vsub.f32 1.0, %v5837_v17  ;;  %v5855_v1 = vadd.f32 %v16421_v44, %v5854_v9  ;;  %v16513_v58 = vmul.f32 %v13664_v16, %v5819_v15  ;;  %v16534_v17 = vmul.f32 %v5834_v21, %v16170_v63  ;;  %v11620_v15 = vld [vmem:[#allocation8 + $0xe8] sm:$0xf] }
 0x591   : > { %13669 = vrcp.f32 %v16458_v19  ;;  %v5869_v49 = vmul.f32 %v16429_v3, %v5868_v18  ;;  %v13668_v46 = vpop.eup %13667  ;;  %v16499_v39 = vadd.f32 1.0, %v13666_v24  ;;  %v12993_v18 = vld [vmem:[#allocation10 + $0x14] sm:$0xf0]  ;;  %v11368_v9 = vmul.f32 -1.442695, %v6173_v27 }
 0x592   : > { %13671 = vtanh.f32 %v5781_v20  ;;  %v16505_v35 = vadd.f32 1.0, %v13668_v46  ;;  %v6151_v20 = vpop.f32.mrf.mxu2  ;;  %v16525_v50 = vmul.f32 %v16442_v14, %v5838_v25  ;;  %v5859_v6 = vsel %vm16518_vm7, %v16421_v44, %v5855_v1  ;;  %v12989_v1 = vld [vmem:[#allocation8 + $0xf4] sm:$0xf0]  ;;  %v11622_v27 = vld [vmem:[#allocation8 + $0xf8] sm:$0xf0] }
 0x593   : > { %13673 = vpow2.f32 %v11367_v52  ;;  %v5870_v8 = vadd.f32 %v16429_v3, %v5869_v49  ;;  %v6174_v0 = vadd.f32 %v6151_v20, %v16416_v57  ;;  %v5890_v57 = vand.u32 2147483647, %v16499_v39  ;;  %v11612_v49 = vld [vmem:[#allocation8 + $0xe0] sm:$0xf] }
 0x594   : > { %13675 = vrcp.f32 %v16505_v35  ;;  %v6209_v41 = vand.u32 2147483647, %v16458_v19  ;;  %v5864_v24 = vsel %vm16491_vm3, %v5863_v22, %v5859_v6  ;;  %v6211_v59 = vand.u32 2147483648, %v16458_v19 }
 0x595   : > { %13677 = vrcp.f32 %v16499_v39  ;;  %v5874_v5 = vsel %vm16541_vm8, %v16429_v3, %v5870_v8  ;;  %v11369_v33 = vmul.f32 -1.442695, %v6174_v0  ;;  %vm6205_vm10 = vweird.f32 %v16458_v19  ;;  %v12986_v3 = vld [vmem:[#allocation8 + $0xe4] sm:$0xf]  ;;  %v12984_v0 = vld [vmem:[#allocation8 + $0xcc] sm:$0xf0] }
 0x596   : > { %13679 = vtanh.f32 %v6171_v12  ;;  %v11381_v55 = vor.u32 %v12993_v18, %v11380_v36  ;;  %v11385_v22 = vor.u32 %v12991_v30, %v11382_v38  ;;  %v5879_v7 = vsel %vm16501_vm5, %v16484_v60, %v5874_v5  ;;  %v12987_v12 = vld [vmem:[#allocation8 + $0xec] sm:$0xf]  ;;  %v12982_v5 = vld [vmem:[#allocation8 + $0xc4] sm:$0xf] }
 0x597   : > { %v16511_v26 = vpop.eup %13669  ;;  %13681 = vpow2.f32 %v11368_v9  ;;  %vm16575_vm12 = vcmp.eq.f32.partialorder %v6209_v41, 8.507059e+37  ;;  %v6212_v10 = vor.u32 1.1754944e-38, %v6211_v59  ;;  %v11617_v6 = vor.u32 %v12986_v3, %v11614_v51  ;;  %v11598_v59 = vld [vmem:[#allocation8 + $0xd0] sm:$0xf0] }
 0x598   : > { %v13672_v47 = vpop.eup %13671  ;;  %v6201_v16 = vmul.f32 %v16511_v26, %v16458_v19  ;;  %vm6206_vm9 = vweird.f32 %v16511_v26  ;;  %13683 = vpow2.f32 %v11366_v13  ;;  %6568 = vmatpush.bf16.msrb.mxu2 %v11381_v55  ;;  %6582 = vmatpush.bf16.msrb.mxu3 %v11385_v22  ;;  %v5899_v18 = vmul.f32 %v5879_v7, %v16181_v37 }
 0x599   : > { %v13674_v63 = vpop.eup %13673  ;;  %v5901_v19 = vmul.f32 %v13672_v47, %v5864_v24  ;;  %vm16571_vm11 = vmor %vm6205_vm10, %vm6206_vm9  ;;  %v11613_v47 = vor.u32 %v12988_v28, %v11612_v49  ;;  %v6226_v30 = vand.u32 2147483648, %v16505_v35  ;;  %v6224_v9 = vand.u32 2147483647, %v16505_v35  ;;  %6763 = vmatpush.bf16.msra.mxu1 %v11617_v6  ;;  %v11582_v6 = vld [vmem:[#allocation8 + $0xb0] sm:$0xf0] }
 0x59a   : > { %v6202_v11 = vsub.f32 1.0, %v6201_v16  ;;  %v16555_v52 = vadd.f32 1.0, %v13674_v63  ;;  %v16557_v62 = vpop.eup %13675  ;;  %v11596_v16 = vld [vmem:[#allocation8 + $0xc0] sm:$0xf]  ;;  %v11621_v41 = vor.u32 %v12989_v1, %v11620_v15  ;;  %v11625_v63 = vor.u32 %v12987_v12, %v11622_v27  ;;  %v12983_v15 = vld [vmem:[#allocation8 + $0xcc] sm:$0xf] }
 0x59b   : > { %v6216_v46 = vmul.f32 %v16557_v62, %v16505_v35  ;;  %v16567_v20 = vpop.eup %13677  ;;  %vm6221_vm13 = vweird.f32 %v16557_v62  ;;  %6749 = vmatpush.bf16.msra.mxu0 %v11613_v47  ;;  %v11597_v24 = vor.u32 %v12984_v0, %v11596_v16  ;;  %vm6220_vm14 = vweird.f32 %v16505_v35  ;;  %v11604_v35 = vld [vmem:[#allocation8 + $0xc8] sm:$0xf]  ;;  %v11606_v1 = vld [vmem:[#allocation8 + $0xd8] sm:$0xf0]  ;;  %v11580_v12 = vld [vmem:[#allocation8 + $0xa0] sm:$0xf] }
 0x59c   : > { %v6203_v23 = vmul.f32 %v16511_v26, %v6202_v11  ;;  %13685 = vrcp.f32 %v16555_v52  ;;  %v13680_v34 = vpop.eup %13679  ;;  %v5882_v37 = vmul.f32 %v16567_v20, %v16499_v39  ;;  %v5892_v22 = vand.u32 2147483648, %v16499_v39  ;;  %vm16607_vm15 = vmor %vm6220_vm14, %vm6221_vm13  ;;  %6777 = vmatpush.bf16.msra.mxu2 %v11621_v41  ;;  %6791 = vmatpush.bf16.msra.mxu3 %v11625_v63  ;;  %v18056_v27 = vld [vmem:[#allocation41_spill] sm:$0xff]  ;;  %v12976_v41 = vld [vmem:[#allocation8 + $0x8c] sm:$0xf0] }
 0x59d   : > { %13687 = vpow2.f32 %v11369_v33  ;;  %v6217_v29 = vsub.f32 1.0, %v6216_v46  ;;  %v13682_v36 = vpop.eup %13681  ;;  %v16597_v33 = vadd.f32 %v16513_v58, %v16534_v17  ;;  %v16603_v28 = vadd.f32 %v5901_v19, %v5899_v18  ;;  %v12985_v17 = vld [vmem:[#allocation8 + $0xd4] sm:$0xf0]  ;;  %v12978_v47 = vld [vmem:[#allocation8 + $0xa4] sm:$0xf]  ;;  %vm16710_vm13 = vmor %vm5841_vm2, %vm5842_vm1 }
 0x59e   : > { %v6204_v25 = vadd.f32 %v16511_v26, %v6203_v23  ;;  %v13684_v11 = vpop.eup %13683  ;;  %v6227_v51 = vor.u32 1.1754944e-38, %v6226_v30  ;;  %vm6225_vm0 = vcmp.eq.f32.partialorder %v6224_v9, 8.507059e+37  ;;  %v5883_v19 = vsub.f32 1.0, %v5882_v37  ;;  %v12981_v18 = vld [vmem:[#allocation8 + $0xb4] sm:$0xf0] }
 0x59f   : > { %v6218_v38 = vmul.f32 %v16557_v62, %v6217_v29  ;;  %v16613_v7 = vadd.f32 1.0, %v13684_v11  ;;  %6750 = vmatpush.bf16.msra.mxu0 %v11597_v24  ;;  %v11605_v0 = vor.u32 %v12985_v17, %v11604_v35  ;;  %v12979_v30 = vld [vmem:[#allocation8 + $0xac] sm:$0xf]  ;;  %v11590_v11 = vld [vmem:[#allocation8 + $0xb8] sm:$0xf0]  ;;  %vm5886_vm3 = vweird.f32 %v16499_v39 }
 0x5a0   : > { %v6208_v8 = vsel %vm16571_vm11, %v16511_v26, %v6204_v25  ;;  %v16589_v26 = vadd.f32 1.0, %v13682_v36  ;;  %v11601_v25 = vor.u32 %v12982_v5, %v11598_v59  ;;  %v11588_v36 = vld [vmem:[#allocation8 + $0xa8] sm:$0xf]  ;;  %v16637_v37 = vld [vmem:[#allocation8 + $0x80] sm:$0xf]  ;;  %v5884_v63 = vmul.f32 %v16567_v20, %v5883_v19 }
 0x5a1   : > { %v6213_v13 = vsel %vm16575_vm12, %v6212_v10, %v6208_v8  ;;  %v6219_v49 = vadd.f32 %v16557_v62, %v6218_v38  ;;  %v6165_v8 = vpop.f32.mrf.mxu3  ;;  %v11609_v38 = vor.u32 %v12983_v15, %v11606_v1  ;;  %6778 = vmatpush.bf16.msra.mxu2 %v11605_v0  ;;  %v12974_v5 = vld [vmem:[#allocation8 + $0x84] sm:$0xf]  ;;  %v11566_v59 = vld [vmem:[#allocation8 + $0x90] sm:$0xf0]  ;;  %vm6250_vm4 = vweird.f32 %v16555_v52  ;;  %v11574_v35 = vld [vmem:[#allocation8 + $0x98] sm:$0xf0] }
 0x5a2   : > { %v6294_v44 = vmul.f32 %v13680_v34, %v6213_v13  ;;  %v16593_v23 = vpop.eup %13685  ;;  %13689 = vrcp.f32 %v16589_v26  ;;  %v664_v34 = vadd.f32 %v18056_v27, %v14436_v4  ;;  %6764 = vmatpush.bf16.msra.mxu1 %v11601_v25  ;;  %v11589_v3 = vor.u32 %v12981_v18, %v11588_v36  ;;  %v16661_v19 = vld [vmem:[#allocation8 + $0x60] sm:$0xf]  ;;  %v12962_v18 = vld [vmem:[#allocation8 + $0x24] sm:$0xf] }
 0x5a3   : > { %v13688_v55 = vpop.eup %13687  ;;  %v6246_v58 = vmul.f32 %v16593_v23, %v16555_v52  ;;  %v6223_v46 = vsel %vm16607_vm15, %v16557_v62, %v6219_v49  ;;  %13691 = vtanh.f32 %v16597_v33  ;;  %v12980_v62 = vld [vmem:[#allocation8 + $0xac] sm:$0xf0]  ;;  %6792 = vmatpush.bf16.msra.mxu3 %v11609_v38  ;;  %vm16649_vm5 = vcmp.eq.f32.partialorder %v5845_v61, 8.507059e+37 }
 0x5a4   : > { %v6228_v21 = vsel %vm6225_vm0, %v6227_v51, %v6223_v46  ;;  %v16618_v10 = vadd.f32 1.0, %v13688_v55  ;;  %13693 = vtanh.f32 %v16603_v28  ;;  %v11581_v49 = vor.u32 %v12980_v62, %v11580_v12  ;;  %v12977_v51 = vld [vmem:[#allocation8 + $0x94] sm:$0xf0]  ;;  %v11526_v46 = vld [vmem:[#allocation8 + $0x38] sm:$0xf0] }
 0x5a5   : > { %v6247_v60 = vsub.f32 1.0, %v6246_v58  ;;  %v6292_v29 = vmul.f32 %v6228_v21, %v16199_v2  ;;  %v16631_v2 = vadd.f32 %v16442_v14, %v16525_v50  ;;  %13695 = vrcp.f32 %v16613_v7  ;;  %v12975_v58 = vld [vmem:[#allocation8 + $0x8c] sm:$0xf]  ;;  %v16663_v21 = vld [vmem:[#allocation8 + $0x6c] sm:$0xf0]  ;;  %6779 = vmatpush.bf16.msra.mxu2 %v11589_v3 }
 0x5a6   : > { %13697 = vrcp.f32 %v16618_v10  ;;  %v6175_v50 = vadd.f32 %v6165_v8, %v664_v34  ;;  %v11585_v55 = vor.u32 %v12978_v47, %v11582_v6  ;;  %vm16655_vm6 = vcmp.eq.f32.partialorder %v5890_v57, 8.507059e+37  ;;  %6751 = vmatpush.bf16.msra.mxu0 %v11581_v49  ;;  %v12970_v34 = vld [vmem:[#allocation8 + $0x64] sm:$0xf]  ;;  %v11550_v6 = vld [vmem:[#allocation8 + $0x70] sm:$0xf0] }
 0x5a7   : > { %v6248_v16 = vmul.f32 %v16593_v23, %v6247_v60  ;;  %v16635_v9 = vadd.f32 %v6294_v44, %v6292_v29  ;;  %v16644_v44 = vld [vmem:[#allocation8 + $0x88] sm:$0xf]  ;;  %vm6251_vm7 = vweird.f32 %v16593_v23  ;;  %v11593_v1 = vor.u32 %v12979_v30, %v11590_v11  ;;  %v12973_v11 = vld [vmem:[#allocation8 + $0x74] sm:$0xf0]  ;;  %v11534_v3 = vld [vmem:[#allocation8 + $0x50] sm:$0xf0] }
 0x5a8   : > { %v16627_v13 = vpop.eup %13689  ;;  %v6254_v60 = vand.u32 2147483647, %v16555_v52  ;;  %v6256_v12 = vand.u32 2147483648, %v16555_v52  ;;  %6765 = vmatpush.bf16.msra.mxu1 %v11585_v55  ;;  %v11565_v57 = vor.u32 %v12976_v41, %v16637_v37  ;;  %v11569_v27 = vor.u32 %v12974_v5, %v11566_v59  ;;  %vm16684_vm10 = vmor %vm6250_vm4, %vm6251_vm7  ;;  %v12971_v37 = vld [vmem:[#allocation8 + $0x6c] sm:$0xf] }
 0x5a9   : > { %v6261_v24 = vmul.f32 %v16627_v13, %v16589_v26  ;;  %v6249_v15 = vadd.f32 %v16593_v23, %v6248_v16  ;;  %v16665_v61 = vpop.eup %13691  ;;  %vm6266_vm8 = vweird.f32 %v16627_v13  ;;  %v6271_v62 = vand.u32 2147483648, %v16589_v26  ;;  %v11556_v16 = vld [vmem:[#allocation8 + $0x68] sm:$0xf]  ;;  %6793 = vmatpush.bf16.msra.mxu3 %v11593_v1  ;;  %v11532_v5 = vld [vmem:[#allocation8 + $0x40] sm:$0xf] }
 0x5aa   : > { %v16670_v29 = vpop.eup %13693  ;;  %v11573_v47 = vor.u32 %v12977_v51, %v16644_v44  ;;  %v5885_v36 = vadd.f32 %v16567_v20, %v5884_v63  ;;  %vm5887_vm9 = vweird.f32 %v16567_v20  ;;  %v6269_v30 = vand.u32 2147483647, %v16589_v26  ;;  %v12968_v59 = vld [vmem:[#allocation8 + $0x4c] sm:$0xf0]  ;;  %6752 = vmatpush.bf16.msra.mxu0 %v11565_v57  ;;  %v11542_v57 = vld [vmem:[#allocation8 + $0x58] sm:$0xf0] }
 0x5ab   : > { %v6262_v25 = vsub.f32 1.0, %v6261_v24  ;;  %v16676_v0 = vpop.eup %13695  ;;  %v11577_v38 = vor.u32 %v12975_v58, %v11574_v35  ;;  %vm6265_vm11 = vweird.f32 %v16589_v26  ;;  %v6253_v63 = vsel %vm16684_vm10, %v16593_v23, %v6249_v15  ;;  %v11558_v24 = vld [vmem:[#allocation8 + $0x78] sm:$0xf0]  ;;  %vm16721_vm15 = vmor %vm5886_vm3, %vm5887_vm9  ;;  %v12958_v49 = vld [vmem:[#allocation8 + $0x4] sm:$0xf] }
 0x5ac   : > { %v16689_v41 = vpop.eup %13697  ;;  %13699 = vtanh.f32 %v6175_v50  ;;  %v5893_v44 = vor.u32 1.1754944e-38, %v5892_v22  ;;  %vm16700_vm12 = vmor %vm6265_vm11, %vm6266_vm8  ;;  %v6257_v26 = vor.u32 1.1754944e-38, %v6256_v12  ;;  %6766 = vmatpush.bf16.msra.mxu1 %v11569_v27  ;;  %v11549_v23 = vor.u32 %v16663_v21, %v16661_v19  ;;  %v12966_v50 = vld [vmem:[#allocation8 + $0x44] sm:$0xf]  ;;  %6780 = vmatpush.bf16.msra.mxu2 %v11573_v47  ;;  %v11540_v19 = vld [vmem:[#allocation8 + $0x48] sm:$0xf] }
 0x5ad   : > { %v6263_v8 = vmul.f32 %v16627_v13, %v6262_v25  ;;  %v11553_v55 = vor.u32 %v12970_v34, %v11550_v6  ;;  %v6272_v51 = vor.u32 1.1754944e-38, %v6271_v62  ;;  %vm6255_vm14 = vcmp.eq.f32.partialorder %v6254_v60, 8.507059e+37  ;;  %6794 = vmatpush.bf16.msra.mxu3 %v11577_v38  ;;  %v12967_v12 = vld [vmem:[#allocation8 + $0x4c] sm:$0xf]  ;;  %v12964_v62 = vld [vmem:[#allocation8 + $0x2c] sm:$0xf0] }
 0x5ae   : > { %v11557_v35 = vor.u32 %v12973_v11, %v11556_v16  ;;  %v16727_v54 = vmul.f32 %v16689_v41, %v16618_v10  ;;  %v6258_v15 = vsel %vm6255_vm14, %v6257_v26, %v6253_v63  ;;  %vm6270_vm0 = vcmp.eq.f32.partialorder %v6269_v30, 8.507059e+37  ;;  %6753 = vmatpush.bf16.msra.mxu0 %v11549_v23  ;;  %v11502_v23 = vld [vmem:[#allocation8 + $0x10] sm:$0xf0]  ;;  %v11510_v25 = vld [vmem:[#allocation8 + $0x18] sm:$0xf0] }
 0x5af   : > { %v6264_v52 = vadd.f32 %v16627_v13, %v6263_v8  ;;  %v11561_v1 = vor.u32 %v12971_v37, %v11558_v24  ;;  %v11533_v21 = vor.u32 %v12968_v59, %v11532_v5  ;;  %v11537_v60 = vor.u32 %v12966_v50, %v11534_v3  ;;  %v11516_v8 = vld [vmem:[#allocation8 + $0x20] sm:$0xf]  ;;  %v12963_v37 = vld [vmem:[#allocation8 + $0x2c] sm:$0xf] }
 0x5b0   : > { %v5844_v39 = vsel %vm16710_vm13, %v16442_v14, %v16631_v2  ;;  %v5889_v27 = vsel %vm16721_vm15, %v16567_v20, %v5885_v36  ;;  %6767 = vmatpush.bf16.msra.mxu1 %v11553_v55  ;;  %v6231_v14 = vmul.f32 %v16676_v0, %v16613_v7  ;;  %6781 = vmatpush.bf16.msra.mxu2 %v11557_v35  ;;  %v11518_v20 = vld [vmem:[#allocation8 + $0x30] sm:$0xf0]  ;;  %v11524_v36 = vld [vmem:[#allocation8 + $0x28] sm:$0xf]  ;;  %v11500_v59 = vld [vmem:[#allocation8] sm:$0xf]  ;;  %vm6281_vm1 = vweird.f32 %v16689_v41 }
 0x5b1   : > { %v6268_v58 = vsel %vm16700_vm12, %v16627_v13, %v6264_v52  ;;  %v12969_v13 = vld [vmem:[#allocation8 + $0x54] sm:$0xf0]  ;;  %v5849_v47 = vsel %vm16649_vm5, %v16452_v32, %v5844_v39  ;;  %v5894_v6 = vsel %vm16655_vm6, %v5893_v44, %v5889_v27  ;;  %6795 = vmatpush.bf16.msra.mxu3 %v11561_v1  ;;  %v11545_v17 = vor.u32 %v12967_v12, %v11542_v57  ;;  %v12960_v44 = vld [vmem:[#allocation8 + $0xc] sm:$0xf0]  ;;  %v11508_v55 = vld [vmem:[#allocation8 + $0x8] sm:$0xf] }
 0x5b2   : > { %v6273_v34 = vsel %vm6270_vm0, %v6272_v51, %v6268_v58  ;;  %v13700_v16 = vpop.eup %13699  ;;  %v11541_v2 = vor.u32 %v12969_v13, %v11540_v19  ;;  %v5906_v30 = vmul.f32 %v16665_v61, %v5849_v47  ;;  %v5907_v38 = vmul.f32 %v16670_v29, %v5894_v6  ;;  %v12965_v32 = vld [vmem:[#allocation8 + $0x34] sm:$0xf0]  ;;  %6754 = vmatpush.bf16.msra.mxu0 %v11533_v21  ;;  %v12959_v58 = vld [vmem:[#allocation8 + $0xc] sm:$0xf]  ;;  %v13052_v1 = vld [vmem:[#allocation5 + $0xec] sm:$0xf0] }
 0x5b3   : > { %v6295_v11 = vmul.f32 %v13700_v16, %v6258_v15  ;;  %v6293_v63 = vmul.f32 %v6273_v34, %v16298_v40  ;;  %v6277_v26 = vsub.f32 1.0, %v16727_v54  ;;  %v11517_v61 = vor.u32 %v12964_v62, %v11516_v8  ;;  %v12961_v51 = vld [vmem:[#allocation8 + $0x14] sm:$0xf0]  ;;  %v11746_v15 = vld [vmem:[#allocation5 + $0xe0] sm:$0xf] }
 0x5b4   : > { %v5908_v52 = vpack.c.bf16 %v5906_v30, %v5906_v30  ;;  %v5909_v24 = vpack.c.bf16 %v5907_v38, %v5907_v38  ;;  %v13238_v5 = vpack.c.bf16 %v5907_v38, %v5906_v30  ;;  %6768 = vmatpush.bf16.msra.mxu1 %v11537_v60  ;;  %v11521_v29 = vor.u32 %v12962_v18, %v11518_v20  ;;  %v13050_v13 = vld [vmem:[#allocation5 + $0xe4] sm:$0xf]  ;;  %v11748_v21 = vld [vmem:[#allocation5 + $0xf0] sm:$0xf0]  ;;  %v11754_v60 = vld [vmem:[#allocation5 + $0xe8] sm:$0xf] }
 0x5b5   : > { %v6232_v50 = vsub.f32 1.0, %v6231_v14  ;;  %6782 = vmatpush.bf16.msra.mxu2 %v11541_v2  ;;  %v11525_v3 = vor.u32 %v12965_v32, %v11524_v36  ;;  %6796 = vmatpush.bf16.msra.mxu3 %v11545_v17  ;;  %v11529_v35 = vor.u32 %v12963_v37, %v11526_v46  ;;  %v16748_v54 = vadd.f32 %v6295_v11, %v6293_v63  ;;  %v13053_v27 = vld [vmem:[#allocation5 + $0xf4] sm:$0xf0]  ;;  %v13051_v34 = vld [vmem:[#allocation5 + $0xec] sm:$0xf] }
 0x5b6   : > { %13258 = vst [vmem:[%s14192_s19 + $0x20] sm:$0xff] %v13238_v5   ;;  %v6369_v40 = vunpack.c.l.b16 %v5908_v52  ;;  %v6370_v22 = vunpack.c.l.b16 %v5909_v24  ;;  %v6278_v12 = vmul.f32 %v16689_v41, %v6277_v26  ;;  %6755 = vmatpush.bf16.msra.mxu0 %v11517_v61  ;;  %v11501_v57 = vor.u32 %v12960_v44, %v11500_v59  ;;  %v11756_v8 = vld [vmem:[#allocation5 + $0xf8] sm:$0xf0]  ;;  %v11730_v20 = vld [vmem:[#allocation5 + $0xc0] sm:$0xf] }
 0x5b7   : > { %v11505_v39 = vor.u32 %v12958_v49, %v11502_v23  ;;  %v6239_v62 = vand.u32 2147483647, %v16613_v7  ;;  %v11509_v47 = vor.u32 %v12961_v51, %v11508_v55  ;;  %v11747_v6 = vor.u32 %v13052_v1, %v11746_v15  ;;  %v13048_v36 = vld [vmem:[#allocation5 + $0xcc] sm:$0xf0]  ;;  %v13046_v11 = vld [vmem:[#allocation5 + $0xc4] sm:$0xf] }
 0x5b8   : > { %v6371_v19 = vpack.c.b16 %v6370_v22, %v6369_v40  ;;  %6769 = vmatpush.bf16.msra.mxu1 %v11521_v29  ;;  %v6233_v16 = vmul.f32 %v16676_v0, %v6232_v50  ;;  %v6241_v14 = vand.u32 2147483648, %v16613_v7  ;;  %v11513_v2 = vor.u32 %v12959_v58, %v11510_v25  ;;  %v11732_v17 = vld [vmem:[#allocation5 + $0xd0] sm:$0xf0]  ;;  %v11738_v32 = vld [vmem:[#allocation5 + $0xc8] sm:$0xf] }
 0x5b9   : > { %6783 = vmatpush.bf16.msra.mxu2 %v11525_v3  ;;  %6797 = vmatpush.bf16.msra.mxu3 %v11529_v35  ;;  %v11751_v18 = vor.u32 %v13050_v13, %v11748_v21  ;;  %13701 = vtanh.f32 %v16748_v54  ;;  %v11755_v30 = vor.u32 %v13053_v27, %v11754_v60  ;;  %v11759_v38 = vor.u32 %v13051_v34, %v11756_v8  ;;  %v13049_v46 = vld [vmem:[#allocation5 + $0xd4] sm:$0xf0]  ;;  %v13047_v63 = vld [vmem:[#allocation5 + $0xcc] sm:$0xf]  ;;  %v11740_v52 = vld [vmem:[#allocation5 + $0xd8] sm:$0xf0] }
 0x5ba   : > { %6541 = vmatmul.bf16.vlgmr.msrb.gmra.mxu0 %v6371_v19  ;;  %6555 = vmatmul.bf16.vlgmr.msrb.gmra.mxu1 %v6371_v19  ;;  %v6279_v37 = vadd.f32 %v16689_v41, %v6278_v12  ;;  %13703 = vtanh.f32 %v16635_v9  ;;  %v6284_v24 = vand.u32 2147483647, %v16618_v10  ;;  %v6286_v5 = vand.u32 2147483648, %v16618_v10  ;;  %v11714_v26 = vld [vmem:[#allocation5 + $0xa0] sm:$0xf] }
 0x5bb   : > { %6569 = vmatmul.bf16.vlgmr.msrb.gmra.mxu2 %v6371_v19  ;;  %6583 = vmatmul.bf16.vlgmr.msrb.gmra.mxu3 %v6371_v19  ;;  %v11731_v59 = vor.u32 %v13048_v36, %v11730_v20  ;;  %v6234_v44 = vadd.f32 %v16676_v0, %v6233_v16  ;;  %vm6236_vm2 = vweird.f32 %v16676_v0  ;;  %vm6280_vm3 = vweird.f32 %v16618_v10  ;;  %v13044_v61 = vld [vmem:[#allocation5 + $0xac] sm:$0xf0]  ;;  %v13042_v29 = vld [vmem:[#allocation5 + $0xa4] sm:$0xf]  ;;  %v11716_v3 = vld [vmem:[#allocation5 + $0xb0] sm:$0xf0] }
 0x5bc   : > { %6756 = vmatpush.bf16.msra.mxu0 %v11501_v57  ;;  %6770 = vmatpush.bf16.msra.mxu1 %v11505_v39  ;;  %v11735_v49 = vor.u32 %v13046_v11, %v11732_v17  ;;  %vm16765_vm4 = vmor %vm6280_vm3, %vm6281_vm1  ;;  %v11739_v55 = vor.u32 %v13049_v46, %v11738_v32  ;;  %v11743_v50 = vor.u32 %v13047_v63, %v11740_v52  ;;  %v11722_v40 = vld [vmem:[#allocation5 + $0xa8] sm:$0xf]  ;;  %vm6235_vm5 = vweird.f32 %v16613_v7  ;;  %v13045_v22 = vld [vmem:[#allocation5 + $0xb4] sm:$0xf0] }
 0x5bd   : > { %6784 = vmatpush.bf16.msra.mxu2 %v11509_v47  ;;  %6798 = vmatpush.bf16.msra.mxu3 %v11513_v2  ;;  %v6283_v10 = vsel %vm16765_vm4, %v16689_v41, %v6279_v37  ;;  %v13043_v51 = vld [vmem:[#allocation5 + $0xac] sm:$0xf]  ;;  %v11724_v58 = vld [vmem:[#allocation5 + $0xb8] sm:$0xf0]  ;;  %vm16775_vm6 = vmor %vm6235_vm5, %vm6236_vm2  ;;  %vm16779_vm7 = vcmp.eq.f32.partialorder %v6239_v62, 8.507059e+37  ;;  %v6287_v1 = vor.u32 1.1754944e-38, %v6286_v5  ;;  %v11715_v7 = vor.u32 %v13044_v61, %v11714_v26 }
 0x5be   : > { %v6238_v41 = vsel %vm16775_vm6, %v16676_v0, %v6234_v44  ;;  %v6242_v19 = vor.u32 1.1754944e-38, %v6241_v14  ;;  %vm6285_vm8 = vcmp.eq.f32.partialorder %v6284_v24, 8.507059e+37  ;;  %v11719_v13 = vor.u32 %v13042_v29, %v11716_v3  ;;  %v11698_v21 = vld [vmem:[#allocation5 + $0x80] sm:$0xf]  ;;  %v13040_v60 = vld [vmem:[#allocation5 + $0x8c] sm:$0xf0] }
 0x5bf   : > { %v13702_v35 = vpop.eup %13701  ;;  %v6288_v57 = vsel %vm6285_vm8, %v6287_v1, %v6283_v10  ;;  %v11723_v39 = vor.u32 %v13045_v22, %v11722_v40  ;;  %v11727_v27 = vor.u32 %v13043_v51, %v11724_v58  ;;  %v13038_v34 = vld [vmem:[#allocation5 + $0x84] sm:$0xf]  ;;  %v11700_v8 = vld [vmem:[#allocation5 + $0x90] sm:$0xf0]  ;;  %v11706_v62 = vld [vmem:[#allocation5 + $0x88] sm:$0xf]  ;;  %v11699_v14 = vor.u32 %v13040_v60, %v11698_v21 }
 0x5c0   : > { %7143 = vmatpush.bf16.msrb.mxu0 %v11747_v6  ;;  %7157 = vmatpush.bf16.msrb.mxu1 %v11751_v18  ;;  %v13704_v12 = vpop.eup %13703  ;;  %v6301_v47 = vmul.f32 %v13702_v35, %v6288_v57  ;;  %v13041_v6 = vld [vmem:[#allocation5 + $0x94] sm:$0xf0]  ;;  %v13039_v16 = vld [vmem:[#allocation5 + $0x8c] sm:$0xf]  ;;  %v11708_v2 = vld [vmem:[#allocation5 + $0x98] sm:$0xf0]  ;;  %v6243_v0 = vsel %vm16779_vm7, %v6242_v19, %v6238_v41  ;;  %v11703_v20 = vor.u32 %v13038_v34, %v11700_v8 }
 0x5c1   : > { %7171 = vmatpush.bf16.msrb.mxu2 %v11755_v30  ;;  %7185 = vmatpush.bf16.msrb.mxu3 %v11759_v38  ;;  %v6300_v18 = vmul.f32 %v13704_v12, %v6243_v0  ;;  %v11682_v36 = vld [vmem:[#allocation5 + $0x60] sm:$0xf]  ;;  %v13036_v30 = vld [vmem:[#allocation5 + $0x6c] sm:$0xf0]  ;;  %v11707_v38 = vor.u32 %v13041_v6, %v11706_v62  ;;  %v11711_v11 = vor.u32 %v13039_v16, %v11708_v2  ;;  %v13034_v17 = vld [vmem:[#allocation5 + $0x64] sm:$0xf] }
 0x5c2   : > { %v11684_v32 = vld [vmem:[#allocation5 + $0x70] sm:$0xf0]  ;;  %v11690_v37 = vld [vmem:[#allocation5 + $0x68] sm:$0xf]  ;;  %v13037_v63 = vld [vmem:[#allocation5 + $0x74] sm:$0xf0]  ;;  %v11683_v5 = vor.u32 %v13036_v30, %v11682_v36 }
 0x5c3   : > { %v16788_v46 = vpack.c.bf16 %v6301_v47, %v6300_v18  ;;  %v13035_v52 = vld [vmem:[#allocation5 + $0x6c] sm:$0xf]  ;;  %v11692_v24 = vld [vmem:[#allocation5 + $0x78] sm:$0xf0]  ;;  %v11666_v44 = vld [vmem:[#allocation5 + $0x40] sm:$0xf]  ;;  %v11691_v26 = vor.u32 %v13037_v63, %v11690_v37 }
 0x5c4   : > { %7144 = vmatpush.bf16.msrb.mxu0 %v11731_v59  ;;  %7158 = vmatpush.bf16.msrb.mxu1 %v11735_v49  ;;  %v11687_v59 = vor.u32 %v13034_v17, %v11684_v32  ;;  %v13032_v49 = vld [vmem:[#allocation5 + $0x4c] sm:$0xf0]  ;;  %v11695_v61 = vor.u32 %v13035_v52, %v11692_v24  ;;  %v13030_v29 = vld [vmem:[#allocation5 + $0x44] sm:$0xf]  ;;  %v11668_v23 = vld [vmem:[#allocation5 + $0x50] sm:$0xf0] }
 0x5c5   : > { %7172 = vmatpush.bf16.msrb.mxu2 %v11739_v55  ;;  %7186 = vmatpush.bf16.msrb.mxu3 %v11743_v50  ;;  %v11674_v55 = vld [vmem:[#allocation5 + $0x48] sm:$0xf]  ;;  %v13033_v50 = vld [vmem:[#allocation5 + $0x54] sm:$0xf0]  ;;  %v13031_v3 = vld [vmem:[#allocation5 + $0x4c] sm:$0xf]  ;;  %v11667_v10 = vor.u32 %v13032_v49, %v11666_v44  ;;  %v11671_v22 = vor.u32 %v13030_v29, %v11668_v23 }
 0x5c6   : > { %v11676_v40 = vld [vmem:[#allocation5 + $0x58] sm:$0xf0]  ;;  %v11650_v51 = vld [vmem:[#allocation5 + $0x20] sm:$0xf]  ;;  %v13028_v58 = vld [vmem:[#allocation5 + $0x2c] sm:$0xf0]  ;;  %v11675_v35 = vor.u32 %v13033_v50, %v11674_v55 }
 0x5c7   : > { %v11679_v25 = vor.u32 %v13031_v3, %v11676_v40  ;;  %v13026_v15 = vld [vmem:[#allocation5 + $0x24] sm:$0xf]  ;;  %v11652_v1 = vld [vmem:[#allocation5 + $0x30] sm:$0xf0]  ;;  %v13029_v41 = vld [vmem:[#allocation5 + $0x34] sm:$0xf0]  ;;  %v11651_v21 = vor.u32 %v13028_v58, %v11650_v51 }
 0x5c8   : > { %7145 = vmatpush.bf16.msrb.mxu0 %v11715_v7  ;;  %7159 = vmatpush.bf16.msrb.mxu1 %v11719_v13  ;;  %v11658_v7 = vld [vmem:[#allocation5 + $0x28] sm:$0xf]  ;;  %v13027_v19 = vld [vmem:[#allocation5 + $0x2c] sm:$0xf]  ;;  %v11660_v13 = vld [vmem:[#allocation5 + $0x38] sm:$0xf0]  ;;  %v11655_v60 = vor.u32 %v13026_v15, %v11652_v1 }
 0x5c9   : > { %7173 = vmatpush.bf16.msrb.mxu2 %v11723_v39  ;;  %7187 = vmatpush.bf16.msrb.mxu3 %v11727_v27  ;;  %v11634_v12 = vld [vmem:[#allocation5] sm:$0xf]  ;;  %v13024_v57 = vld [vmem:[#allocation5 + $0xc] sm:$0xf0]  ;;  %v11659_v39 = vor.u32 %v13029_v41, %v11658_v7  ;;  %v11663_v27 = vor.u32 %v13027_v19, %v11660_v13  ;;  %v13022_v34 = vld [vmem:[#allocation5 + $0x4] sm:$0xf] }
 0x5ca   : > { %6757 = vmatmul.bf16.vlgmr.msra.gmra.mxu0 %v16788_v46  ;;  %6771 = vmatmul.bf16.vlgmr.msra.gmra.mxu1 %v16788_v46  ;;  %v11636_v8 = vld [vmem:[#allocation5 + $0x10] sm:$0xf0]  ;;  %v11642_v62 = vld [vmem:[#allocation5 + $0x8] sm:$0xf]  ;;  %v13025_v47 = vld [vmem:[#allocation5 + $0x14] sm:$0xf0]  ;;  %v11635_v2 = vor.u32 %v13024_v57, %v11634_v12 }
 0x5cb   : > { %6785 = vmatmul.bf16.vlgmr.msra.gmra.mxu2 %v16788_v46  ;;  %6799 = vmatmul.bf16.vlgmr.msra.gmra.mxu3 %v16788_v46  ;;  %v13023_v6 = vld [vmem:[#allocation5 + $0xc] sm:$0xf]  ;;  %v11644_v16 = vld [vmem:[#allocation5 + $0x18] sm:$0xf0]  ;;  %v11639_v0 = vor.u32 %v13022_v34, %v11636_v8  ;;  %v13116_v36 = vld [vmem:[#allocation10 + $0xec] sm:$0xf0] }
 0x5cc   : > { %7146 = vmatpush.bf16.msrb.mxu0 %v11699_v14  ;;  %7160 = vmatpush.bf16.msrb.mxu1 %v11703_v20  ;;  %v11643_v14 = vor.u32 %v13025_v47, %v11642_v62  ;;  %v11647_v18 = vor.u32 %v13023_v6, %v11644_v16  ;;  %v11880_v20 = vld [vmem:[#allocation10 + $0xe0] sm:$0xf]  ;;  %v13114_v30 = vld [vmem:[#allocation10 + $0xe4] sm:$0xf]  ;;  %v11888_v17 = vld [vmem:[#allocation10 + $0xe8] sm:$0xf] }
 0x5cd   : > { %7174 = vmatpush.bf16.msrb.mxu2 %v11707_v38  ;;  %7188 = vmatpush.bf16.msrb.mxu3 %v11711_v11  ;;  %v11881_v38 = vor.u32 %v13116_v36, %v11880_v20  ;;  %v11882_v11 = vld [vmem:[#allocation10 + $0xf0] sm:$0xf0]  ;;  %v13117_v32 = vld [vmem:[#allocation10 + $0xf4] sm:$0xf0]  ;;  %v13115_v52 = vld [vmem:[#allocation10 + $0xec] sm:$0xf] }
 0x5ce   : > { %v11885_v37 = vor.u32 %v13114_v30, %v11882_v11  ;;  %v11889_v63 = vor.u32 %v13117_v32, %v11888_v17  ;;  %v11890_v24 = vld [vmem:[#allocation10 + $0xf8] sm:$0xf0]  ;;  %v11864_v49 = vld [vmem:[#allocation10 + $0xc0] sm:$0xf]  ;;  %v11866_v29 = vld [vmem:[#allocation10 + $0xd0] sm:$0xf0] }
 0x5cf   : > { %v11872_v23 = vld [vmem:[#allocation10 + $0xc8] sm:$0xf]  ;;  %v13113_v55 = vld [vmem:[#allocation10 + $0xd4] sm:$0xf0]  ;;  %v13111_v40 = vld [vmem:[#allocation10 + $0xcc] sm:$0xf] }
 0x5d0   : > { %7147 = vmatpush.bf16.msrb.mxu0 %v11683_v5  ;;  %7161 = vmatpush.bf16.msrb.mxu1 %v11687_v59  ;;  %v11893_v59 = vor.u32 %v13115_v52, %v11890_v24  ;;  %v11873_v3 = vor.u32 %v13113_v55, %v11872_v23  ;;  %v11848_v51 = vld [vmem:[#allocation10 + $0xa0] sm:$0xf]  ;;  %v13108_v58 = vld [vmem:[#allocation10 + $0xac] sm:$0xf0]  ;;  %v11850_v15 = vld [vmem:[#allocation10 + $0xb0] sm:$0xf0] }
 0x5d1   : > { %7175 = vmatpush.bf16.msrb.mxu2 %v11691_v26  ;;  %7189 = vmatpush.bf16.msrb.mxu3 %v11695_v61  ;;  %v13110_v26 = vld [vmem:[#allocation10 + $0xc4] sm:$0xf]  ;;  %v11856_v1 = vld [vmem:[#allocation10 + $0xa8] sm:$0xf]  ;;  %v13109_v7 = vld [vmem:[#allocation10 + $0xb4] sm:$0xf0] }
 0x5d2   : > { %v11869_v50 = vor.u32 %v13110_v26, %v11866_v29  ;;  %v11857_v19 = vor.u32 %v13109_v7, %v11856_v1  ;;  %v13107_v13 = vld [vmem:[#allocation10 + $0xac] sm:$0xf]  ;;  %v13104_v34 = vld [vmem:[#allocation10 + $0x8c] sm:$0xf0]  ;;  %v13102_v8 = vld [vmem:[#allocation10 + $0x84] sm:$0xf] }
 0x5d3   : > { %v11834_v47 = vld [vmem:[#allocation10 + $0x90] sm:$0xf0]  ;;  %v11840_v6 = vld [vmem:[#allocation10 + $0x88] sm:$0xf]  ;;  %v13105_v16 = vld [vmem:[#allocation10 + $0x94] sm:$0xf0] }
 0x5d4   : > { %7148 = vmatpush.bf16.msrb.mxu0 %v11667_v10  ;;  %7162 = vmatpush.bf16.msrb.mxu1 %v11671_v22  ;;  %v11874_v10 = vld [vmem:[#allocation10 + $0xd8] sm:$0xf0]  ;;  %v11816_v32 = vld [vmem:[#allocation10 + $0x60] sm:$0xf]  ;;  %v13101_v26 = vld [vmem:[#allocation10 + $0x74] sm:$0xf0] }
 0x5d5   : > { %7176 = vmatpush.bf16.msrb.mxu2 %v11675_v35  ;;  %7190 = vmatpush.bf16.msrb.mxu3 %v11679_v25  ;;  %v11877_v22 = vor.u32 %v13111_v40, %v11874_v10  ;;  %v13106_v35 = vld [vmem:[#allocation10 + $0xa4] sm:$0xf]  ;;  %v11849_v25 = vor.u32 %v13108_v58, %v11848_v51  ;;  %v13099_v23 = vld [vmem:[#allocation10 + $0x6c] sm:$0xf]  ;;  %v11826_v55 = vld [vmem:[#allocation10 + $0x78] sm:$0xf0] }
 0x5d6   : > { %v11853_v41 = vor.u32 %v13106_v35, %v11850_v15  ;;  %v11802_v15 = vld [vmem:[#allocation10 + $0x50] sm:$0xf0]  ;;  %v11808_v1 = vld [vmem:[#allocation10 + $0x48] sm:$0xf] }
 0x5d8   : > { %7149 = vmatpush.bf16.msrb.mxu0 %v11651_v21  ;;  %7163 = vmatpush.bf16.msrb.mxu1 %v11655_v60  ;;  %v11858_v21 = vld [vmem:[#allocation10 + $0xb8] sm:$0xf0] }
 0x5d9   : > { %7177 = vmatpush.bf16.msrb.mxu2 %v11659_v39  ;;  %7191 = vmatpush.bf16.msrb.mxu3 %v11663_v27  ;;  %v11861_v12 = vor.u32 %v13107_v13, %v11858_v21  ;;  %v11832_v27 = vld [vmem:[#allocation10 + $0x80] sm:$0xf]  ;;  %v13097_v13 = vld [vmem:[#allocation10 + $0x54] sm:$0xf0]  ;;  %v13095_v21 = vld [vmem:[#allocation10 + $0x4c] sm:$0xf] }
 0x5da   : > { %v11833_v62 = vor.u32 %v13104_v34, %v11832_v27  ;;  %v11809_v34 = vor.u32 %v13097_v13, %v11808_v1 }
 0x5dc   : > { %7150 = vmatpush.bf16.msrb.mxu0 %v11635_v2  ;;  %7164 = vmatpush.bf16.msrb.mxu1 %v11639_v0  ;;  %v11837_v2 = vor.u32 %v13102_v8, %v11834_v47  ;;  %v11841_v0 = vor.u32 %v13105_v16, %v11840_v6 }
 0x5dd   : > { %7178 = vmatpush.bf16.msrb.mxu2 %v11643_v14  ;;  %7192 = vmatpush.bf16.msrb.mxu3 %v11647_v18  ;;  %v13103_v14 = vld [vmem:[#allocation10 + $0x8c] sm:$0xf]  ;;  %v11842_v18 = vld [vmem:[#allocation10 + $0x98] sm:$0xf0] }
 0x5de   : > { %v11845_v20 = vor.u32 %v13103_v14, %v11842_v18  ;;  %v13092_v14 = vld [vmem:[#allocation10 + $0x2c] sm:$0xf0] }
 0x5df   : > { %7151 = vmatmul.bf16.vlgmr.msrb.gmra.mxu0 %v16788_v46  ;;  %7165 = vmatmul.bf16.vlgmr.msrb.gmra.mxu1 %v16788_v46 }
 0x5e0   : > { %7179 = vmatmul.bf16.vlgmr.msrb.gmra.mxu2 %v16788_v46  ;;  %7193 = vmatmul.bf16.vlgmr.msrb.gmra.mxu3 %v16788_v46  ;;  %v13112_v46 = vld [vmem:[#allocation10 + $0xcc] sm:$0xf0] }
 0x5e1   : > { %7564 = vmatpush.bf16.msra.mxu0 %v11881_v38  ;;  %7578 = vmatpush.bf16.msra.mxu1 %v11885_v37  ;;  %v11865_v61 = vor.u32 %v13112_v46, %v11864_v49  ;;  %v13100_v37 = vld [vmem:[#allocation10 + $0x6c] sm:$0xf0]  ;;  %v11818_v49 = vld [vmem:[#allocation10 + $0x70] sm:$0xf0]  ;;  %v11824_v46 = vld [vmem:[#allocation10 + $0x68] sm:$0xf] }
 0x5e2   : > { %7592 = vmatpush.bf16.msra.mxu2 %v11889_v63  ;;  %7606 = vmatpush.bf16.msra.mxu3 %v11893_v59  ;;  %v13098_v63 = vld [vmem:[#allocation10 + $0x64] sm:$0xf]  ;;  %v11817_v59 = vor.u32 %v13100_v37, %v11816_v32  ;;  %v11825_v29 = vor.u32 %v13101_v26, %v11824_v46  ;;  %v13091_v46 = vld [vmem:[#allocation10 + $0x2c] sm:$0xf]  ;;  %v11794_v26 = vld [vmem:[#allocation10 + $0x38] sm:$0xf0] }
 0x5e5   : > { %7565 = vmatpush.bf16.msra.mxu0 %v11865_v61  ;;  %7579 = vmatpush.bf16.msra.mxu1 %v11869_v50  ;;  %v11821_v61 = vor.u32 %v13098_v63, %v11818_v49  ;;  %v13093_v49 = vld [vmem:[#allocation10 + $0x34] sm:$0xf0] }
 0x5e6   : > { %7593 = vmatpush.bf16.msra.mxu2 %v11873_v3  ;;  %7607 = vmatpush.bf16.msra.mxu3 %v11877_v22  ;;  %v13096_v22 = vld [vmem:[#allocation10 + $0x4c] sm:$0xf0] }
 0x5e9   : > { %7566 = vmatpush.bf16.msra.mxu0 %v11849_v25  ;;  %7580 = vmatpush.bf16.msra.mxu1 %v11853_v41  ;;  %v13094_v25 = vld [vmem:[#allocation10 + $0x44] sm:$0xf] }
 0x5ea   : > { %7594 = vmatpush.bf16.msra.mxu2 %v11857_v19  ;;  %7608 = vmatpush.bf16.msra.mxu3 %v11861_v12  ;;  %v11805_v19 = vor.u32 %v13094_v25, %v11802_v15  ;;  %v11810_v12 = vld [vmem:[#allocation10 + $0x58] sm:$0xf0] }
 0x5eb   : > { %v11813_v8 = vor.u32 %v13095_v21, %v11810_v12  ;;  %v18076_v12 = vld [vmem:[#allocation43_spill] sm:$0xff] }
 0x5ed   : > { %7567 = vmatpush.bf16.msra.mxu0 %v11833_v62  ;;  %7581 = vmatpush.bf16.msra.mxu1 %v11837_v2 }
 0x5ee   : > { %7595 = vmatpush.bf16.msra.mxu2 %v11841_v0  ;;  %7609 = vmatpush.bf16.msra.mxu3 %v11845_v20  ;;  %v11784_v0 = vld [vmem:[#allocation10 + $0x20] sm:$0xf] }
 0x5f1   : > { %7568 = vmatpush.bf16.msra.mxu0 %v11817_v59  ;;  %7582 = vmatpush.bf16.msra.mxu1 %v11821_v61  ;;  %v11792_v59 = vld [vmem:[#allocation10 + $0x28] sm:$0xf] }
 0x5f2   : > { %7596 = vmatpush.bf16.msra.mxu2 %v11825_v29  ;;  %v18075_v29 = vld [vmem:[#allocation42_spill] sm:$0xff] }
 0x5f5   : > { %7583 = vmatpush.bf16.msra.mxu1 %v11805_v19 }
 0x5f6   : > { %7597 = vmatpush.bf16.msra.mxu2 %v11809_v34  ;;  %v18077_v34 = vld [vmem:[#allocation44_spill] sm:$0xff] }
 0x637   : > { %v6542_v5 = vpop.f32.mrf.mxu0  ;;  %v16798_v44 = vpop.f32.mrf.mxu1 }
 0x63e   : > { %v6570_v60 = vpop.f32.mrf.mxu2  ;;  %v16802_v36 = vpop.f32.mrf.mxu3 }
 0x63f   : > { %v6544_v57 = vpop.f32.mrf.mxu0  ;;  %v16800_v39 = vpop.f32.mrf.mxu1 }
 0x646   : > { %v16804_v30 = vpop.f32.mrf.mxu2  ;;  %v16809_v40 = vpop.f32.mrf.mxu3 }
 0x647   : > { %v6758_v38 = vpop.f32.mrf.mxu0  ;;  %v6772_v17 = vpop.f32.mrf.mxu1 }
 0x648   : > { %v6759_v11 = vadd.f32 %v6758_v38, %v6542_v5  ;;  %v6773_v24 = vadd.f32 %v6772_v17, %v16798_v44  ;;  %v11829_v5 = vor.u32 %v13099_v23, %v11826_v55  ;;  %v11800_v44 = vld [vmem:[#allocation10 + $0x40] sm:$0xf]  ;;  %v11785_v38 = vor.u32 %v13092_v14, %v11784_v0  ;;  %v11786_v17 = vld [vmem:[#allocation10 + $0x30] sm:$0xf0]  ;;  %v18079_v0 = vld [vmem:[#allocation46_spill] sm:$0xff] }
 0x649   : > { %v11801_v35 = vor.u32 %v13096_v22, %v11800_v44  ;;  %v520_v23 = vadd.f32 %v18075_v29, %v14413_v45  ;;  %v522_v14 = vadd.f32 %v18079_v0, %v14413_v45 }
 0x64a   : > { %v6805_v52 = vadd.f32 %v6759_v11, %v14595_v31  ;;  %v6806_v3 = vadd.f32 %v6773_v24, %v14598_v43  ;;  %7610 = vmatpush.bf16.msra.mxu3 %v11829_v5  ;;  %v13090_v11 = vld [vmem:[#allocation10 + $0x24] sm:$0xf] }
 0x64b   : > { %7569 = vmatpush.bf16.msra.mxu0 %v11801_v35  ;;  %v11789_v24 = vor.u32 %v13090_v11, %v11786_v17 }
 0x64c   : > { %v11626_v50 = vmul.f32 -1.442695, %v6805_v52  ;;  %v11627_v10 = vmul.f32 -1.442695, %v6806_v3  ;;  %v11797_v3 = vor.u32 %v13091_v46, %v11794_v26 }
 0x64d   : > { %7584 = vmatpush.bf16.msra.mxu1 %v11789_v24 }
 0x64e   : > { %13705 = vpow2.f32 %v11626_v50  ;;  %v6786_v51 = vpop.f32.mrf.mxu2  ;;  %7611 = vmatpush.bf16.msra.mxu3 %v11813_v8  ;;  %v6800_v32 = vpop.f32.mrf.mxu3  ;;  %v11793_v50 = vor.u32 %v13093_v49, %v11792_v59  ;;  %v16843_v8 = vadd.f32 %v18077_v34, %v14425_v42 }
 0x64f   : > { %v6760_v58 = vpop.f32.mrf.mxu0  ;;  %13707 = vpow2.f32 %v11627_v10  ;;  %v6787_v7 = vadd.f32 %v6786_v51, %v6570_v60  ;;  %v6774_v27 = vpop.f32.mrf.mxu1  ;;  %7570 = vmatpush.bf16.msra.mxu0 %v11785_v38  ;;  %v6801_v35 = vadd.f32 %v6800_v32, %v16802_v36 }
 0x650   : > { %v6761_v41 = vadd.f32 %v6760_v58, %v6544_v57  ;;  %v6775_v47 = vadd.f32 %v6774_v27, %v16800_v39  ;;  %7598 = vmatpush.bf16.msra.mxu2 %v11793_v50  ;;  %v569_v27 = vadd.f32 %v18076_v12, %v14416_v48 }
 0x651   : > { %v6807_v16 = vadd.f32 %v6787_v7, %v14603_v56 }
 0x652   : > { %v6809_v62 = vadd.f32 %v6761_v41, %v14595_v31  ;;  %v6810_v57 = vadd.f32 %v6775_v47, %v14598_v43  ;;  %7612 = vmatpush.bf16.msra.mxu3 %v11797_v3 }
 0x653   : > { %v11628_v63 = vmul.f32 -1.442695, %v6807_v16 }
 0x654   : > { %v13706_v6 = vpop.eup %13705  ;;  %v11629_v60 = vmul.f32 -1.442695, %v6809_v62  ;;  %v11630_v20 = vmul.f32 -1.442695, %v6810_v57  ;;  %v6808_v62 = vadd.f32 %v6801_v35, %v14626_v53 }
 0x655   : > { %v16815_v2 = vadd.f32 1.0, %v13706_v6  ;;  %v13708_v18 = vpop.eup %13707  ;;  %v18078_v6 = vld [vmem:[#allocation45_spill] sm:$0xff] }
 0x656   : > { %v16818_v39 = vadd.f32 1.0, %v13708_v18  ;;  %v6788_v37 = vpop.f32.mrf.mxu2  ;;  %v6802_v7 = vpop.f32.mrf.mxu3  ;;  %v16850_v16 = vadd.f32 %v18078_v6, %v14436_v4  ;;  %v18080_v18 = vld [vmem:[#allocation47_spill] sm:$0xff] }
 0x657   : > { %13709 = vrcp.f32 %v16815_v2  ;;  %v6789_v52 = vadd.f32 %v6788_v37, %v16804_v30  ;;  %v6803_v47 = vadd.f32 %v6802_v7, %v16809_v40  ;;  %v6846_v11 = vand.u32 2147483647, %v16815_v2  ;;  %v18081_v40 = vld [vmem:[#allocation48_spill] sm:$0xff] }
 0x658   : > { %13711 = vpow2.f32 %v11629_v60  ;;  %v16862_v17 = vadd.f32 %v18081_v40, %v14425_v42  ;;  %v6863_v32 = vand.u32 2147483648, %v16818_v39  ;;  %v6848_v37 = vand.u32 2147483648, %v16815_v2 }
 0x659   : > { %13713 = vrcp.f32 %v16818_v39  ;;  %v6811_v55 = vadd.f32 %v6789_v52, %v14603_v56  ;;  %vm6842_vm9 = vweird.f32 %v16815_v2  ;;  %v6812_v59 = vadd.f32 %v6803_v47, %v14626_v53 }
 0x65a   : > { %13715 = vpow2.f32 %v11630_v20  ;;  %v571_v20 = vadd.f32 %v18080_v18, %v14416_v48  ;;  %vm6857_vm10 = vweird.f32 %v16818_v39  ;;  %vm16880_vm12 = vcmp.eq.f32.partialorder %v6846_v11, 8.507059e+37 }
 0x65b   : > { %13717 = vpow2.f32 %v11628_v63  ;;  %v11631_v15 = vmul.f32 -1.442695, %v6811_v55  ;;  %v6861_v63 = vand.u32 2147483647, %v16818_v39 }
 0x65c   : > { %v7152_v61 = vpop.f32.mrf.mxu0  ;;  %v7166_v21 = vpop.f32.mrf.mxu1 }
 0x65d   : > { %v16825_v30 = vpop.eup %13709  ;;  %v7199_v5 = vadd.f32 %v7152_v61, %v520_v23  ;;  %v7200_v57 = vadd.f32 %v7166_v21, %v569_v27  ;;  %vm16886_vm13 = vcmp.eq.f32.partialorder %v6861_v63, 8.507059e+37 }
 0x65e   : > { %v13712_v10 = vpop.eup %13711  ;;  %v6838_v44 = vmul.f32 %v16825_v30, %v16815_v2  ;;  %vm6843_vm11 = vweird.f32 %v16825_v30 }
 0x65f   : > { %v16829_v22 = vpop.eup %13713  ;;  %v16834_v25 = vadd.f32 1.0, %v13712_v10  ;;  %v11760_v41 = vmul.f32 -1.442695, %v7199_v5  ;;  %v11761_v26 = vmul.f32 -1.442695, %v7200_v57  ;;  %v6864_v5 = vor.u32 1.1754944e-38, %v6863_v32  ;;  %vm16900_vm15 = vmor %vm6842_vm9, %vm6843_vm11 }
 0x660   : > { %v13716_v51 = vpop.eup %13715  ;;  %v6853_v58 = vmul.f32 %v16829_v22, %v16818_v39  ;;  %v6839_v13 = vsub.f32 1.0, %v6838_v44  ;;  %v6849_v10 = vor.u32 1.1754944e-38, %v6848_v37  ;;  %vm6858_vm14 = vweird.f32 %v16829_v22 }
 0x661   : > { %v16836_v1 = vadd.f32 1.0, %v13716_v51  ;;  %v13718_v19 = vpop.eup %13717  ;;  %13719 = vrcp.f32 %v16834_v25  ;;  %v6891_v34 = vand.u32 2147483647, %v16834_v25  ;;  %vm16917_vm0 = vmor %vm6857_vm10, %vm6858_vm14  ;;  %vm6887_vm2 = vweird.f32 %v16834_v25 }
 0x662   : > { %v6854_v36 = vsub.f32 1.0, %v6853_v58  ;;  %v16852_v60 = vadd.f32 1.0, %v13718_v19  ;;  %v6840_v38 = vmul.f32 %v16825_v30, %v6839_v13  ;;  %v6893_v57 = vand.u32 2147483648, %v16834_v25 }
 0x663   : > { %13721 = vrcp.f32 %v16836_v1  ;;  %v7180_v50 = vpop.f32.mrf.mxu2  ;;  %v6908_v12 = vand.u32 2147483648, %v16836_v1  ;;  %vm6902_vm1 = vweird.f32 %v16836_v1  ;;  %v6906_v39 = vand.u32 2147483647, %v16836_v1 }
 0x664   : > { %13723 = vpow2.f32 %v11631_v15  ;;  %v6855_v24 = vmul.f32 %v16829_v22, %v6854_v36  ;;  %v6841_v29 = vadd.f32 %v16825_v30, %v6840_v38  ;;  %v6876_v15 = vand.u32 2147483647, %v16852_v60  ;;  %v7154_v36 = vpop.f32.mrf.mxu0 }
 0x665   : > { %13725 = vpow2.f32 %v11760_v41  ;;  %v6878_v7 = vand.u32 2147483648, %v16852_v60  ;;  %v7201_v0 = vadd.f32 %v7180_v50, %v16843_v8  ;;  %v7203_v11 = vadd.f32 %v7154_v36, %v522_v14  ;;  %v11768_v8 = vld [vmem:[#allocation10] sm:$0xf]  ;;  %v13087_v36 = vld [vmem:[#allocation10 + $0xc] sm:$0xf] }
 0x666   : > { %13727 = vtanh.f32 %v6808_v62  ;;  %v6856_v58 = vadd.f32 %v16829_v22, %v6855_v24  ;;  %v6845_v21 = vsel %vm16900_vm15, %v16825_v30, %v6841_v29  ;;  %v7168_v62 = vpop.f32.mrf.mxu1  ;;  %vm16943_vm3 = vcmp.eq.f32.partialorder %v6891_v34, 8.507059e+37  ;;  %v13088_v24 = vld [vmem:[#allocation10 + $0xc] sm:$0xf0]  ;;  %v13089_v34 = vld [vmem:[#allocation10 + $0x14] sm:$0xf0] }
 0x667   : > { %v16867_v52 = vpop.eup %13719  ;;  %13729 = vrcp.f32 %v16852_v60  ;;  %v6850_v18 = vsel %vm16880_vm12, %v6849_v10, %v6845_v21  ;;  %v7204_v40 = vadd.f32 %v7168_v62, %v571_v20  ;;  %v11762_v23 = vmul.f32 -1.442695, %v7201_v0 }
 0x668   : > { %v6883_v46 = vmul.f32 %v16867_v52, %v16834_v25  ;;  %13731 = vtanh.f32 %v6812_v59  ;;  %v6860_v6 = vsel %vm16917_vm0, %v16829_v22, %v6856_v58  ;;  %v16940_v22 = vor.u32 1.1754944e-38, %v6908_v12  ;;  %v11770_v58 = vld [vmem:[#allocation10 + $0x10] sm:$0xf0]  ;;  %v11776_v12 = vld [vmem:[#allocation10 + $0x8] sm:$0xf] }
 0x669   : > { %v16872_v49 = vpop.eup %13721  ;;  %13733 = vpow2.f32 %v11761_v26  ;;  %v6865_v14 = vsel %vm16886_vm13, %v6864_v5, %v6860_v6  ;;  %vm6888_vm4 = vweird.f32 %v16867_v52  ;;  %v7194_v26 = vpop.f32.mrf.mxu3  ;;  %v11764_v10 = vmul.f32 -1.442695, %v7204_v40  ;;  %v13084_v6 = vld [vmem:[#allocation8 + $0xec] sm:$0xf0]  ;;  %v12010_v40 = vld [vmem:[#allocation8 + $0xf0] sm:$0xf0] }
 0x66a   : > { %v13724_v61 = vpop.eup %13723  ;;  %v6898_v55 = vmul.f32 %v16872_v49, %v16836_v1  ;;  %v6884_v51 = vsub.f32 1.0, %v6883_v46  ;;  %vm6903_vm5 = vweird.f32 %v16872_v49  ;;  %v11769_v44 = vor.u32 %v13088_v24, %v11768_v8  ;;  %vm16967_vm6 = vmor %vm6887_vm2, %vm6888_vm4  ;;  %v12016_v8 = vld [vmem:[#allocation8 + $0xe8] sm:$0xf] }
 0x66b   : > { %v13726_v3 = vpop.eup %13725  ;;  %v16908_v27 = vadd.f32 1.0, %v13724_v61  ;;  %v7182_v50 = vpop.f32.mrf.mxu2  ;;  %v16961_v41 = vmul.f32 %v6865_v14, %v16597_v33  ;;  %v7202_v21 = vadd.f32 %v7194_v26, %v16850_v16  ;;  %v11778_v33 = vld [vmem:[#allocation10 + $0x18] sm:$0xf0]  ;;  %v6894_v25 = vor.u32 1.1754944e-38, %v6893_v57  ;;  %vm16985_vm7 = vmor %vm6902_vm1, %vm6903_vm5  ;;  %v13083_v14 = vld [vmem:[#allocation8 + $0xec] sm:$0xf] }
 0x66c   : > { %v16892_v35 = vadd.f32 1.0, %v13726_v3  ;;  %v6899_v19 = vsub.f32 1.0, %v6898_v55  ;;  %v13728_v13 = vpop.eup %13727  ;;  %v6885_v30 = vmul.f32 %v16867_v52, %v6884_v51  ;;  %v11763_v55 = vmul.f32 -1.442695, %v7203_v11  ;;  %v13086_v51 = vld [vmem:[#allocation10 + $0x4] sm:$0xf]  ;;  %7571 = vmatpush.bf16.msra.mxu0 %v11769_v44 }
 0x66d   : > { %v16911_v2 = vpop.eup %13729  ;;  %v6921_v20 = vand.u32 2147483647, %v16908_v27  ;;  %v16952_v61 = vmul.f32 %v13728_v13, %v6850_v18  ;;  %v7205_v47 = vadd.f32 %v7182_v50, %v16862_v17  ;;  %v13082_v17 = vld [vmem:[#allocation8 + $0xe4] sm:$0xf]  ;;  %vm16994_vm8 = vcmp.eq.f32.partialorder %v6906_v39, 8.507059e+37 }
 0x66e   : > { %13735 = vrcp.f32 %v16892_v35  ;;  %v6900_v38 = vmul.f32 %v16872_v49, %v6899_v19  ;;  %v16934_v32 = vpop.eup %13731  ;;  %v16938_v37 = vmul.f32 %v16911_v2, %v16852_v60  ;;  %v6886_v46 = vadd.f32 %v16867_v52, %v6885_v30  ;;  %v12008_v30 = vld [vmem:[#allocation8 + $0xe0] sm:$0xf]  ;;  %v13080_v50 = vld [vmem:[#allocation8 + $0xcc] sm:$0xf0]  ;;  %v11994_v19 = vld [vmem:[#allocation8 + $0xd0] sm:$0xf0] }
 0x66f   : > { %13737 = vrcp.f32 %v16908_v27  ;;  %v13734_v59 = vpop.eup %13733  ;;  %v7242_v57 = vand.u32 2147483648, %v16892_v35  ;;  %v11773_v1 = vor.u32 %v13086_v51, %v11770_v58  ;;  %vm7236_vm9 = vweird.f32 %v16892_v35  ;;  %v13078_v58 = vld [vmem:[#allocation8 + $0xc4] sm:$0xf] }
 0x670   : > { %v16954_v29 = vadd.f32 1.0, %v13734_v59  ;;  %v6901_v5 = vadd.f32 %v16872_v49, %v6900_v38  ;;  %v6890_v62 = vsel %vm16967_vm6, %v16867_v52, %v6886_v46  ;;  %v7240_v52 = vand.u32 2147483647, %v16892_v35  ;;  %v13085_v59 = vld [vmem:[#allocation8 + $0xf4] sm:$0xf0] }
 0x671   : > { %v6895_v24 = vsel %vm16943_vm3, %v6894_v25, %v6890_v62  ;;  %v12018_v46 = vld [vmem:[#allocation8 + $0xf8] sm:$0xf0]  ;;  %v11765_v39 = vmul.f32 -1.442695, %v7205_v47  ;;  %7585 = vmatpush.bf16.msra.mxu1 %v11773_v1  ;;  %v11777_v26 = vor.u32 %v13089_v34, %v11776_v12  ;;  %v7243_v44 = vor.u32 1.1754944e-38, %v7242_v57 }
 0x672   : > { %13739 = vrcp.f32 %v16954_v29  ;;  %v6905_v38 = vsel %vm16985_vm7, %v16872_v49, %v6901_v5  ;;  %vm17008_vm11 = vcmp.eq.f32.partialorder %v7240_v52, 8.507059e+37  ;;  %v12009_v51 = vor.u32 %v13084_v6, %v12008_v30 }
 0x673   : > { %13741 = vpow2.f32 %v11763_v55  ;;  %v11992_v55 = vld [vmem:[#allocation8 + $0xc0] sm:$0xf]  ;;  %v6910_v63 = vsel %vm16994_vm8, %v16940_v22, %v6905_v38  ;;  %v7257_v12 = vand.u32 2147483648, %v16954_v29  ;;  %7599 = vmatpush.bf16.msra.mxu2 %v11777_v26  ;;  %v12000_v22 = vld [vmem:[#allocation8 + $0xc8] sm:$0xf]  ;;  %v12017_v47 = vor.u32 %v13085_v59, %v12016_v8 }
 0x674   : > { %v16956_v3 = vpop.eup %13735  ;;  %13743 = vpow2.f32 %v11762_v23  ;;  %v11781_v23 = vor.u32 %v13087_v36, %v11778_v33  ;;  %v12013_v36 = vor.u32 %v13082_v17, %v12010_v40  ;;  %v13081_v33 = vld [vmem:[#allocation8 + $0xd4] sm:$0xf0]  ;;  %7780 = vmatpush.bf16.msrb.mxu0 %v12009_v51  ;;  %v12021_v30 = vor.u32 %v13083_v14, %v12018_v46  ;;  %v12002_v26 = vld [vmem:[#allocation8 + $0xd8] sm:$0xf0]  ;;  %v11978_v51 = vld [vmem:[#allocation8 + $0xb0] sm:$0xf0] }
 0x675   : > { %v7232_v13 = vmul.f32 %v16956_v3, %v16892_v35  ;;  %v16979_v0 = vpop.eup %13737  ;;  %13745 = vpow2.f32 %v11764_v10  ;;  %vm7237_vm10 = vweird.f32 %v16956_v3  ;;  %v11993_v6 = vor.u32 %v13080_v50, %v11992_v55  ;;  %v13076_v55 = vld [vmem:[#allocation8 + $0xac] sm:$0xf0] }
 0x676   : > { %13747 = vtanh.f32 %v7202_v21  ;;  %7613 = vmatpush.bf16.msra.mxu3 %v11781_v23  ;;  %vm7238_vm12 = vmor %vm7236_vm9, %vm7237_vm10  ;;  %7794 = vmatpush.bf16.msrb.mxu1 %v12013_v36  ;;  %v11997_v57 = vor.u32 %v13078_v58, %v11994_v19  ;;  %v12001_v11 = vor.u32 %v13081_v33, %v12000_v22  ;;  %v6913_v8 = vmul.f32 %v16979_v0, %v16908_v27  ;;  %v13075_v33 = vld [vmem:[#allocation8 + $0xac] sm:$0xf] }
 0x677   : > { %v7233_v18 = vsub.f32 1.0, %v7232_v13  ;;  %13749 = vpow2.f32 %v11765_v39  ;;  %7808 = vmatpush.bf16.msrb.mxu2 %v12017_v47  ;;  %v6930_v59 = vmul.f32 %v6910_v63, %v16603_v28  ;;  %v6932_v14 = vmul.f32 %v16934_v32, %v6895_v24  ;;  %v13079_v39 = vld [vmem:[#allocation8 + $0xcc] sm:$0xf]  ;;  %v11976_v24 = vld [vmem:[#allocation8 + $0xa0] sm:$0xf] }
 0x678   : > { %v17003_v5 = vpop.eup %13739  ;;  %7781 = vmatpush.bf16.msrb.mxu0 %v11993_v6  ;;  %v6869_v46 = vsub.f32 1.0, %v16938_v37  ;;  %vm7251_vm14 = vweird.f32 %v16954_v29  ;;  %v6923_v23 = vand.u32 2147483648, %v16908_v27  ;;  %v7258_v32 = vor.u32 1.1754944e-38, %v7257_v12  ;;  %v11986_v47 = vld [vmem:[#allocation8 + $0xb8] sm:$0xf0] }
 0x679   : > { %v7234_v49 = vmul.f32 %v16956_v3, %v7233_v18  ;;  %v13742_v13 = vpop.eup %13741  ;;  %v7247_v21 = vmul.f32 %v17003_v5, %v16954_v29  ;;  %vm7252_vm13 = vweird.f32 %v17003_v5  ;;  %v17050_v63 = vadd.f32 %v16952_v61, %v16961_v41  ;;  %v13077_v61 = vld [vmem:[#allocation8 + $0xb4] sm:$0xf0]  ;;  %v13068_v28 = vld [vmem:[#allocation8 + $0x6c] sm:$0xf0] }
 0x67a   : > { %v13744_v62 = vpop.eup %13743  ;;  %v17020_v25 = vadd.f32 1.0, %v13742_v13  ;;  %7822 = vmatpush.bf16.msrb.mxu3 %v12021_v30  ;;  %7795 = vmatpush.bf16.msrb.mxu1 %v11997_v57  ;;  %vm17042_vm15 = vmor %vm7251_vm14, %vm7252_vm13  ;;  %v17059_v19 = vor.u32 1.1754944e-38, %v6878_v7  ;;  %v6914_v13 = vsub.f32 1.0, %v6913_v8  ;;  %v17064_v41 = vmul.f32 %v16911_v2, %v6869_v46  ;;  %v11960_v7 = vld [vmem:[#allocation8 + $0x80] sm:$0xf] }
 0x67b   : > { %v7235_v34 = vadd.f32 %v16956_v3, %v7234_v49  ;;  %v13746_v16 = vpop.eup %13745  ;;  %v7248_v18 = vsub.f32 1.0, %v7247_v21  ;;  %7809 = vmatpush.bf16.msrb.mxu2 %v12001_v11  ;;  %v17061_v21 = vadd.f32 %v6932_v14, %v6930_v59  ;;  %v17066_v36 = vadd.f32 1.0, %v13744_v62  ;;  %v13072_v57 = vld [vmem:[#allocation8 + $0x8c] sm:$0xf0]  ;;  %v13073_v46 = vld [vmem:[#allocation8 + $0x94] sm:$0xf0] }
 0x67c   : > { %v13748_v17 = vpop.eup %13747  ;;  %13751 = vrcp.f32 %v17020_v25  ;;  %v17026_v35 = vadd.f32 1.0, %v13746_v16  ;;  %vm6873_vm1 = vweird.f32 %v16911_v2  ;;  %v17074_v6 = vor.u32 1.1754944e-38, %v6923_v23  ;;  %v11944_v23 = vld [vmem:[#allocation8 + $0x60] sm:$0xf] }
 0x67d   : > { %v7239_v52 = vsel %vm7238_vm12, %v16956_v3, %v7235_v34  ;;  %v7249_v1 = vmul.f32 %v17003_v5, %v7248_v18  ;;  %v7255_v3 = vand.u32 2147483647, %v16954_v29  ;;  %v13750_v37 = vpop.eup %13749  ;;  %v18102_v29 = vld [vmem:[#allocation49_spill] sm:$0xff]  ;;  %v11984_v34 = vld [vmem:[#allocation8 + $0xa8] sm:$0xf]  ;;  %v7196_v18 = vpop.f32.mrf.mxu3  ;;  %v11977_v62 = vor.u32 %v13076_v55, %v11976_v24 }
 0x67e   : > { %v7244_v38 = vsel %vm17008_vm11, %v7243_v44, %v7239_v52  ;;  %13753 = vrcp.f32 %v17026_v35  ;;  %v669_v50 = vadd.f32 %v18102_v29, %v14436_v4  ;;  %v13074_v44 = vld [vmem:[#allocation8 + $0xa4] sm:$0xf]  ;;  %v17076_v16 = vadd.f32 1.0, %v13750_v37 }
 0x67f   : > { %v7325_v40 = vmul.f32 %v13748_v17, %v7244_v38  ;;  %v7250_v49 = vadd.f32 %v17003_v5, %v7249_v1  ;;  %vm7256_vm0 = vcmp.eq.f32.partialorder %v7255_v3, 8.507059e+37  ;;  %v12005_v52 = vor.u32 %v13079_v39, %v12002_v26  ;;  %v13070_v17 = vld [vmem:[#allocation8 + $0x84] sm:$0xf]  ;;  %v11962_v1 = vld [vmem:[#allocation8 + $0x90] sm:$0xf0]  ;;  %7782 = vmatpush.bf16.msrb.mxu0 %v11977_v62 }
 0x680   : > { %13755 = vtanh.f32 %v17050_v63  ;;  %v11968_v3 = vld [vmem:[#allocation8 + $0x88] sm:$0xf]  ;;  %vm6872_vm2 = vweird.f32 %v16852_v60  ;;  %v6915_v8 = vmul.f32 %v16979_v0, %v6914_v13  ;;  %v11981_v59 = vor.u32 %v13074_v44, %v11978_v51  ;;  %v13066_v37 = vld [vmem:[#allocation8 + $0x64] sm:$0xf]  ;;  %v11946_v51 = vld [vmem:[#allocation8 + $0x70] sm:$0xf0] }
 0x681   : > { %v7254_v10 = vsel %vm17042_vm15, %v17003_v5, %v7250_v49  ;;  %13757 = vtanh.f32 %v17061_v21  ;;  %7823 = vmatpush.bf16.msrb.mxu3 %v12005_v52  ;;  %v11985_v14 = vor.u32 %v13077_v61, %v11984_v34  ;;  %v13071_v49 = vld [vmem:[#allocation8 + $0x8c] sm:$0xf]  ;;  %v7206_v26 = vadd.f32 %v7196_v18, %v669_v50  ;;  %v11952_v13 = vld [vmem:[#allocation8 + $0x68] sm:$0xf]  ;;  %v13064_v62 = vld [vmem:[#allocation8 + $0x4c] sm:$0xf0] }
 0x682   : > { %v17055_v58 = vpop.eup %13751  ;;  %v7259_v12 = vsel %vm7256_vm0, %v7258_v32, %v7254_v10  ;;  %13759 = vrcp.f32 %v17066_v36  ;;  %vm7281_vm3 = vweird.f32 %v17020_v25  ;;  %7796 = vmatpush.bf16.msrb.mxu1 %v11981_v59  ;;  %v11989_v24 = vor.u32 %v13075_v33, %v11986_v47  ;;  %v11928_v33 = vld [vmem:[#allocation8 + $0x40] sm:$0xf]  ;;  %vm17146_vm11 = vmor %vm6872_vm2, %vm6873_vm1 }
 0x683   : > { %v7323_v5 = vmul.f32 %v7259_v12, %v16635_v9  ;;  %v7277_v22 = vmul.f32 %v17055_v58, %v17020_v25  ;;  %13761 = vrcp.f32 %v17076_v16  ;;  %7810 = vmatpush.bf16.msrb.mxu2 %v11985_v14  ;;  %v11961_v55 = vor.u32 %v13072_v57, %v11960_v7  ;;  %v13069_v12 = vld [vmem:[#allocation8 + $0x74] sm:$0xf0]  ;;  %v17106_v57 = vld [vmem:[#allocation8 + $0x44] sm:$0xf]  ;;  %v11930_v14 = vld [vmem:[#allocation8 + $0x50] sm:$0xf0] }
 0x684   : > { %v17071_v30 = vpop.eup %13753  ;;  %vm17092_vm4 = vcmp.eq.f32.partialorder %v6876_v15, 8.507059e+37  ;;  %vm7282_vm5 = vweird.f32 %v17055_v58  ;;  %v11965_v10 = vor.u32 %v13070_v17, %v11962_v1  ;;  %v11969_v44 = vor.u32 %v13073_v46, %v11968_v3 }
 0x685   : > { %v17079_v9 = vadd.f32 %v7325_v40, %v7323_v5  ;;  %v7278_v38 = vsub.f32 1.0, %v7277_v22  ;;  %v7292_v11 = vmul.f32 %v17071_v30, %v17026_v35  ;;  %v11970_v40 = vld [vmem:[#allocation8 + $0x98] sm:$0xf0]  ;;  %vm7297_vm6 = vweird.f32 %v17071_v30  ;;  %7824 = vmatpush.bf16.msrb.mxu3 %v11989_v24  ;;  %7783 = vmatpush.bf16.msrb.mxu0 %v11961_v55  ;;  %v13067_v5 = vld [vmem:[#allocation8 + $0x6c] sm:$0xf]  ;;  %vm17114_vm8 = vmor %vm7281_vm3, %vm7282_vm5 }
 0x686   : > { %v11973_v61 = vor.u32 %v13071_v49, %v11970_v40  ;;  %v11945_v15 = vor.u32 %v13068_v28, %v11944_v23  ;;  %v11954_v22 = vld [vmem:[#allocation8 + $0x78] sm:$0xf0]  ;;  %v17100_v47 = vpop.eup %13755  ;;  %vm7296_vm7 = vweird.f32 %v17026_v35  ;;  %v7302_v7 = vand.u32 2147483648, %v17026_v35  ;;  %7797 = vmatpush.bf16.msrb.mxu1 %v11965_v10  ;;  %v11936_v23 = vld [vmem:[#allocation8 + $0x48] sm:$0xf] }
 0x687   : > { %v7293_v39 = vsub.f32 1.0, %v7292_v11  ;;  %v7279_v32 = vmul.f32 %v17055_v58, %v7278_v38  ;;  %v7287_v18 = vand.u32 2147483648, %v17020_v25  ;;  %v17108_v17 = vpop.eup %13757  ;;  %v7285_v11 = vand.u32 2147483647, %v17020_v25  ;;  %7811 = vmatpush.bf16.msrb.mxu2 %v11969_v44  ;;  %vm17130_vm10 = vmor %vm7296_vm7, %vm7297_vm6  ;;  %v13065_v28 = vld [vmem:[#allocation8 + $0x54] sm:$0xf0] }
 0x688   : > { %v7300_v1 = vand.u32 2147483647, %v17026_v35  ;;  %v11949_v3 = vor.u32 %v13066_v37, %v11946_v51  ;;  %v11953_v59 = vor.u32 %v13069_v12, %v11952_v13  ;;  %v17120_v46 = vpop.eup %13759  ;;  %v6871_v49 = vadd.f32 %v16911_v2, %v17064_v41  ;;  %v13063_v24 = vld [vmem:[#allocation8 + $0x4c] sm:$0xf]  ;;  %v11938_v55 = vld [vmem:[#allocation8 + $0x58] sm:$0xf0] }
 0x689   : > { %v7294_v50 = vmul.f32 %v17071_v30, %v7293_v39  ;;  %v7280_v34 = vadd.f32 %v17055_v58, %v7279_v32  ;;  %v6916_v40 = vadd.f32 %v16979_v0, %v6915_v8  ;;  %vm6918_vm9 = vweird.f32 %v16979_v0  ;;  %v17137_v32 = vpop.eup %13761  ;;  %7825 = vmatpush.bf16.msrb.mxu3 %v11973_v61  ;;  %7784 = vmatpush.bf16.msrb.mxu0 %v11945_v15  ;;  %v13058_v51 = vld [vmem:[#allocation8 + $0x24] sm:$0xf]  ;;  %v11914_v61 = vld [vmem:[#allocation8 + $0x30] sm:$0xf0]  ;;  %v11920_v15 = vld [vmem:[#allocation8 + $0x28] sm:$0xf] }
 0x68a   : > { %13763 = vtanh.f32 %v7206_v26  ;;  %v11957_v35 = vor.u32 %v13067_v5, %v11954_v22  ;;  %v11929_v8 = vor.u32 %v13064_v62, %v11928_v33  ;;  %vm6917_vm12 = vweird.f32 %v16908_v27  ;;  %v13060_v26 = vld [vmem:[#allocation8 + $0x2c] sm:$0xf0]  ;;  %7798 = vmatpush.bf16.msrb.mxu1 %v11949_v3  ;;  %v13061_v5 = vld [vmem:[#allocation8 + $0x34] sm:$0xf0]  ;;  %v11896_v38 = vld [vmem:[#allocation8] sm:$0xf] }
 0x68b   : > { %v7295_v52 = vadd.f32 %v17071_v30, %v7294_v50  ;;  %v7284_v39 = vsel %vm17114_vm8, %v17055_v58, %v7280_v34  ;;  %v7303_v37 = vor.u32 1.1754944e-38, %v7302_v7  ;;  %v7288_v50 = vor.u32 1.1754944e-38, %v7287_v18  ;;  %vm17153_vm13 = vmor %vm6917_vm12, %vm6918_vm9  ;;  %7812 = vmatpush.bf16.msrb.mxu2 %v11953_v59  ;;  %v13059_v7 = vld [vmem:[#allocation8 + $0x2c] sm:$0xf]  ;;  %v11922_v18 = vld [vmem:[#allocation8 + $0x38] sm:$0xf0] }
 0x68c   : > { %vm7286_vm14 = vcmp.eq.f32.partialorder %v7285_v11, 8.507059e+37  ;;  %vm7301_vm15 = vcmp.eq.f32.partialorder %v7300_v1, 8.507059e+37  ;;  %v11933_v60 = vor.u32 %v17106_v57, %v11930_v14  ;;  %v11937_v44 = vor.u32 %v13065_v28, %v11936_v23  ;;  %v13056_v11 = vld [vmem:[#allocation8 + $0xc] sm:$0xf0]  ;;  %v11898_v25 = vld [vmem:[#allocation8 + $0x10] sm:$0xf0] }
 0x68d   : > { %v7299_v41 = vsel %vm17130_vm10, %v17071_v30, %v7295_v52  ;;  %v11912_v30 = vld [vmem:[#allocation8 + $0x20] sm:$0xf]  ;;  %v7289_v13 = vsel %vm7286_vm14, %v7288_v50, %v7284_v39  ;;  %v11941_v34 = vor.u32 %v13063_v24, %v11938_v55  ;;  %v6875_v22 = vsel %vm17146_vm11, %v16911_v2, %v6871_v49  ;;  %7826 = vmatpush.bf16.msrb.mxu3 %v11957_v35  ;;  %v11904_v23 = vld [vmem:[#allocation8 + $0x8] sm:$0xf]  ;;  %v13057_v28 = vld [vmem:[#allocation8 + $0x14] sm:$0xf0] }
 0x68e   : > { %v7304_v12 = vsel %vm7301_vm15, %v7303_v37, %v7299_v41  ;;  %vm6922_vm0 = vcmp.eq.f32.partialorder %v6921_v20, 8.507059e+37  ;;  %7785 = vmatpush.bf16.msrb.mxu0 %v11929_v8  ;;  %v11913_v33 = vor.u32 %v13060_v26, %v11912_v30  ;;  %v6880_v52 = vsel %vm17092_vm4, %v17059_v19, %v6875_v22  ;;  %7799 = vmatpush.bf16.msrb.mxu1 %v11933_v60  ;;  %v13055_v41 = vld [vmem:[#allocation8 + $0xc] sm:$0xf]  ;;  %v11906_v8 = vld [vmem:[#allocation8 + $0x18] sm:$0xf0] }
 0x68f   : > { %v6920_v62 = vsel %vm17153_vm13, %v16979_v0, %v6916_v40  ;;  %v7262_v57 = vmul.f32 %v17120_v46, %v17066_v36  ;;  %v7307_v27 = vmul.f32 %v17137_v32, %v17076_v16  ;;  %v6937_v20 = vmul.f32 %v17100_v47, %v6880_v52  ;;  %7813 = vmatpush.bf16.msrb.mxu2 %v11937_v44  ;;  %v13054_v40 = vld [vmem:[#allocation8 + $0x4] sm:$0xf]  ;;  %v12142_v24 = vld [vmem:[#allocation5 + $0xe0] sm:$0xf]  ;;  %v13148_v58 = vld [vmem:[#allocation5 + $0xec] sm:$0xf0] }
 0x690   : > { %v6925_v2 = vsel %vm6922_vm0, %v17074_v6, %v6920_v62  ;;  %v13764_v1 = vpop.eup %13763  ;;  %v11917_v19 = vor.u32 %v13058_v51, %v11914_v61  ;;  %v11921_v29 = vor.u32 %v13061_v5, %v11920_v15  ;;  %v7324_v0 = vmul.f32 %v7304_v12, %v16748_v54  ;;  %v13146_v37 = vld [vmem:[#allocation5 + $0xe4] sm:$0xf]  ;;  %v12144_v30 = vld [vmem:[#allocation5 + $0xf0] sm:$0xf0]  ;;  %v12150_v26 = vld [vmem:[#allocation5 + $0xe8] sm:$0xf] }
 0x691   : > { %v6938_v3 = vmul.f32 %v17108_v17, %v6925_v2  ;;  %v7326_v59 = vmul.f32 %v13764_v1, %v7289_v13  ;;  %v11925_v14 = vor.u32 %v13059_v7, %v11922_v18  ;;  %v6939_v49 = vpack.c.bf16 %v6937_v20, %v6937_v20  ;;  %7827 = vmatpush.bf16.msrb.mxu3 %v11941_v34  ;;  %v13149_v10 = vld [vmem:[#allocation5 + $0xf4] sm:$0xf0]  ;;  %v13147_v13 = vld [vmem:[#allocation5 + $0xec] sm:$0xf]  ;;  %v12152_v12 = vld [vmem:[#allocation5 + $0xf8] sm:$0xf0] }
 0x692   : > { %7786 = vmatpush.bf16.msrb.mxu0 %v11913_v33  ;;  %v11897_v39 = vor.u32 %v13056_v11, %v11896_v38  ;;  %v7308_v35 = vsub.f32 1.0, %v7307_v27  ;;  %v7263_v17 = vsub.f32 1.0, %v7262_v57  ;;  %7800 = vmatpush.bf16.msrb.mxu1 %v11917_v19  ;;  %v11901_v44 = vor.u32 %v13054_v40, %v11898_v25  ;;  %v12126_v7 = vld [vmem:[#allocation5 + $0xc0] sm:$0xf]  ;;  %v13144_v18 = vld [vmem:[#allocation5 + $0xcc] sm:$0xf0] }
 0x693   : > { %v6940_v6 = vpack.c.bf16 %v6938_v3, %v6938_v3  ;;  %v13243_v47 = vpack.c.bf16 %v6938_v3, %v6937_v20  ;;  %7814 = vmatpush.bf16.msrb.mxu2 %v11921_v29  ;;  %v7400_v54 = vunpack.c.l.b16 %v6939_v49  ;;  %v17178_v50 = vadd.f32 %v7326_v59, %v7324_v0  ;;  %v13142_v52 = vld [vmem:[#allocation5 + $0xc4] sm:$0xf]  ;;  %v12128_v27 = vld [vmem:[#allocation5 + $0xd0] sm:$0xf0]  ;;  %v12134_v2 = vld [vmem:[#allocation5 + $0xc8] sm:$0xf] }
 0x694   : > { %v11905_v51 = vor.u32 %v13057_v28, %v11904_v23  ;;  %v7270_v34 = vand.u32 2147483647, %v17066_v36  ;;  %v7309_v61 = vmul.f32 %v17137_v32, %v7308_v35  ;;  %v11909_v15 = vor.u32 %v13055_v41, %v11906_v8  ;;  %v13145_v20 = vld [vmem:[#allocation5 + $0xd4] sm:$0xf0]  ;;  %v13143_v11 = vld [vmem:[#allocation5 + $0xcc] sm:$0xf] }
 0x695   : > { %13259 = vst [vmem:[%s14192_s19 + $0x28] sm:$0xff] %v13243_v47   ;;  %v7401_v55 = vunpack.c.l.b16 %v6940_v6  ;;  %7828 = vmatpush.bf16.msrb.mxu3 %v11925_v14  ;;  %v12143_v5 = vor.u32 %v13148_v58, %v12142_v24  ;;  %v12147_v22 = vor.u32 %v13146_v37, %v12144_v30  ;;  %v12151_v33 = vor.u32 %v13149_v10, %v12150_v26  ;;  %v12136_v1 = vld [vmem:[#allocation5 + $0xd8] sm:$0xf0]  ;;  %v12110_v14 = vld [vmem:[#allocation5 + $0xa0] sm:$0xf] }
 0x696   : > { %7787 = vmatpush.bf16.msrb.mxu0 %v11897_v39  ;;  %v7264_v62 = vmul.f32 %v17120_v46, %v7263_v17  ;;  %v12155_v57 = vor.u32 %v13147_v13, %v12152_v12  ;;  %v7315_v38 = vand.u32 2147483647, %v17076_v16  ;;  %13765 = vtanh.f32 %v17178_v50  ;;  %7801 = vmatpush.bf16.msrb.mxu1 %v11901_v44  ;;  %v13140_v49 = vld [vmem:[#allocation5 + $0xac] sm:$0xf0]  ;;  %v13138_v40 = vld [vmem:[#allocation5 + $0xa4] sm:$0xf] }
 0x697   : > { %v7402_v60 = vpack.c.b16 %v7401_v55, %v7400_v54  ;;  %7815 = vmatpush.bf16.msrb.mxu2 %v11905_v51  ;;  %v7310_v19 = vadd.f32 %v17137_v32, %v7309_v61  ;;  %vm7312_vm1 = vweird.f32 %v17137_v32  ;;  %v7317_v29 = vand.u32 2147483648, %v17076_v16  ;;  %v12112_v47 = vld [vmem:[#allocation5 + $0xb0] sm:$0xf0]  ;;  %v12118_v39 = vld [vmem:[#allocation5 + $0xa8] sm:$0xf] }
 0x698   : > { %v12127_v3 = vor.u32 %v13144_v18, %v12126_v7  ;;  %vm7267_vm2 = vweird.f32 %v17120_v46  ;;  %13767 = vtanh.f32 %v17079_v9  ;;  %v12131_v0 = vor.u32 %v13142_v52, %v12128_v27  ;;  %v13141_v23 = vld [vmem:[#allocation5 + $0xb4] sm:$0xf0]  ;;  %v13139_v35 = vld [vmem:[#allocation5 + $0xac] sm:$0xf]  ;;  %v12120_v8 = vld [vmem:[#allocation5 + $0xb8] sm:$0xf0] }
 0x699   : > { %7572 = vmatmul.bf16.vlgmr.msra.gmra.mxu0 %v7402_v60  ;;  %7586 = vmatmul.bf16.vlgmr.msra.gmra.mxu1 %v7402_v60  ;;  %v12135_v59 = vor.u32 %v13145_v20, %v12134_v2  ;;  %v7265_v25 = vadd.f32 %v17120_v46, %v7264_v62  ;;  %vm7311_vm3 = vweird.f32 %v17076_v16  ;;  %v12139_v6 = vor.u32 %v13143_v11, %v12136_v1  ;;  %v12094_v26 = vld [vmem:[#allocation5 + $0x80] sm:$0xf]  ;;  %v13136_v10 = vld [vmem:[#allocation5 + $0x8c] sm:$0xf0]  ;;  %v12096_v51 = vld [vmem:[#allocation5 + $0x90] sm:$0xf0] }
 0x69a   : > { %7600 = vmatmul.bf16.vlgmr.msra.gmra.mxu2 %v7402_v60  ;;  %7614 = vmatmul.bf16.vlgmr.msra.gmra.mxu3 %v7402_v60  ;;  %vm7266_vm4 = vweird.f32 %v17066_v36  ;;  %v7272_v28 = vand.u32 2147483648, %v17066_v36  ;;  %vm17196_vm5 = vmor %vm7311_vm3, %vm7312_vm1  ;;  %vm17209_vm7 = vcmp.eq.f32.partialorder %v7315_v38, 8.507059e+37  ;;  %v7318_v54 = vor.u32 1.1754944e-38, %v7317_v29  ;;  %v13134_v60 = vld [vmem:[#allocation5 + $0x84] sm:$0xf] }
 0x69b   : > { %7829 = vmatpush.bf16.msrb.mxu3 %v11909_v15  ;;  %8174 = vmatpush.bf16.msra.mxu0 %v12143_v5  ;;  %vm17202_vm6 = vmor %vm7266_vm4, %vm7267_vm2  ;;  %v7314_v24 = vsel %vm17196_vm5, %v17137_v32, %v7310_v19  ;;  %v12111_v55 = vor.u32 %v13140_v49, %v12110_v14  ;;  %v12115_v37 = vor.u32 %v13138_v40, %v12112_v47  ;;  %v12102_v13 = vld [vmem:[#allocation5 + $0x88] sm:$0xf]  ;;  %v13137_v12 = vld [vmem:[#allocation5 + $0x94] sm:$0xf0]  ;;  %vm7271_vm8 = vcmp.eq.f32.partialorder %v7270_v34, 8.507059e+37 }
 0x69c   : > { %8188 = vmatpush.bf16.msra.mxu1 %v12147_v22  ;;  %8202 = vmatpush.bf16.msra.mxu2 %v12151_v33  ;;  %v13766_v58 = vpop.eup %13765  ;;  %v12119_v30 = vor.u32 %v13141_v23, %v12118_v39  ;;  %v7269_v44 = vsel %vm17202_vm6, %v17120_v46, %v7265_v25  ;;  %v12123_v32 = vor.u32 %v13139_v35, %v12120_v8  ;;  %v7273_v15 = vor.u32 1.1754944e-38, %v7272_v28  ;;  %v13135_v22 = vld [vmem:[#allocation5 + $0x8c] sm:$0xf]  ;;  %v12104_v33 = vld [vmem:[#allocation5 + $0x98] sm:$0xf0] }
 0x69d   : > { %v7319_v5 = vsel %vm17209_vm7, %v7318_v54, %v7314_v24  ;;  %v12095_v18 = vor.u32 %v13136_v10, %v12094_v26  ;;  %v12099_v46 = vor.u32 %v13134_v60, %v12096_v51  ;;  %v12103_v62 = vor.u32 %v13137_v12, %v12102_v13  ;;  %v13132_v27 = vld [vmem:[#allocation5 + $0x6c] sm:$0xf0]  ;;  %v13130_v2 = vld [vmem:[#allocation5 + $0x64] sm:$0xf]  ;;  %v12080_v11 = vld [vmem:[#allocation5 + $0x70] sm:$0xf0] }
 0x69e   : > { %v13768_v61 = vpop.eup %13767  ;;  %v7332_v7 = vmul.f32 %v13766_v58, %v7319_v5  ;;  %v7274_v52 = vsel %vm7271_vm8, %v7273_v15, %v7269_v44  ;;  %v12107_v38 = vor.u32 %v13135_v22, %v12104_v33  ;;  %v12086_v1 = vld [vmem:[#allocation5 + $0x68] sm:$0xf]  ;;  %v13133_v19 = vld [vmem:[#allocation5 + $0x74] sm:$0xf0]  ;;  %v13131_v29 = vld [vmem:[#allocation5 + $0x6c] sm:$0xf] }
 0x69f   : > { %8216 = vmatpush.bf16.msra.mxu3 %v12155_v57  ;;  %8175 = vmatpush.bf16.msra.mxu0 %v12127_v3  ;;  %v12078_v57 = vld [vmem:[#allocation5 + $0x60] sm:$0xf]  ;;  %v7331_v20 = vmul.f32 %v13768_v61, %v7274_v52  ;;  %v12088_v36 = vld [vmem:[#allocation5 + $0x78] sm:$0xf0]  ;;  %v13128_v49 = vld [vmem:[#allocation5 + $0x4c] sm:$0xf0] }
 0x6a0   : > { %8189 = vmatpush.bf16.msra.mxu1 %v12131_v0  ;;  %8203 = vmatpush.bf16.msra.mxu2 %v12135_v59  ;;  %v12079_v3 = vor.u32 %v13132_v27, %v12078_v57  ;;  %v12083_v0 = vor.u32 %v13130_v2, %v12080_v11  ;;  %v12087_v59 = vor.u32 %v13133_v19, %v12086_v1  ;;  %v12062_v14 = vld [vmem:[#allocation5 + $0x40] sm:$0xf]  ;;  %v13126_v40 = vld [vmem:[#allocation5 + $0x44] sm:$0xf]  ;;  %v12070_v47 = vld [vmem:[#allocation5 + $0x48] sm:$0xf] }
 0x6a1   : > { %v17220_v34 = vpack.c.bf16 %v7332_v7, %v7331_v20  ;;  %v12091_v25 = vor.u32 %v13131_v29, %v12088_v36  ;;  %v13129_v39 = vld [vmem:[#allocation5 + $0x54] sm:$0xf0]  ;;  %v13127_v23 = vld [vmem:[#allocation5 + $0x4c] sm:$0xf]  ;;  %v12072_v28 = vld [vmem:[#allocation5 + $0x58] sm:$0xf0]  ;;  %v12063_v41 = vor.u32 %v13128_v49, %v12062_v14 }
 0x6a2   : > { %v12071_v8 = vor.u32 %v13129_v39, %v12070_v47  ;;  %v12046_v16 = vld [vmem:[#allocation5 + $0x20] sm:$0xf]  ;;  %v13124_v24 = vld [vmem:[#allocation5 + $0x2c] sm:$0xf0]  ;;  %v13122_v17 = vld [vmem:[#allocation5 + $0x24] sm:$0xf]  ;;  %v12075_v54 = vor.u32 %v13127_v23, %v12072_v28 }
 0x6a3   : > { %8217 = vmatpush.bf16.msra.mxu3 %v12139_v6  ;;  %8176 = vmatpush.bf16.msra.mxu0 %v12111_v55  ;;  %v12064_v6 = vld [vmem:[#allocation5 + $0x50] sm:$0xf0]  ;;  %v12054_v58 = vld [vmem:[#allocation5 + $0x28] sm:$0xf]  ;;  %v12056_v26 = vld [vmem:[#allocation5 + $0x38] sm:$0xf0]  ;;  %v12047_v10 = vor.u32 %v13124_v24, %v12046_v16 }
 0x6a4   : > { %8190 = vmatpush.bf16.msra.mxu1 %v12115_v37  ;;  %8204 = vmatpush.bf16.msra.mxu2 %v12119_v30  ;;  %v12067_v35 = vor.u32 %v13126_v40, %v12064_v6  ;;  %v12048_v55 = vld [vmem:[#allocation5 + $0x30] sm:$0xf0]  ;;  %v13125_v37 = vld [vmem:[#allocation5 + $0x34] sm:$0xf0]  ;;  %v13123_v30 = vld [vmem:[#allocation5 + $0x2c] sm:$0xf] }
 0x6a5   : > { %v12051_v60 = vor.u32 %v13122_v17, %v12048_v55  ;;  %v12055_v44 = vor.u32 %v13125_v37, %v12054_v58  ;;  %v13120_v51 = vld [vmem:[#allocation5 + $0xc] sm:$0xf0]  ;;  %v13118_v13 = vld [vmem:[#allocation5 + $0x4] sm:$0xf]  ;;  %v12059_v12 = vor.u32 %v13123_v30, %v12056_v26  ;;  %v12032_v61 = vld [vmem:[#allocation5 + $0x10] sm:$0xf0] }
 0x6a6   : > { %v12038_v15 = vld [vmem:[#allocation5 + $0x8] sm:$0xf]  ;;  %v13121_v5 = vld [vmem:[#allocation5 + $0x14] sm:$0xf0]  ;;  %v13119_v22 = vld [vmem:[#allocation5 + $0xc] sm:$0xf] }
 0x6a7   : > { %8218 = vmatpush.bf16.msra.mxu3 %v12123_v32  ;;  %8177 = vmatpush.bf16.msra.mxu0 %v12095_v18  ;;  %v12030_v32 = vld [vmem:[#allocation5] sm:$0xf]  ;;  %v12040_v33 = vld [vmem:[#allocation5 + $0x18] sm:$0xf0]  ;;  %v12035_v18 = vor.u32 %v13118_v13, %v12032_v61  ;;  %v12039_v52 = vor.u32 %v13121_v5, %v12038_v15  ;;  %v13212_v19 = vld [vmem:[#allocation10 + $0xec] sm:$0xf0] }
 0x6a8   : > { %8191 = vmatpush.bf16.msra.mxu1 %v12099_v46  ;;  %8205 = vmatpush.bf16.msra.mxu2 %v12103_v62  ;;  %v12031_v7 = vor.u32 %v13120_v51, %v12030_v32  ;;  %v12043_v46 = vor.u32 %v13119_v22, %v12040_v33  ;;  %v12276_v1 = vld [vmem:[#allocation10 + $0xe0] sm:$0xf]  ;;  %v13210_v29 = vld [vmem:[#allocation10 + $0xe4] sm:$0xf]  ;;  %v12262_v24 = vld [vmem:[#allocation10 + $0xd0] sm:$0xf0] }
 0x6a9   : > { %7788 = vmatmul.bf16.vlgmr.msrb.gmra.mxu0 %v17220_v34  ;;  %7802 = vmatmul.bf16.vlgmr.msrb.gmra.mxu1 %v17220_v34  ;;  %v12277_v36 = vor.u32 %v13212_v19, %v12276_v1  ;;  %v12260_v28 = vld [vmem:[#allocation10 + $0xc0] sm:$0xf]  ;;  %v12268_v17 = vld [vmem:[#allocation10 + $0xc8] sm:$0xf]  ;;  %v13207_v30 = vld [vmem:[#allocation10 + $0xcc] sm:$0xf] }
 0x6aa   : > { %7816 = vmatmul.bf16.vlgmr.msrb.gmra.mxu2 %v17220_v34  ;;  %7830 = vmatmul.bf16.vlgmr.msrb.gmra.mxu3 %v17220_v34  ;;  %v12270_v26 = vld [vmem:[#allocation10 + $0xd8] sm:$0xf0]  ;;  %v12244_v33 = vld [vmem:[#allocation10 + $0xa0] sm:$0xf]  ;;  %v13205_v1 = vld [vmem:[#allocation10 + $0xb4] sm:$0xf0] }
 0x6ab   : > { %8219 = vmatpush.bf16.msra.mxu3 %v12107_v38  ;;  %8178 = vmatpush.bf16.msra.mxu0 %v12079_v3  ;;  %v12278_v3 = vld [vmem:[#allocation10 + $0xf0] sm:$0xf0] }
 0x6ac   : > { %8192 = vmatpush.bf16.msra.mxu1 %v12083_v0  ;;  %8206 = vmatpush.bf16.msra.mxu2 %v12087_v59  ;;  %v12284_v0 = vld [vmem:[#allocation10 + $0xe8] sm:$0xf]  ;;  %v13213_v59 = vld [vmem:[#allocation10 + $0xf4] sm:$0xf0]  ;;  %v12281_v49 = vor.u32 %v13210_v29, %v12278_v3  ;;  %v13203_v3 = vld [vmem:[#allocation10 + $0xac] sm:$0xf] }
 0x6ad   : > { %v12285_v40 = vor.u32 %v13213_v59, %v12284_v0 }
 0x6af   : > { %8220 = vmatpush.bf16.msra.mxu3 %v12091_v25  ;;  %8179 = vmatpush.bf16.msra.mxu0 %v12063_v41  ;;  %v12286_v25 = vld [vmem:[#allocation10 + $0xf8] sm:$0xf0]  ;;  %v13208_v41 = vld [vmem:[#allocation10 + $0xcc] sm:$0xf0] }
 0x6b0   : > { %8193 = vmatpush.bf16.msra.mxu1 %v12067_v35  ;;  %8207 = vmatpush.bf16.msra.mxu2 %v12071_v8  ;;  %v13206_v35 = vld [vmem:[#allocation10 + $0xc4] sm:$0xf]  ;;  %v12261_v16 = vor.u32 %v13208_v41, %v12260_v28 }
 0x6b1   : > { %v12265_v58 = vor.u32 %v13206_v35, %v12262_v24  ;;  %v12236_v35 = vld [vmem:[#allocation10 + $0x88] sm:$0xf]  ;;  %v12238_v24 = vld [vmem:[#allocation10 + $0x98] sm:$0xf0] }
 0x6b3   : > { %8221 = vmatpush.bf16.msra.mxu3 %v12075_v54  ;;  %8180 = vmatpush.bf16.msra.mxu0 %v12047_v10  ;;  %v13209_v54 = vld [vmem:[#allocation10 + $0xd4] sm:$0xf0] }
 0x6b4   : > { %8194 = vmatpush.bf16.msra.mxu1 %v12051_v60  ;;  %8208 = vmatpush.bf16.msra.mxu2 %v12055_v44  ;;  %v12269_v37 = vor.u32 %v13209_v54, %v12268_v17  ;;  %v12273_v60 = vor.u32 %v13207_v30, %v12270_v26  ;;  %v18119_v26 = vld [vmem:[#allocation50_spill] sm:$0xff] }
 0x6b7   : > { %8222 = vmatpush.bf16.msra.mxu3 %v12059_v12  ;;  %8181 = vmatpush.bf16.msra.mxu0 %v12031_v7  ;;  %v13204_v7 = vld [vmem:[#allocation10 + $0xac] sm:$0xf0] }
 0x6b8   : > { %8195 = vmatpush.bf16.msra.mxu1 %v12035_v18  ;;  %8209 = vmatpush.bf16.msra.mxu2 %v12039_v52  ;;  %v13202_v18 = vld [vmem:[#allocation10 + $0xa4] sm:$0xf] }
 0x6ba   : > { %8182 = vmatmul.bf16.vlgmr.msra.gmra.mxu0 %v17220_v34 }
 0x6bb   : > { %8223 = vmatpush.bf16.msra.mxu3 %v12043_v46  ;;  %8196 = vmatmul.bf16.vlgmr.msra.gmra.mxu1 %v17220_v34  ;;  %v12245_v46 = vor.u32 %v13204_v7, %v12244_v33  ;;  %v18121_v33 = vld [vmem:[#allocation52_spill] sm:$0xff] }
 0x6bc   : > { %8210 = vmatmul.bf16.vlgmr.msra.gmra.mxu2 %v17220_v34  ;;  %8595 = vmatpush.bf16.msrb.mxu0 %v12277_v36  ;;  %v623_v7 = vadd.f32 %v18121_v33, %v14425_v42 }
 0x6bd   : > { %8609 = vmatpush.bf16.msrb.mxu1 %v12281_v49  ;;  %8623 = vmatpush.bf16.msrb.mxu2 %v12285_v40 }
 0x6be   : > { %8224 = vmatmul.bf16.vlgmr.msra.gmra.mxu3 %v17220_v34  ;;  %v13211_v34 = vld [vmem:[#allocation10 + $0xec] sm:$0xf] }
 0x6bf   : > { %v12289_v39 = vor.u32 %v13211_v34, %v12286_v25 }
 0x6c0   : > { %8596 = vmatpush.bf16.msrb.mxu0 %v12261_v16  ;;  %v13199_v16 = vld [vmem:[#allocation10 + $0x8c] sm:$0xf] }
 0x6c1   : > { %8637 = vmatpush.bf16.msrb.mxu3 %v12289_v39  ;;  %8610 = vmatpush.bf16.msrb.mxu1 %v12265_v58  ;;  %v13198_v39 = vld [vmem:[#allocation10 + $0x84] sm:$0xf] }
 0x6c2   : > { %8624 = vmatpush.bf16.msrb.mxu2 %v12269_v37 }
 0x6c4   : > { %8597 = vmatpush.bf16.msrb.mxu0 %v12245_v46  ;;  %v18122_v46 = vld [vmem:[#allocation55_spill] sm:$0xff] }
 0x6c5   : > { %8638 = vmatpush.bf16.msrb.mxu3 %v12273_v60 }
 0x716   : > { %v7573_v62 = vpop.f32.mrf.mxu0  ;;  %v7587_v57 = vpop.f32.mrf.mxu1 }
 0x71d   : > { %v7601_v27 = vpop.f32.mrf.mxu2  ;;  %v17230_v38 = vpop.f32.mrf.mxu3 }
 0x71e   : > { %v7575_v2 = vpop.f32.mrf.mxu0  ;;  %v7589_v20 = vpop.f32.mrf.mxu1 }
 0x725   : > { %v17232_v11 = vpop.f32.mrf.mxu2  ;;  %v17236_v51 = vpop.f32.mrf.mxu3 }
 0x726   : > { %v7789_v14 = vpop.f32.mrf.mxu0  ;;  %v7803_v47 = vpop.f32.mrf.mxu1 }
 0x727   : > { %v7790_v6 = vadd.f32 %v7789_v14, %v7573_v62  ;;  %v7804_v23 = vadd.f32 %v7803_v47, %v7587_v57  ;;  %v12246_v62 = vld [vmem:[#allocation10 + $0xb0] sm:$0xf0]  ;;  %v12252_v57 = vld [vmem:[#allocation10 + $0xa8] sm:$0xf]  ;;  %v13200_v47 = vld [vmem:[#allocation10 + $0x8c] sm:$0xf0] }
 0x728   : > { %v12249_v36 = vor.u32 %v13202_v18, %v12246_v62  ;;  %v17268_v62 = vadd.f32 %v18122_v46, %v14436_v4 }
 0x729   : > { %v7836_v8 = vadd.f32 %v7790_v6, %v14595_v31  ;;  %v7837_v55 = vadd.f32 %v7804_v23, %v14598_v43  ;;  %v12228_v6 = vld [vmem:[#allocation10 + $0x80] sm:$0xf]  ;;  %v12230_v23 = vld [vmem:[#allocation10 + $0x90] sm:$0xf0] }
 0x72a   : > { %8611 = vmatpush.bf16.msrb.mxu1 %v12249_v36  ;;  %v12229_v58 = vor.u32 %v13200_v47, %v12228_v6  ;;  %v12233_v37 = vor.u32 %v13198_v39, %v12230_v23  ;;  %v18125_v39 = vld [vmem:[#allocation56_spill] sm:$0xff] }
 0x72b   : > { %v12022_v10 = vmul.f32 -1.442695, %v7836_v8  ;;  %v12023_v44 = vmul.f32 -1.442695, %v7837_v55  ;;  %v13201_v8 = vld [vmem:[#allocation10 + $0x94] sm:$0xf0]  ;;  %v17294_v23 = vadd.f32 %v18125_v39, %v14425_v42 }
 0x72c   : > { %8598 = vmatpush.bf16.msrb.mxu0 %v12229_v58 }
 0x72d   : > { %13769 = vpow2.f32 %v12022_v10  ;;  %v7817_v32 = vpop.f32.mrf.mxu2  ;;  %v7831_v28 = vpop.f32.mrf.mxu3  ;;  %v525_v10 = vadd.f32 %v18119_v26, %v14413_v45 }
 0x72e   : > { %13771 = vpow2.f32 %v12023_v44  ;;  %v7818_v13 = vadd.f32 %v7817_v32, %v7601_v27  ;;  %v7791_v12 = vpop.f32.mrf.mxu0  ;;  %v7805_v15 = vpop.f32.mrf.mxu1  ;;  %v12253_v27 = vor.u32 %v13205_v1, %v12252_v57  ;;  %v12237_v44 = vor.u32 %v13201_v8, %v12236_v35  ;;  %8612 = vmatpush.bf16.msrb.mxu1 %v12233_v37  ;;  %v18123_v57 = vld [vmem:[#allocation53_spill] sm:$0xff] }
 0x72f   : > { %v7792_v61 = vadd.f32 %v7791_v12, %v7575_v2  ;;  %v7806_v22 = vadd.f32 %v7805_v15, %v7589_v20  ;;  %v12254_v2 = vld [vmem:[#allocation10 + $0xb8] sm:$0xf0]  ;;  %v17272_v1 = vadd.f32 %v18123_v57, %v14413_v45 }
 0x730   : > { %v7838_v5 = vadd.f32 %v7818_v13, %v14603_v56  ;;  %v12257_v20 = vor.u32 %v13203_v3, %v12254_v2  ;;  %8625 = vmatpush.bf16.msrb.mxu2 %v12253_v27 }
 0x731   : > { %v7840_v52 = vadd.f32 %v7792_v61, %v14595_v31  ;;  %v7841_v29 = vadd.f32 %v7806_v22, %v14598_v43  ;;  %v12241_v61 = vor.u32 %v13199_v16, %v12238_v24 }
 0x732   : > { %v12024_v19 = vmul.f32 -1.442695, %v7838_v5  ;;  %8639 = vmatpush.bf16.msrb.mxu3 %v12257_v20  ;;  %v18120_v5 = vld [vmem:[#allocation51_spill] sm:$0xff] }
 0x733   : > { %v13770_v0 = vpop.eup %13769  ;;  %v12025_v59 = vmul.f32 -1.442695, %v7840_v52  ;;  %v12026_v40 = vmul.f32 -1.442695, %v7841_v29  ;;  %v574_v22 = vadd.f32 %v18120_v5, %v14416_v48  ;;  %v18124_v29 = vld [vmem:[#allocation54_spill] sm:$0xff] }
 0x734   : > { %v13772_v14 = vpop.eup %13771  ;;  %v17241_v49 = vadd.f32 1.0, %v13770_v0  ;;  %13773 = vpow2.f32 %v12024_v19  ;;  %8626 = vmatpush.bf16.msrb.mxu2 %v12237_v44  ;;  %v17279_v36 = vadd.f32 %v18124_v29, %v14416_v48 }
 0x735   : > { %v17243_v34 = vadd.f32 1.0, %v13772_v14  ;;  %13775 = vpow2.f32 %v12025_v59  ;;  %v7819_v25 = vpop.f32.mrf.mxu2  ;;  %v7833_v6 = vpop.f32.mrf.mxu3 }
 0x736   : > { %13777 = vrcp.f32 %v17241_v49  ;;  %v7820_v41 = vadd.f32 %v7819_v25, %v17232_v11  ;;  %v7832_v11 = vadd.f32 %v7831_v28, %v17230_v38  ;;  %8640 = vmatpush.bf16.msrb.mxu3 %v12241_v61  ;;  %v7877_v59 = vand.u32 2147483647, %v17241_v49  ;;  %v18126_v28 = vld [vmem:[#allocation57_spill] sm:$0xff] }
 0x737   : > { %13779 = vrcp.f32 %v17243_v34  ;;  %v8183_v55 = vpop.f32.mrf.mxu0  ;;  %v7879_v14 = vand.u32 2147483648, %v17241_v49  ;;  %v7894_v25 = vand.u32 2147483648, %v17243_v34  ;;  %vm7888_vm11 = vweird.f32 %v17243_v34 }
 0x738   : > { %13781 = vpow2.f32 %v12026_v40  ;;  %v7842_v54 = vadd.f32 %v7820_v41, %v14603_v56  ;;  %v8230_v52 = vadd.f32 %v8183_v55, %v525_v10  ;;  %v8197_v2 = vpop.f32.mrf.mxu1  ;;  %v7839_v45 = vadd.f32 %v7832_v11, %v14626_v53 }
 0x739   : > { %v8231_v47 = vadd.f32 %v8197_v2, %v574_v22  ;;  %v17298_v41 = vadd.f32 %v18126_v28, %v14436_v4  ;;  %v7892_v24 = vand.u32 2147483647, %v17243_v34  ;;  %vm7873_vm13 = vweird.f32 %v17241_v49 }
 0x73a   : > { %v13774_v17 = vpop.eup %13773  ;;  %v12027_v12 = vmul.f32 -1.442695, %v7842_v54  ;;  %v12156_v48 = vmul.f32 -1.442695, %v8230_v52  ;;  %vm17316_vm14 = vcmp.eq.f32.partialorder %v7877_v59, 8.507059e+37  ;;  %v7834_v55 = vadd.f32 %v7833_v6, %v17236_v51 }
 0x73b   : > { %v13776_v30 = vpop.eup %13775  ;;  %v17251_v60 = vadd.f32 1.0, %v13774_v17  ;;  %v7895_v58 = vor.u32 1.1754944e-38, %v7894_v25  ;;  %vm7893_vm0 = vcmp.eq.f32.partialorder %v7892_v24, 8.507059e+37  ;;  %v12212_v24 = vld [vmem:[#allocation10 + $0x60] sm:$0xf] }
 0x73c   : > { %v17253_v32 = vpop.eup %13777  ;;  %v17256_v13 = vadd.f32 1.0, %v13776_v30  ;;  %v7880_v30 = vor.u32 1.1754944e-38, %v7879_v14  ;;  %v7843_v52 = vadd.f32 %v7834_v55, %v14626_v53 }
 0x73d   : > { %v17258_v15 = vpop.eup %13779  ;;  %v7869_v18 = vmul.f32 %v17253_v32, %v17241_v49  ;;  %13783 = vrcp.f32 %v17251_v60  ;;  %vm7874_vm10 = vweird.f32 %v17253_v32  ;;  %v12157_v49 = vmul.f32 -1.442695, %v8231_v47 }
 0x73e   : > { %v13782_v38 = vpop.eup %13781  ;;  %v7884_v19 = vmul.f32 %v17258_v15, %v17243_v34  ;;  %13785 = vrcp.f32 %v17256_v13  ;;  %vm7889_vm9 = vweird.f32 %v17258_v15  ;;  %vm17323_vm15 = vmor %vm7873_vm13, %vm7874_vm10  ;;  %v7907_v33 = vand.u32 2147483647, %v17251_v60 }
 0x73f   : > { %v7870_v27 = vsub.f32 1.0, %v7869_v18  ;;  %v17282_v3 = vadd.f32 1.0, %v13782_v38  ;;  %13787 = vpow2.f32 %v12027_v12  ;;  %v8211_v17 = vpop.f32.mrf.mxu2  ;;  %vm17311_vm12 = vmor %vm7888_vm11, %vm7889_vm9  ;;  %v7909_v18 = vand.u32 2147483648, %v17251_v60  ;;  %v8185_v57 = vpop.f32.mrf.mxu0 }
 0x740   : > { %v7885_v0 = vsub.f32 1.0, %v7884_v19  ;;  %v8232_v12 = vadd.f32 %v8211_v17, %v623_v7  ;;  %v7924_v59 = vand.u32 2147483648, %v17256_v13  ;;  %vm7918_vm3 = vweird.f32 %v17256_v13  ;;  %v13196_v17 = vld [vmem:[#allocation10 + $0x6c] sm:$0xf0] }
 0x741   : > { %v7871_v20 = vmul.f32 %v17253_v32, %v7870_v27  ;;  %13789 = vrcp.f32 %v17282_v3  ;;  %v7922_v27 = vand.u32 2147483647, %v17256_v13  ;;  %v17358_v25 = vor.u32 1.1754944e-38, %v7909_v18 }
 0x742   : > { %v7886_v40 = vmul.f32 %v17258_v15, %v7885_v0  ;;  %13791 = vtanh.f32 %v7839_v45  ;;  %v12158_v2 = vmul.f32 -1.442695, %v8232_v12  ;;  %vm7933_vm2 = vweird.f32 %v17282_v3 }
 0x743   : > { %v7872_v35 = vadd.f32 %v17253_v32, %v7871_v20  ;;  %v17302_v8 = vpop.eup %13783  ;;  %13793 = vpow2.f32 %v12156_v48  ;;  %v7937_v47 = vand.u32 2147483647, %v17282_v3  ;;  %vm17381_vm6 = vcmp.eq.f32.partialorder %v7922_v27, 8.507059e+37 }
 0x744   : > { %v7887_v16 = vadd.f32 %v17258_v15, %v7886_v40  ;;  %v17307_v42 = vpop.eup %13785  ;;  %v7899_v61 = vmul.f32 %v17302_v8, %v17251_v60  ;;  %v8234_v40 = vadd.f32 %v8185_v57, %v17272_v1  ;;  %v7925_v37 = vor.u32 1.1754944e-38, %v7924_v59 }
 0x745   : > { %v13788_v34 = vpop.eup %13787  ;;  %v7914_v26 = vmul.f32 %v17307_v42, %v17256_v13  ;;  %v7876_v51 = vsel %vm17323_vm15, %v17253_v32, %v7872_v35  ;;  %v7939_v32 = vand.u32 2147483648, %v17282_v3  ;;  %vm7919_vm1 = vweird.f32 %v17307_v42  ;;  %v8225_v35 = vpop.f32.mrf.mxu3 }
 0x746   : > { %v7891_v44 = vsel %vm17311_vm12, %v17258_v15, %v7887_v16  ;;  %v17337_v11 = vadd.f32 1.0, %v13788_v34  ;;  %v7881_v7 = vsel %vm17316_vm14, %v7880_v30, %v7876_v51  ;;  %v7900_v0 = vsub.f32 1.0, %v7899_v61  ;;  %v8199_v16 = vpop.f32.mrf.mxu1  ;;  %vm17377_vm5 = vmor %vm7918_vm3, %vm7919_vm1 }
 0x747   : > { %v17329_v10 = vpop.eup %13789  ;;  %v7915_v5 = vsub.f32 1.0, %v7914_v26  ;;  %v7896_v38 = vsel %vm7893_vm0, %v7895_v58, %v7891_v44  ;;  %v12159_v39 = vmul.f32 -1.442695, %v8234_v40  ;;  %v7940_v1 = vor.u32 1.1754944e-38, %v7939_v32  ;;  %v8213_v51 = vpop.f32.mrf.mxu2  ;;  %v13190_v58 = vld [vmem:[#allocation10 + $0x44] sm:$0xf] }
 0x748   : > { %v7929_v22 = vmul.f32 %v17329_v10, %v17282_v3  ;;  %v13792_v15 = vpop.eup %13791  ;;  %13795 = vrcp.f32 %v17337_v11  ;;  %v7960_v14 = vmul.f32 %v7896_v38, %v17050_v63  ;;  %vm7934_vm4 = vweird.f32 %v17329_v10  ;;  %v12214_v38 = vld [vmem:[#allocation10 + $0x70] sm:$0xf0]  ;;  %v13193_v44 = vld [vmem:[#allocation10 + $0x54] sm:$0xf0] }
 0x749   : > { %v13794_v19 = vpop.eup %13793  ;;  %v7916_v29 = vmul.f32 %v17307_v42, %v7915_v5  ;;  %13797 = vpow2.f32 %v12157_v49  ;;  %v7962_v48 = vmul.f32 %v13792_v15, %v7881_v7  ;;  %v7901_v54 = vmul.f32 %v17302_v8, %v7900_v0  ;;  %vm17395_vm7 = vmor %vm7933_vm2, %vm7934_vm4  ;;  %v13194_v7 = vld [vmem:[#allocation10 + $0x64] sm:$0xf] }
 0x74a   : > { %v7930_v46 = vsub.f32 1.0, %v7929_v22  ;;  %v17354_v20 = vadd.f32 1.0, %v13794_v19  ;;  %13799 = vpow2.f32 %v12158_v2  ;;  %v7954_v30 = vand.u32 2147483648, %v17337_v11 }
 0x74b   : > { %v7917_v6 = vadd.f32 %v17307_v42, %v7916_v29  ;;  %v17371_v55 = vadd.f32 %v7962_v48, %v7960_v14  ;;  %vm17399_vm8 = vcmp.eq.f32.partialorder %v7937_v47, 8.507059e+37  ;;  %v8233_v61 = vadd.f32 %v8225_v35, %v17268_v62  ;;  %v12220_v29 = vld [vmem:[#allocation10 + $0x68] sm:$0xf] }
 0x74c   : > { %v7931_v45 = vmul.f32 %v17329_v10, %v7930_v46  ;;  %13801 = vrcp.f32 %v17354_v20  ;;  %v12213_v5 = vor.u32 %v13196_v17, %v12212_v24  ;;  %v7952_v3 = vand.u32 2147483647, %v17337_v11  ;;  %v12222_v24 = vld [vmem:[#allocation10 + $0x78] sm:$0xf0]  ;;  %v12196_v17 = vld [vmem:[#allocation10 + $0x40] sm:$0xf] }
 0x74d   : > { %13803 = vtanh.f32 %v7843_v52  ;;  %v7921_v26 = vsel %vm17377_vm5, %v17307_v42, %v7917_v6  ;;  %v8235_v42 = vadd.f32 %v8199_v16, %v17279_v36  ;;  %v17415_v52 = vadd.f32 %v17302_v8, %v7901_v54 }
 0x74e   : > { %v17366_v63 = vpop.eup %13795  ;;  %v7932_v28 = vadd.f32 %v17329_v10, %v7931_v45  ;;  %13805 = vpow2.f32 %v12159_v39  ;;  %v7926_v62 = vsel %vm17381_vm6, %v7925_v37, %v7921_v26  ;;  %v8236_v15 = vadd.f32 %v8213_v51, %v17294_v23  ;;  %8599 = vmatpush.bf16.msrb.mxu0 %v12213_v5  ;;  %v13197_v23 = vld [vmem:[#allocation10 + $0x74] sm:$0xf0]  ;;  %v13195_v39 = vld [vmem:[#allocation10 + $0x6c] sm:$0xf]  ;;  %v12198_v37 = vld [vmem:[#allocation10 + $0x50] sm:$0xf0]  ;;  %v8227_v5 = vpop.f32.mrf.mxu3 }
 0x74f   : > { %v13798_v4 = vpop.eup %13797  ;;  %v7944_v18 = vmul.f32 %v17366_v63, %v17337_v11  ;;  %v12160_v19 = vmul.f32 -1.442695, %v8235_v42  ;;  %v8271_v0 = vand.u32 2147483647, %v17354_v20  ;;  %v8273_v48 = vand.u32 2147483648, %v17354_v20 }
 0x750   : > { %v17389_v49 = vadd.f32 1.0, %v13798_v4  ;;  %v13800_v13 = vpop.eup %13799  ;;  %v7936_v32 = vsel %vm17395_vm7, %v17329_v10, %v7932_v28  ;;  %v17423_v10 = vor.u32 1.1754944e-38, %v7954_v30  ;;  %v12161_v47 = vmul.f32 -1.442695, %v8236_v15  ;;  %v13192_v4 = vld [vmem:[#allocation10 + $0x4c] sm:$0xf0] }
 0x751   : > { %v17425_v57 = vadd.f32 1.0, %v13800_v13  ;;  %v7941_v27 = vsel %vm17399_vm8, %v7940_v1, %v7936_v32  ;;  %v7945_v59 = vsub.f32 1.0, %v7944_v18  ;;  %v12217_v35 = vor.u32 %v13194_v7, %v12214_v38  ;;  %v12164_v51 = vld [vmem:[#allocation10] sm:$0xf] }
 0x752   : > { %v17405_v22 = vpop.eup %13801  ;;  %13807 = vrcp.f32 %v17389_v49  ;;  %v7961_v28 = vmul.f32 %v7941_v27, %v17061_v21  ;;  %v12221_v16 = vor.u32 %v13197_v23, %v12220_v29  ;;  %vm8267_vm10 = vweird.f32 %v17354_v20 }
 0x753   : > { %v8263_v36 = vmul.f32 %v17405_v22, %v17354_v20  ;;  %v13804_v46 = vpop.eup %13803  ;;  %13809 = vtanh.f32 %v17371_v55  ;;  %vm8268_vm9 = vweird.f32 %v17405_v22  ;;  %v7946_v21 = vmul.f32 %v17366_v63, %v7945_v59  ;;  %8613 = vmatpush.bf16.msrb.mxu1 %v12217_v35  ;;  %v12204_v20 = vld [vmem:[#allocation10 + $0x48] sm:$0xf]  ;;  %v12182_v35 = vld [vmem:[#allocation10 + $0x30] sm:$0xf0] }
 0x754   : > { %13811 = vtanh.f32 %v8233_v61  ;;  %v13806_v45 = vpop.eup %13805  ;;  %v7963_v14 = vmul.f32 %v13804_v46, %v7926_v62  ;;  %vm17449_vm11 = vmor %vm8267_vm10, %vm8268_vm9  ;;  %vm17453_vm12 = vcmp.eq.f32.partialorder %v8271_v0, 8.507059e+37  ;;  %v8274_v13 = vor.u32 1.1754944e-38, %v8273_v48  ;;  %8627 = vmatpush.bf16.msrb.mxu2 %v12221_v16  ;;  %v13191_v62 = vld [vmem:[#allocation10 + $0x4c] sm:$0xf]  ;;  %v13188_v48 = vld [vmem:[#allocation10 + $0x2c] sm:$0xf0] }
 0x755   : > { %v8264_v2 = vsub.f32 1.0, %v8263_v36  ;;  %13813 = vpow2.f32 %v12160_v19  ;;  %v17433_v6 = vadd.f32 1.0, %v13806_v45  ;;  %v12225_v18 = vor.u32 %v13195_v39, %v12222_v24  ;;  %v12206_v36 = vld [vmem:[#allocation10 + $0x58] sm:$0xf0]  ;;  %v12188_v16 = vld [vmem:[#allocation10 + $0x28] sm:$0xf] }
 0x756   : > { %13815 = vrcp.f32 %v17425_v57  ;;  %v12197_v32 = vor.u32 %v13192_v4, %v12196_v17  ;;  %v17460_v7 = vadd.f32 %v7963_v14, %v7961_v28  ;;  %v8288_v38 = vand.u32 2147483648, %v17389_v49  ;;  %v12180_v14 = vld [vmem:[#allocation10 + $0x20] sm:$0xf]  ;;  %v13186_v28 = vld [vmem:[#allocation10 + $0x24] sm:$0xf] }
 0x757   : > { %v8265_v40 = vmul.f32 %v17405_v22, %v8264_v2  ;;  %13817 = vrcp.f32 %v17433_v6  ;;  %v8286_v19 = vand.u32 2147483647, %v17389_v49  ;;  %8641 = vmatpush.bf16.msrb.mxu3 %v12225_v18  ;;  %v8237_v0 = vadd.f32 %v8227_v5, %v17298_v41  ;;  %v13189_v41 = vld [vmem:[#allocation10 + $0x34] sm:$0xf0]  ;;  %v17504_v5 = vld [vmem:[#allocation10 + $0x8] sm:$0xf] }
 0x758   : > { %v17435_v1 = vpop.eup %13807  ;;  %13819 = vpow2.f32 %v12161_v47  ;;  %8600 = vmatpush.bf16.msrb.mxu0 %v12197_v32  ;;  %v12201_v23 = vor.u32 %v13190_v58, %v12198_v37  ;;  %v12205_v45 = vor.u32 %v13193_v44, %v12204_v20  ;;  %v12209_v59 = vor.u32 %v13191_v62, %v12206_v36  ;;  %v12190_v58 = vld [vmem:[#allocation10 + $0x38] sm:$0xf0]  ;;  %v17506_v18 = vld [vmem:[#allocation10 + $0x14] sm:$0xf0]  ;;  %v17517_v36 = vld [vmem:[#allocation10 + $0xc] sm:$0xf] }
 0x759   : > { %v8278_v54 = vmul.f32 %v17435_v1, %v17389_v49  ;;  %v8266_v34 = vadd.f32 %v17405_v22, %v8265_v40  ;;  %v17444_v30 = vpop.eup %13809  ;;  %vm8283_vm13 = vweird.f32 %v17435_v1  ;;  %v17478_v47 = vadd.f32 %v17366_v63, %v7946_v21 }
 0x75a   : > { %v13812_v12 = vpop.eup %13811  ;;  %vm8282_vm14 = vweird.f32 %v17389_v49  ;;  %v8289_v4 = vor.u32 1.1754944e-38, %v8288_v38  ;;  %v8301_v49 = vand.u32 2147483647, %v17425_v57  ;;  %8614 = vmatpush.bf16.msrb.mxu1 %v12201_v23  ;;  %8628 = vmatpush.bf16.msrb.mxu2 %v12205_v45  ;;  %vm7904_vm0 = vweird.f32 %v17302_v8  ;;  %v17521_v38 = vld [vmem:[#allocation8 + $0xe0] sm:$0xf] }
 0x75b   : > { %v8279_v61 = vsub.f32 1.0, %v8278_v54  ;;  %v8270_v42 = vsel %vm17449_vm11, %v17405_v22, %v8266_v34  ;;  %v13814_v15 = vpop.eup %13813  ;;  %vm17486_vm15 = vmor %vm8282_vm14, %vm8283_vm13  ;;  %v13187_v34 = vld [vmem:[#allocation10 + $0x2c] sm:$0xf]  ;;  %vm8287_vm1 = vcmp.eq.f32.partialorder %v8286_v19, 8.507059e+37  ;;  %8642 = vmatpush.bf16.msrb.mxu3 %v12209_v59  ;;  %v12181_v26 = vor.u32 %v13188_v48, %v12180_v14  ;;  %v17527_v23 = vld [vmem:[#allocation8 + $0xe4] sm:$0xf] }
 0x75c   : > { %v8275_v46 = vsel %vm17453_vm12, %v8274_v13, %v8270_v42  ;;  %v17470_v27 = vadd.f32 1.0, %v13814_v15  ;;  %v17472_v2 = vpop.eup %13815  ;;  %v13184_v13 = vld [vmem:[#allocation10 + $0xc] sm:$0xf0]  ;;  %v17502_v42 = vld [vmem:[#allocation10 + $0x10] sm:$0xf0]  ;;  %vm7903_vm2 = vweird.f32 %v17251_v60  ;;  %vm7949_vm3 = vweird.f32 %v17366_v63 }
 0x75d   : > { %v8280_v29 = vmul.f32 %v17435_v1, %v8279_v61  ;;  %v17468_v22 = vmul.f32 %v13812_v12, %v8275_v46  ;;  %v17475_v40 = vpop.eup %13817  ;;  %v8318_v12 = vand.u32 2147483648, %v17433_v6  ;;  %v17500_v61 = vld [vmem:[#allocation10 + $0x4] sm:$0xf]  ;;  %v8303_v32 = vand.u32 2147483648, %v17425_v57  ;;  %8601 = vmatpush.bf16.msrb.mxu0 %v12181_v26  ;;  %v17519_v15 = vld [vmem:[#allocation10 + $0x18] sm:$0xf0]  ;;  %vm17610_vm14 = vmor %vm7903_vm2, %vm7904_vm0 }
 0x75e   : > { %13821 = vrcp.f32 %v17470_v27  ;;  %v13820_v24 = vpop.eup %13819  ;;  %v8308_v54 = vmul.f32 %v17475_v40, %v17433_v6  ;;  %v17523_v46 = vld [vmem:[#allocation8 + $0xec] sm:$0xf0]  ;;  %vm8313_vm4 = vweird.f32 %v17475_v40  ;;  %v17531_v45 = vld [vmem:[#allocation8 + $0xe8] sm:$0xf]  ;;  %vm7948_vm5 = vweird.f32 %v17337_v11  ;;  %v13166_v11 = vld [vmem:[#allocation8 + $0x84] sm:$0xf] }
 0x75f   : > { %v8281_v39 = vadd.f32 %v17435_v1, %v8280_v29  ;;  %13823 = vtanh.f32 %v17460_v7  ;;  %v17497_v21 = vadd.f32 1.0, %v13820_v24  ;;  %v12185_v29 = vor.u32 %v13186_v28, %v12182_v35  ;;  %v13181_v24 = vld [vmem:[#allocation8 + $0xf4] sm:$0xf0]  ;;  %v17540_v28 = vld [vmem:[#allocation8 + $0xec] sm:$0xf] }
 0x760   : > { %v8309_v44 = vsub.f32 1.0, %v8308_v54  ;;  %13825 = vtanh.f32 %v8237_v0  ;;  %v12189_v0 = vor.u32 %v13189_v41, %v12188_v16  ;;  %vm8312_vm6 = vweird.f32 %v17433_v6  ;;  %v17542_v35 = vld [vmem:[#allocation8 + $0xf8] sm:$0xf0]  ;;  %v17550_v54 = vld [vmem:[#allocation8 + $0xc0] sm:$0xf] }
 0x761   : > { %v8285_v37 = vsel %vm17486_vm15, %v17435_v1, %v8281_v39  ;;  %v17512_v1 = vmul.f32 %v17472_v2, %v17425_v57  ;;  %13827 = vrcp.f32 %v17497_v21  ;;  %v12193_v48 = vor.u32 %v13187_v34, %v12190_v58  ;;  %8615 = vmatpush.bf16.msrb.mxu1 %v12185_v29  ;;  %v17552_v34 = vld [vmem:[#allocation8 + $0xcc] sm:$0xf0]  ;;  %vm17567_vm8 = vmor %vm8312_vm6, %vm8313_vm4 }
 0x762   : > { %v8290_v20 = vsel %vm8287_vm1, %v8289_v4, %v8285_v37  ;;  %v8310_v19 = vmul.f32 %v17475_v40, %v8309_v44  ;;  %v12165_v39 = vor.u32 %v13184_v13, %v12164_v51  ;;  %v8316_v4 = vand.u32 2147483647, %v17433_v6  ;;  %8629 = vmatpush.bf16.msrb.mxu2 %v12189_v0  ;;  %v13177_v0 = vld [vmem:[#allocation8 + $0xd4] sm:$0xf0]  ;;  %v12380_v51 = vld [vmem:[#allocation8 + $0xa8] sm:$0xf]  ;;  %vm17629_vm1 = vmor %vm7948_vm5, %vm7949_vm3 }
 0x763   : > { %v8354_v62 = vmul.f32 %v8290_v20, %v17079_v9  ;;  %v17529_v9 = vld [vmem:[#allocation8 + $0xf0] sm:$0xf0]  ;;  %vm17556_vm7 = vcmp.eq.f32.partialorder %v7907_v33, 8.507059e+37  ;;  %v8294_v37 = vsub.f32 1.0, %v17512_v1  ;;  %v8333_v26 = vand.u32 2147483648, %v17470_v27  ;;  %8643 = vmatpush.bf16.msrb.mxu3 %v12193_v48 }
 0x764   : > { %v17533_v59 = vpop.eup %13821  ;;  %v8311_v17 = vadd.f32 %v17475_v40, %v8310_v19  ;;  %8602 = vmatpush.bf16.msrb.mxu0 %v12165_v39  ;;  %v12169_v33 = vor.u32 %v17500_v61, %v17502_v42  ;;  %v12173_v13 = vor.u32 %v17506_v18, %v17504_v5  ;;  %v17575_v20 = vld [vmem:[#allocation8 + $0xc4] sm:$0xf]  ;;  %vm17579_vm9 = vcmp.eq.f32.partialorder %v7952_v3, 8.507059e+37  ;;  %v12390_v5 = vld [vmem:[#allocation8 + $0xd0] sm:$0xf0] }
 0x765   : > { %v17537_v14 = vadd.f32 %v17468_v22, %v8354_v62  ;;  %v17544_v16 = vpop.eup %13823  ;;  %v8323_v41 = vmul.f32 %v17533_v59, %v17470_v27  ;;  %v8319_v22 = vor.u32 1.1754944e-38, %v8318_v12  ;;  %v12177_v61 = vor.u32 %v17517_v36, %v17519_v15  ;;  %v12396_v18 = vld [vmem:[#allocation8 + $0xc8] sm:$0xf]  ;;  %v13175_v48 = vld [vmem:[#allocation8 + $0xcc] sm:$0xf] }
 0x766   : > { %v13826_v44 = vpop.eup %13825  ;;  %v8315_v1 = vsel %vm17567_vm8, %v17475_v40, %v8311_v17  ;;  %v12405_v42 = vor.u32 %v17523_v46, %v17521_v38  ;;  %v8331_v3 = vand.u32 2147483647, %v17470_v27  ;;  %v12409_v19 = vor.u32 %v17527_v23, %v17529_v9  ;;  %8616 = vmatpush.bf16.msrb.mxu1 %v12169_v33  ;;  %8630 = vmatpush.bf16.msrb.mxu2 %v12173_v13  ;;  %v12398_v38 = vld [vmem:[#allocation8 + $0xd8] sm:$0xf0]  ;;  %v12372_v46 = vld [vmem:[#allocation8 + $0xa0] sm:$0xf] }
 0x767   : > { %9007 = vst [vmem:[#allocation3] sm:$0xff] %v17537_v14  ;;  %v8324_v6 = vsub.f32 1.0, %v8323_v41  ;;  %v17590_v62 = vpop.eup %13827  ;;  %v12413_v29 = vor.u32 %v13181_v24, %v17531_v45  ;;  %v12417_v40 = vor.u32 %v17540_v28, %v17542_v35  ;;  %vm8328_vm10 = vweird.f32 %v17533_v59  ;;  %8644 = vmatpush.bf16.msrb.mxu3 %v12177_v61  ;;  %v13172_v45 = vld [vmem:[#allocation8 + $0xac] sm:$0xf0]  ;;  %v13170_v39 = vld [vmem:[#allocation8 + $0xa4] sm:$0xf] }
 0x768   : > { %v8338_v15 = vmul.f32 %v17590_v62, %v17497_v21  ;;  %vm8317_vm11 = vcmp.eq.f32.partialorder %v8316_v4, 8.507059e+37  ;;  %vm8298_vm12 = vweird.f32 %v17472_v2  ;;  %vm8327_vm13 = vweird.f32 %v17470_v27  ;;  %8811 = vmatpush.bf16.msra.mxu0 %v12405_v42  ;;  %v12374_v24 = vld [vmem:[#allocation8 + $0xb0] sm:$0xf0]  ;;  %v13173_v33 = vld [vmem:[#allocation8 + $0xb4] sm:$0xf0] }
 0x769   : > { %v8325_v36 = vmul.f32 %v17533_v59, %v8324_v6  ;;  %v8320_v23 = vsel %vm8317_vm11, %v8319_v22, %v8315_v1  ;;  %v12389_v9 = vor.u32 %v17552_v34, %v17550_v54  ;;  %v12393_v17 = vor.u32 %v17575_v20, %v12390_v5  ;;  %vm17621_vm15 = vmor %vm8327_vm13, %vm8328_vm10  ;;  %v13171_v6 = vld [vmem:[#allocation8 + $0xac] sm:$0xf]  ;;  %v12382_v1 = vld [vmem:[#allocation8 + $0xb8] sm:$0xf0] }
 0x76a   : > { %v8339_v35 = vsub.f32 1.0, %v8338_v15  ;;  %8825 = vmatpush.bf16.msra.mxu1 %v12409_v19  ;;  %8839 = vmatpush.bf16.msra.mxu2 %v12413_v29  ;;  %v12397_v4 = vor.u32 %v13177_v0, %v12396_v18  ;;  %v8295_v22 = vmul.f32 %v17472_v2, %v8294_v37  ;;  %v8334_v54 = vor.u32 1.1754944e-38, %v8333_v26  ;;  %v12356_v5 = vld [vmem:[#allocation8 + $0x80] sm:$0xf]  ;;  %v13168_v18 = vld [vmem:[#allocation8 + $0x8c] sm:$0xf0] }
 0x76b   : > { %v8326_v41 = vadd.f32 %v17533_v59, %v8325_v36  ;;  %vm8332_vm0 = vcmp.eq.f32.partialorder %v8331_v3, 8.507059e+37  ;;  %8853 = vmatpush.bf16.msra.mxu3 %v12417_v40  ;;  %v12401_v34 = vor.u32 %v13175_v48, %v12398_v38  ;;  %v8357_v13 = vmul.f32 %v13826_v44, %v8320_v23  ;;  %v12358_v29 = vld [vmem:[#allocation8 + $0x90] sm:$0xf0]  ;;  %v12364_v40 = vld [vmem:[#allocation8 + $0x88] sm:$0xf] }
 0x76c   : > { %v12373_v20 = vor.u32 %v13172_v45, %v12372_v46  ;;  %v12377_v26 = vor.u32 %v13170_v39, %v12374_v24  ;;  %v8340_v61 = vmul.f32 %v17590_v62, %v8339_v35  ;;  %8812 = vmatpush.bf16.msra.mxu0 %v12389_v9  ;;  %v7906_v3 = vsel %vm17610_vm14, %v17302_v8, %v17415_v52  ;;  %v13169_v0 = vld [vmem:[#allocation8 + $0x94] sm:$0xf0]  ;;  %v13167_v15 = vld [vmem:[#allocation8 + $0x8c] sm:$0xf]  ;;  %v12366_v38 = vld [vmem:[#allocation8 + $0x98] sm:$0xf0] }
 0x76d   : > { %v8330_v27 = vsel %vm17621_vm15, %v17533_v59, %v8326_v41  ;;  %v7951_v59 = vsel %vm17629_vm1, %v17366_v63, %v17478_v47  ;;  %13829 = vtanh.f32 %v17537_v14  ;;  %v12381_v19 = vor.u32 %v13173_v33, %v12380_v51  ;;  %v12340_v45 = vld [vmem:[#allocation8 + $0x60] sm:$0xf]  ;;  %v13164_v39 = vld [vmem:[#allocation8 + $0x6c] sm:$0xf0]  ;;  %v13162_v12 = vld [vmem:[#allocation8 + $0x64] sm:$0xf] }
 0x76e   : > { %v8335_v42 = vsel %vm8332_vm0, %v8334_v54, %v8330_v27  ;;  %8826 = vmatpush.bf16.msra.mxu1 %v12393_v17  ;;  %8840 = vmatpush.bf16.msra.mxu2 %v12397_v4  ;;  %v7911_v48 = vsel %vm17556_vm7, %v17358_v25, %v7906_v3  ;;  %v8296_v8 = vadd.f32 %v17472_v2, %v8295_v22  ;;  %v8348_v47 = vand.u32 2147483648, %v17497_v21  ;;  %v12342_v24 = vld [vmem:[#allocation8 + $0x70] sm:$0xf0]  ;;  %v12348_v35 = vld [vmem:[#allocation8 + $0x68] sm:$0xf] }
 0x76f   : > { %v8355_v44 = vmul.f32 %v8335_v42, %v17178_v50  ;;  %8854 = vmatpush.bf16.msra.mxu3 %v12401_v34  ;;  %v12385_v52 = vor.u32 %v13171_v6, %v12382_v1  ;;  %v7956_v63 = vsel %vm17579_vm9, %v17423_v10, %v7951_v59  ;;  %v7968_v50 = vmul.f32 %v17444_v30, %v7911_v48  ;;  %v13165_v41 = vld [vmem:[#allocation8 + $0x74] sm:$0xf0]  ;;  %v13163_v34 = vld [vmem:[#allocation8 + $0x6c] sm:$0xf]  ;;  %v12350_v51 = vld [vmem:[#allocation8 + $0x78] sm:$0xf0] }
 0x770   : > { %v12357_v36 = vor.u32 %v13168_v18, %v12356_v5  ;;  %v7969_v46 = vmul.f32 %v17544_v16, %v7956_v63  ;;  %v8341_v25 = vadd.f32 %v17590_v62, %v8340_v61  ;;  %8813 = vmatpush.bf16.msra.mxu0 %v12373_v20  ;;  %v12361_v58 = vor.u32 %v13166_v11, %v12358_v29  ;;  %v12326_v42 = vld [vmem:[#allocation8 + $0x50] sm:$0xf0]  ;;  %v12332_v5 = vld [vmem:[#allocation8 + $0x48] sm:$0xf]  ;;  %v13159_v3 = vld [vmem:[#allocation8 + $0x4c] sm:$0xf] }
 0x771   : > { %v8359_v14 = vadd.f32 %v8357_v13, %v8355_v44  ;;  %v12365_v23 = vor.u32 %v13169_v0, %v12364_v40  ;;  %v7970_v9 = vpack.c.bf16 %v7968_v50, %v7968_v50  ;;  %vm8343_vm2 = vweird.f32 %v17590_v62  ;;  %v12334_v59 = vld [vmem:[#allocation8 + $0x58] sm:$0xf0]  ;;  %v12308_v40 = vld [vmem:[#allocation8 + $0x20] sm:$0xf]  ;;  %v13156_v0 = vld [vmem:[#allocation8 + $0x2c] sm:$0xf0] }
 0x772   : > { %8827 = vmatpush.bf16.msra.mxu1 %v12377_v26  ;;  %8841 = vmatpush.bf16.msra.mxu2 %v12381_v19  ;;  %v7971_v10 = vpack.c.bf16 %v7969_v46, %v7969_v46  ;;  %v13248_v30 = vpack.c.bf16 %v7969_v46, %v7968_v50  ;;  %vm8297_vm3 = vweird.f32 %v17425_v57  ;;  %v8346_v16 = vand.u32 2147483647, %v17497_v21  ;;  %v13160_v57 = vld [vmem:[#allocation8 + $0x4c] sm:$0xf0]  ;;  %v13154_v48 = vld [vmem:[#allocation8 + $0x24] sm:$0xf] }
 0x773   : > { %13831 = vtanh.f32 %v8359_v14  ;;  %9008 = vst [vmem:[#allocation3 + $0x18] sm:$0xff] %v8359_v14  ;;  %8855 = vmatpush.bf16.msra.mxu3 %v12385_v52  ;;  %v12369_v28 = vor.u32 %v13167_v15, %v12366_v38  ;;  %v13830_v17 = vpop.eup %13829  ;;  %vm17663_vm4 = vmor %vm8297_vm3, %vm8298_vm12  ;;  %v8304_v22 = vor.u32 1.1754944e-38, %v8303_v32  ;;  %vm8342_vm5 = vweird.f32 %v17497_v21  ;;  %v12324_v32 = vld [vmem:[#allocation8 + $0x40] sm:$0xf]  ;;  %v12310_v63 = vld [vmem:[#allocation8 + $0x30] sm:$0xf0] }
 0x774   : > { %13260 = vst [vmem:[%s14192_s19 + $0x30] sm:$0xff] %v13248_v30   ;;  %v8431_v60 = vunpack.c.l.b16 %v7970_v9  ;;  %v8432_v54 = vunpack.c.l.b16 %v7971_v10  ;;  %vm8302_vm6 = vcmp.eq.f32.partialorder %v8301_v49, 8.507059e+37  ;;  %vm17675_vm7 = vmor %vm8342_vm5, %vm8343_vm2  ;;  %8814 = vmatpush.bf16.msra.mxu0 %v12357_v36  ;;  %v12341_v37 = vor.u32 %v13164_v39, %v12340_v45  ;;  %v13158_v49 = vld [vmem:[#allocation8 + $0x44] sm:$0xf]  ;;  %v12316_v50 = vld [vmem:[#allocation8 + $0x28] sm:$0xf] }
 0x775   : > { %v12345_v27 = vor.u32 %v13162_v12, %v12342_v24  ;;  %v8300_v21 = vsel %vm17663_vm4, %v17472_v2, %v8296_v8  ;;  %v8349_v13 = vor.u32 1.1754944e-38, %v8348_v47  ;;  %v8345_v6 = vsel %vm17675_vm7, %v17590_v62, %v8341_v25  ;;  %v13161_v2 = vld [vmem:[#allocation8 + $0x54] sm:$0xf0]  ;;  %v13155_v14 = vld [vmem:[#allocation8 + $0x2c] sm:$0xf] }
 0x776   : > { %8828 = vmatpush.bf16.msra.mxu1 %v12361_v58  ;;  %8842 = vmatpush.bf16.msra.mxu2 %v12365_v23  ;;  %v8433_v20 = vpack.c.b16 %v8432_v54, %v8431_v60  ;;  %v8305_v26 = vsel %vm8302_vm6, %v8304_v22, %v8300_v21  ;;  %vm8347_vm8 = vcmp.eq.f32.partialorder %v8346_v16, 8.507059e+37  ;;  %v12349_v1 = vor.u32 %v13165_v41, %v12348_v35  ;;  %v13157_v47 = vld [vmem:[#allocation8 + $0x34] sm:$0xf0]  ;;  %v12318_v36 = vld [vmem:[#allocation8 + $0x38] sm:$0xf0] }
 0x777   : > { %8856 = vmatpush.bf16.msra.mxu3 %v12369_v28  ;;  %v12353_v61 = vor.u32 %v13163_v34, %v12350_v51  ;;  %v8362_v18 = vmul.f32 %v13830_v17, %v8305_v26  ;;  %v8350_v44 = vsel %vm8347_vm8, %v8349_v13, %v8345_v6  ;;  %v12325_v62 = vor.u32 %v13160_v57, %v12324_v32  ;;  %v12292_v46 = vld [vmem:[#allocation8] sm:$0xf]  ;;  %v13152_v25 = vld [vmem:[#allocation8 + $0xc] sm:$0xf0]  ;;  %v13150_v9 = vld [vmem:[#allocation8 + $0x4] sm:$0xf] }
 0x778   : > { %8603 = vmatmul.bf16.vlgmr.msrb.gmra.mxu0 %v8433_v20  ;;  %8617 = vmatmul.bf16.vlgmr.msrb.gmra.mxu1 %v8433_v20  ;;  %v12329_v29 = vor.u32 %v13158_v49, %v12326_v42  ;;  %v12333_v8 = vor.u32 %v13161_v2, %v12332_v5  ;;  %v12337_v52 = vor.u32 %v13159_v3, %v12334_v59  ;;  %v12294_v45 = vld [vmem:[#allocation8 + $0x10] sm:$0xf0]  ;;  %v12300_v39 = vld [vmem:[#allocation8 + $0x8] sm:$0xf]  ;;  %v13153_v10 = vld [vmem:[#allocation8 + $0x14] sm:$0xf0] }
 0x779   : > { %v13832_v11 = vpop.eup %13831  ;;  %8631 = vmatmul.bf16.vlgmr.msrb.gmra.mxu2 %v8433_v20  ;;  %8645 = vmatmul.bf16.vlgmr.msrb.gmra.mxu3 %v8433_v20  ;;  %9005 = vst [vmem:[#allocation2 + $0x10] sm:$0xff] %v8362_v18  ;;  %v12309_v15 = vor.u32 %v13156_v0, %v12308_v40  ;;  %v12313_v38 = vor.u32 %v13154_v48, %v12310_v63  ;;  %v13151_v30 = vld [vmem:[#allocation8 + $0xc] sm:$0xf]  ;;  %v12302_v12 = vld [vmem:[#allocation8 + $0x18] sm:$0xf0] }
 0x77a   : > { %v8363_v19 = vmul.f32 %v13832_v11, %v8350_v44  ;;  %8815 = vmatpush.bf16.msra.mxu0 %v12341_v37  ;;  %8829 = vmatpush.bf16.msra.mxu1 %v12345_v27  ;;  %v12317_v58 = vor.u32 %v13157_v47, %v12316_v50  ;;  %v12321_v23 = vor.u32 %v13155_v14, %v12318_v36 }
 0x77b   : > { %8843 = vmatpush.bf16.msra.mxu2 %v12349_v1  ;;  %8857 = vmatpush.bf16.msra.mxu3 %v12353_v61  ;;  %v12293_v24 = vor.u32 %v13152_v25, %v12292_v46  ;;  %v12297_v16 = vor.u32 %v13150_v9, %v12294_v45  ;;  %v12301_v28 = vor.u32 %v13153_v10, %v12300_v39 }
 0x77c   : > { %9006 = vst [vmem:[#allocation2] sm:$0xff] %v8363_v19  ;;  %v12305_v35 = vor.u32 %v13151_v30, %v12302_v12  ;;  %v8364_v41 = vpack.c.bf16 %v8363_v19, %v8362_v18 }
 0x77e   : > { %8816 = vmatpush.bf16.msra.mxu0 %v12325_v62  ;;  %8830 = vmatpush.bf16.msra.mxu1 %v12329_v29 }
 0x77f   : > { %8844 = vmatpush.bf16.msra.mxu2 %v12333_v8  ;;  %8858 = vmatpush.bf16.msra.mxu3 %v12337_v52 }
 0x782   : > { %8817 = vmatpush.bf16.msra.mxu0 %v12309_v15  ;;  %8831 = vmatpush.bf16.msra.mxu1 %v12313_v38 }
 0x783   : > { %8845 = vmatpush.bf16.msra.mxu2 %v12317_v58  ;;  %8859 = vmatpush.bf16.msra.mxu3 %v12321_v23 }
 0x786   : > { %8818 = vmatpush.bf16.msra.mxu0 %v12293_v24  ;;  %8832 = vmatpush.bf16.msra.mxu1 %v12297_v16 }
 0x787   : > { %8846 = vmatpush.bf16.msra.mxu2 %v12301_v28  ;;  %8860 = vmatpush.bf16.msra.mxu3 %v12305_v35 }
 0x789   : > { %8819 = vmatmul.bf16.vlgmr.msra.gmra.mxu0 %v8364_v41  ;;  %8833 = vmatmul.bf16.vlgmr.msra.gmra.mxu1 %v8364_v41 }
 0x78a   : > { %8847 = vmatmul.bf16.vlgmr.msra.gmra.mxu2 %v8364_v41  ;;  %8861 = vmatmul.bf16.vlgmr.msra.gmra.mxu3 %v8364_v41 }
 0x7f5   : > { %v8604_v17 = vpop.f32.mrf.mxu0  ;;  %v8618_v4 = vpop.f32.mrf.mxu1 }
 0x7fc   : > { %v8632_v22 = vpop.f32.mrf.mxu2  ;;  %v8646_v34 = vpop.f32.mrf.mxu3 }
 0x7fd   : > { %v8606_v60 = vpop.f32.mrf.mxu0  ;;  %v8620_v54 = vpop.f32.mrf.mxu1 }
 0x804   : > { %v8634_v51 = vpop.f32.mrf.mxu2  ;;  %v8648_v21 = vpop.f32.mrf.mxu3 }
 0x806   : > { %v8820_v33 = vpop.f32.mrf.mxu0  ;;  %v8834_v37 = vpop.f32.mrf.mxu1 }
 0x807   : > { %v8821_v27 = vadd.f32 %v8820_v33, %v8604_v17  ;;  %v8835_v32 = vadd.f32 %v8834_v37, %v8618_v4 }
 0x809   : > { %v8867_v13 = vadd.f32 %v8821_v27, %v14595_v31  ;;  %v8868_v20 = vadd.f32 %v8835_v32, %v14598_v43 }
 0x80b   : > { %v12418_v57 = vmul.f32 -1.442695, %v8867_v13  ;;  %v12419_v49 = vmul.f32 -1.442695, %v8868_v20 }
 0x80d   : > { %13833 = vpow2.f32 %v12418_v57  ;;  %v8848_v26 = vpop.f32.mrf.mxu2  ;;  %v8862_v44 = vpop.f32.mrf.mxu3 }
 0x80e   : > { %13835 = vpow2.f32 %v12419_v49  ;;  %v8849_v6 = vadd.f32 %v8848_v26, %v8632_v22  ;;  %v8822_v1 = vpop.f32.mrf.mxu0  ;;  %v8836_v61 = vpop.f32.mrf.mxu1  ;;  %v8863_v8 = vadd.f32 %v8862_v44, %v8646_v34 }
 0x80f   : > { %v8823_v42 = vadd.f32 %v8822_v1, %v8606_v60  ;;  %v8837_v5 = vadd.f32 %v8836_v61, %v8620_v54 }
 0x810   : > { %v8869_v18 = vadd.f32 %v8849_v6, %v14603_v56 }
 0x811   : > { %v8871_v11 = vadd.f32 %v8823_v42, %v14595_v31  ;;  %v8872_v2 = vadd.f32 %v8837_v5, %v14598_v43  ;;  %v8870_v31 = vadd.f32 %v8863_v8, %v14626_v53 }
 0x812   : > { %v12420_v3 = vmul.f32 -1.442695, %v8869_v18 }
 0x813   : > { %v13834_v59 = vpop.eup %13833  ;;  %v12421_v19 = vmul.f32 -1.442695, %v8871_v11  ;;  %v12422_v40 = vmul.f32 -1.442695, %v8872_v2 }
 0x814   : > { %v13836_v62 = vpop.eup %13835  ;;  %v8893_v29 = vadd.f32 1.0, %v13834_v59  ;;  %13837 = vpow2.f32 %v12420_v3 }
 0x815   : > { %v8894_v0 = vadd.f32 1.0, %v13836_v62  ;;  %13839 = vpow2.f32 %v12421_v19  ;;  %v8850_v48 = vpop.f32.mrf.mxu2  ;;  %v8864_v9 = vpop.f32.mrf.mxu3 }
 0x816   : > { %13841 = vrcp.f32 %v8893_v29  ;;  %v8851_v52 = vadd.f32 %v8850_v48, %v8634_v51  ;;  %v8908_v23 = vand.u32 2147483647, %v8893_v29  ;;  %v8910_v39 = vand.u32 2147483648, %v8893_v29 }
 0x817   : > { %13843 = vrcp.f32 %v8894_v0  ;;  %v8925_v30 = vand.u32 2147483648, %v8894_v0  ;;  %v8923_v12 = vand.u32 2147483647, %v8894_v0  ;;  %v8865_v16 = vadd.f32 %v8864_v9, %v8648_v21 }
 0x818   : > { %13845 = vpow2.f32 %v12422_v40  ;;  %v8873_v43 = vadd.f32 %v8851_v52, %v14603_v56  ;;  %vm8919_vm11 = vweird.f32 %v8894_v0  ;;  %vm8904_vm12 = vweird.f32 %v8893_v29 }
 0x819   : > { %vm8909_vm14 = vcmp.eq.f32.partialorder %v8908_v23, 8.507059e+37  ;;  %v8911_v22 = vor.u32 1.1754944e-38, %v8910_v39  ;;  %v8926_v34 = vor.u32 1.1754944e-38, %v8925_v30  ;;  %vm8924_vm0 = vcmp.eq.f32.partialorder %v8923_v12, 8.507059e+37 }
 0x81a   : > { %v13838_v63 = vpop.eup %13837  ;;  %v12423_v15 = vmul.f32 -1.442695, %v8873_v43  ;;  %v8874_v33 = vadd.f32 %v8865_v16, %v14626_v53 }
 0x81b   : > { %v13840_v50 = vpop.eup %13839  ;;  %v17692_v47 = vadd.f32 1.0, %v13838_v63 }
 0x81c   : > { %v13842_v14 = vpop.eup %13841  ;;  %v17694_v36 = vadd.f32 1.0, %v13840_v50 }
 0x81d   : > { %v13844_v38 = vpop.eup %13843  ;;  %v8900_v46 = vmul.f32 %v13842_v14, %v8893_v29  ;;  %13847 = vrcp.f32 %v17692_v47  ;;  %vm8905_vm9 = vweird.f32 %v13842_v14  ;;  %vm8934_vm1 = vweird.f32 %v17692_v47 }
 0x81e   : > { %v13846_v25 = vpop.eup %13845  ;;  %v8915_v58 = vmul.f32 %v13844_v38, %v8894_v0  ;;  %13849 = vtanh.f32 %v8870_v31  ;;  %vm8920_vm10 = vweird.f32 %v13844_v38  ;;  %vm8906_vm13 = vmor %vm8904_vm12, %vm8905_vm9  ;;  %v8940_v42 = vand.u32 2147483648, %v17692_v47 }
 0x81f   : > { %v8901_v45 = vsub.f32 1.0, %v8900_v46  ;;  %13851 = vrcp.f32 %v17694_v36  ;;  %v17698_v56 = vadd.f32 1.0, %v13846_v25  ;;  %vm8921_vm15 = vmor %vm8919_vm11, %vm8920_vm10  ;;  %v8955_v18 = vand.u32 2147483648, %v17694_v36 }
 0x820   : > { %v8916_v10 = vsub.f32 1.0, %v8915_v58  ;;  %13853 = vpow2.f32 %v12423_v15  ;;  %v8938_v29 = vand.u32 2147483647, %v17692_v47  ;;  %vm8949_vm6 = vweird.f32 %v17694_v36 }
 0x821   : > { %v8902_v24 = vmul.f32 %v13842_v14, %v8901_v45  ;;  %13855 = vrcp.f32 %v17698_v56  ;;  %v8970_v5 = vand.u32 2147483648, %v17698_v56  ;;  %v8968_v19 = vand.u32 2147483647, %v17698_v56 }
 0x822   : > { %v8917_v28 = vmul.f32 %v13844_v38, %v8916_v10  ;;  %v8941_v0 = vor.u32 1.1754944e-38, %v8940_v42  ;;  %vm8964_vm7 = vweird.f32 %v17698_v56  ;;  %v8956_v48 = vor.u32 1.1754944e-38, %v8955_v18 }
 0x823   : > { %v17701_v35 = vpop.eup %13847  ;;  %v8903_v41 = vadd.f32 %v13842_v14, %v8902_v24  ;;  %v8971_v31 = vor.u32 1.1754944e-38, %v8970_v5  ;;  %vm8969_vm11 = vcmp.eq.f32.partialorder %v8968_v19, 8.507059e+37  ;;  %vm8939_vm12 = vcmp.eq.f32.partialorder %v8938_v29, 8.507059e+37 }
 0x824   : > { %v13850_v17 = vpop.eup %13849  ;;  %v8930_v4 = vmul.f32 %v17701_v35, %v17692_v47  ;;  %v8918_v60 = vadd.f32 %v13844_v38, %v8917_v28  ;;  %vm8935_vm2 = vweird.f32 %v17701_v35 }
 0x825   : > { %v13852_v54 = vpop.eup %13851  ;;  %v8907_v51 = vsel %vm8906_vm13, %v13842_v14, %v8903_v41  ;;  %vm17723_vm5 = vmor %vm8934_vm1, %vm8935_vm2 }
 0x826   : > { %v13854_v37 = vpop.eup %13853  ;;  %v8931_v27 = vsub.f32 1.0, %v8930_v4  ;;  %v8912_v32 = vsel %vm8909_vm14, %v8911_v22, %v8907_v51  ;;  %v8922_v21 = vsel %vm8921_vm15, %v13844_v38, %v8918_v60  ;;  %v8945_v13 = vmul.f32 %v13852_v54, %v17694_v36 }
 0x827   : > { %v13856_v20 = vpop.eup %13855  ;;  %v8927_v57 = vsel %vm8924_vm0, %v8926_v34, %v8922_v21  ;;  %v8993_v49 = vmul.f32 %v13850_v17, %v8912_v32  ;;  %v17708_v26 = vadd.f32 1.0, %v13854_v37  ;;  %vm8950_vm3 = vweird.f32 %v13852_v54 }
 0x828   : > { %v8932_v6 = vmul.f32 %v17701_v35, %v8931_v27  ;;  %v8991_v1 = vmul.f32 %v8927_v57, %v17371_v55  ;;  %v8946_v61 = vsub.f32 1.0, %v8945_v13  ;;  %v8960_v53 = vmul.f32 %v13856_v20, %v17698_v56  ;;  %vm8951_vm8 = vmor %vm8949_vm6, %vm8950_vm3 }
 0x829   : > { %13857 = vrcp.f32 %v17708_v26  ;;  %v8953_v55 = vand.u32 2147483647, %v17694_v36  ;;  %vm8965_vm4 = vweird.f32 %v13856_v20  ;;  %v8985_v10 = vand.u32 2147483648, %v17708_v26 }
 0x82a   : > { %v8995_v11 = vadd.f32 %v8993_v49, %v8991_v1  ;;  %v8961_v2 = vsub.f32 1.0, %v8960_v53  ;;  %13859 = vtanh.f32 %v8874_v33  ;;  %v8933_v3 = vadd.f32 %v17701_v35, %v8932_v6  ;;  %vm8966_vm9 = vmor %vm8964_vm7, %vm8965_vm4 }
 0x82b   : > { %v8947_v59 = vmul.f32 %v13852_v54, %v8946_v61  ;;  %vm8954_vm10 = vcmp.eq.f32.partialorder %v8953_v55, 8.507059e+37  ;;  %vm8979_vm14 = vweird.f32 %v17708_v26  ;;  %v8983_v30 = vand.u32 2147483647, %v17708_v26 }
 0x82c   : > { %13861 = vtanh.f32 %v8995_v11  ;;  %9011 = vst [vmem:[#allocation3 + $0x8] sm:$0xff] %v8995_v11  ;;  %v8962_v44 = vmul.f32 %v13856_v20, %v8961_v2  ;;  %v8937_v63 = vsel %vm17723_vm5, %v17701_v35, %v8933_v3  ;;  %v8986_v12 = vor.u32 1.1754944e-38, %v8985_v10 }
 0x82d   : > { %v8948_v40 = vadd.f32 %v13852_v54, %v8947_v59  ;;  %v8942_v25 = vsel %vm8939_vm12, %v8941_v0, %v8937_v63  ;;  %vm8984_vm0 = vcmp.eq.f32.partialorder %v8983_v30, 8.507059e+37 }
 0x82e   : > { %v8963_v8 = vadd.f32 %v13856_v20, %v8962_v44 }
 0x82f   : > { %v13858_v52 = vpop.eup %13857  ;;  %v8952_v43 = vsel %vm8951_vm8, %v13852_v54, %v8948_v40 }
 0x830   : > { %v13860_v50 = vpop.eup %13859  ;;  %v8975_v47 = vmul.f32 %v13858_v52, %v17708_v26  ;;  %v8957_v14 = vsel %vm8954_vm10, %v8956_v48, %v8952_v43  ;;  %v8967_v36 = vsel %vm8966_vm9, %v13856_v20, %v8963_v8  ;;  %vm8980_vm13 = vweird.f32 %v13858_v52 }
 0x831   : > { %v8972_v15 = vsel %vm8969_vm11, %v8971_v31, %v8967_v36  ;;  %v8994_v38 = vmul.f32 %v13860_v50, %v8957_v14  ;;  %vm8981_vm15 = vmor %vm8979_vm14, %vm8980_vm13 }
 0x832   : > { %v13862_v46 = vpop.eup %13861  ;;  %v8976_v58 = vsub.f32 1.0, %v8975_v47  ;;  %v8992_v23 = vmul.f32 %v8972_v15, %v17460_v7 }
 0x833   : > { %v8999_v9 = vmul.f32 %v13862_v46, %v8942_v25 }
 0x834   : > { %v8977_v45 = vmul.f32 %v13858_v52, %v8976_v58  ;;  %v8996_v39 = vadd.f32 %v8994_v38, %v8992_v23 }
 0x835   : > { %9009 = vst [vmem:[#allocation2 + $0x18] sm:$0xff] %v8999_v9 }
 0x836   : > { %v8978_v56 = vadd.f32 %v13858_v52, %v8977_v45  ;;  %13863 = vtanh.f32 %v8996_v39  ;;  %9012 = vst [vmem:[#allocation3 + $0x10] sm:$0xff] %v8996_v39 }
 0x838   : > { %v8982_v7 = vsel %vm8981_vm15, %v13858_v52, %v8978_v56 }
 0x839   : > { %v8987_v16 = vsel %vm8984_vm0, %v8986_v12, %v8982_v7 }
 0x83c   : > { %v13864_v24 = vpop.eup %13863 }
 0x83d   : > { %v9000_v28 = vmul.f32 %v13864_v24, %v8987_v16 }
 0x83f   : > { %v13253_v35 = vpack.c.bf16 %v9000_v28, %v8999_v9  ;;  %9010 = vst [vmem:[#allocation2 + $0x8] sm:$0xff] %v9000_v28 }
 0x841   : > { %13261 = vst [vmem:[%s14192_s19 + $0x38] sm:$0xff] %v13253_v35  }
 0x842   : > { %13982 = shalt.err (!%p13979_p10)
}
 0x843   : > { %s14049_s3 = smov 64   ;;  %s14050_s19 = smov 4  }
 0x844   : > { %13274 = dma.vmem_to_hbm [thread:$0]  (%p14126_p4), %s9029_s24, 1024, %s9031_s11, %s9014_s15, %s14049_s3, %s14049_s3, %s14050_s19  }
 0x845 PF: > { %p13296_p11 = scmp.ge.s32.totalorder %s14041_s26, 2  ;;  %s9045_s8 = sand.u32 1, %s14021_s21  }
 0x846   : > { %s9046_s13 = scalar_lea.sflag [#allocation7], %s9045_s8 }
 0x847   : > { %p13287_p12 = pnand %p13296_p11, %p14133_p8 }
 0x849   : > { %p13288_p13 = pneg %p13287_p12 }
 0x84b   : > { %14016 = dma.done.wait (%p13288_p13), %s9046_s13, 1024  }
 0x84c   : > { %14018 = vsyncadd (%p13288_p13), %s9046_s13, 4294966272  ;;  %s21_s26 = sadd.s32 1, %s14041_s26   ;;  %s18165_s24 = sld [smem:[#allocation15_spill]] }
 0x84d   : > { %p18_p0 = scmp.ge.s32.totalorder %s21_s26, 4   ;;  %s18166_s25 = sld [smem:[#allocation16_spill]] }
 0x84e   : > { %s18167_s21 = smov %s14025_s22  ;;  %s18168_s22 = smov %s14029_s23 }
 0x84f   : > { %s18169_s23 = smov %s14139_s10  ;;  %20 = sbr.rel (!%p18_p0) target bundleno = 8 (0x8), region = 99 }
 0x854   :  { %9052 = vsyncpa [#allocation6], 1 }
 0x855   :  { %9054 = vsyncpa [#allocation6 + $0x1], 1 }
 0x856   :  { %9055 = vsyncpa [#allocation9], 1 }
 0x857   :  { %9056 = vsyncpa [#allocation7], 1 }
 0x858   :  { %9058 = vsyncpa [#allocation7 + $0x1], 1 }

</bundles_post_ra>
